<compile_context>
chip_gen: v7x
topology: tpu7x:2x2x1
jax: 0.10.0
libtpu: 0.0.40
codegen_flags: <defaults>
</compile_context>

<pallas_src>
import functools
import numpy as np
import jax
import jax.numpy as jnp
from jax.experimental import pallas as pl
from jax.experimental.pallas import tpu as pltpu


# ----------------------------------------------------------------------------
# small static helpers
# ----------------------------------------------------------------------------
def _cdiv(a, b):
    return -(-a // b)


def _round_up(x, m):
    return _cdiv(x, m) * m


def _tiles(dim, unit, cap):
    """Tile size (multiple of `unit`, ~<= cap), padded extent, #tiles."""
    d = _round_up(dim, unit)
    n = _cdiv(d, cap)
    t = _round_up(_cdiv(d, n), unit)
    return t, t * n, n


_VMEM_LIMIT = 32 * 1024 * 1024  # explicit scoped-VMEM cap (safe on v5e/v6e/v7x)


# ----------------------------------------------------------------------------
# Pallas matmul kernels
# ----------------------------------------------------------------------------
def _mm_kernel_nk1(x_ref, w_ref, b_ref, *rest, relu, has_res):
    """Single-K-tile matmul: o = epi(x @ w + b [+ res]).  No scratch/accumulator."""
    if has_res:
        res_ref, o_ref = rest
    else:
        (o_ref,) = rest
    r = jnp.dot(x_ref[...], w_ref[...],
                preferred_element_type=jnp.float32) + b_ref[...]
    if has_res:
        r = r + res_ref[...].astype(jnp.float32)
    if relu:
        r = jnp.maximum(r, 0.0)
    o_ref[...] = r.astype(o_ref.dtype)


def _mm_kernel(x_ref, w_ref, b_ref, *rest, relu, has_res):
    """Multi-K matmul: acc(f32) += x@w; epilogue: + bias (+ residual) (+ ReLU)."""
    if has_res:
        res_ref, o_ref, acc_ref = rest
    else:
        o_ref, acc_ref = rest
    k = pl.program_id(2)

    @pl.when(k == 0)
    def _():
        acc_ref[...] = jnp.zeros_like(acc_ref)

    acc_ref[...] += jnp.dot(x_ref[...], w_ref[...],
                            preferred_element_type=jnp.float32)

    @pl.when(k == pl.num_programs(2) - 1)
    def _():
        r = acc_ref[...] + b_ref[...]
        if has_res:
            r = r + res_ref[...].astype(jnp.float32)
        if relu:
            r = jnp.maximum(r, 0.0)
        o_ref[...] = r.astype(o_ref.dtype)


def _pad2(a, pr, pc):
    if pr or pc:
        a = jnp.pad(a, ((0, pr), (0, pc)))
    return a


def pallas_matmul(x, w, b, residual=None, relu=False,
                  in_dtype=jnp.bfloat16, out_dtype=jnp.float32):
    """(M,K) @ (K,N) + b[N] (+ residual[M,N]) (+ ReLU), output in `out_dtype`.

    Tiled (M,N[,K]) grid, f32 accumulation, MXU inputs in `in_dtype` (bf16),
    epilogue math in f32.  Operands are padded only when a dim is misaligned.
    """
    M, K = x.shape
    K2, N = w.shape
    assert K == K2
    tm, Mp, nm = _tiles(M, 16, 256)     # 16: sublane multiple for bf16 blocks
    tn, Np, nn_ = _tiles(N, 128, 256)
    tk, Kp, nk = _tiles(K, 128, 1024)

    x_p = _pad2(x.astype(in_dtype), Mp - M, Kp - K)
    w_p = _pad2(w.astype(in_dtype), Kp - K, Np - N)
    b_p = jnp.pad(b.astype(jnp.float32), (0, Np - N)).reshape(1, Np) \
        if Np != N else b.astype(jnp.float32).reshape(1, Np)

    has_res = residual is not None
    args = [x_p, w_p, b_p]
    isz = jnp.dtype(in_dtype).itemsize
    osz = jnp.dtype(out_dtype).itemsize
    cost = pl.CostEstimate(
        flops=2 * Mp * Np * Kp,
        transcendentals=0,
        bytes_accessed=int(Mp * Kp * isz + Kp * Np * isz + Np * 4
                           + Mp * Np * (osz + (isz if has_res else 0))),
    )

    if nk == 1:
        in_specs = [
            pl.BlockSpec((tm, tk), lambda i, j: (i, 0)),
            pl.BlockSpec((tk, tn), lambda i, j: (0, j)),
            pl.BlockSpec((1, tn), lambda i, j: (0, j)),
        ]
        if has_res:
            res_p = _pad2(residual, Mp - M, Np - N)
            args.append(res_p)
            in_specs.append(pl.BlockSpec((tm, tn), lambda i, j: (i, j)))
        out = pl.pallas_call(
            functools.partial(_mm_kernel_nk1, relu=relu, has_res=has_res),
            grid=(nm, nn_),
            in_specs=in_specs,
            out_specs=pl.BlockSpec((tm, tn), lambda i, j: (i, j)),
            out_shape=jax.ShapeDtypeStruct((Mp, Np), out_dtype),
            compiler_params=pltpu.CompilerParams(
                dimension_semantics=("parallel", "parallel"),
                vmem_limit_bytes=_VMEM_LIMIT),
            cost_estimate=cost,
        )(*args)
    else:
        in_specs = [
            pl.BlockSpec((tm, tk), lambda i, j, k: (i, k)),
            pl.BlockSpec((tk, tn), lambda i, j, k: (k, j)),
            pl.BlockSpec((1, tn), lambda i, j, k: (0, j)),
        ]
        if has_res:
            res_p = _pad2(residual, Mp - M, Np - N)
            args.append(res_p)
            in_specs.append(pl.BlockSpec((tm, tn), lambda i, j, k: (i, j)))
        out = pl.pallas_call(
            functools.partial(_mm_kernel, relu=relu, has_res=has_res),
            grid=(nm, nn_, nk),
            in_specs=in_specs,
            out_specs=pl.BlockSpec((tm, tn), lambda i, j, k: (i, j)),
            out_shape=jax.ShapeDtypeStruct((Mp, Np), out_dtype),
            scratch_shapes=[pltpu.VMEM((tm, tn), jnp.float32)],
            compiler_params=pltpu.CompilerParams(
                dimension_semantics=("parallel", "parallel", "arbitrary"),
                vmem_limit_bytes=_VMEM_LIMIT),
            cost_estimate=cost,
        )(*args)

    if Mp != M or Np != N:
        out = out[:M, :N]
    return out


# ----------------------------------------------------------------------------
# Max-pool kernel
# ----------------------------------------------------------------------------
def _maxpool_kernel(xee_ref, xeo_ref, xoe_ref, xoo_ref, o_ref, *, Ho, Wo):
    """3x3/s2/p1 max pool over four parity-deinterleaved quadrants."""
    refs = {(0, 0): xee_ref, (0, 1): xeo_ref, (1, 0): xoe_ref, (1, 1): xoo_ref}
    r = None
    for i in range(3):
        ai, pi = (1, 0) if i == 2 else (0, i)
        for j in range(3):
            bj, qj = (1, 0) if j == 2 else (0, j)
            win = refs[(pi, qj)][:, ai:ai + Ho, bj:bj + Wo, :]
            r = win if r is None else jnp.maximum(r, win)
    o_ref[...] = r


def maxpool3x3_s2_p1(x):
    """MaxPool2d(kernel=3, stride=2, padding=1) as one fused Pallas kernel."""
    N, H, W, C = x.shape
    Ho = (H - 1) // 2 + 1
    Wo = (W - 1) // 2 + 1
    neg = -jnp.inf
    xp = jnp.pad(x, ((0, 0), (1, 1), (1, 1), (0, 0)), constant_values=neg)
    Hp, Wp = H + 2, W + 2
    if Hp % 2:
        xp = jnp.pad(xp, ((0, 0), (0, 1), (0, 0), (0, 0)), constant_values=neg)
        Hp += 1
    if Wp % 2:
        xp = jnp.pad(xp, ((0, 0), (0, 0), (0, 1), (0, 0)), constant_values=neg)
        Wp += 1
    # parity de-interleave (cheap XLA strided slices; kernel then only needs
    # contiguous static slices => robust lowering, ~1x HBM traffic)
    quads = [xp[:, p::2, q::2, :] for p in (0, 1) for q in (0, 1)]
    H2, W2 = Hp // 2, Wp // 2
    # TODO(synk): add an H-tiling grid axis for very large inputs (v7x VMEM).
    return pl.pallas_call(
        functools.partial(_maxpool_kernel, Ho=Ho, Wo=Wo),
        grid=(N,),
        in_specs=[pl.BlockSpec((1, H2, W2, C), lambda n: (n, 0, 0, 0))] * 4,
        out_specs=pl.BlockSpec((1, Ho, Wo, C), lambda n: (n, 0, 0, 0)),
        out_shape=jax.ShapeDtypeStruct((N, Ho, Wo, C), x.dtype),
        compiler_params=pltpu.CompilerParams(
            dimension_semantics=("parallel",),
            vmem_limit_bytes=_VMEM_LIMIT),
    )(*quads)


# ----------------------------------------------------------------------------
# conv building blocks (glue = im2col & reshapes; all compute = Pallas matmul)
# ----------------------------------------------------------------------------
def _im2col(x_nhwc, k, stride, pad, dtype):
    N, H, W, C = x_nhwc.shape
    x = x_nhwc.astype(dtype)
    xp = jnp.pad(x, ((0, 0), (pad, pad), (pad, pad), (0, 0)))
    Ho = (H + 2 * pad - k) // stride + 1
    Wo = (W + 2 * pad - k) // stride + 1
    cols = []
    for i in range(k):
        for j in range(k):
            cols.append(xp[:, i:i + stride * Ho:stride,
                           j:j + stride * Wo:stride, :])
    patches = jnp.concatenate(cols, axis=-1)          # (N, Ho, Wo, k*k*C)
    return patches.reshape(N * Ho * Wo, k * k * C), Ho, Wo


def conv2d(x_nhwc, w, b, k, stride, pad, relu, residual=None,
           out_dtype=jnp.bfloat16):
    """w: (k*k*Cin, Cout), ordering (kh, kw, Cin).  Optional fused residual+ReLU."""
    N = x_nhwc.shape[0]
    patches, Ho, Wo = _im2col(x_nhwc, k, stride, pad, jnp.bfloat16)
    res = None if residual is None else residual.reshape(N * Ho * Wo, w.shape[1])
    out = pallas_matmul(patches, w, b, residual=res, relu=relu,
                        in_dtype=jnp.bfloat16, out_dtype=out_dtype)
    return out.reshape(N, Ho, Wo, w.shape[1])


def _adaptive_pool_matrix(in_size, out_size):
    """Row-averaging matrix matching torch.nn.AdaptiveAvgPool2d (1-D factor)."""
    P = np.zeros((out_size, in_size), np.float32)
    for i in range(out_size):
        a = (i * in_size) // out_size
        bnd = _cdiv((i + 1) * in_size, out_size)
        P[i, a:bnd] = 1.0 / (bnd - a)
    return P


def _bilinear_matrix(in_size, out_size):
    """F.interpolate(mode='bilinear', align_corners=True) along one axis."""
    A = np.zeros((out_size, in_size), dtype=np.float32)
    if in_size == 1:
        A[:, 0] = 1.0
    else:
        scale = (in_size - 1) / (out_size - 1) if out_size > 1 else 0.0
        for i in range(out_size):
            src = i * scale
            lo = int(np.floor(src))
            hi = min(lo + 1, in_size - 1)
            frac = src - lo
            A[i, lo] += 1.0 - frac
            A[i, hi] += frac
    return A


# ----------------------------------------------------------------------------
# Deterministic parameter construction (synthetic; BN folded, identity stats)
# ----------------------------------------------------------------------------
_BN_FOLD = 1.0 / np.sqrt(1.0 + 1e-5)  # gamma=1, beta=0, mean=0, var=1


def make_params(key, n_channels, n_class):
    keys = iter(jax.random.split(key, 64))

    def conv_w(k, cin, cout, bn=True):
        std = np.sqrt(2.0 / (k * k * cin))
        w = jax.random.normal(next(keys), (k * k * cin, cout), jnp.float32) * std
        w = w * (_BN_FOLD if bn else 1.0)
        return w.astype(jnp.bfloat16)          # weights stored bf16 (MXU dtype)

    params = {}
    params["conv1_w"] = conv_w(7, n_channels, 64)
    params["layer1"] = [
        {"w1": conv_w(3, 64, 64), "w2": conv_w(3, 64, 64)} for _ in range(3)
    ]
    l2 = [{"w1": conv_w(3, 64, 128), "w2": conv_w(3, 128, 128),
           "wd": conv_w(1, 64, 128)}]
    for _ in range(3):
        l2.append({"w1": conv_w(3, 128, 128), "w2": conv_w(3, 128, 128)})
    params["layer2"] = l2
    params["psp"] = [{"w": conv_w(1, 128, 32)} for _ in range(4)]
    params["dec_w"] = conv_w(1, 256, 512)
    params["head_w"] = conv_w(3, 512, n_class, bn=False)
    params["head_b"] = jax.random.normal(next(keys), (n_class,), jnp.float32) * 0.01
    return params


# ----------------------------------------------------------------------------
# Forward pass
# ----------------------------------------------------------------------------
def _basic_block(x, p, stride):
    c1 = p["w1"].shape[1]
    c2 = p["w2"].shape[1]
    out = conv2d(x, p["w1"], jnp.zeros((c1,), jnp.float32), 3, stride, 1,
                 relu=True)
    if "wd" in p:
        identity = conv2d(x, p["wd"], jnp.zeros((c2,), jnp.float32),
                          1, stride, 0, relu=False)
    else:
        identity = x
    # second conv with the residual add + ReLU fused into the matmul epilogue
    return conv2d(out, p["w2"], jnp.zeros((c2,), jnp.float32), 3, 1, 1,
                  relu=True, residual=identity)


def pspnet_forward(x_nchw, params):
    x = jnp.transpose(x_nchw, (0, 2, 3, 1))                 # -> NHWC

    # --- encoder (resnet34, depth=3), all activations in bf16 ---
    f = conv2d(x, params["conv1_w"], jnp.zeros((64,), jnp.float32),
               7, 2, 3, relu=True)                 # stride 2
    f = maxpool3x3_s2_p1(f)                        # stride 4
    for blk in params["layer1"]:
        f = _basic_block(f, blk, stride=1)
    f = _basic_block(f, params["layer2"][0], stride=2)   # stride 8
    for blk in params["layer2"][1:]:
        f = _basic_block(f, blk, stride=1)

    # --- PSP decoder ---
    N, H, W, C = f.shape
    sizes = (1, 2, 3, 6)
    psp_c = C // len(sizes)                        # 32

    # 1) all four adaptive average pools as ONE bf16 matmul (channels on lanes)
    P_all = np.concatenate(
        [np.kron(_adaptive_pool_matrix(H, s), _adaptive_pool_matrix(W, s))
         for s in sizes], axis=0)                  # (sum s^2, H*W)
    n_rows = P_all.shape[0]
    f_r = jnp.transpose(f.reshape(N, H * W, C), (1, 0, 2)).reshape(H * W, N * C)
    pooled = pallas_matmul(jnp.asarray(P_all), f_r,
                           jnp.zeros((N * C,), jnp.float32),
                           in_dtype=jnp.bfloat16,
                           out_dtype=jnp.bfloat16)  # (n_rows, N*C)

    # 2) the four PSP 1x1 convs (+BN+ReLU) merged into ONE matmul
    pooled_nc = jnp.transpose(pooled.reshape(n_rows, N, C),
                              (1, 0, 2)).reshape(N * n_rows, C)
    W_psp = jnp.concatenate([p["w"] for p in params["psp"]], axis=1)  # (C, C)
    conv_all = pallas_matmul(pooled_nc, W_psp,
                             jnp.zeros((W_psp.shape[1],), jnp.float32),
                             relu=True, out_dtype=jnp.bfloat16)       # (N*n_rows, C)
    conv_nb = conv_all.reshape(N, n_rows, C)

    # 3) all four bilinear (align_corners=True) branch upsamples as ONE matmul
    #    (branch matrices are only (H*W, sum s^2) so dense is fine here)
    offs = np.cumsum([0] + [s * s for s in sizes])
    xs, A_cols = [], []
    for bi, s in enumerate(sizes):
        xb = conv_nb[:, int(offs[bi]):int(offs[bi + 1]),
                     bi * psp_c:(bi + 1) * psp_c]          # (N, s^2, 32)
        xb = jnp.transpose(xb, (1, 0, 2))                   # (s^2, N, 32)
        xb = jnp.pad(xb, ((0, 0), (0, 0),
                          (bi * psp_c, C - (bi + 1) * psp_c)))  # (s^2, N, C)
        xs.append(xb.reshape(s * s, N * C))
        A_cols.append(np.kron(_bilinear_matrix(s, H), _bilinear_matrix(s, W)))
    X_blk = jnp.concatenate(xs, axis=0)                     # (n_rows, N*C)
    A_all = np.concatenate(A_cols, axis=1)                  # (H*W, n_rows)
    Y = pallas_matmul(jnp.asarray(A_all), X_blk,
                      jnp.zeros((N * C,), jnp.float32),
                      in_dtype=jnp.bfloat16,
                      out_dtype=jnp.bfloat16)               # (H*W, N*C)
    psp_br = jnp.transpose(Y.reshape(H * W, N, C), (1, 0, 2)).reshape(N, H, W, C)

    cat = jnp.concatenate([psp_br, f], axis=-1)             # (N,H,W,256) bf16
    d = conv2d(cat, params["dec_w"], jnp.zeros((512,), jnp.float32),
               1, 1, 0, relu=True)
    # Dropout2d(p=0.2): identity in eval mode.

    # --- segmentation head (3x3 conv), padded to 128 lane-dense channels ---
    n_class = params["head_w"].shape[1]
    Cpad = _round_up(n_class, 128)
    head_w = jnp.pad(params["head_w"], ((0, 0), (0, Cpad - n_class)))
    head_b = jnp.pad(params["head_b"], (0, Cpad - n_class))
    h = conv2d(d, head_w, head_b, 3, 1, 1, relu=False)      # (N,H,W,Cpad) bf16

    # --- final x8 bilinear upsample (align_corners=True), SEPARABLE: two matmuls ---
    OH, OW = H * 8, W * 8
    Bh = _bilinear_matrix(H, OH)                             # (OH, H)
    Bw = _bilinear_matrix(W, OW)                             # (OW, W)
    # upsample along H: (H, W*N*C) -> (OH, W*N*C)
    x1 = jnp.transpose(h, (1, 2, 0, 3)).reshape(H, W * N * Cpad)
    y1 = pallas_matmul(jnp.asarray(Bh), x1,
                       jnp.zeros((W * N * Cpad,), jnp.float32),
                       in_dtype=jnp.bfloat16, out_dtype=jnp.bfloat16)
    # upsample along W: (W, OH*N*C) -> (OW, OH*N*C), f32 logits out
    x2 = jnp.transpose(y1.reshape(OH, W, N, Cpad),
                       (1, 0, 2, 3)).reshape(W, OH * N * Cpad)
    y2 = pallas_matmul(jnp.asarray(Bw), x2,
                       jnp.zeros((OH * N * Cpad,), jnp.float32),
                       in_dtype=jnp.bfloat16, out_dtype=jnp.float32)
    up = jnp.transpose(y2.reshape(OW, OH, N, Cpad), (2, 1, 0, 3))   # (N,OH,OW,Cpad)
    out = up[..., :n_class]
    return jnp.transpose(out, (0, 3, 1, 2))                 # back to NCHW (f32)


# ----------------------------------------------------------------------------
if __name__ == "__main__":
    n_channels, n_class = 4, 3
    batch, spatial = 2, 48   # stride-8 feature map = 6x6

    key = jax.random.PRNGKey(0)
    k_param, k_input = jax.random.split(key)
    params = make_params(k_param, n_channels, n_class)
    x = jax.random.normal(k_input, (batch, n_channels, spatial, spatial),
                          jnp.float32)

    fwd = jax.jit(pspnet_forward)
    y = fwd(x, params)
    y = jax.block_until_ready(y)

    assert y.shape == (batch, n_class, spatial, spatial), y.shape
    assert y.dtype == jnp.float32
    assert bool(jnp.all(jnp.isfinite(y)))
    print("KERNEL_OK")
</pallas_src>

<mosaic_0001>
module attributes {stable_mosaic.version = 11 : i64} {
  func.func @_mm_kernel_nk1(%arg0: i32, %arg1: i32, %arg2: memref<240x256xbf16, #tpu.memory_space<vmem>>, %arg3: memref<256x128xbf16, #tpu.memory_space<vmem>>, %arg4: memref<1x128xf32, #tpu.memory_space<vmem>>, %arg5: memref<240x128xbf16, #tpu.memory_space<vmem>>) attributes {dimension_semantics = [#tpu.dimension_semantics<parallel>, #tpu.dimension_semantics<parallel>], iteration_bounds = array<i64: 5, 1>, scalar_prefetch = 0 : i64, scratch_operands = 0 : i64, tpu.core_type = #tpu.core_type<tc>, window_params = [{transform_indices = @transform_0, window_bounds = array<i64: 240, 256>}, {transform_indices = @transform_1, window_bounds = array<i64: 256, 128>}, {transform_indices = @transform_2, window_bounds = array<i64: 1, 128>}, {transform_indices = @transform_3, window_bounds = array<i64: 240, 128>}]} {
    %c0 = arith.constant 0 : index
    %c0_0 = arith.constant 0 : index
    %0 = vector.load %arg2[%c0, %c0_0] : memref<240x256xbf16, #tpu.memory_space<vmem>>, vector<240x256xbf16>
    %c0_1 = arith.constant 0 : index
    %c0_2 = arith.constant 0 : index
    %1 = vector.load %arg3[%c0_1, %c0_2] : memref<256x128xbf16, #tpu.memory_space<vmem>>, vector<256x128xbf16>
    %cst = arith.constant dense<0.000000e+00> : vector<240x128xf32>
    %2 = tpu.matmul %0, %1, %cst {dimension_numbers = #tpu.dot_dimension_numbers<[1], [0], [0], [1], [0, 0, 1, 1], [], []>} : vector<240x256xbf16>, vector<256x128xbf16>, vector<240x128xf32> -> vector<240x128xf32>
    %c0_3 = arith.constant 0 : index
    %c0_4 = arith.constant 0 : index
    %3 = vector.load %arg4[%c0_3, %c0_4] : memref<1x128xf32, #tpu.memory_space<vmem>>, vector<1x128xf32>
    %4 = vector.broadcast %3 : vector<1x128xf32> to vector<240x128xf32>
    %5 = arith.addf %2, %4 : vector<240x128xf32>
    %cst_5 = arith.constant 0.000000e+00 : f32
    %6 = vector.broadcast %cst_5 : f32 to vector<240x128xf32>
    %7 = arith.maximumf %5, %6 : vector<240x128xf32>
    %8 = arith.truncf %7 : vector<240x128xf32> to vector<240x128xbf16>
    %c0_6 = arith.constant 0 : index
    %c0_7 = arith.constant 0 : index
    %9 = vector.load %arg5[%c0_6, %c0_7] : memref<240x128xbf16, #tpu.memory_space<vmem>>, vector<240x128xbf16>
    tpu.vector_store %arg5[%c0_6, %c0_7], %8 {strides = array<i32>} : memref<240x128xbf16, #tpu.memory_space<vmem>>, vector<240x128xbf16>,
    return
  }
  func.func @transform_0(%arg0: i32, %arg1: i32) -> (i32, i32) {
    %c0_i32 = arith.constant 0 : i32
    %c0_i32_0 = arith.constant 0 : i32
    return %arg0, %c0_i32 : i32, i32
  }
  func.func @transform_1(%arg0: i32, %arg1: i32) -> (i32, i32) {
    %c0_i32 = arith.constant 0 : i32
    %c0_i32_0 = arith.constant 0 : i32
    return %c0_i32, %arg1 : i32, i32
  }
  func.func @transform_2(%arg0: i32, %arg1: i32) -> (i32, i32) {
    %c0_i32 = arith.constant 0 : i32
    %c0_i32_0 = arith.constant 0 : i32
    return %c0_i32, %arg1 : i32, i32
  }
  func.func @transform_3(%arg0: i32, %arg1: i32) -> (i32, i32) {
    %c0_i32 = arith.constant 0 : i32
    return %arg0, %arg1 : i32, i32
  }
}

module attributes {stable_mosaic.version = 11 : i64} {
  func.func @_maxpool_kernel(%arg0: i32, %arg1: memref<1x13x13x64xbf16, #tpu.memory_space<vmem>>, %arg2: memref<1x13x13x64xbf16, #tpu.memory_space<vmem>>, %arg3: memref<1x13x13x64xbf16, #tpu.memory_space<vmem>>, %arg4: memref<1x13x13x64xbf16, #tpu.memory_space<vmem>>, %arg5: memref<1x12x12x64xbf16, #tpu.memory_space<vmem>>) attributes {dimension_semantics = [#tpu.dimension_semantics<parallel>], iteration_bounds = array<i64: 2>, scalar_prefetch = 0 : i64, scratch_operands = 0 : i64, tpu.core_type = #tpu.core_type<tc>, window_params = [{transform_indices = @transform_0, window_bounds = array<i64: 1, 13, 13, 64>}, {transform_indices = @transform_1, window_bounds = array<i64: 1, 13, 13, 64>}, {transform_indices = @transform_2, window_bounds = array<i64: 1, 13, 13, 64>}, {transform_indices = @transform_3, window_bounds = array<i64: 1, 13, 13, 64>}, {transform_indices = @transform_4, window_bounds = array<i64: 1, 12, 12, 64>}]} {
    %c0 = arith.constant 0 : index
    %c0_0 = arith.constant 0 : index
    %c0_1 = arith.constant 0 : index
    %c0_2 = arith.constant 0 : index
    %0 = vector.load %arg1[%c0, %c0_0, %c0_1, %c0_2] : memref<1x13x13x64xbf16, #tpu.memory_space<vmem>>, vector<1x12x12x64xbf16>
    %c0_3 = arith.constant 0 : index
    %c0_4 = arith.constant 0 : index
    %c0_5 = arith.constant 0 : index
    %c0_6 = arith.constant 0 : index
    %1 = vector.load %arg2[%c0_3, %c0_4, %c0_5, %c0_6] : memref<1x13x13x64xbf16, #tpu.memory_space<vmem>>, vector<1x12x12x64xbf16>
    %2 = arith.maximumf %0, %1 : vector<1x12x12x64xbf16>
    %c0_7 = arith.constant 0 : index
    %c0_8 = arith.constant 0 : index
    %c1 = arith.constant 1 : index
    %c0_9 = arith.constant 0 : index
    %3 = vector.load %arg1[%c0_7, %c0_8, %c1, %c0_9] : memref<1x13x13x64xbf16, #tpu.memory_space<vmem>>, vector<1x12x12x64xbf16>
    %4 = arith.maximumf %2, %3 : vector<1x12x12x64xbf16>
    %c0_10 = arith.constant 0 : index
    %c0_11 = arith.constant 0 : index
    %c0_12 = arith.constant 0 : index
    %c0_13 = arith.constant 0 : index
    %5 = vector.load %arg3[%c0_10, %c0_11, %c0_12, %c0_13] : memref<1x13x13x64xbf16, #tpu.memory_space<vmem>>, vector<1x12x12x64xbf16>
    %6 = arith.maximumf %4, %5 : vector<1x12x12x64xbf16>
    %c0_14 = arith.constant 0 : index
    %c0_15 = arith.constant 0 : index
    %c0_16 = arith.constant 0 : index
    %c0_17 = arith.constant 0 : index
    %7 = vector.load %arg4[%c0_14, %c0_15, %c0_16, %c0_17] : memref<1x13x13x64xbf16, #tpu.memory_space<vmem>>, vector<1x12x12x64xbf16>
    %8 = arith.maximumf %6, %7 : vector<1x12x12x64xbf16>
    %c0_18 = arith.constant 0 : index
    %c0_19 = arith.constant 0 : index
    %c1_20 = arith.constant 1 : index
    %c0_21 = arith.constant 0 : index
    %9 = vector.load %arg3[%c0_18, %c0_19, %c1_20, %c0_21] : memref<1x13x13x64xbf16, #tpu.memory_space<vmem>>, vector<1x12x12x64xbf16>
    %10 = arith.maximumf %8, %9 : vector<1x12x12x64xbf16>
    %c0_22 = arith.constant 0 : index
    %c1_23 = arith.constant 1 : index
    %c0_24 = arith.constant 0 : index
    %c0_25 = arith.constant 0 : index
    %11 = vector.load %arg1[%c0_22, %c1_23, %c0_24, %c0_25] : memref<1x13x13x64xbf16, #tpu.memory_space<vmem>>, vector<1x12x12x64xbf16>
    %12 = arith.maximumf %10, %11 : vector<1x12x12x64xbf16>
    %c0_26 = arith.constant 0 : index
    %c1_27 = arith.constant 1 : index
    %c0_28 = arith.constant 0 : index
    %c0_29 = arith.constant 0 : index
    %13 = vector.load %arg2[%c0_26, %c1_27, %c0_28, %c0_29] : memref<1x13x13x64xbf16, #tpu.memory_space<vmem>>, vector<1x12x12x64xbf16>
    %14 = arith.maximumf %12, %13 : vector<1x12x12x64xbf16>
    %c0_30 = arith.constant 0 : index
    %c1_31 = arith.constant 1 : index
    %c1_32 = arith.constant 1 : index
    %c0_33 = arith.constant 0 : index
    %15 = vector.load %arg1[%c0_30, %c1_31, %c1_32, %c0_33] : memref<1x13x13x64xbf16, #tpu.memory_space<vmem>>, vector<1x12x12x64xbf16>
    %16 = arith.maximumf %14, %15 : vector<1x12x12x64xbf16>
    %c0_34 = arith.constant 0 : index
    %c0_35 = arith.constant 0 : index
    %c0_36 = arith.constant 0 : index
    %c0_37 = arith.constant 0 : index
    %17 = vector.load %arg5[%c0_34, %c0_35, %c0_36, %c0_37] : memref<1x12x12x64xbf16, #tpu.memory_space<vmem>>, vector<1x12x12x64xbf16>
    tpu.vector_store %arg5[%c0_34, %c0_35, %c0_36, %c0_37], %16 {strides = array<i32>} : memref<1x12x12x64xbf16, #tpu.memory_space<vmem>>, vector<1x12x12x64xbf16>,
    return
  }
  func.func @transform_0(%arg0: i32) -> (i32, i32, i32, i32) {
    %c0_i32 = arith.constant 0 : i32
    %c0_i32_0 = arith.constant 0 : i32
    %c0_i32_1 = arith.constant 0 : i32
    %c0_i32_2 = arith.constant 0 : i32
    return %arg0, %c0_i32, %c0_i32_0, %c0_i32_1 : i32, i32, i32, i32
  }
  func.func @transform_1(%arg0: i32) -> (i32, i32, i32, i32) {
    %c0_i32 = arith.constant 0 : i32
    %c0_i32_0 = arith.constant 0 : i32
    %c0_i32_1 = arith.constant 0 : i32
    %c0_i32_2 = arith.constant 0 : i32
    return %arg0, %c0_i32, %c0_i32_0, %c0_i32_1 : i32, i32, i32, i32
  }
  func.func @transform_2(%arg0: i32) -> (i32, i32, i32, i32) {
    %c0_i32 = arith.constant 0 : i32
    %c0_i32_0 = arith.constant 0 : i32
    %c0_i32_1 = arith.constant 0 : i32
    %c0_i32_2 = arith.constant 0 : i32
    return %arg0, %c0_i32, %c0_i32_0, %c0_i32_1 : i32, i32, i32, i32
  }
  func.func @transform_3(%arg0: i32) -> (i32, i32, i32, i32) {
    %c0_i32 = arith.constant 0 : i32
    %c0_i32_0 = arith.constant 0 : i32
    %c0_i32_1 = arith.constant 0 : i32
    %c0_i32_2 = arith.constant 0 : i32
    return %arg0, %c0_i32, %c0_i32_0, %c0_i32_1 : i32, i32, i32, i32
  }
  func.func @transform_4(%arg0: i32) -> (i32, i32, i32, i32) {
    %c0_i32 = arith.constant 0 : i32
    %c0_i32_0 = arith.constant 0 : i32
    %c0_i32_1 = arith.constant 0 : i32
    %c0_i32_2 = arith.constant 0 : i32
    return %arg0, %c0_i32, %c0_i32_0, %c0_i32_1 : i32, i32, i32, i32
  }
}

module attributes {stable_mosaic.version = 11 : i64} {
  func.func @_mm_kernel_nk1(%arg0: i32, %arg1: i32, %arg2: memref<144x640xbf16, #tpu.memory_space<vmem>>, %arg3: memref<640x128xbf16, #tpu.memory_space<vmem>>, %arg4: memref<1x128xf32, #tpu.memory_space<vmem>>, %arg5: memref<144x128xbf16, #tpu.memory_space<vmem>>) attributes {dimension_semantics = [#tpu.dimension_semantics<parallel>, #tpu.dimension_semantics<parallel>], iteration_bounds = array<i64: 2, 1>, scalar_prefetch = 0 : i64, scratch_operands = 0 : i64, tpu.core_type = #tpu.core_type<tc>, window_params = [{transform_indices = @transform_0, window_bounds = array<i64: 144, 640>}, {transform_indices = @transform_1, window_bounds = array<i64: 640, 128>}, {transform_indices = @transform_2, window_bounds = array<i64: 1, 128>}, {transform_indices = @transform_3, window_bounds = array<i64: 144, 128>}]} {
    %c0 = arith.constant 0 : index
    %c0_0 = arith.constant 0 : index
    %0 = vector.load %arg2[%c0, %c0_0] : memref<144x640xbf16, #tpu.memory_space<vmem>>, vector<144x640xbf16>
    %c0_1 = arith.constant 0 : index
    %c0_2 = arith.constant 0 : index
    %1 = vector.load %arg3[%c0_1, %c0_2] : memref<640x128xbf16, #tpu.memory_space<vmem>>, vector<640x128xbf16>
    %cst = arith.constant dense<0.000000e+00> : vector<144x128xf32>
    %2 = tpu.matmul %0, %1, %cst {dimension_numbers = #tpu.dot_dimension_numbers<[1], [0], [0], [1], [0, 0, 1, 1], [], []>} : vector<144x640xbf16>, vector<640x128xbf16>, vector<144x128xf32> -> vector<144x128xf32>
    %c0_3 = arith.constant 0 : index
    %c0_4 = arith.constant 0 : index
    %3 = vector.load %arg4[%c0_3, %c0_4] : memref<1x128xf32, #tpu.memory_space<vmem>>, vector<1x128xf32>
    %4 = vector.broadcast %3 : vector<1x128xf32> to vector<144x128xf32>
    %5 = arith.addf %2, %4 : vector<144x128xf32>
    %cst_5 = arith.constant 0.000000e+00 : f32
    %6 = vector.broadcast %cst_5 : f32 to vector<144x128xf32>
    %7 = arith.maximumf %5, %6 : vector<144x128xf32>
    %8 = arith.truncf %7 : vector<144x128xf32> to vector<144x128xbf16>
    %c0_6 = arith.constant 0 : index
    %c0_7 = arith.constant 0 : index
    %9 = vector.load %arg5[%c0_6, %c0_7] : memref<144x128xbf16, #tpu.memory_space<vmem>>, vector<144x128xbf16>
    tpu.vector_store %arg5[%c0_6, %c0_7], %8 {strides = array<i32>} : memref<144x128xbf16, #tpu.memory_space<vmem>>, vector<144x128xbf16>,
    return
  }
  func.func @transform_0(%arg0: i32, %arg1: i32) -> (i32, i32) {
    %c0_i32 = arith.constant 0 : i32
    %c0_i32_0 = arith.constant 0 : i32
    return %arg0, %c0_i32 : i32, i32
  }
  func.func @transform_1(%arg0: i32, %arg1: i32) -> (i32, i32) {
    %c0_i32 = arith.constant 0 : i32
    %c0_i32_0 = arith.constant 0 : i32
    return %c0_i32, %arg1 : i32, i32
  }
  func.func @transform_2(%arg0: i32, %arg1: i32) -> (i32, i32) {
    %c0_i32 = arith.constant 0 : i32
    %c0_i32_0 = arith.constant 0 : i32
    return %c0_i32, %arg1 : i32, i32
  }
  func.func @transform_3(%arg0: i32, %arg1: i32) -> (i32, i32) {
    %c0_i32 = arith.constant 0 : i32
    return %arg0, %arg1 : i32, i32
  }
}

module attributes {stable_mosaic.version = 11 : i64} {
  func.func @_mm_kernel_nk1(%arg0: i32, %arg1: i32, %arg2: memref<144x640xbf16, #tpu.memory_space<vmem>>, %arg3: memref<640x128xbf16, #tpu.memory_space<vmem>>, %arg4: memref<1x128xf32, #tpu.memory_space<vmem>>, %arg5: memref<144x128xbf16, #tpu.memory_space<vmem>>, %arg6: memref<144x128xbf16, #tpu.memory_space<vmem>>) attributes {dimension_semantics = [#tpu.dimension_semantics<parallel>, #tpu.dimension_semantics<parallel>], iteration_bounds = array<i64: 2, 1>, scalar_prefetch = 0 : i64, scratch_operands = 0 : i64, tpu.core_type = #tpu.core_type<tc>, window_params = [{transform_indices = @transform_0, window_bounds = array<i64: 144, 640>}, {transform_indices = @transform_1, window_bounds = array<i64: 640, 128>}, {transform_indices = @transform_2, window_bounds = array<i64: 1, 128>}, {transform_indices = @transform_3, window_bounds = array<i64: 144, 128>}, {transform_indices = @transform_4, window_bounds = array<i64: 144, 128>}]} {
    %c0 = arith.constant 0 : index
    %c0_0 = arith.constant 0 : index
    %0 = vector.load %arg2[%c0, %c0_0] : memref<144x640xbf16, #tpu.memory_space<vmem>>, vector<144x640xbf16>
    %c0_1 = arith.constant 0 : index
    %c0_2 = arith.constant 0 : index
    %1 = vector.load %arg3[%c0_1, %c0_2] : memref<640x128xbf16, #tpu.memory_space<vmem>>, vector<640x128xbf16>
    %cst = arith.constant dense<0.000000e+00> : vector<144x128xf32>
    %2 = tpu.matmul %0, %1, %cst {dimension_numbers = #tpu.dot_dimension_numbers<[1], [0], [0], [1], [0, 0, 1, 1], [], []>} : vector<144x640xbf16>, vector<640x128xbf16>, vector<144x128xf32> -> vector<144x128xf32>
    %c0_3 = arith.constant 0 : index
    %c0_4 = arith.constant 0 : index
    %3 = vector.load %arg4[%c0_3, %c0_4] : memref<1x128xf32, #tpu.memory_space<vmem>>, vector<1x128xf32>
    %4 = vector.broadcast %3 : vector<1x128xf32> to vector<144x128xf32>
    %5 = arith.addf %2, %4 : vector<144x128xf32>
    %c0_5 = arith.constant 0 : index
    %c0_6 = arith.constant 0 : index
    %6 = vector.load %arg5[%c0_5, %c0_6] : memref<144x128xbf16, #tpu.memory_space<vmem>>, vector<144x128xbf16>
    %7 = arith.extf %6 : vector<144x128xbf16> to vector<144x128xf32>
    %8 = arith.addf %5, %7 : vector<144x128xf32>
    %cst_7 = arith.constant 0.000000e+00 : f32
    %9 = vector.broadcast %cst_7 : f32 to vector<144x128xf32>
    %10 = arith.maximumf %8, %9 : vector<144x128xf32>
    %11 = arith.truncf %10 : vector<144x128xf32> to vector<144x128xbf16>
    %c0_8 = arith.constant 0 : index
    %c0_9 = arith.constant 0 : index
    %12 = vector.load %arg6[%c0_8, %c0_9] : memref<144x128xbf16, #tpu.memory_space<vmem>>, vector<144x128xbf16>
    tpu.vector_store %arg6[%c0_8, %c0_9], %11 {strides = array<i32>} : memref<144x128xbf16, #tpu.memory_space<vmem>>, vector<144x128xbf16>,
    return
  }
  func.func @transform_0(%arg0: i32, %arg1: i32) -> (i32, i32) {
    %c0_i32 = arith.constant 0 : i32
    %c0_i32_0 = arith.constant 0 : i32
    return %arg0, %c0_i32 : i32, i32
  }
  func.func @transform_1(%arg0: i32, %arg1: i32) -> (i32, i32) {
    %c0_i32 = arith.constant 0 : i32
    %c0_i32_0 = arith.constant 0 : i32
    return %c0_i32, %arg1 : i32, i32
  }
  func.func @transform_2(%arg0: i32, %arg1: i32) -> (i32, i32) {
    %c0_i32 = arith.constant 0 : i32
    %c0_i32_0 = arith.constant 0 : i32
    return %c0_i32, %arg1 : i32, i32
  }
  func.func @transform_3(%arg0: i32, %arg1: i32) -> (i32, i32) {
    %c0_i32 = arith.constant 0 : i32
    return %arg0, %arg1 : i32, i32
  }
  func.func @transform_4(%arg0: i32, %arg1: i32) -> (i32, i32) {
    %c0_i32 = arith.constant 0 : i32
    return %arg0, %arg1 : i32, i32
  }
}

module attributes {stable_mosaic.version = 11 : i64} {
  func.func @_mm_kernel_nk1(%arg0: i32, %arg1: i32, %arg2: memref<80x640xbf16, #tpu.memory_space<vmem>>, %arg3: memref<640x128xbf16, #tpu.memory_space<vmem>>, %arg4: memref<1x128xf32, #tpu.memory_space<vmem>>, %arg5: memref<80x128xbf16, #tpu.memory_space<vmem>>) attributes {dimension_semantics = [#tpu.dimension_semantics<parallel>, #tpu.dimension_semantics<parallel>], iteration_bounds = array<i64: 1, 1>, scalar_prefetch = 0 : i64, scratch_operands = 0 : i64, tpu.core_type = #tpu.core_type<tc>, window_params = [{transform_indices = @transform_0, window_bounds = array<i64: 80, 640>}, {transform_indices = @transform_1, window_bounds = array<i64: 640, 128>}, {transform_indices = @transform_2, window_bounds = array<i64: 1, 128>}, {transform_indices = @transform_3, window_bounds = array<i64: 80, 128>}]} {
    %c0 = arith.constant 0 : index
    %c0_0 = arith.constant 0 : index
    %0 = vector.load %arg2[%c0, %c0_0] : memref<80x640xbf16, #tpu.memory_space<vmem>>, vector<80x640xbf16>
    %c0_1 = arith.constant 0 : index
    %c0_2 = arith.constant 0 : index
    %1 = vector.load %arg3[%c0_1, %c0_2] : memref<640x128xbf16, #tpu.memory_space<vmem>>, vector<640x128xbf16>
    %cst = arith.constant dense<0.000000e+00> : vector<80x128xf32>
    %2 = tpu.matmul %0, %1, %cst {dimension_numbers = #tpu.dot_dimension_numbers<[1], [0], [0], [1], [0, 0, 1, 1], [], []>} : vector<80x640xbf16>, vector<640x128xbf16>, vector<80x128xf32> -> vector<80x128xf32>
    %c0_3 = arith.constant 0 : index
    %c0_4 = arith.constant 0 : index
    %3 = vector.load %arg4[%c0_3, %c0_4] : memref<1x128xf32, #tpu.memory_space<vmem>>, vector<1x128xf32>
    %4 = vector.broadcast %3 : vector<1x128xf32> to vector<80x128xf32>
    %5 = arith.addf %2, %4 : vector<80x128xf32>
    %cst_5 = arith.constant 0.000000e+00 : f32
    %6 = vector.broadcast %cst_5 : f32 to vector<80x128xf32>
    %7 = arith.maximumf %5, %6 : vector<80x128xf32>
    %8 = arith.truncf %7 : vector<80x128xf32> to vector<80x128xbf16>
    %c0_6 = arith.constant 0 : index
    %c0_7 = arith.constant 0 : index
    %9 = vector.load %arg5[%c0_6, %c0_7] : memref<80x128xbf16, #tpu.memory_space<vmem>>, vector<80x128xbf16>
    tpu.vector_store %arg5[%c0_6, %c0_7], %8 {strides = array<i32>} : memref<80x128xbf16, #tpu.memory_space<vmem>>, vector<80x128xbf16>,
    return
  }
  func.func @transform_0(%arg0: i32, %arg1: i32) -> (i32, i32) {
    %c0_i32 = arith.constant 0 : i32
    %c0_i32_0 = arith.constant 0 : i32
    return %arg0, %c0_i32 : i32, i32
  }
  func.func @transform_1(%arg0: i32, %arg1: i32) -> (i32, i32) {
    %c0_i32 = arith.constant 0 : i32
    %c0_i32_0 = arith.constant 0 : i32
    return %c0_i32, %arg1 : i32, i32
  }
  func.func @transform_2(%arg0: i32, %arg1: i32) -> (i32, i32) {
    %c0_i32 = arith.constant 0 : i32
    %c0_i32_0 = arith.constant 0 : i32
    return %c0_i32, %arg1 : i32, i32
  }
  func.func @transform_3(%arg0: i32, %arg1: i32) -> (i32, i32) {
    %c0_i32 = arith.constant 0 : i32
    return %arg0, %arg1 : i32, i32
  }
}

module attributes {stable_mosaic.version = 11 : i64} {
  func.func @_mm_kernel(%arg0: i32, %arg1: i32, %arg2: i32, %arg3: memref<80x640xbf16, #tpu.memory_space<vmem>>, %arg4: memref<640x128xbf16, #tpu.memory_space<vmem>>, %arg5: memref<1x128xf32, #tpu.memory_space<vmem>>, %arg6: memref<80x128xbf16, #tpu.memory_space<vmem>>, %arg7: memref<80x128xbf16, #tpu.memory_space<vmem>>, %arg8: memref<80x128xf32, #tpu.memory_space<vmem>>) attributes {dimension_semantics = [#tpu.dimension_semantics<parallel>, #tpu.dimension_semantics<parallel>, #tpu.dimension_semantics<arbitrary>], iteration_bounds = array<i64: 1, 1, 2>, scalar_prefetch = 0 : i64, scratch_operands = 1 : i64, tpu.core_type = #tpu.core_type<tc>, window_params = [{transform_indices = @transform_0, window_bounds = array<i64: 80, 640>}, {transform_indices = @transform_1, window_bounds = array<i64: 640, 128>}, {transform_indices = @transform_2, window_bounds = array<i64: 1, 128>}, {transform_indices = @transform_3, window_bounds = array<i64: 80, 128>}, {transform_indices = @transform_4, window_bounds = array<i64: 80, 128>}]} {
    %c0_i32 = arith.constant 0 : i32
    %0 = arith.cmpi eq, %arg2, %c0_i32 : i32
    %1 = arith.extui %0 : i1 to i32
    %c0_i32_0 = arith.constant 0 : i32
    %2 = arith.cmpi ne, %1, %c0_i32_0 : i32
    scf.if %2 {
      %cst_9 = arith.constant 0.000000e+00 : f32
      %12 = vector.broadcast %cst_9 : f32 to vector<80x128xf32>
      %c0_10 = arith.constant 0 : index
      %c0_11 = arith.constant 0 : index
      %13 = vector.load %arg8[%c0_10, %c0_11] : memref<80x128xf32, #tpu.memory_space<vmem>>, vector<80x128xf32>
      tpu.vector_store %arg8[%c0_10, %c0_11], %12 {strides = array<i32>} : memref<80x128xf32, #tpu.memory_space<vmem>>, vector<80x128xf32>,
    } else {
    }
    %c0 = arith.constant 0 : index
    %c0_1 = arith.constant 0 : index
    %3 = vector.load %arg8[%c0, %c0_1] : memref<80x128xf32, #tpu.memory_space<vmem>>, vector<80x128xf32>
    %c0_2 = arith.constant 0 : index
    %c0_3 = arith.constant 0 : index
    %4 = vector.load %arg3[%c0_2, %c0_3] : memref<80x640xbf16, #tpu.memory_space<vmem>>, vector<80x640xbf16>
    %c0_4 = arith.constant 0 : index
    %c0_5 = arith.constant 0 : index
    %5 = vector.load %arg4[%c0_4, %c0_5] : memref<640x128xbf16, #tpu.memory_space<vmem>>, vector<640x128xbf16>
    %cst = arith.constant dense<0.000000e+00> : vector<80x128xf32>
    %6 = tpu.matmul %4, %5, %cst {dimension_numbers = #tpu.dot_dimension_numbers<[1], [0], [0], [1], [0, 0, 1, 1], [], []>} : vector<80x640xbf16>, vector<640x128xbf16>, vector<80x128xf32> -> vector<80x128xf32>
    %7 = arith.addf %3, %6 : vector<80x128xf32>
    %c0_6 = arith.constant 0 : index
    %c0_7 = arith.constant 0 : index
    %8 = vector.load %arg8[%c0_6, %c0_7] : memref<80x128xf32, #tpu.memory_space<vmem>>, vector<80x128xf32>
    tpu.vector_store %arg8[%c0_6, %c0_7], %7 {strides = array<i32>} : memref<80x128xf32, #tpu.memory_space<vmem>>, vector<80x128xf32>,
    %c1_i32 = arith.constant 1 : i32
    %9 = arith.cmpi eq, %arg2, %c1_i32 : i32
    %10 = arith.extui %9 : i1 to i32
    %c0_i32_8 = arith.constant 0 : i32
    %11 = arith.cmpi ne, %10, %c0_i32_8 : i32
    scf.if %11 {
      %c0_9 = arith.constant 0 : index
      %c0_10 = arith.constant 0 : index
      %12 = vector.load %arg8[%c0_9, %c0_10] : memref<80x128xf32, #tpu.memory_space<vmem>>, vector<80x128xf32>
      %c0_11 = arith.constant 0 : index
      %c0_12 = arith.constant 0 : index
      %13 = vector.load %arg5[%c0_11, %c0_12] : memref<1x128xf32, #tpu.memory_space<vmem>>, vector<1x128xf32>
      %14 = vector.broadcast %13 : vector<1x128xf32> to vector<80x128xf32>
      %15 = arith.addf %12, %14 : vector<80x128xf32>
      %c0_13 = arith.constant 0 : index
      %c0_14 = arith.constant 0 : index
      %16 = vector.load %arg6[%c0_13, %c0_14] : memref<80x128xbf16, #tpu.memory_space<vmem>>, vector<80x128xbf16>
      %17 = arith.extf %16 : vector<80x128xbf16> to vector<80x128xf32>
      %18 = arith.addf %15, %17 : vector<80x128xf32>
      %cst_15 = arith.constant 0.000000e+00 : f32
      %19 = vector.broadcast %cst_15 : f32 to vector<80x128xf32>
      %20 = arith.maximumf %18, %19 : vector<80x128xf32>
      %21 = arith.truncf %20 : vector<80x128xf32> to vector<80x128xbf16>
      %c0_16 = arith.constant 0 : index
      %c0_17 = arith.constant 0 : index
      %22 = vector.load %arg7[%c0_16, %c0_17] : memref<80x128xbf16, #tpu.memory_space<vmem>>, vector<80x128xbf16>
      tpu.vector_store %arg7[%c0_16, %c0_17], %21 {strides = array<i32>} : memref<80x128xbf16, #tpu.memory_space<vmem>>, vector<80x128xbf16>,
    } else {
    }
    return
  }
  func.func @transform_0(%arg0: i32, %arg1: i32, %arg2: i32) -> (i32, i32) {
    %c0_i32 = arith.constant 0 : i32
    return %arg0, %arg2 : i32, i32
  }
  func.func @transform_1(%arg0: i32, %arg1: i32, %arg2: i32) -> (i32, i32) {
    %c0_i32 = arith.constant 0 : i32
    return %arg2, %arg1 : i32, i32
  }
  func.func @transform_2(%arg0: i32, %arg1: i32, %arg2: i32) -> (i32, i32) {
    %c0_i32 = arith.constant 0 : i32
    %c0_i32_0 = arith.constant 0 : i32
    return %c0_i32, %arg1 : i32, i32
  }
  func.func @transform_3(%arg0: i32, %arg1: i32, %arg2: i32) -> (i32, i32) {
    %c0_i32 = arith.constant 0 : i32
    return %arg0, %arg1 : i32, i32
  }
  func.func @transform_4(%arg0: i32, %arg1: i32, %arg2: i32) -> (i32, i32) {
    %c0_i32 = arith.constant 0 : i32
    return %arg0, %arg1 : i32, i32
  }
}

module attributes {stable_mosaic.version = 11 : i64} {
  func.func @_mm_kernel_nk1(%arg0: i32, %arg1: i32, %arg2: memref<80x128xbf16, #tpu.memory_space<vmem>>, %arg3: memref<128x128xbf16, #tpu.memory_space<vmem>>, %arg4: memref<1x128xf32, #tpu.memory_space<vmem>>, %arg5: memref<80x128xbf16, #tpu.memory_space<vmem>>) attributes {dimension_semantics = [#tpu.dimension_semantics<parallel>, #tpu.dimension_semantics<parallel>], iteration_bounds = array<i64: 1, 1>, scalar_prefetch = 0 : i64, scratch_operands = 0 : i64, tpu.core_type = #tpu.core_type<tc>, window_params = [{transform_indices = @transform_0, window_bounds = array<i64: 80, 128>}, {transform_indices = @transform_1, window_bounds = array<i64: 128, 128>}, {transform_indices = @transform_2, window_bounds = array<i64: 1, 128>}, {transform_indices = @transform_3, window_bounds = array<i64: 80, 128>}]} {
    %c0 = arith.constant 0 : index
    %c0_0 = arith.constant 0 : index
    %0 = vector.load %arg2[%c0, %c0_0] : memref<80x128xbf16, #tpu.memory_space<vmem>>, vector<80x128xbf16>
    %c0_1 = arith.constant 0 : index
    %c0_2 = arith.constant 0 : index
    %1 = vector.load %arg3[%c0_1, %c0_2] : memref<128x128xbf16, #tpu.memory_space<vmem>>, vector<128x128xbf16>
    %cst = arith.constant dense<0.000000e+00> : vector<80x128xf32>
    %2 = tpu.matmul %0, %1, %cst {dimension_numbers = #tpu.dot_dimension_numbers<[1], [0], [0], [1], [0, 0, 1, 1], [], []>} : vector<80x128xbf16>, vector<128x128xbf16>, vector<80x128xf32> -> vector<80x128xf32>
    %c0_3 = arith.constant 0 : index
    %c0_4 = arith.constant 0 : index
    %3 = vector.load %arg4[%c0_3, %c0_4] : memref<1x128xf32, #tpu.memory_space<vmem>>, vector<1x128xf32>
    %4 = vector.broadcast %3 : vector<1x128xf32> to vector<80x128xf32>
    %5 = arith.addf %2, %4 : vector<80x128xf32>
    %6 = arith.truncf %5 : vector<80x128xf32> to vector<80x128xbf16>
    %c0_5 = arith.constant 0 : index
    %c0_6 = arith.constant 0 : index
    %7 = vector.load %arg5[%c0_5, %c0_6] : memref<80x128xbf16, #tpu.memory_space<vmem>>, vector<80x128xbf16>
    tpu.vector_store %arg5[%c0_5, %c0_6], %6 {strides = array<i32>} : memref<80x128xbf16, #tpu.memory_space<vmem>>, vector<80x128xbf16>,
    return
  }
  func.func @transform_0(%arg0: i32, %arg1: i32) -> (i32, i32) {
    %c0_i32 = arith.constant 0 : i32
    %c0_i32_0 = arith.constant 0 : i32
    return %arg0, %c0_i32 : i32, i32
  }
  func.func @transform_1(%arg0: i32, %arg1: i32) -> (i32, i32) {
    %c0_i32 = arith.constant 0 : i32
    %c0_i32_0 = arith.constant 0 : i32
    return %c0_i32, %arg1 : i32, i32
  }
  func.func @transform_2(%arg0: i32, %arg1: i32) -> (i32, i32) {
    %c0_i32 = arith.constant 0 : i32
    %c0_i32_0 = arith.constant 0 : i32
    return %c0_i32, %arg1 : i32, i32
  }
  func.func @transform_3(%arg0: i32, %arg1: i32) -> (i32, i32) {
    %c0_i32 = arith.constant 0 : i32
    return %arg0, %arg1 : i32, i32
  }
}

module attributes {stable_mosaic.version = 11 : i64} {
  func.func @_mm_kernel(%arg0: i32, %arg1: i32, %arg2: i32, %arg3: memref<80x640xbf16, #tpu.memory_space<vmem>>, %arg4: memref<640x128xbf16, #tpu.memory_space<vmem>>, %arg5: memref<1x128xf32, #tpu.memory_space<vmem>>, %arg6: memref<80x128xbf16, #tpu.memory_space<vmem>>, %arg7: memref<80x128xf32, #tpu.memory_space<vmem>>) attributes {dimension_semantics = [#tpu.dimension_semantics<parallel>, #tpu.dimension_semantics<parallel>, #tpu.dimension_semantics<arbitrary>], iteration_bounds = array<i64: 1, 1, 2>, scalar_prefetch = 0 : i64, scratch_operands = 1 : i64, tpu.core_type = #tpu.core_type<tc>, window_params = [{transform_indices = @transform_0, window_bounds = array<i64: 80, 640>}, {transform_indices = @transform_1, window_bounds = array<i64: 640, 128>}, {transform_indices = @transform_2, window_bounds = array<i64: 1, 128>}, {transform_indices = @transform_3, window_bounds = array<i64: 80, 128>}]} {
    %c0_i32 = arith.constant 0 : i32
    %0 = arith.cmpi eq, %arg2, %c0_i32 : i32
    %1 = arith.extui %0 : i1 to i32
    %c0_i32_0 = arith.constant 0 : i32
    %2 = arith.cmpi ne, %1, %c0_i32_0 : i32
    scf.if %2 {
      %cst_9 = arith.constant 0.000000e+00 : f32
      %12 = vector.broadcast %cst_9 : f32 to vector<80x128xf32>
      %c0_10 = arith.constant 0 : index
      %c0_11 = arith.constant 0 : index
      %13 = vector.load %arg7[%c0_10, %c0_11] : memref<80x128xf32, #tpu.memory_space<vmem>>, vector<80x128xf32>
      tpu.vector_store %arg7[%c0_10, %c0_11], %12 {strides = array<i32>} : memref<80x128xf32, #tpu.memory_space<vmem>>, vector<80x128xf32>,
    } else {
    }
    %c0 = arith.constant 0 : index
    %c0_1 = arith.constant 0 : index
    %3 = vector.load %arg7[%c0, %c0_1] : memref<80x128xf32, #tpu.memory_space<vmem>>, vector<80x128xf32>
    %c0_2 = arith.constant 0 : index
    %c0_3 = arith.constant 0 : index
    %4 = vector.load %arg3[%c0_2, %c0_3] : memref<80x640xbf16, #tpu.memory_space<vmem>>, vector<80x640xbf16>
    %c0_4 = arith.constant 0 : index
    %c0_5 = arith.constant 0 : index
    %5 = vector.load %arg4[%c0_4, %c0_5] : memref<640x128xbf16, #tpu.memory_space<vmem>>, vector<640x128xbf16>
    %cst = arith.constant dense<0.000000e+00> : vector<80x128xf32>
    %6 = tpu.matmul %4, %5, %cst {dimension_numbers = #tpu.dot_dimension_numbers<[1], [0], [0], [1], [0, 0, 1, 1], [], []>} : vector<80x640xbf16>, vector<640x128xbf16>, vector<80x128xf32> -> vector<80x128xf32>
    %7 = arith.addf %3, %6 : vector<80x128xf32>
    %c0_6 = arith.constant 0 : index
    %c0_7 = arith.constant 0 : index
    %8 = vector.load %arg7[%c0_6, %c0_7] : memref<80x128xf32, #tpu.memory_space<vmem>>, vector<80x128xf32>
    tpu.vector_store %arg7[%c0_6, %c0_7], %7 {strides = array<i32>} : memref<80x128xf32, #tpu.memory_space<vmem>>, vector<80x128xf32>,
    %c1_i32 = arith.constant 1 : i32
    %9 = arith.cmpi eq, %arg2, %c1_i32 : i32
    %10 = arith.extui %9 : i1 to i32
    %c0_i32_8 = arith.constant 0 : i32
    %11 = arith.cmpi ne, %10, %c0_i32_8 : i32
    scf.if %11 {
      %c0_9 = arith.constant 0 : index
      %c0_10 = arith.constant 0 : index
      %12 = vector.load %arg7[%c0_9, %c0_10] : memref<80x128xf32, #tpu.memory_space<vmem>>, vector<80x128xf32>
      %c0_11 = arith.constant 0 : index
      %c0_12 = arith.constant 0 : index
      %13 = vector.load %arg5[%c0_11, %c0_12] : memref<1x128xf32, #tpu.memory_space<vmem>>, vector<1x128xf32>
      %14 = vector.broadcast %13 : vector<1x128xf32> to vector<80x128xf32>
      %15 = arith.addf %12, %14 : vector<80x128xf32>
      %cst_13 = arith.constant 0.000000e+00 : f32
      %16 = vector.broadcast %cst_13 : f32 to vector<80x128xf32>
      %17 = arith.maximumf %15, %16 : vector<80x128xf32>
      %18 = arith.truncf %17 : vector<80x128xf32> to vector<80x128xbf16>
      %c0_14 = arith.constant 0 : index
      %c0_15 = arith.constant 0 : index
      %19 = vector.load %arg6[%c0_14, %c0_15] : memref<80x128xbf16, #tpu.memory_space<vmem>>, vector<80x128xbf16>
      tpu.vector_store %arg6[%c0_14, %c0_15], %18 {strides = array<i32>} : memref<80x128xbf16, #tpu.memory_space<vmem>>, vector<80x128xbf16>,
    } else {
    }
    return
  }
  func.func @transform_0(%arg0: i32, %arg1: i32, %arg2: i32) -> (i32, i32) {
    %c0_i32 = arith.constant 0 : i32
    return %arg0, %arg2 : i32, i32
  }
  func.func @transform_1(%arg0: i32, %arg1: i32, %arg2: i32) -> (i32, i32) {
    %c0_i32 = arith.constant 0 : i32
    return %arg2, %arg1 : i32, i32
  }
  func.func @transform_2(%arg0: i32, %arg1: i32, %arg2: i32) -> (i32, i32) {
    %c0_i32 = arith.constant 0 : i32
    %c0_i32_0 = arith.constant 0 : i32
    return %c0_i32, %arg1 : i32, i32
  }
  func.func @transform_3(%arg0: i32, %arg1: i32, %arg2: i32) -> (i32, i32) {
    %c0_i32 = arith.constant 0 : i32
    return %arg0, %arg1 : i32, i32
  }
}

module attributes {stable_mosaic.version = 11 : i64} {
  func.func @_mm_kernel_nk1(%arg0: i32, %arg1: i32, %arg2: memref<64x128xbf16, #tpu.memory_space<vmem>>, %arg3: memref<128x256xbf16, #tpu.memory_space<vmem>>, %arg4: memref<1x256xf32, #tpu.memory_space<vmem>>, %arg5: memref<64x256xbf16, #tpu.memory_space<vmem>>) attributes {dimension_semantics = [#tpu.dimension_semantics<parallel>, #tpu.dimension_semantics<parallel>], iteration_bounds = array<i64: 1, 1>, scalar_prefetch = 0 : i64, scratch_operands = 0 : i64, tpu.core_type = #tpu.core_type<tc>, window_params = [{transform_indices = @transform_0, window_bounds = array<i64: 64, 128>}, {transform_indices = @transform_1, window_bounds = array<i64: 128, 256>}, {transform_indices = @transform_2, window_bounds = array<i64: 1, 256>}, {transform_indices = @transform_3, window_bounds = array<i64: 64, 256>}]} {
    %c0 = arith.constant 0 : index
    %c0_0 = arith.constant 0 : index
    %0 = vector.load %arg2[%c0, %c0_0] : memref<64x128xbf16, #tpu.memory_space<vmem>>, vector<64x128xbf16>
    %c0_1 = arith.constant 0 : index
    %c0_2 = arith.constant 0 : index
    %1 = vector.load %arg3[%c0_1, %c0_2] : memref<128x256xbf16, #tpu.memory_space<vmem>>, vector<128x256xbf16>
    %cst = arith.constant dense<0.000000e+00> : vector<64x256xf32>
    %2 = tpu.matmul %0, %1, %cst {dimension_numbers = #tpu.dot_dimension_numbers<[1], [0], [0], [1], [0, 0, 1, 1], [], []>} : vector<64x128xbf16>, vector<128x256xbf16>, vector<64x256xf32> -> vector<64x256xf32>
    %c0_3 = arith.constant 0 : index
    %c0_4 = arith.constant 0 : index
    %3 = vector.load %arg4[%c0_3, %c0_4] : memref<1x256xf32, #tpu.memory_space<vmem>>, vector<1x256xf32>
    %4 = vector.broadcast %3 : vector<1x256xf32> to vector<64x256xf32>
    %5 = arith.addf %2, %4 : vector<64x256xf32>
    %6 = arith.truncf %5 : vector<64x256xf32> to vector<64x256xbf16>
    %c0_5 = arith.constant 0 : index
    %c0_6 = arith.constant 0 : index
    %7 = vector.load %arg5[%c0_5, %c0_6] : memref<64x256xbf16, #tpu.memory_space<vmem>>, vector<64x256xbf16>
    tpu.vector_store %arg5[%c0_5, %c0_6], %6 {strides = array<i32>} : memref<64x256xbf16, #tpu.memory_space<vmem>>, vector<64x256xbf16>,
    return
  }
  func.func @transform_0(%arg0: i32, %arg1: i32) -> (i32, i32) {
    %c0_i32 = arith.constant 0 : i32
    %c0_i32_0 = arith.constant 0 : i32
    return %arg0, %c0_i32 : i32, i32
  }
  func.func @transform_1(%arg0: i32, %arg1: i32) -> (i32, i32) {
    %c0_i32 = arith.constant 0 : i32
    %c0_i32_0 = arith.constant 0 : i32
    return %c0_i32, %arg1 : i32, i32
  }
  func.func @transform_2(%arg0: i32, %arg1: i32) -> (i32, i32) {
    %c0_i32 = arith.constant 0 : i32
    %c0_i32_0 = arith.constant 0 : i32
    return %c0_i32, %arg1 : i32, i32
  }
  func.func @transform_3(%arg0: i32, %arg1: i32) -> (i32, i32) {
    %c0_i32 = arith.constant 0 : i32
    return %arg0, %arg1 : i32, i32
  }
}

module attributes {stable_mosaic.version = 11 : i64} {
  func.func @_mm_kernel_nk1(%arg0: i32, %arg1: i32, %arg2: memref<112x128xbf16, #tpu.memory_space<vmem>>, %arg3: memref<128x128xbf16, #tpu.memory_space<vmem>>, %arg4: memref<1x128xf32, #tpu.memory_space<vmem>>, %arg5: memref<112x128xbf16, #tpu.memory_space<vmem>>) attributes {dimension_semantics = [#tpu.dimension_semantics<parallel>, #tpu.dimension_semantics<parallel>], iteration_bounds = array<i64: 1, 1>, scalar_prefetch = 0 : i64, scratch_operands = 0 : i64, tpu.core_type = #tpu.core_type<tc>, window_params = [{transform_indices = @transform_0, window_bounds = array<i64: 112, 128>}, {transform_indices = @transform_1, window_bounds = array<i64: 128, 128>}, {transform_indices = @transform_2, window_bounds = array<i64: 1, 128>}, {transform_indices = @transform_3, window_bounds = array<i64: 112, 128>}]} {
    %c0 = arith.constant 0 : index
    %c0_0 = arith.constant 0 : index
    %0 = vector.load %arg2[%c0, %c0_0] : memref<112x128xbf16, #tpu.memory_space<vmem>>, vector<112x128xbf16>
    %c0_1 = arith.constant 0 : index
    %c0_2 = arith.constant 0 : index
    %1 = vector.load %arg3[%c0_1, %c0_2] : memref<128x128xbf16, #tpu.memory_space<vmem>>, vector<128x128xbf16>
    %cst = arith.constant dense<0.000000e+00> : vector<112x128xf32>
    %2 = tpu.matmul %0, %1, %cst {dimension_numbers = #tpu.dot_dimension_numbers<[1], [0], [0], [1], [0, 0, 1, 1], [], []>} : vector<112x128xbf16>, vector<128x128xbf16>, vector<112x128xf32> -> vector<112x128xf32>
    %c0_3 = arith.constant 0 : index
    %c0_4 = arith.constant 0 : index
    %3 = vector.load %arg4[%c0_3, %c0_4] : memref<1x128xf32, #tpu.memory_space<vmem>>, vector<1x128xf32>
    %4 = vector.broadcast %3 : vector<1x128xf32> to vector<112x128xf32>
    %5 = arith.addf %2, %4 : vector<112x128xf32>
    %cst_5 = arith.constant 0.000000e+00 : f32
    %6 = vector.broadcast %cst_5 : f32 to vector<112x128xf32>
    %7 = arith.maximumf %5, %6 : vector<112x128xf32>
    %8 = arith.truncf %7 : vector<112x128xf32> to vector<112x128xbf16>
    %c0_6 = arith.constant 0 : index
    %c0_7 = arith.constant 0 : index
    %9 = vector.load %arg5[%c0_6, %c0_7] : memref<112x128xbf16, #tpu.memory_space<vmem>>, vector<112x128xbf16>
    tpu.vector_store %arg5[%c0_6, %c0_7], %8 {strides = array<i32>} : memref<112x128xbf16, #tpu.memory_space<vmem>>, vector<112x128xbf16>,
    return
  }
  func.func @transform_0(%arg0: i32, %arg1: i32) -> (i32, i32) {
    %c0_i32 = arith.constant 0 : i32
    %c0_i32_0 = arith.constant 0 : i32
    return %arg0, %c0_i32 : i32, i32
  }
  func.func @transform_1(%arg0: i32, %arg1: i32) -> (i32, i32) {
    %c0_i32 = arith.constant 0 : i32
    %c0_i32_0 = arith.constant 0 : i32
    return %c0_i32, %arg1 : i32, i32
  }
  func.func @transform_2(%arg0: i32, %arg1: i32) -> (i32, i32) {
    %c0_i32 = arith.constant 0 : i32
    %c0_i32_0 = arith.constant 0 : i32
    return %c0_i32, %arg1 : i32, i32
  }
  func.func @transform_3(%arg0: i32, %arg1: i32) -> (i32, i32) {
    %c0_i32 = arith.constant 0 : i32
    return %arg0, %arg1 : i32, i32
  }
}

module attributes {stable_mosaic.version = 11 : i64} {
  func.func @_mm_kernel_nk1(%arg0: i32, %arg1: i32, %arg2: memref<48x128xbf16, #tpu.memory_space<vmem>>, %arg3: memref<128x256xbf16, #tpu.memory_space<vmem>>, %arg4: memref<1x256xf32, #tpu.memory_space<vmem>>, %arg5: memref<48x256xbf16, #tpu.memory_space<vmem>>) attributes {dimension_semantics = [#tpu.dimension_semantics<parallel>, #tpu.dimension_semantics<parallel>], iteration_bounds = array<i64: 1, 1>, scalar_prefetch = 0 : i64, scratch_operands = 0 : i64, tpu.core_type = #tpu.core_type<tc>, window_params = [{transform_indices = @transform_0, window_bounds = array<i64: 48, 128>}, {transform_indices = @transform_1, window_bounds = array<i64: 128, 256>}, {transform_indices = @transform_2, window_bounds = array<i64: 1, 256>}, {transform_indices = @transform_3, window_bounds = array<i64: 48, 256>}]} {
    %c0 = arith.constant 0 : index
    %c0_0 = arith.constant 0 : index
    %0 = vector.load %arg2[%c0, %c0_0] : memref<48x128xbf16, #tpu.memory_space<vmem>>, vector<48x128xbf16>
    %c0_1 = arith.constant 0 : index
    %c0_2 = arith.constant 0 : index
    %1 = vector.load %arg3[%c0_1, %c0_2] : memref<128x256xbf16, #tpu.memory_space<vmem>>, vector<128x256xbf16>
    %cst = arith.constant dense<0.000000e+00> : vector<48x256xf32>
    %2 = tpu.matmul %0, %1, %cst {dimension_numbers = #tpu.dot_dimension_numbers<[1], [0], [0], [1], [0, 0, 1, 1], [], []>} : vector<48x128xbf16>, vector<128x256xbf16>, vector<48x256xf32> -> vector<48x256xf32>
    %c0_3 = arith.constant 0 : index
    %c0_4 = arith.constant 0 : index
    %3 = vector.load %arg4[%c0_3, %c0_4] : memref<1x256xf32, #tpu.memory_space<vmem>>, vector<1x256xf32>
    %4 = vector.broadcast %3 : vector<1x256xf32> to vector<48x256xf32>
    %5 = arith.addf %2, %4 : vector<48x256xf32>
    %6 = arith.truncf %5 : vector<48x256xf32> to vector<48x256xbf16>
    %c0_5 = arith.constant 0 : index
    %c0_6 = arith.constant 0 : index
    %7 = vector.load %arg5[%c0_5, %c0_6] : memref<48x256xbf16, #tpu.memory_space<vmem>>, vector<48x256xbf16>
    tpu.vector_store %arg5[%c0_5, %c0_6], %6 {strides = array<i32>} : memref<48x256xbf16, #tpu.memory_space<vmem>>, vector<48x256xbf16>,
    return
  }
  func.func @transform_0(%arg0: i32, %arg1: i32) -> (i32, i32) {
    %c0_i32 = arith.constant 0 : i32
    %c0_i32_0 = arith.constant 0 : i32
    return %arg0, %c0_i32 : i32, i32
  }
  func.func @transform_1(%arg0: i32, %arg1: i32) -> (i32, i32) {
    %c0_i32 = arith.constant 0 : i32
    %c0_i32_0 = arith.constant 0 : i32
    return %c0_i32, %arg1 : i32, i32
  }
  func.func @transform_2(%arg0: i32, %arg1: i32) -> (i32, i32) {
    %c0_i32 = arith.constant 0 : i32
    %c0_i32_0 = arith.constant 0 : i32
    return %c0_i32, %arg1 : i32, i32
  }
  func.func @transform_3(%arg0: i32, %arg1: i32) -> (i32, i32) {
    %c0_i32 = arith.constant 0 : i32
    return %arg0, %arg1 : i32, i32
  }
}

module attributes {stable_mosaic.version = 11 : i64} {
  func.func @_mm_kernel_nk1(%arg0: i32, %arg1: i32, %arg2: memref<80x256xbf16, #tpu.memory_space<vmem>>, %arg3: memref<256x256xbf16, #tpu.memory_space<vmem>>, %arg4: memref<1x256xf32, #tpu.memory_space<vmem>>, %arg5: memref<80x256xbf16, #tpu.memory_space<vmem>>) attributes {dimension_semantics = [#tpu.dimension_semantics<parallel>, #tpu.dimension_semantics<parallel>], iteration_bounds = array<i64: 1, 2>, scalar_prefetch = 0 : i64, scratch_operands = 0 : i64, tpu.core_type = #tpu.core_type<tc>, window_params = [{transform_indices = @transform_0, window_bounds = array<i64: 80, 256>}, {transform_indices = @transform_1, window_bounds = array<i64: 256, 256>}, {transform_indices = @transform_2, window_bounds = array<i64: 1, 256>}, {transform_indices = @transform_3, window_bounds = array<i64: 80, 256>}]} {
    %c0 = arith.constant 0 : index
    %c0_0 = arith.constant 0 : index
    %0 = vector.load %arg2[%c0, %c0_0] : memref<80x256xbf16, #tpu.memory_space<vmem>>, vector<80x256xbf16>
    %c0_1 = arith.constant 0 : index
    %c0_2 = arith.constant 0 : index
    %1 = vector.load %arg3[%c0_1, %c0_2] : memref<256x256xbf16, #tpu.memory_space<vmem>>, vector<256x256xbf16>
    %cst = arith.constant dense<0.000000e+00> : vector<80x256xf32>
    %2 = tpu.matmul %0, %1, %cst {dimension_numbers = #tpu.dot_dimension_numbers<[1], [0], [0], [1], [0, 0, 1, 1], [], []>} : vector<80x256xbf16>, vector<256x256xbf16>, vector<80x256xf32> -> vector<80x256xf32>
    %c0_3 = arith.constant 0 : index
    %c0_4 = arith.constant 0 : index
    %3 = vector.load %arg4[%c0_3, %c0_4] : memref<1x256xf32, #tpu.memory_space<vmem>>, vector<1x256xf32>
    %4 = vector.broadcast %3 : vector<1x256xf32> to vector<80x256xf32>
    %5 = arith.addf %2, %4 : vector<80x256xf32>
    %cst_5 = arith.constant 0.000000e+00 : f32
    %6 = vector.broadcast %cst_5 : f32 to vector<80x256xf32>
    %7 = arith.maximumf %5, %6 : vector<80x256xf32>
    %8 = arith.truncf %7 : vector<80x256xf32> to vector<80x256xbf16>
    %c0_6 = arith.constant 0 : index
    %c0_7 = arith.constant 0 : index
    %9 = vector.load %arg5[%c0_6, %c0_7] : memref<80x256xbf16, #tpu.memory_space<vmem>>, vector<80x256xbf16>
    tpu.vector_store %arg5[%c0_6, %c0_7], %8 {strides = array<i32>} : memref<80x256xbf16, #tpu.memory_space<vmem>>, vector<80x256xbf16>,
    return
  }
  func.func @transform_0(%arg0: i32, %arg1: i32) -> (i32, i32) {
    %c0_i32 = arith.constant 0 : i32
    %c0_i32_0 = arith.constant 0 : i32
    return %arg0, %c0_i32 : i32, i32
  }
  func.func @transform_1(%arg0: i32, %arg1: i32) -> (i32, i32) {
    %c0_i32 = arith.constant 0 : i32
    %c0_i32_0 = arith.constant 0 : i32
    return %c0_i32, %arg1 : i32, i32
  }
  func.func @transform_2(%arg0: i32, %arg1: i32) -> (i32, i32) {
    %c0_i32 = arith.constant 0 : i32
    %c0_i32_0 = arith.constant 0 : i32
    return %c0_i32, %arg1 : i32, i32
  }
  func.func @transform_3(%arg0: i32, %arg1: i32) -> (i32, i32) {
    %c0_i32 = arith.constant 0 : i32
    return %arg0, %arg1 : i32, i32
  }
}

module attributes {stable_mosaic.version = 11 : i64} {
  func.func @_mm_kernel(%arg0: i32, %arg1: i32, %arg2: i32, %arg3: memref<80x1024xbf16, #tpu.memory_space<vmem>>, %arg4: memref<1024x128xbf16, #tpu.memory_space<vmem>>, %arg5: memref<1x128xf32, #tpu.memory_space<vmem>>, %arg6: memref<80x128xbf16, #tpu.memory_space<vmem>>, %arg7: memref<80x128xf32, #tpu.memory_space<vmem>>) attributes {dimension_semantics = [#tpu.dimension_semantics<parallel>, #tpu.dimension_semantics<parallel>, #tpu.dimension_semantics<arbitrary>], iteration_bounds = array<i64: 1, 1, 5>, scalar_prefetch = 0 : i64, scratch_operands = 1 : i64, tpu.core_type = #tpu.core_type<tc>, window_params = [{transform_indices = @transform_0, window_bounds = array<i64: 80, 1024>}, {transform_indices = @transform_1, window_bounds = array<i64: 1024, 128>}, {transform_indices = @transform_2, window_bounds = array<i64: 1, 128>}, {transform_indices = @transform_3, window_bounds = array<i64: 80, 128>}]} {
    %c0_i32 = arith.constant 0 : i32
    %0 = arith.cmpi eq, %arg2, %c0_i32 : i32
    %1 = arith.extui %0 : i1 to i32
    %c0_i32_0 = arith.constant 0 : i32
    %2 = arith.cmpi ne, %1, %c0_i32_0 : i32
    scf.if %2 {
      %cst_9 = arith.constant 0.000000e+00 : f32
      %12 = vector.broadcast %cst_9 : f32 to vector<80x128xf32>
      %c0_10 = arith.constant 0 : index
      %c0_11 = arith.constant 0 : index
      %13 = vector.load %arg7[%c0_10, %c0_11] : memref<80x128xf32, #tpu.memory_space<vmem>>, vector<80x128xf32>
      tpu.vector_store %arg7[%c0_10, %c0_11], %12 {strides = array<i32>} : memref<80x128xf32, #tpu.memory_space<vmem>>, vector<80x128xf32>,
    } else {
    }
    %c0 = arith.constant 0 : index
    %c0_1 = arith.constant 0 : index
    %3 = vector.load %arg7[%c0, %c0_1] : memref<80x128xf32, #tpu.memory_space<vmem>>, vector<80x128xf32>
    %c0_2 = arith.constant 0 : index
    %c0_3 = arith.constant 0 : index
    %4 = vector.load %arg3[%c0_2, %c0_3] : memref<80x1024xbf16, #tpu.memory_space<vmem>>, vector<80x1024xbf16>
    %c0_4 = arith.constant 0 : index
    %c0_5 = arith.constant 0 : index
    %5 = vector.load %arg4[%c0_4, %c0_5] : memref<1024x128xbf16, #tpu.memory_space<vmem>>, vector<1024x128xbf16>
    %cst = arith.constant dense<0.000000e+00> : vector<80x128xf32>
    %6 = tpu.matmul %4, %5, %cst {dimension_numbers = #tpu.dot_dimension_numbers<[1], [0], [0], [1], [0, 0, 1, 1], [], []>} : vector<80x1024xbf16>, vector<1024x128xbf16>, vector<80x128xf32> -> vector<80x128xf32>
    %7 = arith.addf %3, %6 : vector<80x128xf32>
    %c0_6 = arith.constant 0 : index
    %c0_7 = arith.constant 0 : index
    %8 = vector.load %arg7[%c0_6, %c0_7] : memref<80x128xf32, #tpu.memory_space<vmem>>, vector<80x128xf32>
    tpu.vector_store %arg7[%c0_6, %c0_7], %7 {strides = array<i32>} : memref<80x128xf32, #tpu.memory_space<vmem>>, vector<80x128xf32>,
    %c4_i32 = arith.constant 4 : i32
    %9 = arith.cmpi eq, %arg2, %c4_i32 : i32
    %10 = arith.extui %9 : i1 to i32
    %c0_i32_8 = arith.constant 0 : i32
    %11 = arith.cmpi ne, %10, %c0_i32_8 : i32
    scf.if %11 {
      %c0_9 = arith.constant 0 : index
      %c0_10 = arith.constant 0 : index
      %12 = vector.load %arg7[%c0_9, %c0_10] : memref<80x128xf32, #tpu.memory_space<vmem>>, vector<80x128xf32>
      %c0_11 = arith.constant 0 : index
      %c0_12 = arith.constant 0 : index
      %13 = vector.load %arg5[%c0_11, %c0_12] : memref<1x128xf32, #tpu.memory_space<vmem>>, vector<1x128xf32>
      %14 = vector.broadcast %13 : vector<1x128xf32> to vector<80x128xf32>
      %15 = arith.addf %12, %14 : vector<80x128xf32>
      %16 = arith.truncf %15 : vector<80x128xf32> to vector<80x128xbf16>
      %c0_13 = arith.constant 0 : index
      %c0_14 = arith.constant 0 : index
      %17 = vector.load %arg6[%c0_13, %c0_14] : memref<80x128xbf16, #tpu.memory_space<vmem>>, vector<80x128xbf16>
      tpu.vector_store %arg6[%c0_13, %c0_14], %16 {strides = array<i32>} : memref<80x128xbf16, #tpu.memory_space<vmem>>, vector<80x128xbf16>,
    } else {
    }
    return
  }
  func.func @transform_0(%arg0: i32, %arg1: i32, %arg2: i32) -> (i32, i32) {
    %c0_i32 = arith.constant 0 : i32
    return %arg0, %arg2 : i32, i32
  }
  func.func @transform_1(%arg0: i32, %arg1: i32, %arg2: i32) -> (i32, i32) {
    %c0_i32 = arith.constant 0 : i32
    return %arg2, %arg1 : i32, i32
  }
  func.func @transform_2(%arg0: i32, %arg1: i32, %arg2: i32) -> (i32, i32) {
    %c0_i32 = arith.constant 0 : i32
    %c0_i32_0 = arith.constant 0 : i32
    return %c0_i32, %arg1 : i32, i32
  }
  func.func @transform_3(%arg0: i32, %arg1: i32, %arg2: i32) -> (i32, i32) {
    %c0_i32 = arith.constant 0 : i32
    return %arg0, %arg1 : i32, i32
  }
}

module attributes {stable_mosaic.version = 11 : i64} {
  func.func @_mm_kernel_nk1(%arg0: i32, %arg1: i32, %arg2: memref<48x128xbf16, #tpu.memory_space<vmem>>, %arg3: memref<128x256xbf16, #tpu.memory_space<vmem>>, %arg4: memref<1x256xf32, #tpu.memory_space<vmem>>, %arg5: memref<48x256xbf16, #tpu.memory_space<vmem>>) attributes {dimension_semantics = [#tpu.dimension_semantics<parallel>, #tpu.dimension_semantics<parallel>], iteration_bounds = array<i64: 1, 6>, scalar_prefetch = 0 : i64, scratch_operands = 0 : i64, tpu.core_type = #tpu.core_type<tc>, window_params = [{transform_indices = @transform_0, window_bounds = array<i64: 48, 128>}, {transform_indices = @transform_1, window_bounds = array<i64: 128, 256>}, {transform_indices = @transform_2, window_bounds = array<i64: 1, 256>}, {transform_indices = @transform_3, window_bounds = array<i64: 48, 256>}]} {
    %c0 = arith.constant 0 : index
    %c0_0 = arith.constant 0 : index
    %0 = vector.load %arg2[%c0, %c0_0] : memref<48x128xbf16, #tpu.memory_space<vmem>>, vector<48x128xbf16>
    %c0_1 = arith.constant 0 : index
    %c0_2 = arith.constant 0 : index
    %1 = vector.load %arg3[%c0_1, %c0_2] : memref<128x256xbf16, #tpu.memory_space<vmem>>, vector<128x256xbf16>
    %cst = arith.constant dense<0.000000e+00> : vector<48x256xf32>
    %2 = tpu.matmul %0, %1, %cst {dimension_numbers = #tpu.dot_dimension_numbers<[1], [0], [0], [1], [0, 0, 1, 1], [], []>} : vector<48x128xbf16>, vector<128x256xbf16>, vector<48x256xf32> -> vector<48x256xf32>
    %c0_3 = arith.constant 0 : index
    %c0_4 = arith.constant 0 : index
    %3 = vector.load %arg4[%c0_3, %c0_4] : memref<1x256xf32, #tpu.memory_space<vmem>>, vector<1x256xf32>
    %4 = vector.broadcast %3 : vector<1x256xf32> to vector<48x256xf32>
    %5 = arith.addf %2, %4 : vector<48x256xf32>
    %6 = arith.truncf %5 : vector<48x256xf32> to vector<48x256xbf16>
    %c0_5 = arith.constant 0 : index
    %c0_6 = arith.constant 0 : index
    %7 = vector.load %arg5[%c0_5, %c0_6] : memref<48x256xbf16, #tpu.memory_space<vmem>>, vector<48x256xbf16>
    tpu.vector_store %arg5[%c0_5, %c0_6], %6 {strides = array<i32>} : memref<48x256xbf16, #tpu.memory_space<vmem>>, vector<48x256xbf16>,
    return
  }
  func.func @transform_0(%arg0: i32, %arg1: i32) -> (i32, i32) {
    %c0_i32 = arith.constant 0 : i32
    %c0_i32_0 = arith.constant 0 : i32
    return %arg0, %c0_i32 : i32, i32
  }
  func.func @transform_1(%arg0: i32, %arg1: i32) -> (i32, i32) {
    %c0_i32 = arith.constant 0 : i32
    %c0_i32_0 = arith.constant 0 : i32
    return %c0_i32, %arg1 : i32, i32
  }
  func.func @transform_2(%arg0: i32, %arg1: i32) -> (i32, i32) {
    %c0_i32 = arith.constant 0 : i32
    %c0_i32_0 = arith.constant 0 : i32
    return %c0_i32, %arg1 : i32, i32
  }
  func.func @transform_3(%arg0: i32, %arg1: i32) -> (i32, i32) {
    %c0_i32 = arith.constant 0 : i32
    return %arg0, %arg1 : i32, i32
  }
}

module attributes {stable_mosaic.version = 11 : i64} {
  func.func @_mm_kernel_nk1(%arg0: i32, %arg1: i32, %arg2: memref<48x128xbf16, #tpu.memory_space<vmem>>, %arg3: memref<128x256xbf16, #tpu.memory_space<vmem>>, %arg4: memref<1x256xf32, #tpu.memory_space<vmem>>, %arg5: memref<48x256xf32, #tpu.memory_space<vmem>>) attributes {dimension_semantics = [#tpu.dimension_semantics<parallel>, #tpu.dimension_semantics<parallel>], iteration_bounds = array<i64: 1, 48>, scalar_prefetch = 0 : i64, scratch_operands = 0 : i64, tpu.core_type = #tpu.core_type<tc>, window_params = [{transform_indices = @transform_0, window_bounds = array<i64: 48, 128>}, {transform_indices = @transform_1, window_bounds = array<i64: 128, 256>}, {transform_indices = @transform_2, window_bounds = array<i64: 1, 256>}, {transform_indices = @transform_3, window_bounds = array<i64: 48, 256>}]} {
    %c0 = arith.constant 0 : index
    %c0_0 = arith.constant 0 : index
    %0 = vector.load %arg2[%c0, %c0_0] : memref<48x128xbf16, #tpu.memory_space<vmem>>, vector<48x128xbf16>
    %c0_1 = arith.constant 0 : index
    %c0_2 = arith.constant 0 : index
    %1 = vector.load %arg3[%c0_1, %c0_2] : memref<128x256xbf16, #tpu.memory_space<vmem>>, vector<128x256xbf16>
    %cst = arith.constant dense<0.000000e+00> : vector<48x256xf32>
    %2 = tpu.matmul %0, %1, %cst {dimension_numbers = #tpu.dot_dimension_numbers<[1], [0], [0], [1], [0, 0, 1, 1], [], []>} : vector<48x128xbf16>, vector<128x256xbf16>, vector<48x256xf32> -> vector<48x256xf32>
    %c0_3 = arith.constant 0 : index
    %c0_4 = arith.constant 0 : index
    %3 = vector.load %arg4[%c0_3, %c0_4] : memref<1x256xf32, #tpu.memory_space<vmem>>, vector<1x256xf32>
    %4 = vector.broadcast %3 : vector<1x256xf32> to vector<48x256xf32>
    %5 = arith.addf %2, %4 : vector<48x256xf32>
    %c0_5 = arith.constant 0 : index
    %c0_6 = arith.constant 0 : index
    %6 = vector.load %arg5[%c0_5, %c0_6] : memref<48x256xf32, #tpu.memory_space<vmem>>, vector<48x256xf32>
    tpu.vector_store %arg5[%c0_5, %c0_6], %5 {strides = array<i32>} : memref<48x256xf32, #tpu.memory_space<vmem>>, vector<48x256xf32>,
    return
  }
  func.func @transform_0(%arg0: i32, %arg1: i32) -> (i32, i32) {
    %c0_i32 = arith.constant 0 : i32
    %c0_i32_0 = arith.constant 0 : i32
    return %arg0, %c0_i32 : i32, i32
  }
  func.func @transform_1(%arg0: i32, %arg1: i32) -> (i32, i32) {
    %c0_i32 = arith.constant 0 : i32
    %c0_i32_0 = arith.constant 0 : i32
    return %c0_i32, %arg1 : i32, i32
  }
  func.func @transform_2(%arg0: i32, %arg1: i32) -> (i32, i32) {
    %c0_i32 = arith.constant 0 : i32
    %c0_i32_0 = arith.constant 0 : i32
    return %c0_i32, %arg1 : i32, i32
  }
  func.func @transform_3(%arg0: i32, %arg1: i32) -> (i32, i32) {
    %c0_i32 = arith.constant 0 : i32
    return %arg0, %arg1 : i32, i32
  }
}

</mosaic_0001>

<bundles_post_ra>
// kernel: pspnet_forward.24
= control target key start
LH: loop header
LB: loop body
LE: loop exit
PB: predicated region body
PF: predicated region fallthrough
CT: control target
= control target key end

     0   :  { %s1439_s12 = smov 0   ;;  %s1441_s13 = smov 0   ;;  %s1608_s0 = inlined_call_operand.vmem [shape: bf16[1200,256], index: 0, kind: input, shape index: {}]   ;;  %s1609_s1 = inlined_call_operand.vmem [shape: bf16[256,128], index: 1, kind: input, shape index: {}]   ;;  %s1610_s2 = inlined_call_operand.vmem [shape: f32[1,128], index: 2, kind: input, shape index: {}]   ;;  %s1611_s3 = inlined_call_operand.vmem [shape: bf16[1200,128], index: 3, kind: output, shape index: {}]  }
   0x1   :  { %s1443_s14 = smov 0  }
   0x2 LB: > { %s25_s15 = sadd.s32 1, %s1413_s13  ;;  %p985_p0 = scmp.ge.s32.totalorder %s1417_s14, 1  ;;  %s1417_s14 = sphi %s1443_s14, %s13_s14   ;;  %s1413_s13 = sphi %s1441_s13, %s1613_s13   ;;  %s1409_s12 = sphi %s1439_s12, %s1612_s12  }
   0x3   : > { %p27_p1 = scmp.ge.s32.totalorder %s25_s15, 5  ;;  %p170_p2 = scmp.lt.s32.totalorder %s1417_s14, 6 }
   0x5   : > { %s1615_s15 = smov (%p27_p1, %s25_s15), 0  ;;  %p171_p3 = pnand %p985_p0, %p170_p2 }
   0x6   : > { %v1334_v0 = vld [vmem:[%s1609_s1 + $0x40] sm:$0xff] (!%p171_p3)   ;;  %s205_s18 = smul.u32 (!%p171_p3), 30, %s1409_s12  ;;  %v1336_v2 = vld [vmem:[%s1609_s1 + $0x48] sm:$0xff] (!%p171_p3)   ;;  %v1338_v4 = vld [vmem:[%s1609_s1 + $0x50] sm:$0xff] (!%p171_p3)  }
   0x7   : > { %174 = sbr.rel (%p171_p3) target bundleno = 319 (0x13f), region = 32  ;;  %v1335_v1 = vld [vmem:[%s1609_s1] sm:$0xff] (!%p171_p3)   ;;  %1188 = vmatprep.subr.bf16.mxu0 (!%p171_p3), %v1334_v0  ;;  %1294 = vmatprep.subr.bf16.mxu1 (!%p171_p3), %v1334_v0  ;;  %v1337_v3 = vld [vmem:[%s1609_s1 + $0x8] sm:$0xff] (!%p171_p3)   ;;  %v1339_v5 = vld [vmem:[%s1609_s1 + $0x10] sm:$0xff] (!%p171_p3)  }
   0x8   : > { %1189 = vmatpush3.bf16.msra.mxu0 (!%p171_p3), %v1335_v1  ;;  %1302 = vmatpush3.bf16.msra.mxu1 (!%p171_p3), %v1335_v1  ;;  %p206_p4 = scmp.lt.s32.totalorder (!%p171_p3), %s205_s18, 149  ;;  %v1340_v6 = vld [vmem:[%s1609_s1 + $0x58] sm:$0xff] (!%p171_p3)   ;;  %v1342_v8 = vld [vmem:[%s1609_s1 + $0x60] sm:$0xff] (!%p171_p3)   ;;  %v1344_v10 = vld [vmem:[%s1609_s1 + $0x68] sm:$0xff] (!%p171_p3)  }
   0x9   : > { %1190 = vmatprep.subr.bf16.mxu0 (!%p171_p3), %v1336_v2  ;;  %1295 = vmatprep.subr.bf16.mxu1 (!%p171_p3), %v1336_v2  ;;  %v1341_v7 = vld [vmem:[%s1609_s1 + $0x18] sm:$0xff] (!%p171_p3)   ;;  %v1343_v9 = vld [vmem:[%s1609_s1 + $0x20] sm:$0xff] (!%p171_p3)   ;;  %v1345_v13 = vld [vmem:[%s1609_s1 + $0x28] sm:$0xff] (!%p171_p3)  }
   0xa   : > { %v1346_v14 = vld [vmem:[%s1609_s1 + $0x70] sm:$0xff] (!%p171_p3)   ;;  %v1348_v16 = vld [vmem:[%s1609_s1 + $0x78] sm:$0xff] (!%p171_p3)   ;;  %v1546_v48 = vld [vmem:[%s1610_s2] ss:$0 sm:$0xff] (!%p171_p3) }
   0xb   : > { %v1347_v15 = vld [vmem:[%s1609_s1 + $0x30] sm:$0xff] (!%p171_p3)   ;;  %v1349_v17 = vld [vmem:[%s1609_s1 + $0x38] sm:$0xff] (!%p171_p3)  }
   0xc   : > { %1191 = vmatpush3.bf16.msra.mxu0 (!%p171_p3), %v1337_v3  ;;  %1303 = vmatpush3.bf16.msra.mxu1 (!%p171_p3), %v1337_v3 }
   0xd   : > { %1192 = vmatprep.subr.bf16.mxu0 (!%p171_p3), %v1338_v4  ;;  %1296 = vmatprep.subr.bf16.mxu1 (!%p171_p3), %v1338_v4 }
   0xe   : > { %s1617_s18 = smov (!%p206_p4, %s205_s18), 149 }
   0xf   : > { %s1068_s6 = sshll.u32 %s1617_s18, 3  ;;  %s988_s5 = sshll.u32 %s1617_s18, 2 }
  0x10   : > { %1193 = vmatpush3.bf16.msra.mxu0 %v1339_v5  ;;  %1304 = vmatpush3.bf16.msra.mxu1 %v1339_v5  ;;  %s1490_s11 = scalar_lea.vmem %s1608_s0, %s1068_s6  ;;  %s1556_s8 = scalar_lea.vmem %s1611_s3, %s988_s5 }
  0x11   : > { %1194 = vmatprep.subr.bf16.mxu0 %v1340_v6  ;;  %1297 = vmatprep.subr.bf16.mxu1 %v1340_v6  ;;  %v1352_v11 = vld [vmem:[%s1490_s11 + $0x4] ss:$8 sps:$4 sm:$0xff]   ;;  %v1350_v18 = vld [vmem:[%s1490_s11] ss:$8 sps:$4 sm:$0xff]   ;;  %v1356_v20 = vld [vmem:[%s1490_s11 + $0x14] ss:$8 sps:$4 sm:$0xff]  }
  0x12   : > { %v1355_v12 = vld [vmem:[%s1490_s11 + $0x84] ss:$8 sps:$4 sm:$0xff]   ;;  %576 = vmatprep.mubr.bf16.mxu0 %v1352_v11  ;;  %v1353_v19 = vld [vmem:[%s1490_s11 + $0x80] ss:$8 sps:$4 sm:$0xff]   ;;  %v1359_v21 = vld [vmem:[%s1490_s11 + $0x94] ss:$8 sps:$4 sm:$0xff]  }
  0x13   : > { %640 = vmatprep.mubr.bf16.mxu1 %v1355_v12  ;;  %v1358_v22 = vld [vmem:[%s1490_s11 + $0x10] ss:$8 sps:$4 sm:$0xff]   ;;  %v1362_v24 = vld [vmem:[%s1490_s11 + $0x24] ss:$8 sps:$4 sm:$0xff]   ;;  %v1364_v26 = vld [vmem:[%s1490_s11 + $0x20] ss:$8 sps:$4 sm:$0xff]  }
  0x14   : > { %1195 = vmatpush3.bf16.msra.mxu0 %v1341_v7  ;;  %1305 = vmatpush3.bf16.msra.mxu1 %v1341_v7  ;;  %v1361_v23 = vld [vmem:[%s1490_s11 + $0x90] ss:$8 sps:$4 sm:$0xff]   ;;  %v1365_v25 = vld [vmem:[%s1490_s11 + $0xa4] ss:$8 sps:$4 sm:$0xff]   ;;  %v1367_v27 = vld [vmem:[%s1490_s11 + $0xa0] ss:$8 sps:$4 sm:$0xff]  }
  0x15   : > { %1196 = vmatprep.subr.bf16.mxu0 %v1342_v8  ;;  %1298 = vmatprep.subr.bf16.mxu1 %v1342_v8  ;;  %v1368_v28 = vld [vmem:[%s1490_s11 + $0x34] ss:$8 sps:$4 sm:$0xff]   ;;  %v1370_v30 = vld [vmem:[%s1490_s11 + $0x30] ss:$8 sps:$4 sm:$0xff]   ;;  %v1374_v32 = vld [vmem:[%s1490_s11 + $0x44] ss:$8 sps:$4 sm:$0xff]  }
  0x16   : > { %v1371_v29 = vld [vmem:[%s1490_s11 + $0xb4] ss:$8 sps:$4 sm:$0xff]   ;;  %v1373_v31 = vld [vmem:[%s1490_s11 + $0xb0] ss:$8 sps:$4 sm:$0xff]   ;;  %v1377_v33 = vld [vmem:[%s1490_s11 + $0xc4] ss:$8 sps:$4 sm:$0xff]  }
  0x17   : > { %v1376_v34 = vld [vmem:[%s1490_s11 + $0x40] ss:$8 sps:$4 sm:$0xff]   ;;  %v1380_v36 = vld [vmem:[%s1490_s11 + $0x54] ss:$8 sps:$4 sm:$0xff]   ;;  %v1382_v38 = vld [vmem:[%s1490_s11 + $0x50] ss:$8 sps:$4 sm:$0xff]  }
  0x18   : > { %1197 = vmatpush3.bf16.msra.mxu0 %v1343_v9  ;;  %1306 = vmatpush3.bf16.msra.mxu1 %v1343_v9  ;;  %v1379_v35 = vld [vmem:[%s1490_s11 + $0xc0] ss:$8 sps:$4 sm:$0xff]   ;;  %v1383_v37 = vld [vmem:[%s1490_s11 + $0xd4] ss:$8 sps:$4 sm:$0xff]   ;;  %v1385_v39 = vld [vmem:[%s1490_s11 + $0xd0] ss:$8 sps:$4 sm:$0xff]  }
  0x19   : > { %1198 = vmatprep.subr.bf16.mxu0 %v1344_v10  ;;  %1299 = vmatprep.subr.bf16.mxu1 %v1344_v10  ;;  %v1386_v40 = vld [vmem:[%s1490_s11 + $0x64] ss:$8 sps:$4 sm:$0xff]   ;;  %v1388_v42 = vld [vmem:[%s1490_s11 + $0x60] ss:$8 sps:$4 sm:$0xff]   ;;  %v1392_v44 = vld [vmem:[%s1490_s11 + $0x74] ss:$8 sps:$4 sm:$0xff]  }
  0x1a   : > { %v1389_v41 = vld [vmem:[%s1490_s11 + $0xe4] ss:$8 sps:$4 sm:$0xff]   ;;  %v1391_v43 = vld [vmem:[%s1490_s11 + $0xe0] ss:$8 sps:$4 sm:$0xff]   ;;  %v1394_v45 = vld [vmem:[%s1490_s11 + $0x70] ss:$8 sps:$4 sm:$0xff]  }
  0x1c   : > { %1199 = vmatpush3.bf16.msra.mxu0 %v1345_v13  ;;  %1307 = vmatpush3.bf16.msra.mxu1 %v1345_v13 }
  0x1d   : > { %1200 = vmatprep.subr.bf16.mxu0 %v1346_v14  ;;  %1300 = vmatprep.subr.bf16.mxu1 %v1346_v14 }
  0x20   : > { %1201 = vmatpush3.bf16.msra.mxu0 %v1347_v15  ;;  %1308 = vmatpush3.bf16.msra.mxu1 %v1347_v15 }
  0x21   : > { %1202 = vmatprep.subr.bf16.mxu0 %v1348_v16  ;;  %1301 = vmatprep.subr.bf16.mxu1 %v1348_v16 }
  0x24   : > { %1203 = vmatpush3.bf16.msra.mxu0 %v1349_v17  ;;  %1309 = vmatpush3.bf16.msra.mxu1 %v1349_v17 }
  0x27   : > { %577 = vmatmul.mubr.bf16.vlgmr.msra.gmra.mrb[0].mxu0 %v1350_v18  ;;  %641 = vmatmul.mubr.bf16.vlgmr.msra.gmra.mrb[0].mxu1 %v1353_v19 }
  0x28   : > { %584 = vmatprep.mubr.bf16.mxu0 %v1356_v20  ;;  %648 = vmatprep.mubr.bf16.mxu1 %v1359_v21 }
  0x2f   : > { %585 = vmatmul.mubr.bf16.gmra.mrb[4].mxu0 %v1358_v22  ;;  %649 = vmatmul.mubr.bf16.gmra.mrb[4].mxu1 %v1361_v23 }
  0x30   : > { %592 = vmatprep.mubr.bf16.mxu0 %v1362_v24  ;;  %656 = vmatprep.mubr.bf16.mxu1 %v1365_v25 }
  0x37   : > { %593 = vmatmul.mubr.bf16.gmra.mrb[8].mxu0 %v1364_v26  ;;  %657 = vmatmul.mubr.bf16.gmra.mrb[8].mxu1 %v1367_v27 }
  0x38   : > { %600 = vmatprep.mubr.bf16.mxu0 %v1368_v28  ;;  %664 = vmatprep.mubr.bf16.mxu1 %v1371_v29 }
  0x3f   : > { %601 = vmatmul.mubr.bf16.gmra.mrb[12].mxu0 %v1370_v30  ;;  %665 = vmatmul.mubr.bf16.gmra.mrb[12].mxu1 %v1373_v31 }
  0x40   : > { %608 = vmatprep.mubr.bf16.mxu0 %v1374_v32  ;;  %672 = vmatprep.mubr.bf16.mxu1 %v1377_v33 }
  0x47   : > { %609 = vmatmul.mubr.bf16.gmra.mrb[16].mxu0 %v1376_v34  ;;  %673 = vmatmul.mubr.bf16.gmra.mrb[16].mxu1 %v1379_v35 }
  0x48   : > { %616 = vmatprep.mubr.bf16.mxu0 %v1380_v36  ;;  %680 = vmatprep.mubr.bf16.mxu1 %v1383_v37 }
  0x4f   : > { %617 = vmatmul.mubr.bf16.gmra.mrb[20].mxu0 %v1382_v38  ;;  %681 = vmatmul.mubr.bf16.gmra.mrb[20].mxu1 %v1385_v39 }
  0x50   : > { %624 = vmatprep.mubr.bf16.mxu0 %v1386_v40  ;;  %688 = vmatprep.mubr.bf16.mxu1 %v1389_v41 }
  0x57   : > { %625 = vmatmul.mubr.bf16.gmra.mrb[24].mxu0 %v1388_v42  ;;  %689 = vmatmul.mubr.bf16.gmra.mrb[24].mxu1 %v1391_v43 }
  0x58   : > { %632 = vmatprep.mubr.bf16.mxu0 %v1392_v44 }
  0x5f   : > { %633 = vmatmul.mubr.bf16.gmra.mrb[28].mxu0 %v1394_v45 }
  0xfa   : > { %v1204_v46 = vpop.f32.mrb[0].mxu0  ;;  %v1252_v47 = vpop.f32.mrb[0].mxu1 }
  0xfb   : > { %v1205_v49 = vpop.f32.mrb[1].mxu0  ;;  %v1253_v50 = vpop.f32.mrb[1].mxu1 }
  0xfc   : > { %v1206_v51 = vadd.f32 %v1205_v49, %v1204_v46  ;;  %v1207_v52 = vpop.f32.mrb[2].mxu0  ;;  %v1254_v53 = vadd.f32 %v1253_v50, %v1252_v47  ;;  %v1255_v54 = vpop.f32.mrb[2].mxu1 }
  0xfd   : > { %v1208_v55 = vpop.f32.mrb[3].mxu0  ;;  %v1256_v56 = vpop.f32.mrb[3].mxu1 }
  0xfe   : > { %v579_v57 = vadd.f32 %v1206_v51, %v1546_v48  ;;  %v1209_v58 = vadd.f32 %v1208_v55, %v1207_v52  ;;  %v643_v59 = vadd.f32 %v1254_v53, %v1546_v48  ;;  %v1257_v60 = vadd.f32 %v1256_v56, %v1255_v54 }
 0x100   : > { %v582_v61 = vadd.f32 %v1209_v58, %v1546_v48  ;;  %v713_v62 = vmax.f32 %v643_v59, 0.0  ;;  %v646_v63 = vadd.f32 %v1257_v60, %v1546_v48  ;;  %v697_v0 = vmax.f32 %v579_v57, 0.0 }
 0x102   : > { %v698_v1 = vmax.f32 %v582_v61, 0.0  ;;  %v1210_v2 = vpop.f32.mrb[4].mxu0  ;;  %v714_v3 = vmax.f32 %v646_v63, 0.0  ;;  %v1258_v4 = vpop.f32.mrb[4].mxu1 }
 0x103   : > { %v1211_v5 = vpop.f32.mrb[5].mxu0  ;;  %v1259_v6 = vpop.f32.mrb[5].mxu1 }
 0x104   : > { %v1102_v7 = vpack.c.bf16 %v698_v1, %v697_v0  ;;  %v1142_v8 = vpack.c.bf16 %v714_v3, %v713_v62  ;;  %v1212_v9 = vadd.f32 %v1211_v5, %v1210_v2  ;;  %v1213_v10 = vpop.f32.mrb[6].mxu0  ;;  %v1260_v11 = vadd.f32 %v1259_v6, %v1258_v4  ;;  %v1261_v12 = vpop.f32.mrb[6].mxu1 }
 0x105   : > { %v1214_v13 = vpop.f32.mrb[7].mxu0  ;;  %v1262_v14 = vpop.f32.mrb[7].mxu1 }
 0x106   : > { %1103 = vst [vmem:[%s1556_s8] sm:$0xff] %v1102_v7   ;;  %1181 = vst [vmem:[%s1556_s8 + $0x40] sm:$0xff] %v1142_v8   ;;  %v587_v15 = vadd.f32 %v1212_v9, %v1546_v48  ;;  %v1215_v16 = vadd.f32 %v1214_v13, %v1213_v10  ;;  %v651_v17 = vadd.f32 %v1260_v11, %v1546_v48 }
 0x107   : > { %v1263_v18 = vadd.f32 %v1262_v14, %v1261_v12 }
 0x108   : > { %v590_v19 = vadd.f32 %v1215_v16, %v1546_v48  ;;  %v715_v20 = vmax.f32 %v651_v17, 0.0  ;;  %v699_v22 = vmax.f32 %v587_v15, 0.0 }
 0x109   : > { %v654_v21 = vadd.f32 %v1263_v18, %v1546_v48 }
 0x10a   : > { %v700_v23 = vmax.f32 %v590_v19, 0.0  ;;  %v1216_v24 = vpop.f32.mrb[8].mxu0  ;;  %v1264_v26 = vpop.f32.mrb[8].mxu1 }
 0x10b   : > { %v716_v25 = vmax.f32 %v654_v21, 0.0  ;;  %v1217_v27 = vpop.f32.mrb[9].mxu0  ;;  %v1265_v28 = vpop.f32.mrb[9].mxu1 }
 0x10c   : > { %v1107_v29 = vpack.c.bf16 %v700_v23, %v699_v22  ;;  %v1218_v31 = vadd.f32 %v1217_v27, %v1216_v24  ;;  %v1219_v32 = vpop.f32.mrb[10].mxu0  ;;  %v1266_v33 = vadd.f32 %v1265_v28, %v1264_v26  ;;  %v1267_v34 = vpop.f32.mrb[10].mxu1 }
 0x10d   : > { %v1147_v30 = vpack.c.bf16 %v716_v25, %v715_v20  ;;  %v1220_v35 = vpop.f32.mrb[11].mxu0  ;;  %v1268_v36 = vpop.f32.mrb[11].mxu1 }
 0x10e   : > { %1174 = vst [vmem:[%s1556_s8 + $0x8] sm:$0xff] %v1107_v29   ;;  %v595_v37 = vadd.f32 %v1218_v31, %v1546_v48  ;;  %v1221_v38 = vadd.f32 %v1220_v35, %v1219_v32  ;;  %v659_v39 = vadd.f32 %v1266_v33, %v1546_v48  ;;  %v1269_v40 = vadd.f32 %v1268_v36, %v1267_v34 }
 0x10f   : > { %1182 = vst [vmem:[%s1556_s8 + $0x48] sm:$0xff] %v1147_v30  }
 0x110   : > { %v598_v41 = vadd.f32 %v1221_v38, %v1546_v48  ;;  %v717_v42 = vmax.f32 %v659_v39, 0.0  ;;  %v662_v43 = vadd.f32 %v1269_v40, %v1546_v48  ;;  %v701_v44 = vmax.f32 %v595_v37, 0.0 }
 0x112   : > { %v702_v45 = vmax.f32 %v598_v41, 0.0  ;;  %v1222_v46 = vpop.f32.mrb[12].mxu0  ;;  %v718_v47 = vmax.f32 %v662_v43, 0.0  ;;  %v1270_v49 = vpop.f32.mrb[12].mxu1 }
 0x113   : > { %v1223_v50 = vpop.f32.mrb[13].mxu0  ;;  %v1271_v51 = vpop.f32.mrb[13].mxu1 }
 0x114   : > { %v1112_v52 = vpack.c.bf16 %v702_v45, %v701_v44  ;;  %v1152_v53 = vpack.c.bf16 %v718_v47, %v717_v42  ;;  %v1224_v54 = vadd.f32 %v1223_v50, %v1222_v46  ;;  %v1225_v55 = vpop.f32.mrb[14].mxu0  ;;  %v1272_v56 = vadd.f32 %v1271_v51, %v1270_v49  ;;  %v1273_v57 = vpop.f32.mrb[14].mxu1 }
 0x115   : > { %v1226_v58 = vpop.f32.mrb[15].mxu0  ;;  %v1274_v59 = vpop.f32.mrb[15].mxu1 }
 0x116   : > { %1175 = vst [vmem:[%s1556_s8 + $0x10] sm:$0xff] %v1112_v52   ;;  %1183 = vst [vmem:[%s1556_s8 + $0x50] sm:$0xff] %v1152_v53   ;;  %v603_v60 = vadd.f32 %v1224_v54, %v1546_v48  ;;  %v1227_v61 = vadd.f32 %v1226_v58, %v1225_v55  ;;  %v667_v62 = vadd.f32 %v1272_v56, %v1546_v48 }
 0x117   : > { %v1275_v63 = vadd.f32 %v1274_v59, %v1273_v57 }
 0x118   : > { %v606_v0 = vadd.f32 %v1227_v61, %v1546_v48  ;;  %v719_v1 = vmax.f32 %v667_v62, 0.0  ;;  %v703_v3 = vmax.f32 %v603_v60, 0.0 }
 0x119   : > { %v670_v2 = vadd.f32 %v1275_v63, %v1546_v48 }
 0x11a   : > { %v704_v4 = vmax.f32 %v606_v0, 0.0  ;;  %v1228_v5 = vpop.f32.mrb[16].mxu0  ;;  %v1276_v7 = vpop.f32.mrb[16].mxu1 }
 0x11b   : > { %v720_v6 = vmax.f32 %v670_v2, 0.0  ;;  %v1229_v8 = vpop.f32.mrb[17].mxu0  ;;  %v1277_v9 = vpop.f32.mrb[17].mxu1 }
 0x11c   : > { %v1117_v10 = vpack.c.bf16 %v704_v4, %v703_v3  ;;  %v1230_v12 = vadd.f32 %v1229_v8, %v1228_v5  ;;  %v1231_v13 = vpop.f32.mrb[18].mxu0  ;;  %v1278_v14 = vadd.f32 %v1277_v9, %v1276_v7  ;;  %v1279_v15 = vpop.f32.mrb[18].mxu1 }
 0x11d   : > { %v1157_v11 = vpack.c.bf16 %v720_v6, %v719_v1  ;;  %v1232_v16 = vpop.f32.mrb[19].mxu0  ;;  %v1280_v17 = vpop.f32.mrb[19].mxu1 }
 0x11e   : > { %1176 = vst [vmem:[%s1556_s8 + $0x18] sm:$0xff] %v1117_v10   ;;  %v611_v18 = vadd.f32 %v1230_v12, %v1546_v48  ;;  %v1233_v19 = vadd.f32 %v1232_v16, %v1231_v13  ;;  %v675_v20 = vadd.f32 %v1278_v14, %v1546_v48  ;;  %v1281_v21 = vadd.f32 %v1280_v17, %v1279_v15 }
 0x11f   : > { %1184 = vst [vmem:[%s1556_s8 + $0x58] sm:$0xff] %v1157_v11  }
 0x120   : > { %v614_v22 = vadd.f32 %v1233_v19, %v1546_v48  ;;  %v721_v23 = vmax.f32 %v675_v20, 0.0  ;;  %v678_v24 = vadd.f32 %v1281_v21, %v1546_v48  ;;  %v705_v25 = vmax.f32 %v611_v18, 0.0 }
 0x122   : > { %v706_v26 = vmax.f32 %v614_v22, 0.0  ;;  %v1234_v27 = vpop.f32.mrb[20].mxu0  ;;  %v722_v28 = vmax.f32 %v678_v24, 0.0  ;;  %v1282_v29 = vpop.f32.mrb[20].mxu1 }
 0x123   : > { %v1235_v30 = vpop.f32.mrb[21].mxu0  ;;  %v1283_v31 = vpop.f32.mrb[21].mxu1 }
 0x124   : > { %v1122_v32 = vpack.c.bf16 %v706_v26, %v705_v25  ;;  %v1162_v33 = vpack.c.bf16 %v722_v28, %v721_v23  ;;  %v1236_v34 = vadd.f32 %v1235_v30, %v1234_v27  ;;  %v1237_v35 = vpop.f32.mrb[22].mxu0  ;;  %v1284_v36 = vadd.f32 %v1283_v31, %v1282_v29  ;;  %v1285_v37 = vpop.f32.mrb[22].mxu1 }
 0x125   : > { %v1238_v38 = vpop.f32.mrb[23].mxu0  ;;  %v1286_v39 = vpop.f32.mrb[23].mxu1 }
 0x126   : > { %1177 = vst [vmem:[%s1556_s8 + $0x20] sm:$0xff] %v1122_v32   ;;  %1185 = vst [vmem:[%s1556_s8 + $0x60] sm:$0xff] %v1162_v33   ;;  %v619_v40 = vadd.f32 %v1236_v34, %v1546_v48  ;;  %v1239_v41 = vadd.f32 %v1238_v38, %v1237_v35  ;;  %v683_v42 = vadd.f32 %v1284_v36, %v1546_v48 }
 0x127   : > { %v1287_v43 = vadd.f32 %v1286_v39, %v1285_v37 }
 0x128   : > { %v622_v44 = vadd.f32 %v1239_v41, %v1546_v48  ;;  %v723_v45 = vmax.f32 %v683_v42, 0.0  ;;  %v707_v47 = vmax.f32 %v619_v40, 0.0 }
 0x129   : > { %v686_v46 = vadd.f32 %v1287_v43, %v1546_v48 }
 0x12a   : > { %v708_v49 = vmax.f32 %v622_v44, 0.0  ;;  %v1240_v50 = vpop.f32.mrb[24].mxu0  ;;  %v1288_v52 = vpop.f32.mrb[24].mxu1 }
 0x12b   : > { %v724_v51 = vmax.f32 %v686_v46, 0.0  ;;  %v1241_v53 = vpop.f32.mrb[25].mxu0  ;;  %v1289_v54 = vpop.f32.mrb[25].mxu1 }
 0x12c   : > { %v1127_v55 = vpack.c.bf16 %v708_v49, %v707_v47  ;;  %v1242_v57 = vadd.f32 %v1241_v53, %v1240_v50  ;;  %v1243_v58 = vpop.f32.mrb[26].mxu0  ;;  %v1290_v59 = vadd.f32 %v1289_v54, %v1288_v52  ;;  %v1291_v60 = vpop.f32.mrb[26].mxu1 }
 0x12d   : > { %v1167_v56 = vpack.c.bf16 %v724_v51, %v723_v45  ;;  %v1244_v61 = vpop.f32.mrb[27].mxu0  ;;  %v1292_v62 = vpop.f32.mrb[27].mxu1 }
 0x12e   : > { %1178 = vst [vmem:[%s1556_s8 + $0x28] sm:$0xff] %v1127_v55   ;;  %v627_v63 = vadd.f32 %v1242_v57, %v1546_v48  ;;  %v1245_v0 = vadd.f32 %v1244_v61, %v1243_v58  ;;  %v691_v1 = vadd.f32 %v1290_v59, %v1546_v48  ;;  %v1293_v2 = vadd.f32 %v1292_v62, %v1291_v60 }
 0x12f   : > { %1186 = vst [vmem:[%s1556_s8 + $0x68] sm:$0xff] %v1167_v56  }
 0x130   : > { %v630_v3 = vadd.f32 %v1245_v0, %v1546_v48  ;;  %v725_v4 = vmax.f32 %v691_v1, 0.0  ;;  %v694_v5 = vadd.f32 %v1293_v2, %v1546_v48  ;;  %v709_v6 = vmax.f32 %v627_v63, 0.0 }
 0x132   : > { %v710_v7 = vmax.f32 %v630_v3, 0.0  ;;  %v1246_v8 = vpop.f32.mrb[28].mxu0  ;;  %v726_v9 = vmax.f32 %v694_v5, 0.0 }
 0x133   : > { %v1247_v10 = vpop.f32.mrb[29].mxu0 }
 0x134   : > { %v1132_v11 = vpack.c.bf16 %v710_v7, %v709_v6  ;;  %v1172_v12 = vpack.c.bf16 %v726_v9, %v725_v4  ;;  %v1248_v13 = vadd.f32 %v1247_v10, %v1246_v8  ;;  %v1249_v14 = vpop.f32.mrb[30].mxu0 }
 0x135   : > { %v1250_v15 = vpop.f32.mrb[31].mxu0 }
 0x136   : > { %1179 = vst [vmem:[%s1556_s8 + $0x30] sm:$0xff] %v1132_v11   ;;  %1187 = vst [vmem:[%s1556_s8 + $0x70] sm:$0xff] %v1172_v12   ;;  %v635_v16 = vadd.f32 %v1248_v13, %v1546_v48  ;;  %v1251_v17 = vadd.f32 %v1250_v15, %v1249_v14 }
 0x138   : > { %v638_v18 = vadd.f32 %v1251_v17, %v1546_v48  ;;  %v711_v19 = vmax.f32 %v635_v16, 0.0 }
 0x13a   : > { %v712_v20 = vmax.f32 %v638_v18, 0.0 }
 0x13c   : > { %v1137_v21 = vpack.c.bf16 %v712_v20, %v711_v19 }
 0x13e   : > { %1180 = vst [vmem:[%s1556_s8 + $0x38] sm:$0xff] %v1137_v21  }
 0x13f PF: > { %s13_s14 = sadd.s32 1, %s1417_s14   ;;  %s1612_s12 = smov %s1413_s13 }
 0x140   : > { %p10_p5 = scmp.ge.s32.totalorder %s13_s14, 7   ;;  %s1613_s13 = smov %s1615_s15 }
 0x142   :  { %12 = sbr.rel (!%p10_p5) target bundleno = 2 (0x2), region = 68 }

// kernel: pspnet_forward.25
= control target key start
LH: loop header
LB: loop body
LE: loop exit
PB: predicated region body
PF: predicated region fallthrough
CT: control target
= control target key end

     0   :  { %s1623_s15 = smov 0   ;;  %s2147_s0 = inlined_call_operand.vmem [shape: bf16[2,13,13,64], index: 0, kind: input, shape index: {}]   ;;  %s2148_s1 = inlined_call_operand.vmem [shape: bf16[2,13,13,64], index: 1, kind: input, shape index: {}]   ;;  %s2149_s2 = inlined_call_operand.vmem [shape: bf16[2,13,13,64], index: 2, kind: input, shape index: {}]   ;;  %s2150_s3 = inlined_call_operand.vmem [shape: bf16[2,13,13,64], index: 3, kind: input, shape index: {}]   ;;  %s2151_s4 = inlined_call_operand.vmem [shape: bf16[2,12,12,64], index: 4, kind: output, shape index: {}]  }
   0x1 LB: > { %s1508_s16 = sadd.s32 4294967295, %s1596_s15   ;;  %p1512_p0 = scmp.ge.s32.totalorder %s1596_s15, 1  ;;  %s1596_s15 = sphi %s1623_s15, %s14_s15  }
   0x2   : > { %p192_p1 = scmp.lt.s32.totalorder %s1596_s15, 3 }
   0x4   : > { %p193_p2 = pnand %p1512_p0, %p192_p1 }
   0x5   : > { %p233_p3 = scmp.lt.s32.totalorder (!%p193_p2), %s1508_s16, 1  ;;  %vm342_vm0 = vsmask.f32 (!%p193_p2), 3328  ;;  %vm343_vm1 = vsmask.f32 (!%p193_p2), 7440  ;;  %vm1391_vm3 = vcmask (!%p193_p2), 519168  }
   0x6   : > { %196 = sbr.rel (%p193_p2) target bundleno = 196 (0xc4), region = 36  ;;  %vm1666_vm2 = vmor (!%p193_p2), %vm342_vm0, %vm343_vm1  ;;  %vm1393_vm4 = vcmask (!%p193_p2), 517120  }
   0xd   : > { %s2155_s16 = smov (!%p233_p3, %s1508_s16), 1 }
   0xe   : > { %s1634_s17 = smul.u32 104, %s2155_s16 }
   0xf   : > { %s1581_s30 = smul.u32 96, %s2155_s16 }
  0x10   : > { %s1640_s20 = scalar_lea.vmem %s2147_s0, %s1634_s17  ;;  %s1646_s23 = scalar_lea.vmem %s2148_s1, %s1634_s17 }
  0x11   : > { %s1652_s26 = scalar_lea.vmem %s2149_s2, %s1634_s17  ;;  %v258_v0 = vld [vmem:[%s1640_s20] sm:$0xf]  ;;  %v330_v1 = vld [vmem:[%s1640_s20 + $0x4] sm:$0x7]  ;;  %v1660_v12 = vld [vmem:[%s1640_s20 + $0x8] sm:$0xf]  ;;  %s1675_s29 = scalar_lea.vmem %s2150_s3, %s1634_s17 }
  0x12   : > { %v282_v2 = vld [vmem:[%s1646_s23] sm:$0xf]  ;;  %v346_v3 = vshrl.u32 %v258_v0, 16  ;;  %v349_v4 = vshll.u32 %v258_v0, 16  ;;  %v355_v6 = vshll.u32 %v330_v1, 16  ;;  %v1116_v19 = vshrl.u32 %v1660_v12, 16  ;;  %s1725_s7 = scalar_lea.vmem %s2151_s4, %s1581_s30 }
  0x13   : > { %v621_v5 = vld [vmem:[%s1652_s26] sm:$0xf]  ;;  %v717_v7 = vld [vmem:[%s1652_s26 + $0x4] sm:$0x7]  ;;  %v1566_v16 = vld [vmem:[%s1640_s20 + $0xc] sm:$0x7]  ;;  %v306_v17 = vmax.bf16 %v282_v2, %v258_v0 }
  0x14   : > { %v730_v8 = vshrl.u32 %v621_v5, 16  ;;  %v733_v9 = vshll.u32 %v621_v5, 16  ;;  %v348_v10 = vrot.slane %v346_v3, 4  ;;  %v351_v11 = vrot.slane %v349_v4, 5  ;;  %v259_v25 = vld [vmem:[%s1640_s20 + $0x4] sm:$0x3] }
  0x15   : > { %v739_v15 = vshll.u32 %v717_v7, 16  ;;  %v1119_v20 = vshll.u32 %v1660_v12, 16  ;;  %v357_v22 = vrot.slane %v355_v6, 5  ;;  %v1125_v24 = vshll.u32 %v1566_v16, 16  ;;  %v283_v30 = vld [vmem:[%s1646_s23 + $0x4] sm:$0x3] }
  0x16   : > { %v732_v13 = vrot.slane %v730_v8, 4  ;;  %v735_v14 = vrot.slane %v733_v9, 5  ;;  %v352_v18 = vor.u32 %v351_v11, %v348_v10  ;;  %v359_v26 = vshrl.u32 %v330_v1, 16  ;;  %v1683_v39 = vld [vmem:[%s1640_s20 + $0x8] sm:$0xf] }
  0x17   : > { %v1118_v28 = vrot.slane %v1116_v19, 4  ;;  %v1121_v29 = vrot.slane %v1119_v20, 5  ;;  %v741_v32 = vrot.slane %v739_v15, 5  ;;  %v743_v34 = vshrl.u32 %v717_v7, 16  ;;  %v669_v41 = vld [vmem:[%s1675_s29] sm:$0xf] }
  0x18   : > { %v736_v23 = vor.u32 %v735_v14, %v732_v13  ;;  %v353_v27 = vrot.slane %v352_v18, 4  ;;  %v361_v33 = vrot.slane %v359_v26, 4  ;;  %v1680_v37 = vrot.slane %v1125_v24, 5  ;;  %v284_v45 = vld [vmem:[%s1646_s23 + $0x8] sm:$0xf] }
  0x19   : > { %v1122_v36 = vor.u32 %v1121_v29, %v1118_v28  ;;  %v1129_v38 = vshrl.u32 %v1566_v16, 16  ;;  %v307_v42 = vmax.bf16 %v283_v30, %v259_v25  ;;  %v745_v44 = vrot.slane %v743_v34, 4  ;;  %v1690_v49 = vld [vmem:[%s1640_s20 + $0xc] sm:$0x7]  ;;  %v1695_v55 = vld [vmem:[%s1652_s26 + $0x8] sm:$0xf] }
  0x1a   : > { %v737_v31 = vrot.slane %v736_v23, 4  ;;  %v358_v35 = vsel %vm1666_vm2, %v353_v27, %v357_v22  ;;  %v362_v43 = vor.u32 %v361_v33, %v357_v22  ;;  %v365_v50 = vshrl.u32 %v1683_v39, 16  ;;  %v622_v57 = vld [vmem:[%s1652_s26 + $0x4] sm:$0x3]  ;;  %v718_v61 = vld [vmem:[%s1652_s26 + $0xc] sm:$0x7] }
  0x1b   : > { %v597_v40 = vmax.bf16 %v358_v35, %v306_v17  ;;  %v1123_v47 = vrot.slane %v1122_v36, 4  ;;  %v1131_v48 = vrot.slane %v1129_v38, 4  ;;  %v746_v53 = vor.u32 %v745_v44, %v741_v32  ;;  %v1706_v2 = vld [vmem:[%s1640_s20 + $0x10] sm:$0xf]  ;;  %v670_v3 = vld [vmem:[%s1675_s29 + $0x4] sm:$0x3] }
  0x1c   : > { %v742_v46 = vsel %vm1666_vm2, %v737_v31, %v741_v32  ;;  %v363_v52 = vrot.slane %v362_v43, 4  ;;  %v368_v54 = vshll.u32 %v1683_v39, 16  ;;  %v308_v59 = vmax.bf16 %v284_v45, %v1683_v39  ;;  %v1567_v13 = vld [vmem:[%s1640_s20 + $0x14] sm:$0x7]  ;;  %v1542_v14 = vld [vmem:[%s1646_s23 + $0x8] sm:$0xf] }
  0x1d   : > { %v645_v51 = vmax.bf16 %v621_v5, %v597_v40  ;;  %v1128_v56 = vsel %vm1666_vm2, %v1123_v47, %v1680_v37  ;;  %v1132_v58 = vor.u32 %v1131_v48, %v1680_v37  ;;  %v367_v60 = vrot.slane %v365_v50, 4  ;;  %v261_v24 = vld [vmem:[%s1640_s20 + $0xc] sm:$0x3]  ;;  %v671_v36 = vld [vmem:[%s1675_s29 + $0x8] sm:$0xf] }
  0x1e   : > { %v598_v63 = vmax.bf16 %v363_v52, %v307_v42  ;;  %v370_v0 = vrot.slane %v368_v54, 5  ;;  %v374_v1 = vshll.u32 %v1690_v49, 16  ;;  %v747_v4 = vrot.slane %v746_v53, 4  ;;  %v285_v25 = vld [vmem:[%s1646_s23 + $0xc] sm:$0x3] }
  0x1f   : > { %v693_v62 = vmax.bf16 %v669_v41, %v645_v51  ;;  %v1133_v5 = vrot.slane %v1132_v58, 4  ;;  %v749_v6 = vshrl.u32 %v1695_v55, 16  ;;  %v752_v7 = vshll.u32 %v1695_v55, 16  ;;  %v1519_v26 = vld [vmem:[%s1640_s20 + $0xc] sm:$0x3] }
  0x20   : > { %v646_v9 = vmax.bf16 %v622_v57, %v598_v63  ;;  %v371_v10 = vor.u32 %v370_v0, %v367_v60  ;;  %v758_v11 = vshll.u32 %v718_v61, 16  ;;  %v1135_v17 = vshrl.u32 %v1706_v2, 16  ;;  %v1543_v34 = vld [vmem:[%s1646_s23 + $0xc] sm:$0x3]  ;;  %v1731_v44 = vld [vmem:[%s1640_s20 + $0x10] sm:$0xf] }
  0x21   : > { %v981_v8 = vmax.bf16 %v742_v46, %v693_v62  ;;  %v751_v15 = vrot.slane %v749_v6, 4  ;;  %v754_v16 = vrot.slane %v752_v7, 5  ;;  %v1138_v18 = vshll.u32 %v1706_v2, 16  ;;  %v1734_v45 = vld [vmem:[%s1646_s23 + $0x10] sm:$0xf] }
  0x22   : > { %v694_v20 = vmax.bf16 %v670_v3, %v646_v9  ;;  %v372_v22 = vrot.slane %v371_v10, 4  ;;  %v376_v23 = vrot.slane %v374_v1, 5  ;;  %v1137_v28 = vrot.slane %v1135_v17, 4  ;;  %v1744_v57 = vld [vmem:[%s1640_s20 + $0x14] sm:$0x7] }
  0x23   : > { %v1030_v19 = vmax.bf16 %v1660_v12, %v981_v8  ;;  %v755_v27 = vor.u32 %v754_v16, %v751_v15  ;;  %v1140_v29 = vrot.slane %v1138_v18, 5  ;;  %v1144_v30 = vshll.u32 %v1567_v13, 16  ;;  %v719_v8 = vld [vmem:[%s1652_s26 + $0x14] sm:$0x7]  ;;  %v1568_v18 = vld [vmem:[%s1640_s20 + $0x1c] sm:$0x7] }
  0x24   : > { %v982_v32 = vmax.bf16 %v747_v4, %v694_v20  ;;  %v377_v33 = vsel %vm1666_vm2, %v372_v22, %v376_v23  ;;  %v760_v12 = vrot.slane %v758_v11, 5  ;;  %v309_v39 = vmax.bf16 %v285_v25, %v261_v24  ;;  %v624_v4 = vld [vmem:[%s1652_s26 + $0xc] sm:$0x3] }
  0x25   : > { %v1079_v31 = vmax.bf16 %v1542_v14, %v1030_v19  ;;  %v599_v35 = vmax.bf16 %v377_v33, %v308_v59  ;;  %v756_v37 = vrot.slane %v755_v27, 4  ;;  %v1141_v38 = vor.u32 %v1140_v29, %v1137_v28  ;;  %v1748_v59 = vld [vmem:[%s1652_s26 + $0x10] sm:$0xf]  ;;  %v672_v25 = vld [vmem:[%s1675_s29 + $0xc] sm:$0x3] }
  0x26   : > { %v1031_v41 = vmax.bf16 %v1519_v26, %v982_v32  ;;  %v378_v42 = vshrl.u32 %v1690_v49, 16  ;;  %v762_v43 = vshrl.u32 %v718_v61, 16  ;;  %v1146_v48 = vrot.slane %v1144_v30, 5  ;;  %v1544_v61 = vld [vmem:[%s1646_s23 + $0x10] sm:$0xf] }
  0x27   : > { %v1367_v40 = vmax.bf16 %v1128_v56, %v1079_v31  ;;  %v647_v46 = vmax.bf16 %v1695_v55, %v599_v35  ;;  %v1142_v47 = vrot.slane %v1141_v38, 4  ;;  %v1148_v50 = vshrl.u32 %v1567_v13, 16  ;;  %v1761_v13 = vld [vmem:[%s1640_s20 + $0x18] sm:$0xf]  ;;  %v263_v35 = vld [vmem:[%s1640_s20 + $0x14] sm:$0x3] }
  0x28   : > { %v1080_v51 = vmax.bf16 %v1543_v34, %v1031_v41  ;;  %v761_v52 = vsel %vm1666_vm2, %v756_v37, %v760_v12  ;;  %v380_v49 = vrot.slane %v378_v42, 4  ;;  %v764_v53 = vrot.slane %v762_v43, 4  ;;  %v1521_v41 = vld [vmem:[%s1640_s20 + $0x14] sm:$0x3] }
  0x29   : > { %1392 = vst.msk [vmem:[%s1725_s7] sm:$0xf] %vm1391_vm3, %v1367_v40  ;;  %v695_v54 = vmax.bf16 %v671_v36, %v647_v46  ;;  %v1150_v56 = vrot.slane %v1148_v50, 4  ;;  %v310_v55 = vmax.bf16 %v1734_v45, %v1731_v44  ;;  %v384_v58 = vshrl.u32 %v1731_v44, 16  ;;  %v287_v36 = vld [vmem:[%s1646_s23 + $0x14] sm:$0x3] }
  0x2a   : > { %v1368_v60 = vmax.bf16 %v1133_v5, %v1080_v51  ;;  %v381_v62 = vor.u32 %v380_v49, %v376_v23  ;;  %v765_v63 = vor.u32 %v764_v53, %v760_v12  ;;  %v387_v0 = vshll.u32 %v1731_v44, 16  ;;  %v1782_v46 = vld [vmem:[%s1640_s20 + $0x18] sm:$0xf]  ;;  %v1545_v53 = vld [vmem:[%s1646_s23 + $0x14] sm:$0x3] }
  0x2b   : > { %v983_v1 = vmax.bf16 %v761_v52, %v695_v54  ;;  %v1147_v3 = vsel %vm1666_vm2, %v1142_v47, %v1146_v48  ;;  %v1151_v6 = vor.u32 %v1150_v56, %v1146_v48  ;;  %v386_v7 = vrot.slane %v384_v58, 4  ;;  %v673_v48 = vld [vmem:[%s1675_s29 + $0x10] sm:$0xf]  ;;  %v288_v49 = vld [vmem:[%s1646_s23 + $0x18] sm:$0xf] }
  0x2c   : > { %1394 = vst.msk [vmem:[%s1725_s7 + $0x4] sm:$0x3] %vm1393_vm4, %v1368_v60  ;;  %v382_v9 = vrot.slane %v381_v62, 4  ;;  %v389_v5 = vrot.slane %v387_v0, 5  ;;  %v393_v10 = vshll.u32 %v1744_v57, 16  ;;  %v768_v11 = vshrl.u32 %v1748_v59, 16 }
  0x2d   : > { %v1032_v14 = vmax.bf16 %v1706_v2, %v983_v1  ;;  %v766_v15 = vrot.slane %v765_v63, 4  ;;  %v1764_v16 = vrot.slane %v1151_v6, 4  ;;  %v771_v17 = vshll.u32 %v1748_v59, 16  ;;  %v1791_v62 = vld [vmem:[%s1640_s20 + $0x1c] sm:$0x7] }
  0x2e   : > { %v600_v19 = vmax.bf16 %v382_v9, %v309_v39  ;;  %v390_v20 = vor.u32 %v389_v5, %v386_v7  ;;  %v770_v22 = vrot.slane %v768_v11, 4  ;;  %v777_v23 = vshll.u32 %v719_v8, 16  ;;  %v720_v5 = vld [vmem:[%s1652_s26 + $0x1c] sm:$0x7] }
  0x2f   : > { %v1081_v24 = vmax.bf16 %v1544_v61, %v1032_v14  ;;  %v773_v26 = vrot.slane %v771_v17, 5  ;;  %v1154_v27 = vshrl.u32 %v1761_v13, 16  ;;  %v1157_v2 = vshll.u32 %v1761_v13, 16  ;;  %v1805_v17 = vld [vmem:[%s1640_s20 + $0x20] sm:$0xf] }
  0x30   : > { %v648_v28 = vmax.bf16 %v624_v4, %v600_v19  ;;  %v391_v29 = vrot.slane %v390_v20, 4  ;;  %v395_v30 = vrot.slane %v393_v10, 5  ;;  %v1163_v31 = vshll.u32 %v1568_v18, 16  ;;  %v1797_v4 = vld [vmem:[%s1652_s26 + $0x18] sm:$0xf] }
  0x31   : > { %v1369_v32 = vmax.bf16 %v1147_v3, %v1081_v24  ;;  %v774_v33 = vor.u32 %v773_v26, %v770_v22  ;;  %v1156_v12 = vrot.slane %v1154_v27, 4  ;;  %v1159_v34 = vrot.slane %v1157_v2, 5  ;;  %v1546_v19 = vld [vmem:[%s1646_s23 + $0x18] sm:$0xf]  ;;  %v626_v20 = vld [vmem:[%s1652_s26 + $0x14] sm:$0x3] }
  0x32   : > { %v696_v37 = vmax.bf16 %v672_v25, %v648_v28  ;;  %v396_v38 = vsel %vm1666_vm2, %v391_v29, %v395_v30  ;;  %v779_v39 = vrot.slane %v777_v23, 5  ;;  %v1775_v40 = vrot.slane %v1163_v31, 5  ;;  %v1569_v28 = vld [vmem:[%s1640_s20 + $0x24] sm:$0x7]  ;;  %v674_v29 = vld [vmem:[%s1675_s29 + $0x14] sm:$0x3] }
  0x33   : > { %1395 = vst.msk [vmem:[%s1725_s7 + $0x8] sm:$0xf] %vm1391_vm3, %v1369_v32  ;;  %v601_v42 = vmax.bf16 %v396_v38, %v310_v55  ;;  %v775_v43 = vrot.slane %v774_v33, 4  ;;  %v1160_v44 = vor.u32 %v1159_v34, %v1156_v12  ;;  %v397_v45 = vshrl.u32 %v1744_v57, 16 }
  0x34   : > { %v984_v47 = vmax.bf16 %v766_v15, %v696_v37  ;;  %v311_v50 = vmax.bf16 %v287_v36, %v263_v35  ;;  %v781_v51 = vshrl.u32 %v719_v8, 16  ;;  %v1167_v52 = vshrl.u32 %v1568_v18, 16 }
  0x35   : > { %v649_v54 = vmax.bf16 %v1748_v59, %v601_v42  ;;  %v780_v56 = vsel %vm1666_vm2, %v775_v43, %v779_v39  ;;  %v1161_v55 = vrot.slane %v1160_v44, 4  ;;  %v399_v58 = vrot.slane %v397_v45, 4  ;;  %v265_v43 = vld [vmem:[%s1640_s20 + $0x1c] sm:$0x3] }
  0x36   : > { %v1033_v57 = vmax.bf16 %v1521_v41, %v984_v47  ;;  %v783_v60 = vrot.slane %v781_v51, 4  ;;  %v1169_v61 = vrot.slane %v1167_v52, 4  ;;  %v403_v63 = vshrl.u32 %v1782_v46, 16  ;;  %v289_v44 = vld [vmem:[%s1646_s23 + $0x1c] sm:$0x3] }
  0x37   : > { %v697_v0 = vmax.bf16 %v673_v48, %v649_v54  ;;  %v400_v1 = vor.u32 %v399_v58, %v395_v30  ;;  %v312_v59 = vmax.bf16 %v288_v49, %v1782_v46  ;;  %v406_v3 = vshll.u32 %v1782_v46, 16  ;;  %v1523_v45 = vld [vmem:[%s1640_s20 + $0x1c] sm:$0x3]  ;;  %v675_v52 = vld [vmem:[%s1675_s29 + $0x18] sm:$0xf] }
  0x38   : > { %v1082_v6 = vmax.bf16 %v1545_v53, %v1033_v57  ;;  %v1166_v7 = vsel %vm1666_vm2, %v1161_v55, %v1775_v40  ;;  %v784_v8 = vor.u32 %v783_v60, %v779_v39  ;;  %v405_v9 = vrot.slane %v403_v63, 4  ;;  %v1547_v55 = vld [vmem:[%s1646_s23 + $0x1c] sm:$0x3]  ;;  %v1838_v63 = vld [vmem:[%s1646_s23 + $0x20] sm:$0xf] }
  0x39   : > { %v985_v10 = vmax.bf16 %v780_v56, %v697_v0  ;;  %v401_v11 = vrot.slane %v400_v1, 4  ;;  %v408_v14 = vrot.slane %v406_v3, 5  ;;  %v412_v15 = vshll.u32 %v1791_v62, 16  ;;  %v1833_v56 = vld [vmem:[%s1640_s20 + $0x20] sm:$0xf] }
  0x3a   : > { %v1370_v18 = vmax.bf16 %v1764_v16, %v1082_v6  ;;  %v785_v22 = vrot.slane %v784_v8, 4  ;;  %v1170_v23 = vor.u32 %v1169_v61, %v1775_v40  ;;  %v787_v24 = vshrl.u32 %v1797_v4, 16  ;;  %v334_v8 = vld [vmem:[%s1640_s20 + $0x24] sm:$0x7] }
  0x3b   : > { %v1034_v25 = vmax.bf16 %v1761_v13, %v985_v10  ;;  %v602_v26 = vmax.bf16 %v401_v11, %v311_v50  ;;  %v409_v27 = vor.u32 %v408_v14, %v405_v9  ;;  %v1813_v2 = vrot.slane %v412_v15, 5  ;;  %v1848_v14 = vld [vmem:[%s1652_s26 + $0x20] sm:$0xf] }
  0x3c   : > { %1396 = vst.msk [vmem:[%s1725_s7 + $0xc] sm:$0x3] %vm1393_vm4, %v1370_v18  ;;  %v789_v30 = vrot.slane %v787_v24, 4  ;;  %v790_v16 = vshll.u32 %v1797_v4, 16  ;;  %v796_v31 = vshll.u32 %v720_v5, 16  ;;  %v1173_v32 = vshrl.u32 %v1805_v17, 16 }
  0x3d   : > { %v1083_v33 = vmax.bf16 %v1546_v19, %v1034_v25  ;;  %v650_v12 = vmax.bf16 %v626_v20, %v602_v26  ;;  %v410_v13 = vrot.slane %v409_v27, 4  ;;  %v1176_v34 = vshll.u32 %v1805_v17, 16  ;;  %v1548_v24 = vld [vmem:[%s1646_s23 + $0x20] sm:$0xf] }
  0x3e   : > { %v1171_v35 = vrot.slane %v1170_v23, 4  ;;  %v792_v36 = vrot.slane %v790_v16, 5  ;;  %v1175_v37 = vrot.slane %v1173_v32, 4  ;;  %v1182_v38 = vshll.u32 %v1569_v28, 16 }
  0x3f   : > { %v1371_v39 = vmax.bf16 %v1166_v7, %v1083_v33  ;;  %v698_v40 = vmax.bf16 %v674_v29, %v650_v12  ;;  %v415_v41 = vsel %vm1666_vm2, %v410_v13, %v1813_v2  ;;  %v1178_v42 = vrot.slane %v1176_v34, 5  ;;  %v628_v29 = vld [vmem:[%s1652_s26 + $0x1c] sm:$0x3]  ;;  %v1570_v34 = vld [vmem:[%s1640_s20 + $0x2c] sm:$0x7] }
  0x40   : > { %v603_v46 = vmax.bf16 %v415_v41, %v312_v59  ;;  %v793_v47 = vor.u32 %v792_v36, %v789_v30  ;;  %v798_v48 = vrot.slane %v796_v31, 5  ;;  %v1184_v50 = vrot.slane %v1182_v38, 5  ;;  %v676_v36 = vld [vmem:[%s1675_s29 + $0x1c] sm:$0x3] }
  0x41   : > { %1397 = vst.msk [vmem:[%s1725_s7 + $0x10] sm:$0xf] %vm1391_vm3, %v1371_v39  ;;  %v986_v51 = vmax.bf16 %v785_v22, %v698_v40  ;;  %v1179_v49 = vor.u32 %v1178_v42, %v1175_v37  ;;  %v416_v53 = vshrl.u32 %v1791_v62, 16  ;;  %v800_v54 = vshrl.u32 %v720_v5, 16  ;;  %v721_v22 = vld [vmem:[%s1652_s26 + $0x24] sm:$0x7] }
  0x42   : > { %v651_v58 = vmax.bf16 %v1797_v4, %v603_v46  ;;  %v794_v57 = vrot.slane %v793_v47, 4  ;;  %v313_v60 = vmax.bf16 %v289_v44, %v265_v43  ;;  %v1186_v61 = vshrl.u32 %v1569_v28, 16  ;;  %v267_v39 = vld [vmem:[%s1640_s20 + $0x24] sm:$0x3] }
  0x43   : > { %v1035_v0 = vmax.bf16 %v1523_v45, %v986_v51  ;;  %v1180_v1 = vrot.slane %v1179_v49, 4  ;;  %v418_v59 = vrot.slane %v416_v53, 4  ;;  %v802_v3 = vrot.slane %v800_v54, 4  ;;  %v291_v44 = vld [vmem:[%s1646_s23 + $0x24] sm:$0x3] }
  0x44   : > { %v699_v6 = vmax.bf16 %v675_v52, %v651_v58  ;;  %v799_v62 = vsel %vm1666_vm2, %v794_v57, %v798_v48  ;;  %v1188_v7 = vrot.slane %v1186_v61, 4  ;;  %v422_v4 = vshrl.u32 %v1833_v56, 16  ;;  %v1525_v53 = vld [vmem:[%s1640_s20 + $0x24] sm:$0x3] }
  0x45   : > { %v1084_v9 = vmax.bf16 %v1547_v55, %v1035_v0  ;;  %v419_v5 = vor.u32 %v418_v59, %v1813_v2  ;;  %v803_v10 = vor.u32 %v802_v3, %v798_v48  ;;  %v314_v11 = vmax.bf16 %v1838_v63, %v1833_v56  ;;  %v1856_v2 = vld [vmem:[%s1640_s20 + $0x28] sm:$0xf]  ;;  %v1549_v54 = vld [vmem:[%s1646_s23 + $0x24] sm:$0x3]  ;;  %v677_v63 = vld [vmem:[%s1675_s29 + $0x20] sm:$0xf] }
  0x46   : > { %v987_v15 = vmax.bf16 %v799_v62, %v699_v6  ;;  %v1189_v18 = vor.u32 %v1188_v7, %v1184_v50  ;;  %v424_v19 = vrot.slane %v422_v4, 4  ;;  %v425_v20 = vshll.u32 %v1833_v56, 16  ;;  %v1878_v59 = vld [vmem:[%s1640_s20 + $0x28] sm:$0xf] }
  0x47   : > { %v1372_v23 = vmax.bf16 %v1171_v35, %v1084_v9  ;;  %v1185_v25 = vsel %vm1666_vm2, %v1180_v1, %v1184_v50  ;;  %v420_v26 = vrot.slane %v419_v5, 4  ;;  %v431_v27 = vshll.u32 %v334_v8, 16  ;;  %v292_v4 = vld [vmem:[%s1646_s23 + $0x28] sm:$0xf] }
  0x48   : > { %v1036_v28 = vmax.bf16 %v1805_v17, %v987_v15  ;;  %v804_v30 = vrot.slane %v803_v10, 4  ;;  %v427_v16 = vrot.slane %v425_v20, 5  ;;  %v806_v31 = vshrl.u32 %v1848_v14, 16 }
  0x49   : > { %1398 = vst.msk [vmem:[%s1725_s7 + $0x14] sm:$0x3] %vm1393_vm4, %v1372_v23  ;;  %v604_v32 = vmax.bf16 %v420_v26, %v313_v60  ;;  %v1190_v33 = vrot.slane %v1189_v18, 4  ;;  %v809_v12 = vshll.u32 %v1848_v14, 16  ;;  %v815_v13 = vshll.u32 %v721_v22, 16 }
  0x4a   : > { %v1085_v35 = vmax.bf16 %v1548_v24, %v1036_v28  ;;  %v428_v37 = vor.u32 %v427_v16, %v424_v19  ;;  %v808_v38 = vrot.slane %v806_v31, 4  ;;  %v1192_v17 = vshrl.u32 %v1856_v2, 16  ;;  %v1885_v19 = vld [vmem:[%s1640_s20 + $0x2c] sm:$0x7] }
  0x4b   : > { %v652_v40 = vmax.bf16 %v628_v29, %v604_v32  ;;  %v433_v41 = vrot.slane %v431_v27, 5  ;;  %v811_v42 = vrot.slane %v809_v12, 5  ;;  %v1195_v43 = vshll.u32 %v1856_v2, 16  ;;  %v630_v32 = vld [vmem:[%s1652_s26 + $0x24] sm:$0x3] }
  0x4c   : > { %v1373_v45 = vmax.bf16 %v1185_v25, %v1085_v35  ;;  %v429_v46 = vrot.slane %v428_v37, 4  ;;  %v1194_v47 = vrot.slane %v1192_v17, 4  ;;  %v1201_v48 = vshll.u32 %v1570_v34, 16  ;;  %v1891_v25 = vld [vmem:[%s1652_s26 + $0x28] sm:$0xf] }
  0x4d   : > { %v700_v50 = vmax.bf16 %v676_v36, %v652_v40  ;;  %v812_v51 = vor.u32 %v811_v42, %v808_v38  ;;  %v817_v52 = vrot.slane %v815_v13, 5  ;;  %v1197_v49 = vrot.slane %v1195_v43, 5  ;;  %v1550_v35 = vld [vmem:[%s1646_s23 + $0x28] sm:$0xf]  ;;  %v1571_v43 = vld [vmem:[%s1640_s20 + $0x34] sm:$0x7] }
  0x4e   : > { %1399 = vst.msk [vmem:[%s1725_s7 + $0x18] sm:$0xf] %vm1391_vm3, %v1373_v45  ;;  %v434_v56 = vsel %vm1666_vm2, %v429_v46, %v433_v41  ;;  %v315_v55 = vmax.bf16 %v291_v44, %v267_v39  ;;  %v435_v58 = vshrl.u32 %v334_v8, 16  ;;  %v819_v57 = vshrl.u32 %v721_v22, 16  ;;  %v678_v39 = vld [vmem:[%s1675_s29 + $0x24] sm:$0x3] }
  0x4f   : > { %v988_v60 = vmax.bf16 %v804_v30, %v700_v50  ;;  %v605_v61 = vmax.bf16 %v434_v56, %v314_v11  ;;  %v813_v0 = vrot.slane %v812_v51, 4  ;;  %v1198_v1 = vor.u32 %v1197_v49, %v1194_v47  ;;  %v722_v30 = vld [vmem:[%s1652_s26 + $0x2c] sm:$0x7] }
  0x50   : > { %v1203_v3 = vrot.slane %v1201_v48, 5  ;;  %v437_v6 = vrot.slane %v435_v58, 4  ;;  %v821_v62 = vrot.slane %v819_v57, 4  ;;  %v1205_v7 = vshrl.u32 %v1570_v34, 16  ;;  %v1899_v34 = vld [vmem:[%s1640_s20 + $0x30] sm:$0xf] }
  0x51   : > { %v1037_v9 = vmax.bf16 %v1525_v53, %v988_v60  ;;  %v653_v5 = vmax.bf16 %v1848_v14, %v605_v61  ;;  %v818_v8 = vsel %vm1666_vm2, %v813_v0, %v817_v52  ;;  %v1199_v10 = vrot.slane %v1198_v1, 4  ;;  %v1911_v48 = vld [vmem:[%s1640_s20 + $0x2c] sm:$0x3] }
  0x52   : > { %v438_v11 = vor.u32 %v437_v6, %v433_v41  ;;  %v822_v15 = vor.u32 %v821_v62, %v817_v52  ;;  %v1207_v18 = vrot.slane %v1205_v7, 4  ;;  %v441_v20 = vshrl.u32 %v1878_v59, 16  ;;  %v293_v49 = vld [vmem:[%s1646_s23 + $0x2c] sm:$0x3] }
  0x53   : > { %v1086_v22 = vmax.bf16 %v1549_v54, %v1037_v9  ;;  %v701_v23 = vmax.bf16 %v677_v63, %v653_v5  ;;  %v316_v24 = vmax.bf16 %v292_v4, %v1878_v59  ;;  %v444_v14 = vshll.u32 %v1878_v59, 16  ;;  %v1527_v57 = vld [vmem:[%s1640_s20 + $0x2c] sm:$0x3] }
  0x54   : > { %v1204_v26 = vsel %vm1666_vm2, %v1199_v10, %v1203_v3  ;;  %v439_v27 = vrot.slane %v438_v11, 4  ;;  %v1208_v28 = vor.u32 %v1207_v18, %v1203_v3  ;;  %v443_v29 = vrot.slane %v441_v20, 4  ;;  %v1551_v1 = vld [vmem:[%s1646_s23 + $0x2c] sm:$0x3]  ;;  %v679_v3 = vld [vmem:[%s1675_s29 + $0x28] sm:$0xf] }
  0x55   : > { %v1374_v16 = vmax.bf16 %v1190_v33, %v1086_v22  ;;  %v989_v31 = vmax.bf16 %v818_v8, %v701_v23  ;;  %v446_v12 = vrot.slane %v444_v14, 5  ;;  %v450_v13 = vshll.u32 %v1885_v19, 16  ;;  %v270_v8 = vld [vmem:[%s1640_s20 + $0x30] sm:$0xf] }
  0x56   : > { %v606_v36 = vmax.bf16 %v439_v27, %v315_v55  ;;  %v823_v37 = vrot.slane %v822_v15, 4  ;;  %v825_v38 = vshrl.u32 %v1891_v25, 16  ;;  %v828_v17 = vshll.u32 %v1891_v25, 16  ;;  %v294_v20 = vld [vmem:[%s1646_s23 + $0x30] sm:$0xf] }
  0x57   : > { %1400 = vst.msk [vmem:[%s1725_s7 + $0x1c] sm:$0x3] %vm1393_vm4, %v1374_v16  ;;  %v1038_v33 = vmax.bf16 %v1856_v2, %v989_v31  ;;  %v1209_v40 = vrot.slane %v1208_v28, 4  ;;  %v447_v41 = vor.u32 %v446_v12, %v443_v29  ;;  %v834_v42 = vshll.u32 %v722_v30, 16  ;;  %v1930_v27 = vld [vmem:[%s1640_s20 + $0x34] sm:$0x7] }
  0x58   : > { %v654_v44 = vmax.bf16 %v630_v32, %v606_v36  ;;  %v827_v45 = vrot.slane %v825_v38, 4  ;;  %v830_v46 = vrot.slane %v828_v17, 5  ;;  %v1211_v47 = vshrl.u32 %v1899_v34, 16  ;;  %v633_v32 = vld [vmem:[%s1652_s26 + $0x30] sm:$0xf] }
  0x59   : > { %v1087_v50 = vmax.bf16 %v1550_v35, %v1038_v33  ;;  %v448_v51 = vrot.slane %v447_v41, 4  ;;  %v452_v52 = vrot.slane %v450_v13, 5  ;;  %v1214_v2 = vshll.u32 %v1899_v34, 16  ;;  %v1937_v38 = vld [vmem:[%s1640_s20 + $0x38] sm:$0xf] }
  0x5a   : > { %v702_v53 = vmax.bf16 %v678_v39, %v654_v44  ;;  %v831_v54 = vor.u32 %v830_v46, %v827_v45  ;;  %v1213_v56 = vrot.slane %v1211_v47, 4  ;;  %v1220_v55 = vshll.u32 %v1571_v43, 16  ;;  %v1552_v17 = vld [vmem:[%s1646_s23 + $0x30] sm:$0xf]  ;;  %v632_v44 = vld [vmem:[%s1652_s26 + $0x2c] sm:$0x3] }
  0x5b   : > { %v1375_v58 = vmax.bf16 %v1204_v26, %v1087_v50  ;;  %v453_v60 = vsel %vm1666_vm2, %v448_v51, %v452_v52  ;;  %v836_v61 = vrot.slane %v834_v42, 5  ;;  %v1216_v63 = vrot.slane %v1214_v2, 5 }
  0x5c   : > { %v990_v0 = vmax.bf16 %v823_v37, %v702_v53  ;;  %v607_v59 = vmax.bf16 %v453_v60, %v316_v24  ;;  %v832_v6 = vrot.slane %v831_v54, 4  ;;  %v317_v62 = vmax.bf16 %v293_v49, %v1911_v48  ;;  %v723_v37 = vld [vmem:[%s1652_s26 + $0x34] sm:$0x7] }
  0x5d   : > { %1401 = vst.msk [vmem:[%s1725_s7 + $0x20] sm:$0xf] %vm1391_vm3, %v1375_v58  ;;  %v1217_v7 = vor.u32 %v1216_v63, %v1213_v56  ;;  %v454_v4 = vshrl.u32 %v1885_v19, 16  ;;  %v838_v9 = vshrl.u32 %v722_v30, 16  ;;  %v1224_v5 = vshrl.u32 %v1571_v43, 16 }
  0x5e   : > { %v1039_v10 = vmax.bf16 %v1527_v57, %v990_v0  ;;  %v655_v11 = vmax.bf16 %v1891_v25, %v607_v59  ;;  %v837_v15 = vsel %vm1666_vm2, %v832_v6, %v836_v61  ;;  %v1222_v18 = vrot.slane %v1220_v55, 5  ;;  %v271_v55 = vld [vmem:[%s1640_s20 + $0x34] sm:$0x3] }
  0x5f   : > { %v1218_v22 = vrot.slane %v1217_v7, 4  ;;  %v456_v23 = vrot.slane %v454_v4, 4  ;;  %v840_v24 = vrot.slane %v838_v9, 4  ;;  %v1226_v14 = vrot.slane %v1224_v5, 4  ;;  %v1529_v6 = vld [vmem:[%s1640_s20 + $0x34] sm:$0x3] }
  0x60   : > { %v1088_v26 = vmax.bf16 %v1551_v1, %v1039_v10  ;;  %v703_v19 = vmax.bf16 %v679_v3, %v655_v11  ;;  %v460_v28 = vshrl.u32 %v270_v8, 16  ;;  %v463_v29 = vshll.u32 %v270_v8, 16  ;;  %v681_v9 = vld [vmem:[%s1675_s29 + $0x30] sm:$0xf] }
  0x61   : > { %v1223_v25 = vsel %vm1666_vm2, %v1218_v22, %v1222_v18  ;;  %v457_v30 = vor.u32 %v456_v23, %v452_v52  ;;  %v841_v16 = vor.u32 %v840_v24, %v836_v61  ;;  %v318_v31 = vmax.bf16 %v294_v20, %v270_v8  ;;  %v1572_v52 = vld [vmem:[%s1640_s20 + $0x3c] sm:$0x7]  ;;  %v295_v61 = vld [vmem:[%s1646_s23 + $0x34] sm:$0x3]  ;;  %v272_v24 = vld [vmem:[%s1640_s20 + $0x38] sm:$0xf] }
  0x62   : > { %v1376_v12 = vmax.bf16 %v1209_v40, %v1088_v26  ;;  %v991_v13 = vmax.bf16 %v837_v15, %v703_v19  ;;  %v462_v35 = vrot.slane %v460_v28, 4  ;;  %v465_v36 = vrot.slane %v463_v29, 5  ;;  %v680_v40 = vld [vmem:[%s1675_s29 + $0x2c] sm:$0x3]  ;;  %v296_v29 = vld [vmem:[%s1646_s23 + $0x38] sm:$0xf] }
  0x63   : > { %v458_v33 = vrot.slane %v457_v30, 4  ;;  %v842_v39 = vrot.slane %v841_v16, 4  ;;  %v1227_v41 = vor.u32 %v1226_v14, %v1222_v18  ;;  %v469_v42 = vshll.u32 %v1930_v27, 16  ;;  %v1553_v18 = vld [vmem:[%s1646_s23 + $0x34] sm:$0x3] }
  0x64   : > { %1402 = vst.msk [vmem:[%s1725_s7 + $0x24] sm:$0x3] %vm1393_vm4, %v1376_v12  ;;  %v1040_v43 = vmax.bf16 %v1899_v34, %v991_v13  ;;  %v466_v45 = vor.u32 %v465_v36, %v462_v35  ;;  %v844_v46 = vshrl.u32 %v633_v32, 16  ;;  %v847_v47 = vshll.u32 %v633_v32, 16  ;;  %v337_v12 = vld [vmem:[%s1640_s20 + $0x3c] sm:$0x7] }
  0x65   : > { %v608_v48 = vmax.bf16 %v458_v33, %v317_v62  ;;  %v471_v50 = vrot.slane %v469_v42, 5  ;;  %v853_v51 = vshll.u32 %v723_v37, 16  ;;  %v1230_v2 = vshrl.u32 %v1937_v38, 16  ;;  %v724_v42 = vld [vmem:[%s1652_s26 + $0x3c] sm:$0x7] }
  0x66   : > { %v1089_v49 = vmax.bf16 %v1552_v17, %v1040_v43  ;;  %v467_v53 = vrot.slane %v466_v45, 4  ;;  %v846_v54 = vrot.slane %v844_v46, 4  ;;  %v849_v56 = vrot.slane %v847_v47, 5  ;;  %v1554_v17 = vld [vmem:[%s1646_s23 + $0x38] sm:$0xf] }
  0x67   : > { %v656_v34 = vmax.bf16 %v632_v44, %v608_v48  ;;  %v1228_v58 = vrot.slane %v1227_v41, 4  ;;  %v1232_v57 = vrot.slane %v1230_v2, 4  ;;  %v1233_v60 = vshll.u32 %v1937_v38, 16  ;;  %v635_v41 = vld [vmem:[%s1652_s26 + $0x38] sm:$0xf] }
  0x68   : > { %v1377_v63 = vmax.bf16 %v1223_v25, %v1089_v49  ;;  %v472_v0 = vsel %vm1666_vm2, %v467_v53, %v471_v50  ;;  %v850_v1 = vor.u32 %v849_v56, %v846_v54  ;;  %v1239_v59 = vshll.u32 %v1572_v52, 16  ;;  %v1970_v46 = vld [vmem:[%s1640_s20 + $0x40] sm:$0xf]  ;;  %v682_v49 = vld [vmem:[%s1675_s29 + $0x34] sm:$0x3] }
  0x69   : > { %v704_v3 = vmax.bf16 %v680_v40, %v656_v34  ;;  %v609_v62 = vmax.bf16 %v472_v0, %v318_v31  ;;  %v855_v7 = vrot.slane %v853_v51, 5  ;;  %v1235_v4 = vrot.slane %v1233_v60, 5  ;;  %v1573_v60 = vld [vmem:[%s1640_s20 + $0x44] sm:$0x7] }
  0x6a   : > { %1403 = vst.msk [vmem:[%s1725_s7 + $0x28] sm:$0xf] %vm1391_vm3, %v1377_v63  ;;  %v851_v5 = vrot.slane %v850_v1, 4  ;;  %v319_v8 = vmax.bf16 %v295_v61, %v271_v55  ;;  %v473_v10 = vshrl.u32 %v1930_v27, 16  ;;  %v857_v11 = vshrl.u32 %v723_v37, 16 }
  0x6b   : > { %v992_v15 = vmax.bf16 %v842_v39, %v704_v3  ;;  %v657_v20 = vmax.bf16 %v633_v32, %v609_v62  ;;  %v1236_v22 = vor.u32 %v1235_v4, %v1232_v57  ;;  %v1243_v23 = vshrl.u32 %v1572_v52, 16 }
  0x6c   : > { %v856_v14 = vsel %vm1666_vm2, %v851_v5, %v855_v7  ;;  %v1241_v26 = vrot.slane %v1239_v59, 5  ;;  %v475_v19 = vrot.slane %v473_v10, 4  ;;  %v859_v28 = vrot.slane %v857_v11, 4 }
  0x6d   : > { %v1041_v25 = vmax.bf16 %v1529_v6, %v992_v15  ;;  %v705_v27 = vmax.bf16 %v681_v9, %v657_v20  ;;  %v1237_v30 = vrot.slane %v1236_v22, 4  ;;  %v1245_v16 = vrot.slane %v1243_v23, 4  ;;  %v683_v23 = vld [vmem:[%s1675_s29 + $0x38] sm:$0xf] }
  0x6e   : > { %v476_v31 = vor.u32 %v475_v19, %v471_v50  ;;  %v860_v32 = vor.u32 %v859_v28, %v855_v7  ;;  %v479_v13 = vshrl.u32 %v272_v24, 16  ;;  %v482_v35 = vshll.u32 %v272_v24, 16  ;;  %v634_v50 = vld [vmem:[%s1652_s26 + $0x34] sm:$0x3]  ;;  %v1531_v7 = vld [vmem:[%s1640_s20 + $0x3c] sm:$0x3] }
  0x6f   : > { %v1090_v36 = vmax.bf16 %v1553_v18, %v1041_v25  ;;  %v993_v37 = vmax.bf16 %v856_v14, %v705_v27  ;;  %v1242_v33 = vsel %vm1666_vm2, %v1237_v30, %v1241_v26  ;;  %v320_v39 = vmax.bf16 %v296_v29, %v272_v24  ;;  %v297_v18 = vld [vmem:[%s1646_s23 + $0x3c] sm:$0x3]  ;;  %v274_v30 = vld [vmem:[%s1640_s20 + $0x40] sm:$0xf] }
  0x70   : > { %v477_v43 = vrot.slane %v476_v31, 4  ;;  %v1246_v44 = vor.u32 %v1245_v16, %v1241_v26  ;;  %v481_v40 = vrot.slane %v479_v13, 4  ;;  %v484_v45 = vrot.slane %v482_v35, 5  ;;  %v1555_v19 = vld [vmem:[%s1646_s23 + $0x3c] sm:$0x3] }
  0x71   : > { %v1378_v47 = vmax.bf16 %v1228_v58, %v1090_v36  ;;  %v1042_v48 = vmax.bf16 %v1937_v38, %v993_v37  ;;  %v861_v51 = vrot.slane %v860_v32, 4  ;;  %v488_v52 = vshll.u32 %v337_v12, 16  ;;  %v298_v13 = vld [vmem:[%s1646_s23 + $0x40] sm:$0xf] }
  0x72   : > { %v610_v2 = vmax.bf16 %v477_v43, %v319_v8  ;;  %v485_v53 = vor.u32 %v484_v45, %v481_v40  ;;  %v863_v54 = vshrl.u32 %v635_v41, 16  ;;  %v866_v56 = vshll.u32 %v635_v41, 16  ;;  %v273_v8 = vld [vmem:[%s1640_s20 + $0x3c] sm:$0x3] }
  0x73   : > { %1404 = vst.msk [vmem:[%s1725_s7 + $0x2c] sm:$0x3] %vm1393_vm4, %v1378_v47  ;;  %v1091_v55 = vmax.bf16 %v1554_v17, %v1042_v48  ;;  %v490_v34 = vrot.slane %v488_v52, 5  ;;  %v872_v57 = vshll.u32 %v724_v42, 16  ;;  %v1249_v58 = vshrl.u32 %v1970_v46, 16 }
  0x74   : > { %v658_v38 = vmax.bf16 %v634_v50, %v610_v2  ;;  %v486_v61 = vrot.slane %v485_v53, 4  ;;  %v865_v63 = vrot.slane %v863_v54, 4  ;;  %v868_v0 = vrot.slane %v866_v56, 5  ;;  %v637_v50 = vld [vmem:[%s1652_s26 + $0x40] sm:$0xf] }
  0x75   : > { %v1379_v1 = vmax.bf16 %v1242_v33, %v1091_v55  ;;  %v1247_v59 = vrot.slane %v1246_v44, 4  ;;  %v1251_v3 = vrot.slane %v1249_v58, 4  ;;  %v1252_v6 = vshll.u32 %v1970_v46, 16  ;;  %v2001_v56 = vld [vmem:[%s1640_s20 + $0x48] sm:$0xf] }
  0x76   : > { %v706_v62 = vmax.bf16 %v682_v49, %v658_v38  ;;  %v491_v4 = vsel %vm1666_vm2, %v486_v61, %v490_v34  ;;  %v869_v9 = vor.u32 %v868_v0, %v865_v63  ;;  %v1258_v5 = vshll.u32 %v1573_v60, 16  ;;  %v636_v49 = vld [vmem:[%s1652_s26 + $0x3c] sm:$0x3] }
  0x77   : > { %1405 = vst.msk [vmem:[%s1725_s7 + $0x30] sm:$0xf] %vm1391_vm3, %v1379_v1  ;;  %v611_v10 = vmax.bf16 %v491_v4, %v320_v39  ;;  %v874_v11 = vrot.slane %v872_v57, 5  ;;  %v1254_v15 = vrot.slane %v1252_v6, 5  ;;  %v492_v20 = vshrl.u32 %v337_v12, 16 }
  0x78   : > { %v994_v22 = vmax.bf16 %v861_v51, %v706_v62  ;;  %v870_v24 = vrot.slane %v869_v9, 4  ;;  %v1260_v14 = vrot.slane %v1258_v5, 5  ;;  %v876_v26 = vshrl.u32 %v724_v42, 16  ;;  %v1556_v39 = vld [vmem:[%s1646_s23 + $0x40] sm:$0xf] }
  0x79   : > { %v659_v28 = vmax.bf16 %v635_v41, %v611_v10  ;;  %v1255_v29 = vor.u32 %v1254_v15, %v1251_v3  ;;  %v494_v25 = vrot.slane %v492_v20, 4  ;;  %v1262_v27 = vshrl.u32 %v1573_v60, 16  ;;  %v338_v42 = vld [vmem:[%s1640_s20 + $0x44] sm:$0x7]  ;;  %v684_v58 = vld [vmem:[%s1675_s29 + $0x3c] sm:$0x3] }
  0x7a   : > { %v1043_v16 = vmax.bf16 %v1531_v7, %v994_v22  ;;  %v875_v31 = vsel %vm1666_vm2, %v870_v24, %v874_v11  ;;  %v321_v32 = vmax.bf16 %v297_v18, %v273_v8  ;;  %v878_v12 = vrot.slane %v876_v26, 4  ;;  %v725_v51 = vld [vmem:[%s1652_s26 + $0x44] sm:$0x7]  ;;  %v1574_v6 = vld [vmem:[%s1640_s20 + $0x4c] sm:$0x7] }
  0x7b   : > { %v707_v35 = vmax.bf16 %v683_v23, %v659_v28  ;;  %v1256_v36 = vrot.slane %v1255_v29, 4  ;;  %v495_v37 = vor.u32 %v494_v25, %v490_v34  ;;  %v1264_v17 = vrot.slane %v1262_v27, 4  ;;  %v1533_v15 = vld [vmem:[%s1640_s20 + $0x44] sm:$0x3]  ;;  %v685_v27 = vld [vmem:[%s1675_s29 + $0x40] sm:$0xf] }
  0x7c   : > { %v1092_v33 = vmax.bf16 %v1555_v19, %v1043_v16  ;;  %v879_v41 = vor.u32 %v878_v12, %v874_v11  ;;  %v498_v43 = vshrl.u32 %v274_v30, 16  ;;  %v501_v44 = vshll.u32 %v274_v30, 16  ;;  %v1557_v18 = vld [vmem:[%s1646_s23 + $0x44] sm:$0x3] }
  0x7d   : > { %v995_v40 = vmax.bf16 %v875_v31, %v707_v35  ;;  %v496_v45 = vrot.slane %v495_v37, 4  ;;  %v1265_v47 = vor.u32 %v1264_v17, %v1260_v14  ;;  %v322_v48 = vmax.bf16 %v298_v13, %v274_v30  ;;  %v275_v28 = vld [vmem:[%s1640_s20 + $0x44] sm:$0x3]  ;;  %v276_v37 = vld [vmem:[%s1640_s20 + $0x48] sm:$0xf] }
  0x7e   : > { %v1380_v52 = vmax.bf16 %v1247_v59, %v1092_v33  ;;  %v1261_v2 = vsel %vm1666_vm2, %v1256_v36, %v1260_v14  ;;  %v500_v53 = vrot.slane %v498_v43, 4  ;;  %v503_v54 = vrot.slane %v501_v44, 5  ;;  %v299_v29 = vld [vmem:[%s1646_s23 + $0x44] sm:$0x3]  ;;  %v300_v17 = vld [vmem:[%s1646_s23 + $0x48] sm:$0xf] }
  0x7f   : > { %v1044_v55 = vmax.bf16 %v1970_v46, %v995_v40  ;;  %v612_v34 = vmax.bf16 %v496_v45, %v321_v32  ;;  %v880_v57 = vrot.slane %v879_v41, 4  ;;  %v507_v60 = vshll.u32 %v338_v42, 16 }
  0x80   : > { %1406 = vst.msk [vmem:[%s1725_s7 + $0x34] sm:$0x3] %vm1393_vm4, %v1380_v52  ;;  %v504_v38 = vor.u32 %v503_v54, %v500_v53  ;;  %v882_v61 = vshrl.u32 %v637_v50, 16  ;;  %v885_v63 = vshll.u32 %v637_v50, 16  ;;  %v891_v0 = vshll.u32 %v725_v51, 16 }
  0x81   : > { %v1093_v1 = vmax.bf16 %v1556_v39, %v1044_v55  ;;  %v660_v59 = vmax.bf16 %v636_v49, %v612_v34  ;;  %v1266_v3 = vrot.slane %v1265_v47, 4  ;;  %v1268_v62 = vshrl.u32 %v2001_v56, 16  ;;  %v1558_v47 = vld [vmem:[%s1646_s23 + $0x48] sm:$0xf] }
  0x82   : > { %v505_v46 = vrot.slane %v504_v38, 4  ;;  %v509_v7 = vrot.slane %v507_v60, 5  ;;  %v884_v4 = vrot.slane %v882_v61, 4  ;;  %v887_v9 = vrot.slane %v885_v63, 5  ;;  %v2026_v49 = vld [vmem:[%s1652_s26 + $0x48] sm:$0xf] }
  0x83   : > { %v1381_v5 = vmax.bf16 %v1261_v2, %v1093_v1  ;;  %v708_v8 = vmax.bf16 %v684_v58, %v660_v59  ;;  %v1270_v10 = vrot.slane %v1268_v62, 4  ;;  %v1271_v11 = vshll.u32 %v2001_v56, 16  ;;  %v2030_v60 = vld [vmem:[%s1640_s20 + $0x50] sm:$0xf]  ;;  %v638_v38 = vld [vmem:[%s1652_s26 + $0x44] sm:$0x3] }
  0x84   : > { %v510_v20 = vsel %vm1666_vm2, %v505_v46, %v509_v7  ;;  %v888_v22 = vor.u32 %v887_v9, %v884_v4  ;;  %v893_v23 = vrot.slane %v891_v0, 5  ;;  %v1277_v24 = vshll.u32 %v1574_v6, 16  ;;  %v1575_v9 = vld [vmem:[%s1640_s20 + $0x54] sm:$0x7] }
  0x85   : > { %1407 = vst.msk [vmem:[%s1725_s7 + $0x38] sm:$0xf] %vm1391_vm3, %v1381_v5  ;;  %v996_v14 = vmax.bf16 %v880_v57, %v708_v8  ;;  %v613_v26 = vmax.bf16 %v510_v20, %v322_v48  ;;  %v1273_v19 = vrot.slane %v1271_v11, 5  ;;  %v511_v25 = vshrl.u32 %v338_v42, 16  ;;  %v726_v57 = vld [vmem:[%s1652_s26 + $0x4c] sm:$0x7] }
  0x86   : > { %v889_v30 = vrot.slane %v888_v22, 4  ;;  %v1279_v16 = vrot.slane %v1277_v24, 5  ;;  %v895_v31 = vshrl.u32 %v725_v51, 16  ;;  %v1281_v32 = vshrl.u32 %v1574_v6, 16  ;;  %v339_v51 = vld [vmem:[%s1640_s20 + $0x4c] sm:$0x7] }
  0x87   : > { %v1045_v12 = vmax.bf16 %v1533_v15, %v996_v14  ;;  %v661_v13 = vmax.bf16 %v637_v50, %v613_v26  ;;  %v1274_v35 = vor.u32 %v1273_v19, %v1270_v10  ;;  %v513_v36 = vrot.slane %v511_v25, 4  ;;  %v301_v24 = vld [vmem:[%s1646_s23 + $0x4c] sm:$0x3] }
  0x88   : > { %v894_v33 = vsel %vm1666_vm2, %v889_v30, %v893_v23  ;;  %v323_v39 = vmax.bf16 %v299_v29, %v275_v28  ;;  %v897_v41 = vrot.slane %v895_v31, 4  ;;  %v1283_v42 = vrot.slane %v1281_v32, 4  ;;  %v1535_v29 = vld [vmem:[%s1640_s20 + $0x4c] sm:$0x3] }
  0x89   : > { %v1094_v43 = vmax.bf16 %v1557_v18, %v1045_v12  ;;  %v709_v44 = vmax.bf16 %v685_v27, %v661_v13  ;;  %v1275_v40 = vrot.slane %v1274_v35, 4  ;;  %v514_v45 = vor.u32 %v513_v36, %v509_v7  ;;  %v1559_v32 = vld [vmem:[%s1646_s23 + $0x4c] sm:$0x3]  ;;  %v687_v13 = vld [vmem:[%s1675_s29 + $0x48] sm:$0xf] }
  0x8a   : > { %v898_v48 = vor.u32 %v897_v41, %v893_v23  ;;  %v324_v50 = vmax.bf16 %v300_v17, %v276_v37  ;;  %v517_v52 = vshrl.u32 %v276_v37, 16  ;;  %v520_v2 = vshll.u32 %v276_v37, 16  ;;  %v2054_v41 = vld [vmem:[%s1640_s20 + $0x50] sm:$0xf] }
  0x8b   : > { %v1382_v53 = vmax.bf16 %v1266_v3, %v1094_v43  ;;  %v997_v54 = vmax.bf16 %v894_v33, %v709_v44  ;;  %v515_v55 = vrot.slane %v514_v45, 4  ;;  %v1284_v34 = vor.u32 %v1283_v42, %v1279_v16  ;;  %v686_v3 = vld [vmem:[%s1675_s29 + $0x44] sm:$0x3] }
  0x8c   : > { %v1280_v58 = vsel %vm1666_vm2, %v1275_v40, %v1279_v16  ;;  %v899_v61 = vrot.slane %v898_v48, 4  ;;  %v519_v63 = vrot.slane %v517_v52, 4  ;;  %v522_v0 = vrot.slane %v520_v2, 5 }
  0x8d   : > { %1408 = vst.msk [vmem:[%s1725_s7 + $0x3c] sm:$0x3] %vm1393_vm4, %v1382_v53  ;;  %v1046_v1 = vmax.bf16 %v2001_v56, %v997_v54  ;;  %v614_v59 = vmax.bf16 %v515_v55, %v323_v39  ;;  %v526_v6 = vshll.u32 %v339_v51, 16  ;;  %v901_v62 = vshrl.u32 %v2026_v49, 16  ;;  %v277_v56 = vld [vmem:[%s1640_s20 + $0x4c] sm:$0x3] }
  0x8e   : > { %v523_v46 = vor.u32 %v522_v0, %v519_v63  ;;  %v904_v7 = vshll.u32 %v2026_v49, 16  ;;  %v910_v4 = vshll.u32 %v726_v57, 16  ;;  %v1287_v5 = vshrl.u32 %v2030_v60, 16  ;;  %v640_v63 = vld [vmem:[%s1652_s26 + $0x4c] sm:$0x3] }
  0x8f   : > { %v1095_v8 = vmax.bf16 %v1558_v47, %v1046_v1  ;;  %v662_v10 = vmax.bf16 %v638_v38, %v614_v59  ;;  %v1285_v11 = vrot.slane %v1284_v34, 4  ;;  %v903_v15 = vrot.slane %v901_v62, 4  ;;  %v340_v34 = vld [vmem:[%s1640_s20 + $0x54] sm:$0x7]  ;;  %v2069_v59 = vld [vmem:[%s1640_s20 + $0x58] sm:$0xf] }
  0x90   : > { %v524_v18 = vrot.slane %v523_v46, 4  ;;  %v528_v20 = vrot.slane %v526_v6, 5  ;;  %v906_v22 = vrot.slane %v904_v7, 5  ;;  %v1289_v23 = vrot.slane %v1287_v5, 4  ;;  %v688_v5 = vld [vmem:[%s1675_s29 + $0x4c] sm:$0x3] }
  0x91   : > { %v1383_v14 = vmax.bf16 %v1280_v58, %v1095_v8  ;;  %v710_v26 = vmax.bf16 %v686_v3, %v662_v10  ;;  %v1290_v19 = vshll.u32 %v2030_v60, 16  ;;  %v1296_v28 = vshll.u32 %v1575_v9, 16  ;;  %v2064_v58 = vld [vmem:[%s1652_s26 + $0x50] sm:$0xf] }
  0x92   : > { %v529_v25 = vsel %vm1666_vm2, %v524_v18, %v528_v20  ;;  %v907_v27 = vor.u32 %v906_v22, %v903_v15  ;;  %v912_v30 = vrot.slane %v910_v4, 5  ;;  %v530_v16 = vshrl.u32 %v339_v51, 16  ;;  %v302_v51 = vld [vmem:[%s1646_s23 + $0x50] sm:$0xf]  ;;  %v727_v4 = vld [vmem:[%s1652_s26 + $0x54] sm:$0x7] }
  0x93   : > { %1409 = vst.msk [vmem:[%s1725_s7 + $0x40] sm:$0xf] %vm1391_vm3, %v1383_v14  ;;  %v998_v31 = vmax.bf16 %v899_v61, %v710_v26  ;;  %v615_v12 = vmax.bf16 %v529_v25, %v324_v50  ;;  %v1292_v35 = vrot.slane %v1290_v19, 5  ;;  %v325_v36 = vmax.bf16 %v301_v24, %v277_v56  ;;  %v1560_v3 = vld [vmem:[%s1646_s23 + $0x50] sm:$0xf] }
  0x94   : > { %v908_v37 = vrot.slane %v907_v27, 4  ;;  %v532_v17 = vrot.slane %v530_v16, 4  ;;  %v914_v33 = vshrl.u32 %v726_v57, 16  ;;  %v1300_v39 = vshrl.u32 %v1575_v9, 16  ;;  %v1537_v19 = vld [vmem:[%s1640_s20 + $0x54] sm:$0x3] }
  0x95   : > { %v1047_v42 = vmax.bf16 %v1535_v29, %v998_v31  ;;  %v663_v43 = vmax.bf16 %v2026_v49, %v615_v12  ;;  %v1293_v44 = vor.u32 %v1292_v35, %v1289_v23  ;;  %v1298_v40 = vrot.slane %v1296_v28, 5  ;;  %v303_v12 = vld [vmem:[%s1646_s23 + $0x54] sm:$0x3] }
  0x96   : > { %v913_v45 = vsel %vm1666_vm2, %v908_v37, %v912_v30  ;;  %v533_v47 = vor.u32 %v532_v17, %v528_v20  ;;  %v916_v48 = vrot.slane %v914_v33, 4  ;;  %v1302_v50 = vrot.slane %v1300_v39, 4  ;;  %v1576_v20 = vld [vmem:[%s1640_s20 + $0x5c] sm:$0x7]  ;;  %v1561_v17 = vld [vmem:[%s1646_s23 + $0x54] sm:$0x3] }
  0x97   : > { %v1096_v52 = vmax.bf16 %v1559_v32, %v1047_v42  ;;  %v711_v2 = vmax.bf16 %v687_v13, %v663_v43  ;;  %v1294_v53 = vrot.slane %v1293_v44, 4  ;;  %v536_v54 = vshrl.u32 %v2054_v41, 16  ;;  %v279_v32 = vld [vmem:[%s1640_s20 + $0x54] sm:$0x3]  ;;  %v689_v44 = vld [vmem:[%s1675_s29 + $0x50] sm:$0xf] }
  0x98   : > { %v534_v55 = vrot.slane %v533_v47, 4  ;;  %v917_v49 = vor.u32 %v916_v48, %v912_v30  ;;  %v539_v57 = vshll.u32 %v2054_v41, 16  ;;  %v326_v0 = vmax.bf16 %v302_v51, %v2054_v41  ;;  %v280_v48 = vld [vmem:[%s1640_s20 + $0x58] sm:$0xf] }
  0x99   : > { %v1384_v38 = vmax.bf16 %v1285_v11, %v1096_v52  ;;  %v999_v61 = vmax.bf16 %v913_v45, %v711_v2  ;;  %v538_v1 = vrot.slane %v536_v54, 4  ;;  %v1299_v6 = vsel %vm1666_vm2, %v1294_v53, %v1298_v40  ;;  %v304_v53 = vld [vmem:[%s1646_s23 + $0x58] sm:$0xf] }
  0x9a   : > { %v616_v62 = vmax.bf16 %v534_v55, %v325_v36  ;;  %v1303_v46 = vor.u32 %v1302_v50, %v1298_v40  ;;  %v541_v7 = vrot.slane %v539_v57, 5  ;;  %v545_v8 = vshll.u32 %v340_v34, 16 }
  0x9b   : > { %1410 = vst.msk [vmem:[%s1725_s7 + $0x44] sm:$0x3] %vm1393_vm4, %v1384_v38  ;;  %v1048_v9 = vmax.bf16 %v2030_v60, %v999_v61  ;;  %v920_v10 = vshrl.u32 %v2064_v58, 16  ;;  %v923_v11 = vshll.u32 %v2064_v58, 16  ;;  %v918_v56 = vrot.slane %v917_v49, 4 }
  0x9c   : > { %v664_v15 = vmax.bf16 %v640_v63, %v616_v62  ;;  %v542_v18 = vor.u32 %v541_v7, %v538_v1  ;;  %v1306_v22 = vshrl.u32 %v2069_v59, 16  ;;  %v929_v26 = vshll.u32 %v727_v4, 16  ;;  %v642_v61 = vld [vmem:[%s1652_s26 + $0x54] sm:$0x3]  ;;  %v728_v7 = vld [vmem:[%s1652_s26 + $0x5c] sm:$0x7] }
  0x9d   : > { %v1097_v23 = vmax.bf16 %v1560_v3, %v1048_v9  ;;  %v922_v24 = vrot.slane %v920_v10, 4  ;;  %v925_v14 = vrot.slane %v923_v11, 5  ;;  %v547_v29 = vrot.slane %v545_v8, 5  ;;  %v2105_v10 = vld [vmem:[%s1640_s20 + $0x60] sm:$0xf] }
  0x9e   : > { %v712_v60 = vmax.bf16 %v688_v5, %v664_v15  ;;  %v543_v28 = vrot.slane %v542_v18, 4  ;;  %v1308_v25 = vrot.slane %v1306_v22, 4  ;;  %v1309_v16 = vshll.u32 %v2069_v59, 16  ;;  %v1562_v11 = vld [vmem:[%s1646_s23 + $0x58] sm:$0xf] }
  0x9f   : > { %v1385_v27 = vmax.bf16 %v1299_v6, %v1097_v23  ;;  %v926_v30 = vor.u32 %v925_v14, %v922_v24  ;;  %v1315_v31 = vshll.u32 %v1576_v20, 16  ;;  %v1304_v35 = vrot.slane %v1303_v46, 4  ;;  %v643_v46 = vld [vmem:[%s1652_s26 + $0x58] sm:$0xf]  ;;  %v690_v23 = vld [vmem:[%s1675_s29 + $0x54] sm:$0x3] }
  0xa0   : > { %v1000_v13 = vmax.bf16 %v918_v56, %v712_v60  ;;  %v548_v36 = vsel %vm1666_vm2, %v543_v28, %v547_v29  ;;  %v549_v37 = vshrl.u32 %v340_v34, 16  ;;  %v931_v41 = vrot.slane %v929_v26, 5 }
  0xa1   : > { %1411 = vst.msk [vmem:[%s1725_s7 + $0x48] sm:$0xf] %vm1391_vm3, %v1385_v27  ;;  %v617_v33 = vmax.bf16 %v548_v36, %v326_v0  ;;  %v927_v39 = vrot.slane %v926_v30, 4  ;;  %v1311_v42 = vrot.slane %v1309_v16, 5  ;;  %v327_v40 = vmax.bf16 %v303_v12, %v279_v32 }
  0xa2   : > { %v1049_v43 = vmax.bf16 %v1537_v19, %v1000_v13  ;;  %v551_v45 = vrot.slane %v549_v37, 4  ;;  %v933_v47 = vshrl.u32 %v727_v4, 16  ;;  %v2095_v52 = vrot.slane %v1315_v31, 5 }
  0xa3   : > { %v665_v50 = vmax.bf16 %v2064_v58, %v617_v33  ;;  %v1312_v51 = vor.u32 %v1311_v42, %v1308_v25  ;;  %v1319_v2 = vshrl.u32 %v1576_v20, 16  ;;  %v932_v55 = vsel %vm1666_vm2, %v927_v39, %v931_v41  ;;  %v341_v58 = vld [vmem:[%s1640_s20 + $0x5c] sm:$0x7] }
  0xa4   : > { %v1098_v54 = vmax.bf16 %v1561_v17, %v1049_v43  ;;  %v552_v49 = vor.u32 %v551_v45, %v547_v29  ;;  %v935_v34 = vrot.slane %v933_v47, 4  ;;  %v555_v63 = vshrl.u32 %v280_v48, 16  ;;  %v1563_v33 = vld [vmem:[%s1646_s23 + $0x5c] sm:$0x3]  ;;  %v691_v43 = vld [vmem:[%s1675_s29 + $0x58] sm:$0xf] }
  0xa5   : > { %v713_v57 = vmax.bf16 %v689_v44, %v665_v50  ;;  %v1313_v38 = vrot.slane %v1312_v51, 4  ;;  %v558_v0 = vshll.u32 %v280_v48, 16  ;;  %v328_v62 = vmax.bf16 %v304_v53, %v280_v48  ;;  %v305_v53 = vld [vmem:[%s1646_s23 + $0x5c] sm:$0x3] }
  0xa6   : > { %v1386_v1 = vmax.bf16 %v1304_v35, %v1098_v54  ;;  %v553_v3 = vrot.slane %v552_v49, 4  ;;  %v936_v6 = vor.u32 %v935_v34, %v931_v41  ;;  %v1321_v9 = vrot.slane %v1319_v2, 4  ;;  %v1539_v35 = vld [vmem:[%s1640_s20 + $0x5c] sm:$0x3]  ;;  %v1577_v41 = vld [vmem:[%s1640_s20 + $0x64] sm:$0x7] }
  0xa7   : > { %v1001_v4 = vmax.bf16 %v932_v55, %v713_v57  ;;  %v557_v5 = vrot.slane %v555_v63, 4  ;;  %v560_v8 = vrot.slane %v558_v0, 5  ;;  %v1318_v15 = vsel %vm1666_vm2, %v1313_v38, %v2095_v52  ;;  %v281_v2 = vld [vmem:[%s1640_s20 + $0x5c] sm:$0x3] }
  0xa8   : > { %1412 = vst.msk [vmem:[%s1725_s7 + $0x4c] sm:$0x3] %vm1393_vm4, %v1386_v1  ;;  %v618_v56 = vmax.bf16 %v553_v3, %v327_v40  ;;  %v937_v18 = vrot.slane %v936_v6, 4  ;;  %v564_v20 = vshll.u32 %v341_v58, 16  ;;  %v939_v14 = vshrl.u32 %v643_v46, 16 }
  0xa9   : > { %v1050_v22 = vmax.bf16 %v2069_v59, %v1001_v4  ;;  %v561_v24 = vor.u32 %v560_v8, %v557_v5  ;;  %v942_v26 = vshll.u32 %v643_v46, 16  ;;  %v948_v28 = vshll.u32 %v728_v7, 16  ;;  %v1564_v6 = vld [vmem:[%s1646_s23 + $0x60] sm:$0xf] }
  0xaa   : > { %v666_v60 = vmax.bf16 %v642_v61, %v618_v56  ;;  %v566_v19 = vrot.slane %v564_v20, 5  ;;  %v1325_v29 = vshrl.u32 %v2105_v10, 16  ;;  %v941_v30 = vrot.slane %v939_v14, 4  ;;  %v692_v56 = vld [vmem:[%s1675_s29 + $0x5c] sm:$0x3] }
  0xab   : > { %v1099_v25 = vmax.bf16 %v1562_v11, %v1050_v22  ;;  %v562_v27 = vrot.slane %v561_v24, 4  ;;  %v944_v16 = vrot.slane %v942_v26, 5  ;;  %v1322_v59 = vor.u32 %v1321_v9, %v2095_v52  ;;  %v644_v9 = vld [vmem:[%s1652_s26 + $0x5c] sm:$0x3]  ;;  %v1541_v14 = vld [vmem:[%s1640_s20 + $0x64] sm:$0x3] }
  0xac   : > { %v714_v31 = vmax.bf16 %v690_v23, %v666_v60  ;;  %v1327_v32 = vrot.slane %v1325_v29, 4  ;;  %v1328_v12 = vshll.u32 %v2105_v10, 16  ;;  %v950_v40 = vrot.slane %v948_v28, 5  ;;  %v1565_v60 = vld [vmem:[%s1646_s23 + $0x64] sm:$0x3] }
  0xad   : > { %v1387_v13 = vmax.bf16 %v1318_v15, %v1099_v25  ;;  %v567_v36 = vsel %vm1666_vm2, %v562_v27, %v566_v19  ;;  %v945_v37 = vor.u32 %v944_v16, %v941_v30  ;;  %v568_v45 = vshrl.u32 %v341_v58, 16 }
  0xae   : > { %v1002_v17 = vmax.bf16 %v937_v18, %v714_v31  ;;  %v619_v39 = vmax.bf16 %v567_v36, %v328_v62  ;;  %v1330_v42 = vrot.slane %v1328_v12, 5  ;;  %v952_v47 = vshrl.u32 %v728_v7, 16 }
  0xaf   : > { %1413 = vst.msk [vmem:[%s1725_s7 + $0x50] sm:$0xf] %vm1391_vm3, %v1387_v13  ;;  %v946_v44 = vrot.slane %v945_v37, 4  ;;  %v1323_v50 = vrot.slane %v1322_v59, 4  ;;  %v1334_v55 = vshll.u32 %v1577_v41, 16  ;;  %v570_v49 = vrot.slane %v568_v45, 4 }
  0xb0   : > { %v1051_v48 = vmax.bf16 %v1539_v35, %v1002_v17  ;;  %v667_v51 = vmax.bf16 %v643_v46, %v619_v39  ;;  %v1331_v52 = vor.u32 %v1330_v42, %v1327_v32  ;;  %v954_v34 = vrot.slane %v952_v47, 4 }
  0xb1   : > { %v951_v54 = vsel %vm1666_vm2, %v946_v44, %v950_v40  ;;  %v329_v58 = vmax.bf16 %v305_v53, %v281_v2  ;;  %v571_v63 = vor.u32 %v570_v49, %v566_v19  ;;  %v1338_v0 = vshrl.u32 %v1577_v41, 16 }
  0xb2   : > { %v1100_v57 = vmax.bf16 %v1563_v33, %v1051_v48  ;;  %v715_v38 = vmax.bf16 %v691_v43, %v667_v51  ;;  %v1332_v61 = vrot.slane %v1331_v52, 4  ;;  %v1336_v62 = vrot.slane %v1334_v55, 5 }
  0xb3   : > { %v572_v46 = vrot.slane %v571_v63, 4  ;;  %v955_v7 = vor.u32 %v954_v34, %v950_v40  ;;  %v1340_v11 = vrot.slane %v1338_v0, 4 }
  0xb4   : > { %v1388_v1 = vmax.bf16 %v1323_v50, %v1100_v57  ;;  %v1003_v3 = vmax.bf16 %v951_v54, %v715_v38  ;;  %v1337_v5 = vsel %vm1666_vm2, %v1332_v61, %v1336_v62 }
  0xb5   : > { %v620_v8 = vmax.bf16 %v572_v46, %v329_v58  ;;  %v956_v20 = vrot.slane %v955_v7, 4  ;;  %v1341_v24 = vor.u32 %v1340_v11, %v1336_v62 }
  0xb6   : > { %1414 = vst.msk [vmem:[%s1725_s7 + $0x54] sm:$0x3] %vm1393_vm4, %v1388_v1  ;;  %v1052_v4 = vmax.bf16 %v2105_v10, %v1003_v3 }
  0xb7   : > { %v668_v18 = vmax.bf16 %v644_v9, %v620_v8  ;;  %v1342_v19 = vrot.slane %v1341_v24, 4 }
  0xb8   : > { %v1101_v15 = vmax.bf16 %v1564_v6, %v1052_v4 }
  0xb9   : > { %v716_v23 = vmax.bf16 %v692_v56, %v668_v18 }
  0xba   : > { %v1389_v22 = vmax.bf16 %v1337_v5, %v1101_v15 }
  0xbb   : > { %v1004_v26 = vmax.bf16 %v956_v20, %v716_v23 }
  0xbc   : > { %1415 = vst.msk [vmem:[%s1725_s7 + $0x58] sm:$0xf] %vm1391_vm3, %v1389_v22 }
  0xbd   : > { %v1053_v10 = vmax.bf16 %v1541_v14, %v1004_v26 }
  0xbf   : > { %v1102_v28 = vmax.bf16 %v1565_v60, %v1053_v10 }
  0xc1   : > { %v1390_v21 = vmax.bf16 %v1342_v19, %v1102_v28 }
  0xc3   : > { %1416 = vst.msk [vmem:[%s1725_s7 + $0x5c] sm:$0x3] %vm1393_vm4, %v1390_v21 }
  0xc4 PF: > { %s14_s15 = sadd.s32 1, %s1596_s15  }
  0xc5   : > { %p11_p4 = scmp.ge.s32.totalorder %s14_s15, 4  }
  0xc7   :  { %13 = sbr.rel (!%p11_p4) target bundleno = 1 (0x1), region = 77 }

// kernel: pspnet_forward.26
= control target key start
LH: loop header
LB: loop body
LE: loop exit
PB: predicated region body
PF: predicated region fallthrough
CT: control target
= control target key end

     0   :  { %s1956_s12 = smov 0   ;;  %s1958_s13 = smov 0   ;;  %s2268_s0 = inlined_call_operand.vmem [shape: bf16[288,640], index: 0, kind: input, shape index: {}]   ;;  %s2269_s1 = inlined_call_operand.vmem [shape: bf16[640,128], index: 1, kind: input, shape index: {}]   ;;  %s2270_s2 = inlined_call_operand.vmem [shape: f32[1,128], index: 2, kind: input, shape index: {}]   ;;  %s2271_s3 = inlined_call_operand.vmem [shape: bf16[288,128], index: 3, kind: output, shape index: {}]  }
   0x1   :  { %s1960_s14 = smov 0  }
   0x2 LB: > { %s25_s15 = sadd.s32 1, %s1928_s13  ;;  %p1375_p0 = scmp.ge.s32.totalorder %s1932_s14, 1  ;;  %s1932_s14 = sphi %s1960_s14, %s13_s14   ;;  %s1928_s13 = sphi %s1958_s13, %s2273_s13   ;;  %s1924_s12 = sphi %s1956_s12, %s2272_s12  }
   0x3   : > { %p27_p1 = scmp.ge.s32.totalorder %s25_s15, 2  ;;  %p170_p2 = scmp.lt.s32.totalorder %s1932_s14, 3 }
   0x5   : > { %s2275_s15 = smov (%p27_p1, %s25_s15), 0  ;;  %p171_p3 = pnand %p1375_p0, %p170_p2 }
   0x6   : > { %v1807_v0 = vld [vmem:[%s2269_s1 + $0x40] sm:$0xff] (!%p171_p3)   ;;  %s205_s18 = smul.u32 (!%p171_p3), 18, %s1924_s12  ;;  %v1809_v2 = vld [vmem:[%s2269_s1 + $0x48] sm:$0xff] (!%p171_p3)   ;;  %v1811_v4 = vld [vmem:[%s2269_s1 + $0x50] sm:$0xff] (!%p171_p3)   ;;  %v1934_v24 = vmov (!%p171_p3), 0.0   ;;  %vm1935_vm0 = vmmov (!%p171_p3), 0  }
   0x7   : > { %174 = sbr.rel (%p171_p3) target bundleno = 369 (0x171), region = 32  ;;  %v1808_v1 = vld [vmem:[%s2269_s1] sm:$0xff] (!%p171_p3)   ;;  %1764 = vmatprep.subr.bf16.mxu1 (!%p171_p3), %v1807_v0  ;;  %1555 = vmatprep.subr.bf16.mxu0 (!%p171_p3), %v1807_v0  ;;  %v1810_v3 = vld [vmem:[%s2269_s1 + $0x8] sm:$0xff] (!%p171_p3)   ;;  %v1812_v5 = vld [vmem:[%s2269_s1 + $0x10] sm:$0xff] (!%p171_p3)  }
   0x8   : > { %p206_p4 = scmp.lt.s32.totalorder (!%p171_p3), %s205_s18, 35  ;;  %1772 = vmatpush3.bf16.msra.mxu1 (!%p171_p3), %v1808_v1  ;;  %1556 = vmatpush3.bf16.msra.mxu0 (!%p171_p3), %v1808_v1  ;;  %v1813_v6 = vld [vmem:[%s2269_s1 + $0x58] sm:$0xff] (!%p171_p3)   ;;  %v1815_v8 = vld [vmem:[%s2269_s1 + $0x60] sm:$0xff] (!%p171_p3)   ;;  %v1817_v10 = vld [vmem:[%s2269_s1 + $0x68] sm:$0xff] (!%p171_p3)  }
   0x9   : > { %1765 = vmatprep.subr.bf16.mxu1 (!%p171_p3), %v1809_v2  ;;  %1557 = vmatprep.subr.bf16.mxu0 (!%p171_p3), %v1809_v2  ;;  %v1814_v7 = vld [vmem:[%s2269_s1 + $0x18] sm:$0xff] (!%p171_p3)   ;;  %v1816_v9 = vld [vmem:[%s2269_s1 + $0x20] sm:$0xff] (!%p171_p3)   ;;  %v1818_v12 = vld [vmem:[%s2269_s1 + $0x28] sm:$0xff] (!%p171_p3)  }
   0xa   : > { %v1819_v13 = vld [vmem:[%s2269_s1 + $0x70] sm:$0xff] (!%p171_p3)   ;;  %v1821_v16 = vld [vmem:[%s2269_s1 + $0x78] sm:$0xff] (!%p171_p3)   ;;  %v1826_v19 = vld [vmem:[%s2269_s1 + $0xc0] sm:$0xff] (!%p171_p3)  }
   0xb   : > { %v1820_v14 = vld [vmem:[%s2269_s1 + $0x30] sm:$0xff] (!%p171_p3)   ;;  %v1822_v17 = vld [vmem:[%s2269_s1 + $0x38] sm:$0xff] (!%p171_p3)   ;;  %v1827_v20 = vld [vmem:[%s2269_s1 + $0x80] sm:$0xff] (!%p171_p3)  }
   0xc   : > { %1773 = vmatpush3.bf16.msra.mxu1 (!%p171_p3), %v1810_v3  ;;  %1558 = vmatpush3.bf16.msra.mxu0 (!%p171_p3), %v1810_v3  ;;  %v1828_v23 = vld [vmem:[%s2269_s1 + $0xc8] sm:$0xff] (!%p171_p3)   ;;  %v1838_v25 = vld [vmem:[%s2269_s1 + $0x100] sm:$0xff] (!%p171_p3)   ;;  %v1836_v29 = vld [vmem:[%s2269_s1 + $0xd0] sm:$0xff] (!%p171_p3)  }
   0xd   : > { %1766 = vmatprep.subr.bf16.mxu1 (!%p171_p3), %v1811_v4  ;;  %1559 = vmatprep.subr.bf16.mxu0 (!%p171_p3), %v1811_v4  ;;  %v1829_v27 = vld [vmem:[%s2269_s1 + $0x88] sm:$0xff] (!%p171_p3)   ;;  %v1837_v31 = vld [vmem:[%s2269_s1 + $0x90] sm:$0xff] (!%p171_p3)   ;;  %v1841_v34 = vld [vmem:[%s2269_s1 + $0xd8] sm:$0xff] (!%p171_p3)  }
   0xe   : > { %s2277_s18 = smov (!%p206_p4, %s205_s18), 35  ;;  %v1844_v30 = vld [vmem:[%s2269_s1 + $0x108] sm:$0xff]   ;;  %v1849_v35 = vld [vmem:[%s2269_s1 + $0x110] sm:$0xff]   ;;  %v1843_v37 = vld [vmem:[%s2269_s1 + $0x98] sm:$0xff]  }
   0xf   : > { %s1780_s4 = smul.u32 20, %s2277_s18  ;;  %v1848_v38 = vld [vmem:[%s2269_s1 + $0xe0] sm:$0xff]   ;;  %v1854_v39 = vld [vmem:[%s2269_s1 + $0x118] sm:$0xff]   ;;  %v1855_v44 = vld [vmem:[%s2269_s1 + $0xe8] sm:$0xff]   ;;  %s1377_s8 = sshll.u32 %s2277_s18, 2 }
  0x10   : > { %1774 = vmatpush3.bf16.msra.mxu1 %v1812_v5  ;;  %1560 = vmatpush3.bf16.msra.mxu0 %v1812_v5  ;;  %v1850_v41 = vld [vmem:[%s2269_s1 + $0xa0] sm:$0xff]   ;;  %v1858_v47 = vld [vmem:[%s2269_s1 + $0xa8] sm:$0xff]   ;;  %v1861_v48 = vld [vmem:[%s2269_s1 + $0xf0] sm:$0xff]   ;;  %s2220_s12 = scalar_lea.vmem %s2271_s3, %s1377_s8 }
  0x11   : > { %1767 = vmatprep.subr.bf16.mxu1 %v1813_v6  ;;  %1561 = vmatprep.subr.bf16.mxu0 %v1813_v6  ;;  %s2007_s11 = scalar_lea.vmem %s2268_s0, %s1780_s4  ;;  %v1860_v45 = vld [vmem:[%s2269_s1 + $0x120] sm:$0xff]   ;;  %v1866_v50 = vld [vmem:[%s2269_s1 + $0x128] sm:$0xff]   ;;  %v1864_v53 = vld [vmem:[%s2269_s1 + $0xb0] sm:$0xff]  }
  0x12   : > { %v1825_v11 = vld [vmem:[%s2007_s11 + $0xa4] ss:$20 sps:$4 sm:$0xff]   ;;  %v1823_v18 = vld [vmem:[%s2007_s11 + $0xa0] ss:$20 sps:$4 sm:$0xff]   ;;  %v1832_v28 = vld [vmem:[%s2007_s11 + $0xc8] ss:$20 sps:$4 sm:$0xff]  }
  0x13   : > { %908 = vmatprep.mubr.bf16.mxu1 %v1825_v11  ;;  %v1835_v15 = vld [vmem:[%s2007_s11 + $0x4] ss:$20 sps:$4 sm:$0xff]   ;;  %v1833_v21 = vld [vmem:[%s2007_s11] ss:$20 sps:$4 sm:$0xff]   ;;  %v1847_v33 = vld [vmem:[%s2007_s11 + $0x28] ss:$20 sps:$4 sm:$0xff]  }
  0x14   : > { %1775 = vmatpush3.bf16.msra.mxu1 %v1814_v7  ;;  %1562 = vmatpush3.bf16.msra.mxu0 %v1814_v7  ;;  %v1830_v22 = vld [vmem:[%s2007_s11 + $0xcc] ss:$20 sps:$4 sm:$0xff]   ;;  %v1839_v32 = vld [vmem:[%s2007_s11 + $0xf4] ss:$20 sps:$4 sm:$0xff]   ;;  %v1842_v40 = vld [vmem:[%s2007_s11 + $0xf0] ss:$20 sps:$4 sm:$0xff]  }
  0x15   : > { %1768 = vmatprep.subr.bf16.mxu1 %v1815_v8  ;;  %1563 = vmatprep.subr.bf16.mxu0 %v1815_v8  ;;  %v1845_v26 = vld [vmem:[%s2007_s11 + $0x2c] ss:$20 sps:$4 sm:$0xff]   ;;  %v1856_v36 = vld [vmem:[%s2007_s11 + $0x54] ss:$20 sps:$4 sm:$0xff]   ;;  %v1859_v42 = vld [vmem:[%s2007_s11 + $0x50] ss:$20 sps:$4 sm:$0xff]  }
  0x16   : > { %876 = vmatprep.mubr.bf16.mxu0 %v1835_v15  ;;  %v1851_v43 = vld [vmem:[%s2007_s11 + $0x11c] ss:$20 sps:$4 sm:$0xff]   ;;  %v1853_v49 = vld [vmem:[%s2007_s11 + $0x118] ss:$20 sps:$4 sm:$0xff]   ;;  %v1865_v58 = vld [vmem:[%s2007_s11 + $0x140] ss:$20 sps:$4 sm:$0xff]  }
  0x17   : > { %v1867_v46 = vld [vmem:[%s2007_s11 + $0x7c] ss:$20 sps:$4 sm:$0xff]   ;;  %v1862_v51 = vld [vmem:[%s2007_s11 + $0x144] ss:$20 sps:$4 sm:$0xff]   ;;  %v1875_v59 = vld [vmem:[%s2007_s11 + $0xc] ss:$20 sps:$4 sm:$0xff]  }
  0x18   : > { %1776 = vmatpush3.bf16.msra.mxu1 %v1816_v9  ;;  %1564 = vmatpush3.bf16.msra.mxu0 %v1816_v9  ;;  %v1869_v52 = vld [vmem:[%s2007_s11 + $0x78] ss:$20 sps:$4 sm:$0xff]   ;;  %v1872_v55 = vld [vmem:[%s2269_s1 + $0x130] sm:$0xff]   ;;  %v1873_v61 = vld [vmem:[%s2007_s11 + $0x8] ss:$20 sps:$4 sm:$0xff]  }
  0x19   : > { %1769 = vmatprep.subr.bf16.mxu1 %v1817_v10  ;;  %1565 = vmatprep.subr.bf16.mxu0 %v1817_v10  ;;  %v1870_v54 = vld [vmem:[%s2269_s1 + $0xf8] sm:$0xff]   ;;  %v1877_v60 = vld [vmem:[%s2007_s11 + $0x10] ss:$20 sps:$4 sm:$0xff]   ;;  %v1878_v62 = vld [vmem:[%s2007_s11 + $0x34] ss:$20 sps:$4 sm:$0xff]  }
  0x1a   : > { %v1871_v56 = vld [vmem:[%s2269_s1 + $0xb8] sm:$0xff]   ;;  %v1880_v0 = vld [vmem:[%s2007_s11 + $0x30] ss:$20 sps:$4 sm:$0xff]   ;;  %v1885_v2 = vld [vmem:[%s2007_s11 + $0x60] ss:$20 sps:$4 sm:$0xff]  }
  0x1b   : > { %v1876_v57 = vld [vmem:[%s2269_s1 + $0x138] sm:$0xff]   ;;  %v1888_v6 = vld [vmem:[%s2007_s11 + $0x80] ss:$20 sps:$4 sm:$0xff]   ;;  %v1893_v8 = vld [vmem:[%s2007_s11 + $0xb0] ss:$20 sps:$4 sm:$0xff]  }
  0x1c   : > { %1777 = vmatpush3.bf16.msra.mxu1 %v1818_v12  ;;  %1566 = vmatpush3.bf16.msra.mxu0 %v1818_v12  ;;  %v1881_v63 = vld [vmem:[%s2007_s11 + $0x38] ss:$20 sps:$4 sm:$0xff]   ;;  %v1882_v1 = vld [vmem:[%s2007_s11 + $0x5c] ss:$20 sps:$4 sm:$0xff]   ;;  %v1894_v10 = vld [vmem:[%s2007_s11 + $0xd4] ss:$20 sps:$4 sm:$0xff]  }
  0x1d   : > { %1770 = vmatprep.subr.bf16.mxu1 %v1819_v13  ;;  %1567 = vmatprep.subr.bf16.mxu0 %v1819_v13  ;;  %v1884_v3 = vld [vmem:[%s2007_s11 + $0x58] ss:$20 sps:$4 sm:$0xff]   ;;  %v1889_v5 = vld [vmem:[%s2007_s11 + $0x88] ss:$20 sps:$4 sm:$0xff]   ;;  %v1896_v12 = vld [vmem:[%s2007_s11 + $0xd0] ss:$20 sps:$4 sm:$0xff]  }
  0x1e   : > { %v1886_v4 = vld [vmem:[%s2007_s11 + $0x84] ss:$20 sps:$4 sm:$0xff]   ;;  %v1890_v7 = vld [vmem:[%s2007_s11 + $0xac] ss:$20 sps:$4 sm:$0xff]   ;;  %v1892_v9 = vld [vmem:[%s2007_s11 + $0xa8] ss:$20 sps:$4 sm:$0xff]  }
  0x1f   : > { %v1897_v11 = vld [vmem:[%s2007_s11 + $0xd8] ss:$20 sps:$4 sm:$0xff]   ;;  %v1898_v13 = vld [vmem:[%s2007_s11 + $0xfc] ss:$20 sps:$4 sm:$0xff]  }
  0x20   : > { %1778 = vmatpush3.bf16.msra.mxu1 %v1820_v14  ;;  %1568 = vmatpush3.bf16.msra.mxu0 %v1820_v14  ;;  %v1901_v14 = vld [vmem:[%s2007_s11 + $0x100] ss:$20 sps:$4 sm:$0xff]   ;;  %v1900_v15 = vld [vmem:[%s2007_s11 + $0xf8] ss:$20 sps:$4 sm:$0xff]  }
  0x21   : > { %1771 = vmatprep.subr.bf16.mxu1 %v1821_v16  ;;  %1569 = vmatprep.subr.bf16.mxu0 %v1821_v16  ;;  %v1902_v16 = vld [vmem:[%s2007_s11 + $0x124] ss:$20 sps:$4 sm:$0xff]  }
  0x24   : > { %1779 = vmatpush3.bf16.msra.mxu1 %v1822_v17  ;;  %1570 = vmatpush3.bf16.msra.mxu0 %v1822_v17  ;;  %v1905_v17 = vld [vmem:[%s2007_s11 + $0x128] ss:$20 sps:$4 sm:$0xff]  }
  0x25   : > { %1625 = vmatprep.subr.bf16.mxu1 %v1826_v19  ;;  %1712 = vmatprep.subr.bf16.mxu0 %v1934_v24  ;;  %v1906_v19 = vld [vmem:[%s2007_s11 + $0x14c] ss:$20 sps:$4 sm:$0xff]  }
  0x27   : > { %909 = vmatmul.mubr.bf16.vlgmr.msra.gmra.mrb[0].mxu1 %v1823_v18  ;;  %877 = vmatmul.mubr.bf16.vlgmr.msra.gmra.mrb[0].mxu0 %v1833_v21  ;;  %v1904_v18 = vld [vmem:[%s2007_s11 + $0x120] ss:$20 sps:$4 sm:$0xff]   ;;  %v1908_v21 = vld [vmem:[%s2007_s11 + $0x148] ss:$20 sps:$4 sm:$0xff]  }
  0x28   : > { %1626 = vmatpush3.bf16.msra.mxu1 %v1827_v20  ;;  %916 = vmatprep.mubr.bf16.mxu1 %v1830_v22  ;;  %v1909_v20 = vld [vmem:[%s2007_s11 + $0x150] ss:$20 sps:$4 sm:$0xff]  }
  0x29   : > { %1627 = vmatprep.subr.bf16.mxu1 %v1828_v23  ;;  %1713 = vmatpush3.bf16.msra.mxu0 %v1838_v25 }
  0x2a   : > { %1714 = vmatprep.subr.bf16.mxu0 %v1934_v24  ;;  %884 = vmatprep.mubr.bf16.mxu0 %v1845_v26 }
  0x2c   : > { %1628 = vmatpush3.bf16.msra.mxu1 %v1829_v27 }
  0x2d   : > { %1629 = vmatprep.subr.bf16.mxu1 %v1836_v29  ;;  %1715 = vmatpush3.bf16.msra.mxu0 %v1844_v30 }
  0x2e   : > { %1716 = vmatprep.subr.bf16.mxu0 %v1934_v24 }
  0x2f   : > { %917 = vmatmul.mubr.bf16.gmra.mrb[4].mxu1 %v1832_v28  ;;  %885 = vmatmul.mubr.bf16.gmra.mrb[4].mxu0 %v1847_v33 }
  0x30   : > { %1630 = vmatpush3.bf16.msra.mxu1 %v1837_v31  ;;  %924 = vmatprep.mubr.bf16.mxu1 %v1839_v32 }
  0x31   : > { %1631 = vmatprep.subr.bf16.mxu1 %v1841_v34  ;;  %1717 = vmatpush3.bf16.msra.mxu0 %v1849_v35 }
  0x32   : > { %1718 = vmatprep.subr.bf16.mxu0 %v1934_v24  ;;  %892 = vmatprep.mubr.bf16.mxu0 %v1856_v36 }
  0x34   : > { %1632 = vmatpush3.bf16.msra.mxu1 %v1843_v37 }
  0x35   : > { %1633 = vmatprep.subr.bf16.mxu1 %v1848_v38  ;;  %1719 = vmatpush3.bf16.msra.mxu0 %v1854_v39 }
  0x36   : > { %1720 = vmatprep.subr.bf16.mxu0 %v1934_v24 }
  0x37   : > { %925 = vmatmul.mubr.bf16.gmra.mrb[8].mxu1 %v1842_v40  ;;  %893 = vmatmul.mubr.bf16.gmra.mrb[8].mxu0 %v1859_v42 }
  0x38   : > { %1634 = vmatpush3.bf16.msra.mxu1 %v1850_v41  ;;  %932 = vmatprep.mubr.bf16.mxu1 %v1851_v43 }
  0x39   : > { %1635 = vmatprep.subr.bf16.mxu1 %v1855_v44  ;;  %1721 = vmatpush3.bf16.msra.mxu0 %v1860_v45 }
  0x3a   : > { %1722 = vmatprep.subr.bf16.mxu0 %v1934_v24  ;;  %900 = vmatprep.mubr.bf16.mxu0 %v1867_v46 }
  0x3c   : > { %1636 = vmatpush3.bf16.msra.mxu1 %v1858_v47 }
  0x3d   : > { %1637 = vmatprep.subr.bf16.mxu1 %v1861_v48  ;;  %1723 = vmatpush3.bf16.msra.mxu0 %v1866_v50 }
  0x3e   : > { %1724 = vmatprep.subr.bf16.mxu0 %v1934_v24 }
  0x3f   : > { %933 = vmatmul.mubr.bf16.gmra.mrb[12].mxu1 %v1853_v49  ;;  %901 = vmatmul.mubr.bf16.gmra.mrb[12].mxu0 %v1869_v52 }
  0x40   : > { %940 = vmatprep.mubr.bf16.mxu1 %v1862_v51  ;;  %1638 = vmatpush3.bf16.msra.mxu1 %v1864_v53 }
  0x41   : > { %1639 = vmatprep.subr.bf16.mxu1 %v1870_v54  ;;  %1725 = vmatpush3.bf16.msra.mxu0 %v1872_v55 }
  0x42   : > { %1726 = vmatprep.subr.bf16.mxu0 %v1934_v24  ;;  %1728 = vmatprep.mubr.msk.bf16.mxu0 %vm1935_vm0, %v1934_v24 }
  0x44   : > { %1640 = vmatpush3.bf16.msra.mxu1 %v1871_v56 }
  0x45   : > { %1727 = vmatpush3.bf16.msra.mxu0 %v1876_v57 }
  0x47   : > { %941 = vmatmul.mubr.bf16.gmra.mrb[16].mxu1 %v1865_v58 }
  0x48   : > { %981 = vmatprep.mubr.bf16.mxu1 %v1875_v59  ;;  %1729 = vmatmul.mubr.bf16.vlgmr.msra.gmra.mrb[16].mxu0 %v1877_v60 }
  0x49   : > { %1732 = vmatprep.mubr.msk.bf16.mxu0 %vm1935_vm0, %v1934_v24 }
  0x4f   : > { %982 = vmatmul.mubr.bf16.vlgmr.msra.gmra.mrb[20].mxu1 %v1873_v61 }
  0x50   : > { %989 = vmatprep.mubr.bf16.mxu1 %v1878_v62  ;;  %1733 = vmatmul.mubr.bf16.gmra.mrb[20].mxu0 %v1881_v63 }
  0x51   : > { %1736 = vmatprep.mubr.msk.bf16.mxu0 %vm1935_vm0, %v1934_v24 }
  0x57   : > { %990 = vmatmul.mubr.bf16.gmra.mrb[24].mxu1 %v1880_v0 }
  0x58   : > { %997 = vmatprep.mubr.bf16.mxu1 %v1882_v1  ;;  %1737 = vmatmul.mubr.bf16.gmra.mrb[24].mxu0 %v1885_v2 }
  0x59   : > { %1740 = vmatprep.mubr.msk.bf16.mxu0 %vm1935_vm0, %v1934_v24 }
  0x5f   : > { %998 = vmatmul.mubr.bf16.gmra.mrb[28].mxu1 %v1884_v3 }
  0x60   : > { %1005 = vmatprep.mubr.bf16.mxu1 %v1886_v4  ;;  %1741 = vmatmul.mubr.bf16.gmra.mrb[28].mxu0 %v1889_v5 }
  0x61   : > { %1744 = vmatprep.mubr.msk.bf16.mxu0 %vm1935_vm0, %v1934_v24 }
  0x67   : > { %1006 = vmatmul.mubr.bf16.gmra.mrb[32].mxu1 %v1888_v6 }
  0x68   : > { %1013 = vmatprep.mubr.bf16.mxu1 %v1890_v7  ;;  %1745 = vmatmul.mubr.bf16.gmra.mrb[32].mxu0 %v1893_v8 }
  0x69   : > { %1748 = vmatprep.mubr.msk.bf16.mxu0 %vm1935_vm0, %v1934_v24 }
  0x6f   : > { %1014 = vmatmul.mubr.bf16.gmra.mrb[36].mxu1 %v1892_v9 }
  0x70   : > { %1021 = vmatprep.mubr.bf16.mxu1 %v1894_v10  ;;  %1749 = vmatmul.mubr.bf16.gmra.mrb[36].mxu0 %v1897_v11 }
  0x71   : > { %1752 = vmatprep.mubr.msk.bf16.mxu0 %vm1935_vm0, %v1934_v24 }
  0x77   : > { %1022 = vmatmul.mubr.bf16.gmra.mrb[40].mxu1 %v1896_v12  ;;  %v2204_v12 = vld [vmem:[%s2270_s2] ss:$0 sm:$0xff] }
  0x78   : > { %1029 = vmatprep.mubr.bf16.mxu1 %v1898_v13  ;;  %1753 = vmatmul.mubr.bf16.gmra.mrb[40].mxu0 %v1901_v14 }
  0x79   : > { %1756 = vmatprep.mubr.msk.bf16.mxu0 %vm1935_vm0, %v1934_v24 }
  0x7f   : > { %1030 = vmatmul.mubr.bf16.gmra.mrb[44].mxu1 %v1900_v15 }
  0x80   : > { %1037 = vmatprep.mubr.bf16.mxu1 %v1902_v16  ;;  %1757 = vmatmul.mubr.bf16.gmra.mrb[44].mxu0 %v1905_v17 }
  0x81   : > { %1760 = vmatprep.mubr.msk.bf16.mxu0 %vm1935_vm0, %v1934_v24 }
  0x87   : > { %1038 = vmatmul.mubr.bf16.gmra.mrb[48].mxu1 %v1904_v18 }
  0x88   : > { %1045 = vmatprep.mubr.bf16.mxu1 %v1906_v19  ;;  %1761 = vmatmul.mubr.bf16.gmra.mrb[48].mxu0 %v1909_v20 }
  0x8f   : > { %1046 = vmatmul.mubr.bf16.gmra.mrb[52].mxu1 %v1908_v21 }
  0xfa   : > { %v1595_v22 = vpop.f32.mrb[0].mxu1  ;;  %v1571_v23 = vpop.f32.mrb[0].mxu0 }
  0xfb   : > { %v1596_v25 = vpop.f32.mrb[1].mxu1  ;;  %v1572_v26 = vpop.f32.mrb[1].mxu0 }
  0xfc   : > { %v2173_v27 = vadd.f32 %v1596_v25, %v1595_v22  ;;  %v1598_v28 = vpop.f32.mrb[2].mxu1  ;;  %v1573_v29 = vadd.f32 %v1572_v26, %v1571_v23  ;;  %v1574_v30 = vpop.f32.mrb[2].mxu0 }
  0xfd   : > { %v1599_v31 = vpop.f32.mrb[3].mxu1  ;;  %v1575_v32 = vpop.f32.mrb[3].mxu0 }
  0xfe   : > { %v2175_v24 = vadd.f32 %v1599_v31, %v1598_v28  ;;  %v1576_v33 = vadd.f32 %v1575_v32, %v1574_v30  ;;  %v879_v22 = vadd.f32 %v1573_v29, %v2204_v12 }
 0x100   : > { %v882_v31 = vadd.f32 %v1576_v33, %v2204_v12 }
 0x102   : > { %v1601_v34 = vpop.f32.mrb[4].mxu1  ;;  %v1577_v35 = vpop.f32.mrb[4].mxu0 }
 0x103   : > { %v1602_v36 = vpop.f32.mrb[5].mxu1  ;;  %v1578_v37 = vpop.f32.mrb[5].mxu0 }
 0x104   : > { %v2177_v38 = vadd.f32 %v1602_v36, %v1601_v34  ;;  %v1604_v39 = vpop.f32.mrb[6].mxu1  ;;  %v2179_v40 = vadd.f32 %v1578_v37, %v1577_v35  ;;  %v1580_v41 = vpop.f32.mrb[6].mxu0 }
 0x105   : > { %v1605_v42 = vpop.f32.mrb[7].mxu1  ;;  %v1581_v43 = vpop.f32.mrb[7].mxu0 }
 0x106   : > { %v2181_v44 = vadd.f32 %v1605_v42, %v1604_v39  ;;  %v2183_v45 = vadd.f32 %v1581_v43, %v1580_v41  ;;  %v887_v29 = vadd.f32 %v2179_v40, %v2204_v12 }
 0x10a   : > { %v1607_v46 = vpop.f32.mrb[8].mxu1  ;;  %v1583_v47 = vpop.f32.mrb[8].mxu0 }
 0x10b   : > { %v1608_v48 = vpop.f32.mrb[9].mxu1  ;;  %v1584_v49 = vpop.f32.mrb[9].mxu0 }
 0x10c   : > { %v2185_v50 = vadd.f32 %v1608_v48, %v1607_v46  ;;  %v1610_v51 = vpop.f32.mrb[10].mxu1  ;;  %v2187_v52 = vadd.f32 %v1584_v49, %v1583_v47  ;;  %v1586_v53 = vpop.f32.mrb[10].mxu0 }
 0x10d   : > { %v1611_v54 = vpop.f32.mrb[11].mxu1  ;;  %v1587_v55 = vpop.f32.mrb[11].mxu0 }
 0x10e   : > { %v2189_v56 = vadd.f32 %v1611_v54, %v1610_v51  ;;  %v2191_v57 = vadd.f32 %v1587_v55, %v1586_v53  ;;  %v890_v54 = vadd.f32 %v2183_v45, %v2204_v12 }
 0x112   : > { %v1613_v58 = vpop.f32.mrb[12].mxu1  ;;  %v1589_v59 = vpop.f32.mrb[12].mxu0 }
 0x113   : > { %v1614_v60 = vpop.f32.mrb[13].mxu1  ;;  %v1590_v61 = vpop.f32.mrb[13].mxu0 }
 0x114   : > { %v2193_v62 = vadd.f32 %v1614_v60, %v1613_v58  ;;  %v1616_v63 = vpop.f32.mrb[14].mxu1  ;;  %v2195_v0 = vadd.f32 %v1590_v61, %v1589_v59  ;;  %v1592_v1 = vpop.f32.mrb[14].mxu0 }
 0x115   : > { %v1617_v2 = vpop.f32.mrb[15].mxu1  ;;  %v1593_v3 = vpop.f32.mrb[15].mxu0 }
 0x116   : > { %v2197_v4 = vadd.f32 %v1617_v2, %v1616_v63  ;;  %v2199_v5 = vadd.f32 %v1593_v3, %v1592_v1 }
 0x11a   : > { %v1619_v6 = vpop.f32.mrb[16].mxu1 }
 0x11b   : > { %v1620_v7 = vpop.f32.mrb[17].mxu1  ;;  %v1088_v8 = vpop.f32.mrb[16].mxu0 }
 0x11c   : > { %v1621_v9 = vadd.f32 %v1620_v7, %v1619_v6  ;;  %v1622_v10 = vpop.f32.mrb[18].mxu1  ;;  %v1730_v11 = vpop.f32.mrb[17].mxu0  ;;  %v895_v6 = vadd.f32 %v2187_v52, %v2204_v12 }
 0x11d   : > { %v1623_v13 = vpop.f32.mrb[19].mxu1  ;;  %v1091_v14 = vpop.f32.mrb[18].mxu0 }
 0x11e   : > { %v2207_v15 = vadd.f32 %v1621_v9, %v2204_v12  ;;  %v1624_v16 = vadd.f32 %v1623_v13, %v1622_v10  ;;  %v1731_v17 = vpop.f32.mrb[19].mxu0 }
 0x120   : > { %v2210_v18 = vadd.f32 %v1624_v16, %v2204_v12 }
 0x122   : > { %v1641_v19 = vpop.f32.mrb[20].mxu1 }
 0x123   : > { %v1642_v20 = vpop.f32.mrb[21].mxu1  ;;  %v1096_v21 = vpop.f32.mrb[20].mxu0 }
 0x124   : > { %v1643_v23 = vadd.f32 %v1642_v20, %v1641_v19  ;;  %v1644_v25 = vpop.f32.mrb[22].mxu1  ;;  %v1734_v26 = vpop.f32.mrb[21].mxu0 }
 0x125   : > { %v1645_v28 = vpop.f32.mrb[23].mxu1  ;;  %v1099_v30 = vpop.f32.mrb[22].mxu0 }
 0x126   : > { %v1646_v32 = vadd.f32 %v1645_v28, %v1644_v25  ;;  %v984_v34 = vadd.f32 %v1643_v23, %v879_v22  ;;  %v1735_v35 = vpop.f32.mrb[23].mxu0  ;;  %v903_v28 = vadd.f32 %v2195_v0, %v2204_v12 }
 0x128   : > { %v1089_v36 = vadd.f32 %v1088_v8, %v984_v34  ;;  %v987_v37 = vadd.f32 %v1646_v32, %v882_v31 }
 0x12a   : > { %v1092_v39 = vadd.f32 %v1091_v14, %v987_v37  ;;  %v1647_v41 = vpop.f32.mrb[24].mxu1  ;;  %v1159_v46 = vmax.f32 %v1089_v36, 0.0  ;;  %v898_v14 = vadd.f32 %v2191_v57, %v2204_v12  ;;  %v906_v37 = vadd.f32 %v2199_v5, %v2204_v12 }
 0x12b   : > { %v1648_v42 = vpop.f32.mrb[25].mxu1  ;;  %v1104_v43 = vpop.f32.mrb[24].mxu0 }
 0x12c   : > { %v1160_v47 = vmax.f32 %v1092_v39, 0.0  ;;  %v1649_v48 = vadd.f32 %v1648_v42, %v1647_v41  ;;  %v1650_v49 = vpop.f32.mrb[26].mxu1  ;;  %v1738_v51 = vpop.f32.mrb[25].mxu0 }
 0x12d   : > { %v1651_v33 = vpop.f32.mrb[27].mxu1  ;;  %v1107_v53 = vpop.f32.mrb[26].mxu0  ;;  %v911_v51 = vadd.f32 %v2173_v27, %v2204_v12 }
 0x12e   : > { %v1505_v55 = vpack.c.bf16 %v1160_v47, %v1159_v46  ;;  %v1652_v58 = vadd.f32 %v1651_v33, %v1650_v49  ;;  %v992_v59 = vadd.f32 %v1649_v48, %v887_v29  ;;  %v1739_v40 = vpop.f32.mrb[27].mxu0 }
 0x12f   : > { %v914_v40 = vadd.f32 %v2175_v24, %v2204_v12 }
 0x130   : > { %1506 = vst [vmem:[%s2220_s12] sm:$0xff] %v1505_v55   ;;  %v1097_v60 = vadd.f32 %v1096_v21, %v992_v59  ;;  %v995_v61 = vadd.f32 %v1652_v58, %v890_v54 }
 0x132   : > { %v1100_v63 = vadd.f32 %v1099_v30, %v995_v61  ;;  %v1653_v1 = vpop.f32.mrb[28].mxu1  ;;  %v1161_v7 = vmax.f32 %v1097_v60, 0.0 }
 0x133   : > { %v1654_v2 = vpop.f32.mrb[29].mxu1  ;;  %v1112_v3 = vpop.f32.mrb[28].mxu0 }
 0x134   : > { %v1162_v8 = vmax.f32 %v1100_v63, 0.0  ;;  %v1655_v9 = vadd.f32 %v1654_v2, %v1653_v1  ;;  %v1656_v10 = vpop.f32.mrb[30].mxu1  ;;  %v1742_v45 = vpop.f32.mrb[29].mxu0 }
 0x135   : > { %v1657_v11 = vpop.f32.mrb[31].mxu1  ;;  %v1115_v13 = vpop.f32.mrb[30].mxu0 }
 0x136   : > { %v1510_v16 = vpack.c.bf16 %v1162_v8, %v1161_v7  ;;  %v1658_v17 = vadd.f32 %v1657_v11, %v1656_v10  ;;  %v1000_v19 = vadd.f32 %v1655_v9, %v895_v6  ;;  %v1743_v20 = vpop.f32.mrb[31].mxu0  ;;  %v919_v9 = vadd.f32 %v2177_v38, %v2204_v12 }
 0x138   : > { %1547 = vst [vmem:[%s2220_s12 + $0x8] sm:$0xff] %v1510_v16   ;;  %v1105_v21 = vadd.f32 %v1104_v43, %v1000_v19  ;;  %v1003_v22 = vadd.f32 %v1658_v17, %v898_v14  ;;  %v922_v17 = vadd.f32 %v2181_v44, %v2204_v12 }
 0x13a   : > { %v1108_v23 = vadd.f32 %v1107_v53, %v1003_v22  ;;  %v1659_v25 = vpop.f32.mrb[32].mxu1  ;;  %v1163_v30 = vmax.f32 %v1105_v21, 0.0 }
 0x13b   : > { %v1660_v52 = vpop.f32.mrb[33].mxu1  ;;  %v1120_v26 = vpop.f32.mrb[32].mxu0 }
 0x13c   : > { %v1164_v31 = vmax.f32 %v1108_v23, 0.0  ;;  %v1661_v32 = vadd.f32 %v1660_v52, %v1659_v25  ;;  %v1662_v34 = vpop.f32.mrb[34].mxu1  ;;  %v1746_v57 = vpop.f32.mrb[33].mxu0 }
 0x13d   : > { %v1663_v35 = vpop.f32.mrb[35].mxu1  ;;  %v1123_v36 = vpop.f32.mrb[34].mxu0 }
 0x13e   : > { %v1515_v39 = vpack.c.bf16 %v1164_v31, %v1163_v30  ;;  %v1664_v41 = vadd.f32 %v1663_v35, %v1662_v34  ;;  %v1008_v42 = vadd.f32 %v1661_v32, %v903_v28  ;;  %v1747_v43 = vpop.f32.mrb[35].mxu0  ;;  %v927_v30 = vadd.f32 %v2185_v50, %v2204_v12 }
 0x140   : > { %1548 = vst [vmem:[%s2220_s12 + $0x10] sm:$0xff] %v1515_v39   ;;  %v1113_v29 = vadd.f32 %v1112_v3, %v1008_v42  ;;  %v1011_v46 = vadd.f32 %v1664_v41, %v906_v37  ;;  %v930_v37 = vadd.f32 %v2189_v56, %v2204_v12 }
 0x142   : > { %v1116_v47 = vadd.f32 %v1115_v13, %v1011_v46  ;;  %v1665_v48 = vpop.f32.mrb[36].mxu1  ;;  %v1165_v33 = vmax.f32 %v1113_v29, 0.0 }
 0x143   : > { %v1666_v0 = vpop.f32.mrb[37].mxu1  ;;  %v1128_v49 = vpop.f32.mrb[36].mxu0 }
 0x144   : > { %v1166_v53 = vmax.f32 %v1116_v47, 0.0  ;;  %v1667_v54 = vadd.f32 %v1666_v0, %v1665_v48  ;;  %v1668_v55 = vpop.f32.mrb[38].mxu1  ;;  %v1750_v5 = vpop.f32.mrb[37].mxu0 }
 0x145   : > { %v1669_v58 = vpop.f32.mrb[39].mxu1  ;;  %v1131_v59 = vpop.f32.mrb[38].mxu0 }
 0x146   : > { %v1520_v60 = vpack.c.bf16 %v1166_v53, %v1165_v33  ;;  %v1670_v61 = vadd.f32 %v1669_v58, %v1668_v55  ;;  %v1016_v63 = vadd.f32 %v1667_v54, %v911_v51  ;;  %v1751_v1 = vpop.f32.mrb[39].mxu0  ;;  %v938_v58 = vadd.f32 %v2197_v4, %v2204_v12 }
 0x148   : > { %1549 = vst [vmem:[%s2220_s12 + $0x18] sm:$0xff] %v1520_v60   ;;  %v1121_v2 = vadd.f32 %v1120_v26, %v1016_v63  ;;  %v1019_v3 = vadd.f32 %v1670_v61, %v914_v40 }
 0x14a   : > { %v1124_v6 = vadd.f32 %v1123_v36, %v1019_v3  ;;  %v1671_v7 = vpop.f32.mrb[40].mxu1  ;;  %v1167_v10 = vmax.f32 %v1121_v2, 0.0 }
 0x14b   : > { %v1672_v27 = vpop.f32.mrb[41].mxu1  ;;  %v1136_v8 = vpop.f32.mrb[40].mxu0 }
 0x14c   : > { %v1168_v45 = vmax.f32 %v1124_v6, 0.0  ;;  %v1673_v11 = vadd.f32 %v1672_v27, %v1671_v7  ;;  %v1674_v13 = vpop.f32.mrb[42].mxu1  ;;  %v1754_v24 = vpop.f32.mrb[41].mxu0 }
 0x14d   : > { %v1675_v14 = vpop.f32.mrb[43].mxu1  ;;  %v1139_v16 = vpop.f32.mrb[42].mxu0 }
 0x14e   : > { %v1525_v19 = vpack.c.bf16 %v1168_v45, %v1167_v10  ;;  %v1676_v20 = vadd.f32 %v1675_v14, %v1674_v13  ;;  %v1024_v21 = vadd.f32 %v1673_v11, %v919_v9  ;;  %v1755_v22 = vpop.f32.mrb[43].mxu0 }
 0x150   : > { %1550 = vst [vmem:[%s2220_s12 + $0x20] sm:$0xff] %v1525_v19   ;;  %v1129_v23 = vadd.f32 %v1128_v49, %v1024_v21  ;;  %v1027_v25 = vadd.f32 %v1676_v20, %v922_v17  ;;  %v935_v49 = vadd.f32 %v2193_v62, %v2204_v12 }
 0x152   : > { %v1132_v52 = vadd.f32 %v1131_v59, %v1027_v25  ;;  %v1677_v26 = vpop.f32.mrb[44].mxu1  ;;  %v1169_v31 = vmax.f32 %v1129_v23, 0.0 }
 0x153   : > { %v1678_v38 = vpop.f32.mrb[45].mxu1  ;;  %v1144_v28 = vpop.f32.mrb[44].mxu0 }
 0x154   : > { %v1170_v32 = vmax.f32 %v1132_v52, 0.0  ;;  %v1679_v34 = vadd.f32 %v1678_v38, %v1677_v26  ;;  %v1680_v57 = vpop.f32.mrb[46].mxu1  ;;  %v1758_v44 = vpop.f32.mrb[45].mxu0 }
 0x155   : > { %v1681_v35 = vpop.f32.mrb[47].mxu1  ;;  %v1147_v36 = vpop.f32.mrb[46].mxu0 }
 0x156   : > { %v1530_v39 = vpack.c.bf16 %v1170_v32, %v1169_v31  ;;  %v1682_v41 = vadd.f32 %v1681_v35, %v1680_v57  ;;  %v1032_v42 = vadd.f32 %v1679_v34, %v927_v30  ;;  %v1759_v43 = vpop.f32.mrb[47].mxu0 }
 0x158   : > { %1551 = vst [vmem:[%s2220_s12 + $0x28] sm:$0xff] %v1530_v39   ;;  %v1137_v29 = vadd.f32 %v1136_v8, %v1032_v42  ;;  %v1035_v46 = vadd.f32 %v1682_v41, %v930_v37 }
 0x15a   : > { %v1140_v47 = vadd.f32 %v1139_v16, %v1035_v46  ;;  %v1683_v48 = vpop.f32.mrb[48].mxu1  ;;  %v1171_v51 = vmax.f32 %v1137_v29, 0.0 }
 0x15b   : > { %v1684_v50 = vpop.f32.mrb[49].mxu1  ;;  %v1152_v0 = vpop.f32.mrb[48].mxu0 }
 0x15c   : > { %v1172_v33 = vmax.f32 %v1140_v47, 0.0  ;;  %v1685_v53 = vadd.f32 %v1684_v50, %v1683_v48  ;;  %v1686_v54 = vpop.f32.mrb[50].mxu1  ;;  %v1762_v56 = vpop.f32.mrb[49].mxu0 }
 0x15d   : > { %v1687_v55 = vpop.f32.mrb[51].mxu1  ;;  %v1155_v5 = vpop.f32.mrb[50].mxu0 }
 0x15e   : > { %v1535_v59 = vpack.c.bf16 %v1172_v33, %v1171_v51  ;;  %v1688_v40 = vadd.f32 %v1687_v55, %v1686_v54  ;;  %v1040_v60 = vadd.f32 %v1685_v53, %v935_v49  ;;  %v1763_v61 = vpop.f32.mrb[51].mxu0 }
 0x160   : > { %1552 = vst [vmem:[%s2220_s12 + $0x30] sm:$0xff] %v1535_v59   ;;  %v1145_v63 = vadd.f32 %v1144_v28, %v1040_v60  ;;  %v1043_v1 = vadd.f32 %v1688_v40, %v938_v58 }
 0x162   : > { %v1148_v2 = vadd.f32 %v1147_v36, %v1043_v1  ;;  %v1689_v62 = vpop.f32.mrb[52].mxu1  ;;  %v1173_v6 = vmax.f32 %v1145_v63, 0.0 }
 0x163   : > { %v1690_v3 = vpop.f32.mrb[53].mxu1 }
 0x164   : > { %v1174_v7 = vmax.f32 %v1148_v2, 0.0  ;;  %v1691_v27 = vadd.f32 %v1690_v3, %v1689_v62  ;;  %v1692_v8 = vpop.f32.mrb[54].mxu1 }
 0x165   : > { %v1693_v9 = vpop.f32.mrb[55].mxu1 }
 0x166   : > { %v1540_v10 = vpack.c.bf16 %v1174_v7, %v1173_v6  ;;  %v1694_v45 = vadd.f32 %v1693_v9, %v1692_v8  ;;  %v1048_v4 = vadd.f32 %v1691_v27, %v2207_v15 }
 0x168   : > { %1553 = vst [vmem:[%s2220_s12 + $0x38] sm:$0xff] %v1540_v10   ;;  %v1153_v12 = vadd.f32 %v1152_v0, %v1048_v4  ;;  %v1051_v11 = vadd.f32 %v1694_v45, %v2210_v18 }
 0x16a   : > { %v1156_v13 = vadd.f32 %v1155_v5, %v1051_v11  ;;  %v1175_v24 = vmax.f32 %v1153_v12, 0.0 }
 0x16c   : > { %v1176_v14 = vmax.f32 %v1156_v13, 0.0 }
 0x16e   : > { %v1545_v16 = vpack.c.bf16 %v1176_v14, %v1175_v24 }
 0x170   : > { %1554 = vst [vmem:[%s2220_s12 + $0x40] sm:$0xff] %v1545_v16  }
 0x171 PF: > { %s13_s14 = sadd.s32 1, %s1932_s14   ;;  %s2272_s12 = smov %s1928_s13 }
 0x172   : > { %p10_p5 = scmp.ge.s32.totalorder %s13_s14, 4   ;;  %s2273_s13 = smov %s2275_s15 }
 0x174   :  { %12 = sbr.rel (!%p10_p5) target bundleno = 2 (0x2), region = 68 }

// kernel: pspnet_forward.27
= control target key start
LH: loop header
LB: loop body
LE: loop exit
PB: predicated region body
PF: predicated region fallthrough
CT: control target
= control target key end

     0   :  { %s2135_s15 = smov 0   ;;  %s2137_s16 = smov 0   ;;  %s2465_s0 = inlined_call_operand.vmem [shape: bf16[288,640], index: 0, kind: input, shape index: {}]   ;;  %s2466_s1 = inlined_call_operand.vmem [shape: bf16[640,128], index: 1, kind: input, shape index: {}]   ;;  %s2467_s2 = inlined_call_operand.vmem [shape: f32[1,128], index: 2, kind: input, shape index: {}]   ;;  %s2468_s3 = inlined_call_operand.vmem [shape: bf16[288,128], index: 3, kind: input, shape index: {}]   ;;  %s2469_s4 = inlined_call_operand.vmem [shape: bf16[288,128], index: 4, kind: output, shape index: {}]  }
   0x1   :  { %s2139_s17 = smov 0  }
   0x2 LB: > { %s26_s18 = sadd.s32 1, %s2102_s16  ;;  %p1504_p0 = scmp.ge.s32.totalorder %s2106_s17, 1  ;;  %s2106_s17 = sphi %s2139_s17, %s14_s17   ;;  %s2102_s16 = sphi %s2137_s16, %s2471_s16   ;;  %s2098_s15 = sphi %s2135_s15, %s2470_s15  }
   0x3   : > { %p28_p1 = scmp.ge.s32.totalorder %s26_s18, 2  ;;  %p211_p2 = scmp.lt.s32.totalorder %s2106_s17, 3 }
   0x5   : > { %s2473_s18 = smov (%p28_p1, %s26_s18), 0  ;;  %p212_p3 = pnand %p1504_p0, %p211_p2 }
   0x6   : > { %v1981_v0 = vld [vmem:[%s2466_s1 + $0x40] sm:$0xff] (!%p212_p3)   ;;  %s256_s21 = smul.u32 (!%p212_p3), 18, %s2098_s15  ;;  %v1983_v2 = vld [vmem:[%s2466_s1 + $0x48] sm:$0xff] (!%p212_p3)   ;;  %v1985_v4 = vld [vmem:[%s2466_s1 + $0x50] sm:$0xff] (!%p212_p3)   ;;  %v2108_v24 = vmov (!%p212_p3), 0.0   ;;  %vm2109_vm0 = vmmov (!%p212_p3), 0  }
   0x7   : > { %215 = sbr.rel (%p212_p3) target bundleno = 371 (0x173), region = 36  ;;  %v1982_v1 = vld [vmem:[%s2466_s1] sm:$0xff] (!%p212_p3)   ;;  %1938 = vmatprep.subr.bf16.mxu1 (!%p212_p3), %v1981_v0  ;;  %1729 = vmatprep.subr.bf16.mxu0 (!%p212_p3), %v1981_v0  ;;  %v1984_v3 = vld [vmem:[%s2466_s1 + $0x8] sm:$0xff] (!%p212_p3)   ;;  %v1986_v5 = vld [vmem:[%s2466_s1 + $0x10] sm:$0xff] (!%p212_p3)  }
   0x8   : > { %p257_p4 = scmp.lt.s32.totalorder (!%p212_p3), %s256_s21, 35  ;;  %1946 = vmatpush3.bf16.msra.mxu1 (!%p212_p3), %v1982_v1  ;;  %1730 = vmatpush3.bf16.msra.mxu0 (!%p212_p3), %v1982_v1  ;;  %v1987_v6 = vld [vmem:[%s2466_s1 + $0x58] sm:$0xff] (!%p212_p3)   ;;  %v1989_v8 = vld [vmem:[%s2466_s1 + $0x60] sm:$0xff] (!%p212_p3)   ;;  %v1991_v10 = vld [vmem:[%s2466_s1 + $0x68] sm:$0xff] (!%p212_p3)  }
   0x9   : > { %1939 = vmatprep.subr.bf16.mxu1 (!%p212_p3), %v1983_v2  ;;  %1731 = vmatprep.subr.bf16.mxu0 (!%p212_p3), %v1983_v2  ;;  %v1988_v7 = vld [vmem:[%s2466_s1 + $0x18] sm:$0xff] (!%p212_p3)   ;;  %v1990_v9 = vld [vmem:[%s2466_s1 + $0x20] sm:$0xff] (!%p212_p3)   ;;  %v1992_v12 = vld [vmem:[%s2466_s1 + $0x28] sm:$0xff] (!%p212_p3)  }
   0xa   : > { %v1993_v13 = vld [vmem:[%s2466_s1 + $0x70] sm:$0xff] (!%p212_p3)   ;;  %v1995_v16 = vld [vmem:[%s2466_s1 + $0x78] sm:$0xff] (!%p212_p3)   ;;  %v2000_v19 = vld [vmem:[%s2466_s1 + $0xc0] sm:$0xff] (!%p212_p3)  }
   0xb   : > { %v1994_v14 = vld [vmem:[%s2466_s1 + $0x30] sm:$0xff] (!%p212_p3)   ;;  %v1996_v17 = vld [vmem:[%s2466_s1 + $0x38] sm:$0xff] (!%p212_p3)   ;;  %v2001_v20 = vld [vmem:[%s2466_s1 + $0x80] sm:$0xff] (!%p212_p3)  }
   0xc   : > { %1947 = vmatpush3.bf16.msra.mxu1 (!%p212_p3), %v1984_v3  ;;  %1732 = vmatpush3.bf16.msra.mxu0 (!%p212_p3), %v1984_v3  ;;  %v2002_v23 = vld [vmem:[%s2466_s1 + $0xc8] sm:$0xff] (!%p212_p3)   ;;  %v2012_v25 = vld [vmem:[%s2466_s1 + $0x100] sm:$0xff] (!%p212_p3)   ;;  %v2010_v29 = vld [vmem:[%s2466_s1 + $0xd0] sm:$0xff] (!%p212_p3)  }
   0xd   : > { %1940 = vmatprep.subr.bf16.mxu1 (!%p212_p3), %v1985_v4  ;;  %1733 = vmatprep.subr.bf16.mxu0 (!%p212_p3), %v1985_v4  ;;  %v2003_v27 = vld [vmem:[%s2466_s1 + $0x88] sm:$0xff] (!%p212_p3)   ;;  %v2011_v31 = vld [vmem:[%s2466_s1 + $0x90] sm:$0xff] (!%p212_p3)   ;;  %v2015_v34 = vld [vmem:[%s2466_s1 + $0xd8] sm:$0xff] (!%p212_p3)  }
   0xe   : > { %s2475_s21 = smov (!%p257_p4, %s256_s21), 35  ;;  %v2018_v30 = vld [vmem:[%s2466_s1 + $0x108] sm:$0xff]   ;;  %v2023_v35 = vld [vmem:[%s2466_s1 + $0x110] sm:$0xff]   ;;  %v2017_v37 = vld [vmem:[%s2466_s1 + $0x98] sm:$0xff]  }
   0xf   : > { %s1954_s8 = smul.u32 20, %s2475_s21  ;;  %v2022_v38 = vld [vmem:[%s2466_s1 + $0xe0] sm:$0xff]   ;;  %v2028_v39 = vld [vmem:[%s2466_s1 + $0x118] sm:$0xff]   ;;  %v2029_v44 = vld [vmem:[%s2466_s1 + $0xe8] sm:$0xff]   ;;  %s1506_s19 = sshll.u32 %s2475_s21, 2 }
  0x10   : > { %1948 = vmatpush3.bf16.msra.mxu1 %v1986_v5  ;;  %1734 = vmatpush3.bf16.msra.mxu0 %v1986_v5  ;;  %v2024_v41 = vld [vmem:[%s2466_s1 + $0xa0] sm:$0xff]   ;;  %v2032_v47 = vld [vmem:[%s2466_s1 + $0xa8] sm:$0xff]   ;;  %v2035_v48 = vld [vmem:[%s2466_s1 + $0xf0] sm:$0xff]   ;;  %s2397_s23 = scalar_lea.vmem %s2468_s3, %s1506_s19  ;;  %s2412_s26 = scalar_lea.vmem %s2469_s4, %s1506_s19 }
  0x11   : > { %1941 = vmatprep.subr.bf16.mxu1 %v1987_v6  ;;  %1735 = vmatprep.subr.bf16.mxu0 %v1987_v6  ;;  %s2186_s15 = scalar_lea.vmem %s2465_s0, %s1954_s8  ;;  %v2034_v45 = vld [vmem:[%s2466_s1 + $0x120] sm:$0xff]   ;;  %v2040_v50 = vld [vmem:[%s2466_s1 + $0x128] sm:$0xff]   ;;  %v2038_v53 = vld [vmem:[%s2466_s1 + $0xb0] sm:$0xff]  }
  0x12   : > { %v1999_v11 = vld [vmem:[%s2186_s15 + $0xa4] ss:$20 sps:$4 sm:$0xff]   ;;  %v1997_v18 = vld [vmem:[%s2186_s15 + $0xa0] ss:$20 sps:$4 sm:$0xff]   ;;  %v2006_v28 = vld [vmem:[%s2186_s15 + $0xc8] ss:$20 sps:$4 sm:$0xff]  }
  0x13   : > { %968 = vmatprep.mubr.bf16.mxu1 %v1999_v11  ;;  %v2009_v15 = vld [vmem:[%s2186_s15 + $0x4] ss:$20 sps:$4 sm:$0xff]   ;;  %v2007_v21 = vld [vmem:[%s2186_s15] ss:$20 sps:$4 sm:$0xff]   ;;  %v2021_v33 = vld [vmem:[%s2186_s15 + $0x28] ss:$20 sps:$4 sm:$0xff]  }
  0x14   : > { %1949 = vmatpush3.bf16.msra.mxu1 %v1988_v7  ;;  %1736 = vmatpush3.bf16.msra.mxu0 %v1988_v7  ;;  %v2004_v22 = vld [vmem:[%s2186_s15 + $0xcc] ss:$20 sps:$4 sm:$0xff]   ;;  %v2013_v32 = vld [vmem:[%s2186_s15 + $0xf4] ss:$20 sps:$4 sm:$0xff]   ;;  %v2016_v40 = vld [vmem:[%s2186_s15 + $0xf0] ss:$20 sps:$4 sm:$0xff]  }
  0x15   : > { %1942 = vmatprep.subr.bf16.mxu1 %v1989_v8  ;;  %1737 = vmatprep.subr.bf16.mxu0 %v1989_v8  ;;  %v2019_v26 = vld [vmem:[%s2186_s15 + $0x2c] ss:$20 sps:$4 sm:$0xff]   ;;  %v2030_v36 = vld [vmem:[%s2186_s15 + $0x54] ss:$20 sps:$4 sm:$0xff]   ;;  %v2033_v42 = vld [vmem:[%s2186_s15 + $0x50] ss:$20 sps:$4 sm:$0xff]  }
  0x16   : > { %936 = vmatprep.mubr.bf16.mxu0 %v2009_v15  ;;  %v2025_v43 = vld [vmem:[%s2186_s15 + $0x11c] ss:$20 sps:$4 sm:$0xff]   ;;  %v2027_v49 = vld [vmem:[%s2186_s15 + $0x118] ss:$20 sps:$4 sm:$0xff]   ;;  %v2039_v58 = vld [vmem:[%s2186_s15 + $0x140] ss:$20 sps:$4 sm:$0xff]  }
  0x17   : > { %v2041_v46 = vld [vmem:[%s2186_s15 + $0x7c] ss:$20 sps:$4 sm:$0xff]   ;;  %v2036_v51 = vld [vmem:[%s2186_s15 + $0x144] ss:$20 sps:$4 sm:$0xff]   ;;  %v2049_v59 = vld [vmem:[%s2186_s15 + $0xc] ss:$20 sps:$4 sm:$0xff]  }
  0x18   : > { %1950 = vmatpush3.bf16.msra.mxu1 %v1990_v9  ;;  %1738 = vmatpush3.bf16.msra.mxu0 %v1990_v9  ;;  %v2043_v52 = vld [vmem:[%s2186_s15 + $0x78] ss:$20 sps:$4 sm:$0xff]   ;;  %v2046_v55 = vld [vmem:[%s2466_s1 + $0x130] sm:$0xff]   ;;  %v2047_v61 = vld [vmem:[%s2186_s15 + $0x8] ss:$20 sps:$4 sm:$0xff]  }
  0x19   : > { %1943 = vmatprep.subr.bf16.mxu1 %v1991_v10  ;;  %1739 = vmatprep.subr.bf16.mxu0 %v1991_v10  ;;  %v2044_v54 = vld [vmem:[%s2466_s1 + $0xf8] sm:$0xff]   ;;  %v2051_v60 = vld [vmem:[%s2186_s15 + $0x10] ss:$20 sps:$4 sm:$0xff]   ;;  %v2052_v62 = vld [vmem:[%s2186_s15 + $0x34] ss:$20 sps:$4 sm:$0xff]  }
  0x1a   : > { %v2045_v56 = vld [vmem:[%s2466_s1 + $0xb8] sm:$0xff]   ;;  %v2054_v0 = vld [vmem:[%s2186_s15 + $0x30] ss:$20 sps:$4 sm:$0xff]   ;;  %v2059_v2 = vld [vmem:[%s2186_s15 + $0x60] ss:$20 sps:$4 sm:$0xff]  }
  0x1b   : > { %v2050_v57 = vld [vmem:[%s2466_s1 + $0x138] sm:$0xff]   ;;  %v2062_v6 = vld [vmem:[%s2186_s15 + $0x80] ss:$20 sps:$4 sm:$0xff]   ;;  %v2067_v8 = vld [vmem:[%s2186_s15 + $0xb0] ss:$20 sps:$4 sm:$0xff]  }
  0x1c   : > { %1951 = vmatpush3.bf16.msra.mxu1 %v1992_v12  ;;  %1740 = vmatpush3.bf16.msra.mxu0 %v1992_v12  ;;  %v2055_v63 = vld [vmem:[%s2186_s15 + $0x38] ss:$20 sps:$4 sm:$0xff]   ;;  %v2056_v1 = vld [vmem:[%s2186_s15 + $0x5c] ss:$20 sps:$4 sm:$0xff]   ;;  %v2068_v10 = vld [vmem:[%s2186_s15 + $0xd4] ss:$20 sps:$4 sm:$0xff]  }
  0x1d   : > { %1944 = vmatprep.subr.bf16.mxu1 %v1993_v13  ;;  %1741 = vmatprep.subr.bf16.mxu0 %v1993_v13  ;;  %v2058_v3 = vld [vmem:[%s2186_s15 + $0x58] ss:$20 sps:$4 sm:$0xff]   ;;  %v2063_v5 = vld [vmem:[%s2186_s15 + $0x88] ss:$20 sps:$4 sm:$0xff]   ;;  %v2070_v12 = vld [vmem:[%s2186_s15 + $0xd0] ss:$20 sps:$4 sm:$0xff]  }
  0x1e   : > { %v2060_v4 = vld [vmem:[%s2186_s15 + $0x84] ss:$20 sps:$4 sm:$0xff]   ;;  %v2064_v7 = vld [vmem:[%s2186_s15 + $0xac] ss:$20 sps:$4 sm:$0xff]   ;;  %v2066_v9 = vld [vmem:[%s2186_s15 + $0xa8] ss:$20 sps:$4 sm:$0xff]  }
  0x1f   : > { %v2071_v11 = vld [vmem:[%s2186_s15 + $0xd8] ss:$20 sps:$4 sm:$0xff]   ;;  %v2072_v13 = vld [vmem:[%s2186_s15 + $0xfc] ss:$20 sps:$4 sm:$0xff]  }
  0x20   : > { %1952 = vmatpush3.bf16.msra.mxu1 %v1994_v14  ;;  %1742 = vmatpush3.bf16.msra.mxu0 %v1994_v14  ;;  %v2075_v14 = vld [vmem:[%s2186_s15 + $0x100] ss:$20 sps:$4 sm:$0xff]   ;;  %v2074_v15 = vld [vmem:[%s2186_s15 + $0xf8] ss:$20 sps:$4 sm:$0xff]  }
  0x21   : > { %1945 = vmatprep.subr.bf16.mxu1 %v1995_v16  ;;  %1743 = vmatprep.subr.bf16.mxu0 %v1995_v16  ;;  %v2076_v16 = vld [vmem:[%s2186_s15 + $0x124] ss:$20 sps:$4 sm:$0xff]  }
  0x24   : > { %1953 = vmatpush3.bf16.msra.mxu1 %v1996_v17  ;;  %1744 = vmatpush3.bf16.msra.mxu0 %v1996_v17  ;;  %v2079_v17 = vld [vmem:[%s2186_s15 + $0x128] ss:$20 sps:$4 sm:$0xff]  }
  0x25   : > { %1799 = vmatprep.subr.bf16.mxu1 %v2000_v19  ;;  %1886 = vmatprep.subr.bf16.mxu0 %v2108_v24  ;;  %v2080_v19 = vld [vmem:[%s2186_s15 + $0x14c] ss:$20 sps:$4 sm:$0xff]  }
  0x27   : > { %969 = vmatmul.mubr.bf16.vlgmr.msra.gmra.mrb[0].mxu1 %v1997_v18  ;;  %937 = vmatmul.mubr.bf16.vlgmr.msra.gmra.mrb[0].mxu0 %v2007_v21  ;;  %v2078_v18 = vld [vmem:[%s2186_s15 + $0x120] ss:$20 sps:$4 sm:$0xff]   ;;  %v2082_v21 = vld [vmem:[%s2186_s15 + $0x148] ss:$20 sps:$4 sm:$0xff]  }
  0x28   : > { %1800 = vmatpush3.bf16.msra.mxu1 %v2001_v20  ;;  %976 = vmatprep.mubr.bf16.mxu1 %v2004_v22  ;;  %v2083_v20 = vld [vmem:[%s2186_s15 + $0x150] ss:$20 sps:$4 sm:$0xff]  }
  0x29   : > { %1801 = vmatprep.subr.bf16.mxu1 %v2002_v23  ;;  %1887 = vmatpush3.bf16.msra.mxu0 %v2012_v25 }
  0x2a   : > { %1888 = vmatprep.subr.bf16.mxu0 %v2108_v24  ;;  %944 = vmatprep.mubr.bf16.mxu0 %v2019_v26 }
  0x2c   : > { %1802 = vmatpush3.bf16.msra.mxu1 %v2003_v27 }
  0x2d   : > { %1803 = vmatprep.subr.bf16.mxu1 %v2010_v29  ;;  %1889 = vmatpush3.bf16.msra.mxu0 %v2018_v30 }
  0x2e   : > { %1890 = vmatprep.subr.bf16.mxu0 %v2108_v24 }
  0x2f   : > { %977 = vmatmul.mubr.bf16.gmra.mrb[4].mxu1 %v2006_v28  ;;  %945 = vmatmul.mubr.bf16.gmra.mrb[4].mxu0 %v2021_v33 }
  0x30   : > { %1804 = vmatpush3.bf16.msra.mxu1 %v2011_v31  ;;  %984 = vmatprep.mubr.bf16.mxu1 %v2013_v32 }
  0x31   : > { %1805 = vmatprep.subr.bf16.mxu1 %v2015_v34  ;;  %1891 = vmatpush3.bf16.msra.mxu0 %v2023_v35 }
  0x32   : > { %1892 = vmatprep.subr.bf16.mxu0 %v2108_v24  ;;  %952 = vmatprep.mubr.bf16.mxu0 %v2030_v36 }
  0x34   : > { %1806 = vmatpush3.bf16.msra.mxu1 %v2017_v37 }
  0x35   : > { %1807 = vmatprep.subr.bf16.mxu1 %v2022_v38  ;;  %1893 = vmatpush3.bf16.msra.mxu0 %v2028_v39 }
  0x36   : > { %1894 = vmatprep.subr.bf16.mxu0 %v2108_v24 }
  0x37   : > { %985 = vmatmul.mubr.bf16.gmra.mrb[8].mxu1 %v2016_v40  ;;  %953 = vmatmul.mubr.bf16.gmra.mrb[8].mxu0 %v2033_v42 }
  0x38   : > { %1808 = vmatpush3.bf16.msra.mxu1 %v2024_v41  ;;  %992 = vmatprep.mubr.bf16.mxu1 %v2025_v43 }
  0x39   : > { %1809 = vmatprep.subr.bf16.mxu1 %v2029_v44  ;;  %1895 = vmatpush3.bf16.msra.mxu0 %v2034_v45 }
  0x3a   : > { %1896 = vmatprep.subr.bf16.mxu0 %v2108_v24  ;;  %960 = vmatprep.mubr.bf16.mxu0 %v2041_v46 }
  0x3c   : > { %1810 = vmatpush3.bf16.msra.mxu1 %v2032_v47 }
  0x3d   : > { %1811 = vmatprep.subr.bf16.mxu1 %v2035_v48  ;;  %1897 = vmatpush3.bf16.msra.mxu0 %v2040_v50 }
  0x3e   : > { %1898 = vmatprep.subr.bf16.mxu0 %v2108_v24 }
  0x3f   : > { %993 = vmatmul.mubr.bf16.gmra.mrb[12].mxu1 %v2027_v49  ;;  %961 = vmatmul.mubr.bf16.gmra.mrb[12].mxu0 %v2043_v52 }
  0x40   : > { %1000 = vmatprep.mubr.bf16.mxu1 %v2036_v51  ;;  %1812 = vmatpush3.bf16.msra.mxu1 %v2038_v53 }
  0x41   : > { %1813 = vmatprep.subr.bf16.mxu1 %v2044_v54  ;;  %1899 = vmatpush3.bf16.msra.mxu0 %v2046_v55 }
  0x42   : > { %1900 = vmatprep.subr.bf16.mxu0 %v2108_v24  ;;  %1902 = vmatprep.mubr.msk.bf16.mxu0 %vm2109_vm0, %v2108_v24 }
  0x44   : > { %1814 = vmatpush3.bf16.msra.mxu1 %v2045_v56 }
  0x45   : > { %1901 = vmatpush3.bf16.msra.mxu0 %v2050_v57 }
  0x47   : > { %1001 = vmatmul.mubr.bf16.gmra.mrb[16].mxu1 %v2039_v58 }
  0x48   : > { %1041 = vmatprep.mubr.bf16.mxu1 %v2049_v59  ;;  %1903 = vmatmul.mubr.bf16.vlgmr.msra.gmra.mrb[16].mxu0 %v2051_v60 }
  0x49   : > { %1906 = vmatprep.mubr.msk.bf16.mxu0 %vm2109_vm0, %v2108_v24 }
  0x4f   : > { %1042 = vmatmul.mubr.bf16.vlgmr.msra.gmra.mrb[20].mxu1 %v2047_v61 }
  0x50   : > { %1049 = vmatprep.mubr.bf16.mxu1 %v2052_v62  ;;  %1907 = vmatmul.mubr.bf16.gmra.mrb[20].mxu0 %v2055_v63 }
  0x51   : > { %1910 = vmatprep.mubr.msk.bf16.mxu0 %vm2109_vm0, %v2108_v24 }
  0x57   : > { %1050 = vmatmul.mubr.bf16.gmra.mrb[24].mxu1 %v2054_v0 }
  0x58   : > { %1057 = vmatprep.mubr.bf16.mxu1 %v2056_v1  ;;  %1911 = vmatmul.mubr.bf16.gmra.mrb[24].mxu0 %v2059_v2 }
  0x59   : > { %1914 = vmatprep.mubr.msk.bf16.mxu0 %vm2109_vm0, %v2108_v24 }
  0x5f   : > { %1058 = vmatmul.mubr.bf16.gmra.mrb[28].mxu1 %v2058_v3 }
  0x60   : > { %1065 = vmatprep.mubr.bf16.mxu1 %v2060_v4  ;;  %1915 = vmatmul.mubr.bf16.gmra.mrb[28].mxu0 %v2063_v5 }
  0x61   : > { %1918 = vmatprep.mubr.msk.bf16.mxu0 %vm2109_vm0, %v2108_v24 }
  0x67   : > { %1066 = vmatmul.mubr.bf16.gmra.mrb[32].mxu1 %v2062_v6 }
  0x68   : > { %1073 = vmatprep.mubr.bf16.mxu1 %v2064_v7  ;;  %1919 = vmatmul.mubr.bf16.gmra.mrb[32].mxu0 %v2067_v8 }
  0x69   : > { %1922 = vmatprep.mubr.msk.bf16.mxu0 %vm2109_vm0, %v2108_v24 }
  0x6f   : > { %1074 = vmatmul.mubr.bf16.gmra.mrb[36].mxu1 %v2066_v9 }
  0x70   : > { %1081 = vmatprep.mubr.bf16.mxu1 %v2068_v10  ;;  %1923 = vmatmul.mubr.bf16.gmra.mrb[36].mxu0 %v2071_v11 }
  0x71   : > { %1926 = vmatprep.mubr.msk.bf16.mxu0 %vm2109_vm0, %v2108_v24 }
  0x77   : > { %1082 = vmatmul.mubr.bf16.gmra.mrb[40].mxu1 %v2070_v12  ;;  %v2383_v12 = vld [vmem:[%s2467_s2] ss:$0 sm:$0xff] }
  0x78   : > { %1089 = vmatprep.mubr.bf16.mxu1 %v2072_v13  ;;  %1927 = vmatmul.mubr.bf16.gmra.mrb[40].mxu0 %v2075_v14 }
  0x79   : > { %1930 = vmatprep.mubr.msk.bf16.mxu0 %vm2109_vm0, %v2108_v24 }
  0x7f   : > { %1090 = vmatmul.mubr.bf16.gmra.mrb[44].mxu1 %v2074_v15 }
  0x80   : > { %1097 = vmatprep.mubr.bf16.mxu1 %v2076_v16  ;;  %1931 = vmatmul.mubr.bf16.gmra.mrb[44].mxu0 %v2079_v17 }
  0x81   : > { %1934 = vmatprep.mubr.msk.bf16.mxu0 %vm2109_vm0, %v2108_v24 }
  0x87   : > { %1098 = vmatmul.mubr.bf16.gmra.mrb[48].mxu1 %v2078_v18 }
  0x88   : > { %1105 = vmatprep.mubr.bf16.mxu1 %v2080_v19  ;;  %1935 = vmatmul.mubr.bf16.gmra.mrb[48].mxu0 %v2083_v20 }
  0x8f   : > { %1106 = vmatmul.mubr.bf16.gmra.mrb[52].mxu1 %v2082_v21  ;;  %v1633_v21 = vld [vmem:[%s2397_s23] sm:$0xff]  }
  0xfa   : > { %v1769_v22 = vpop.f32.mrb[0].mxu1  ;;  %v1745_v23 = vpop.f32.mrb[0].mxu0 }
  0xfb   : > { %v1770_v25 = vpop.f32.mrb[1].mxu1  ;;  %v1746_v26 = vpop.f32.mrb[1].mxu0 }
  0xfc   : > { %v2352_v27 = vadd.f32 %v1770_v25, %v1769_v22  ;;  %v1772_v28 = vpop.f32.mrb[2].mxu1  ;;  %v1747_v29 = vadd.f32 %v1746_v26, %v1745_v23  ;;  %v1748_v30 = vpop.f32.mrb[2].mxu0 }
  0xfd   : > { %v1773_v31 = vpop.f32.mrb[3].mxu1  ;;  %v1749_v32 = vpop.f32.mrb[3].mxu0 }
  0xfe   : > { %v2354_v24 = vadd.f32 %v1773_v31, %v1772_v28  ;;  %v1750_v33 = vadd.f32 %v1749_v32, %v1748_v30  ;;  %v939_v23 = vadd.f32 %v1747_v29, %v2383_v12 }
 0x100   : > { %v942_v32 = vadd.f32 %v1750_v33, %v2383_v12 }
 0x102   : > { %v1775_v34 = vpop.f32.mrb[4].mxu1  ;;  %v1751_v35 = vpop.f32.mrb[4].mxu0 }
 0x103   : > { %v1776_v36 = vpop.f32.mrb[5].mxu1  ;;  %v1752_v37 = vpop.f32.mrb[5].mxu0 }
 0x104   : > { %v2356_v38 = vadd.f32 %v1776_v36, %v1775_v34  ;;  %v1778_v39 = vpop.f32.mrb[6].mxu1  ;;  %v2358_v40 = vadd.f32 %v1752_v37, %v1751_v35  ;;  %v1754_v41 = vpop.f32.mrb[6].mxu0  ;;  %v1634_v36 = vunpack.c.l.bf16 %v1633_v21 }
 0x105   : > { %v1779_v42 = vpop.f32.mrb[7].mxu1  ;;  %v1755_v43 = vpop.f32.mrb[7].mxu0 }
 0x106   : > { %v2360_v44 = vadd.f32 %v1779_v42, %v1778_v39  ;;  %v2362_v45 = vadd.f32 %v1755_v43, %v1754_v41  ;;  %v1635_v42 = vunpack.c.h.bf16 %v1633_v21 }
 0x10a   : > { %v1781_v46 = vpop.f32.mrb[8].mxu1  ;;  %v1757_v47 = vpop.f32.mrb[8].mxu0 }
 0x10b   : > { %v1782_v48 = vpop.f32.mrb[9].mxu1  ;;  %v1758_v49 = vpop.f32.mrb[9].mxu0 }
 0x10c   : > { %v2364_v50 = vadd.f32 %v1782_v48, %v1781_v46  ;;  %v1784_v51 = vpop.f32.mrb[10].mxu1  ;;  %v2366_v52 = vadd.f32 %v1758_v49, %v1757_v47  ;;  %v1760_v53 = vpop.f32.mrb[10].mxu0  ;;  %v1713_v48 = vld [vmem:[%s2397_s23 + $0x8] sm:$0xff]  }
 0x10d   : > { %v1785_v54 = vpop.f32.mrb[11].mxu1  ;;  %v1761_v55 = vpop.f32.mrb[11].mxu0 }
 0x10e   : > { %v2368_v56 = vadd.f32 %v1785_v54, %v1784_v51  ;;  %v2370_v57 = vadd.f32 %v1761_v55, %v1760_v53  ;;  %v947_v51 = vadd.f32 %v2358_v40, %v2383_v12 }
 0x112   : > { %v1787_v58 = vpop.f32.mrb[12].mxu1  ;;  %v1763_v59 = vpop.f32.mrb[12].mxu0 }
 0x113   : > { %v1788_v60 = vpop.f32.mrb[13].mxu1  ;;  %v1764_v61 = vpop.f32.mrb[13].mxu0 }
 0x114   : > { %v2372_v62 = vadd.f32 %v1788_v60, %v1787_v58  ;;  %v1790_v63 = vpop.f32.mrb[14].mxu1  ;;  %v2374_v0 = vadd.f32 %v1764_v61, %v1763_v59  ;;  %v1766_v1 = vpop.f32.mrb[14].mxu0  ;;  %v950_v58 = vadd.f32 %v2362_v45, %v2383_v12  ;;  %v1638_v60 = vunpack.c.l.bf16 %v1713_v48 }
 0x115   : > { %v1791_v2 = vpop.f32.mrb[15].mxu1  ;;  %v1767_v3 = vpop.f32.mrb[15].mxu0  ;;  %v1639_v45 = vunpack.c.h.bf16 %v1713_v48 }
 0x116   : > { %v2376_v4 = vadd.f32 %v1791_v2, %v1790_v63  ;;  %v2378_v5 = vadd.f32 %v1767_v3, %v1766_v1  ;;  %v963_v48 = vadd.f32 %v2374_v0, %v2383_v12 }
 0x11a   : > { %v1793_v6 = vpop.f32.mrb[16].mxu1 }
 0x11b   : > { %v1794_v7 = vpop.f32.mrb[17].mxu1  ;;  %v1148_v8 = vpop.f32.mrb[16].mxu0 }
 0x11c   : > { %v1795_v9 = vadd.f32 %v1794_v7, %v1793_v6  ;;  %v1796_v10 = vpop.f32.mrb[18].mxu1  ;;  %v1904_v11 = vpop.f32.mrb[17].mxu0 }
 0x11d   : > { %v1797_v13 = vpop.f32.mrb[19].mxu1  ;;  %v1151_v14 = vpop.f32.mrb[18].mxu0 }
 0x11e   : > { %v2387_v15 = vadd.f32 %v1795_v9, %v2383_v12  ;;  %v1798_v16 = vadd.f32 %v1797_v13, %v1796_v10  ;;  %v1905_v17 = vpop.f32.mrb[19].mxu0  ;;  %v1714_v13 = vld [vmem:[%s2397_s23 + $0x10] sm:$0xff]  }
 0x11f   : > { %v955_v17 = vadd.f32 %v2366_v52, %v2383_v12 }
 0x120   : > { %v2390_v18 = vadd.f32 %v1798_v16, %v2383_v12 }
 0x122   : > { %v1815_v19 = vpop.f32.mrb[20].mxu1 }
 0x123   : > { %v1816_v20 = vpop.f32.mrb[21].mxu1  ;;  %v1156_v22 = vpop.f32.mrb[20].mxu0 }
 0x124   : > { %v1817_v25 = vadd.f32 %v1816_v20, %v1815_v19  ;;  %v1818_v26 = vpop.f32.mrb[22].mxu1  ;;  %v1908_v28 = vpop.f32.mrb[21].mxu0 }
 0x125   : > { %v1819_v30 = vpop.f32.mrb[23].mxu1  ;;  %v1159_v31 = vpop.f32.mrb[22].mxu0 }
 0x126   : > { %v1820_v34 = vadd.f32 %v1819_v30, %v1818_v26  ;;  %v1044_v35 = vadd.f32 %v1817_v25, %v939_v23  ;;  %v1909_v37 = vpop.f32.mrb[23].mxu0  ;;  %v1642_v26 = vunpack.c.l.bf16 %v1714_v13 }
 0x128   : > { %v1149_v39 = vadd.f32 %v1148_v8, %v1044_v35  ;;  %v1047_v41 = vadd.f32 %v1820_v34, %v942_v32 }
 0x12a   : > { %v1255_v43 = vadd.f32 %v1634_v36, %v1149_v39  ;;  %v1152_v46 = vadd.f32 %v1151_v14, %v1047_v41  ;;  %v1821_v47 = vpop.f32.mrb[24].mxu1  ;;  %v1643_v39 = vunpack.c.h.bf16 %v1714_v13 }
 0x12b   : > { %v1822_v29 = vpop.f32.mrb[25].mxu1  ;;  %v1164_v49 = vpop.f32.mrb[24].mxu0 }
 0x12c   : > { %v1256_v53 = vadd.f32 %v1635_v42, %v1152_v46  ;;  %v1823_v54 = vadd.f32 %v1822_v29, %v1821_v47  ;;  %v1824_v33 = vpop.f32.mrb[26].mxu1  ;;  %v1912_v55 = vpop.f32.mrb[25].mxu0  ;;  %v1273_v63 = vmax.f32 %v1255_v43, 0.0  ;;  %v1715_v46 = vld [vmem:[%s2397_s23 + $0x18] sm:$0xff]  }
 0x12d   : > { %v1825_v59 = vpop.f32.mrb[27].mxu1  ;;  %v1167_v61 = vpop.f32.mrb[26].mxu0  ;;  %v1646_v55 = vunpack.c.l.bf16 %v1715_v46 }
 0x12e   : > { %v1274_v1 = vmax.f32 %v1256_v53, 0.0  ;;  %v1826_v2 = vadd.f32 %v1825_v59, %v1824_v33  ;;  %v1052_v3 = vadd.f32 %v1823_v54, %v947_v51  ;;  %v1913_v6 = vpop.f32.mrb[27].mxu0 }
 0x12f   : > { %v1647_v6 = vunpack.c.h.bf16 %v1715_v46 }
 0x130   : > { %v1671_v40 = vpack.c.bf16 %v1274_v1, %v1273_v63  ;;  %v1157_v7 = vadd.f32 %v1156_v22, %v1052_v3  ;;  %v1055_v8 = vadd.f32 %v1826_v2, %v950_v58  ;;  %v958_v22 = vadd.f32 %v2370_v57, %v2383_v12 }
 0x132   : > { %1672 = vst [vmem:[%s2412_s26] sm:$0xff] %v1671_v40   ;;  %v1257_v9 = vadd.f32 %v1638_v60, %v1157_v7  ;;  %v1160_v10 = vadd.f32 %v1159_v31, %v1055_v8  ;;  %v1827_v11 = vpop.f32.mrb[28].mxu1 }
 0x133   : > { %v1828_v14 = vpop.f32.mrb[29].mxu1  ;;  %v1172_v16 = vpop.f32.mrb[28].mxu0 }
 0x134   : > { %v1258_v19 = vadd.f32 %v1639_v45, %v1160_v10  ;;  %v1829_v20 = vadd.f32 %v1828_v14, %v1827_v11  ;;  %v1830_v21 = vpop.f32.mrb[30].mxu1  ;;  %v1916_v23 = vpop.f32.mrb[29].mxu0  ;;  %v1275_v30 = vmax.f32 %v1257_v9, 0.0  ;;  %v1716_v45 = vld [vmem:[%s2397_s23 + $0x20] sm:$0xff]   ;;  %v971_v10 = vadd.f32 %v2352_v27, %v2383_v12 }
 0x135   : > { %v1831_v25 = vpop.f32.mrb[31].mxu1  ;;  %v1175_v28 = vpop.f32.mrb[30].mxu0 }
 0x136   : > { %v1276_v31 = vmax.f32 %v1258_v19, 0.0  ;;  %v1832_v32 = vadd.f32 %v1831_v25, %v1830_v21  ;;  %v1060_v34 = vadd.f32 %v1829_v20, %v955_v17  ;;  %v1917_v35 = vpop.f32.mrb[31].mxu0  ;;  %v1650_v20 = vunpack.c.l.bf16 %v1716_v45 }
 0x138   : > { %v1676_v36 = vpack.c.bf16 %v1276_v31, %v1275_v30  ;;  %v1165_v37 = vadd.f32 %v1164_v49, %v1060_v34  ;;  %v1063_v52 = vadd.f32 %v1832_v32, %v958_v22  ;;  %v966_v49 = vadd.f32 %v2378_v5, %v2383_v12 }
 0x139   : > { %v1651_v32 = vunpack.c.h.bf16 %v1716_v45 }
 0x13a   : > { %1721 = vst [vmem:[%s2412_s26 + $0x8] sm:$0xff] %v1676_v36   ;;  %v1259_v41 = vadd.f32 %v1642_v26, %v1165_v37  ;;  %v1168_v42 = vadd.f32 %v1167_v61, %v1063_v52  ;;  %v1833_v43 = vpop.f32.mrb[32].mxu1  ;;  %v1717_v37 = vld [vmem:[%s2397_s23 + $0x28] sm:$0xff]  }
 0x13b   : > { %v1834_v47 = vpop.f32.mrb[33].mxu1  ;;  %v1180_v57 = vpop.f32.mrb[32].mxu0 }
 0x13c   : > { %v1260_v29 = vadd.f32 %v1643_v39, %v1168_v42  ;;  %v1835_v51 = vadd.f32 %v1834_v47, %v1833_v43  ;;  %v1836_v53 = vpop.f32.mrb[34].mxu1  ;;  %v1920_v54 = vpop.f32.mrb[33].mxu0  ;;  %v1277_v59 = vmax.f32 %v1259_v41, 0.0  ;;  %v979_v39 = vadd.f32 %v2356_v38, %v2383_v12 }
 0x13d   : > { %v1837_v33 = vpop.f32.mrb[35].mxu1  ;;  %v1183_v58 = vpop.f32.mrb[34].mxu0  ;;  %v982_v47 = vadd.f32 %v2360_v44, %v2383_v12 }
 0x13e   : > { %v1278_v60 = vmax.f32 %v1260_v29, 0.0  ;;  %v1838_v61 = vadd.f32 %v1837_v33, %v1836_v53  ;;  %v1068_v63 = vadd.f32 %v1835_v51, %v963_v48  ;;  %v1921_v1 = vpop.f32.mrb[35].mxu0  ;;  %v1654_v48 = vunpack.c.l.bf16 %v1717_v37 }
 0x13f   : > { %v1718_v1 = vld [vmem:[%s2397_s23 + $0x30] sm:$0xff]  }
 0x140   : > { %v1681_v2 = vpack.c.bf16 %v1278_v60, %v1277_v59  ;;  %v1173_v3 = vadd.f32 %v1172_v16, %v1068_v63  ;;  %v1071_v0 = vadd.f32 %v1838_v61, %v966_v49  ;;  %v974_v16 = vadd.f32 %v2354_v24, %v2383_v12 }
 0x141   : > { %v1655_v59 = vunpack.c.h.bf16 %v1717_v37 }
 0x142   : > { %1722 = vst [vmem:[%s2412_s26 + $0x10] sm:$0xff] %v1681_v2   ;;  %v1261_v40 = vadd.f32 %v1646_v55, %v1173_v3  ;;  %v1176_v7 = vadd.f32 %v1175_v28, %v1071_v0  ;;  %v1839_v8 = vpop.f32.mrb[36].mxu1  ;;  %v987_v3 = vadd.f32 %v2364_v50, %v2383_v12 }
 0x143   : > { %v1840_v9 = vpop.f32.mrb[37].mxu1  ;;  %v1188_v5 = vpop.f32.mrb[36].mxu0 }
 0x144   : > { %v1262_v11 = vadd.f32 %v1647_v6, %v1176_v7  ;;  %v1841_v13 = vadd.f32 %v1840_v9, %v1839_v8  ;;  %v1842_v14 = vpop.f32.mrb[38].mxu1  ;;  %v1924_v17 = vpop.f32.mrb[37].mxu0  ;;  %v1279_v23 = vmax.f32 %v1261_v40, 0.0  ;;  %v990_v8 = vadd.f32 %v2368_v56, %v2383_v12 }
 0x145   : > { %v1843_v19 = vpop.f32.mrb[39].mxu1  ;;  %v1191_v21 = vpop.f32.mrb[38].mxu0  ;;  %v1658_v9 = vunpack.c.l.bf16 %v1718_v1 }
 0x146   : > { %v1280_v22 = vmax.f32 %v1262_v11, 0.0  ;;  %v1844_v25 = vadd.f32 %v1843_v19, %v1842_v14  ;;  %v1076_v26 = vadd.f32 %v1841_v13, %v971_v10  ;;  %v1925_v28 = vpop.f32.mrb[39].mxu0 }
 0x147   : > { %v995_v28 = vadd.f32 %v2372_v62, %v2383_v12 }
 0x148   : > { %v1686_v30 = vpack.c.bf16 %v1280_v22, %v1279_v23  ;;  %v1181_v31 = vadd.f32 %v1180_v57, %v1076_v26  ;;  %v1079_v27 = vadd.f32 %v1844_v25, %v974_v16  ;;  %v1719_v25 = vld [vmem:[%s2397_s23 + $0x38] sm:$0xff]  }
 0x14a   : > { %1723 = vst [vmem:[%s2412_s26 + $0x18] sm:$0xff] %v1686_v30   ;;  %v1263_v34 = vadd.f32 %v1650_v20, %v1181_v31  ;;  %v1184_v35 = vadd.f32 %v1183_v58, %v1079_v27  ;;  %v1845_v36 = vpop.f32.mrb[40].mxu1  ;;  %v1659_v20 = vunpack.c.h.bf16 %v1718_v1 }
 0x14b   : > { %v1846_v52 = vpop.f32.mrb[41].mxu1  ;;  %v1196_v24 = vpop.f32.mrb[40].mxu0 }
 0x14c   : > { %v1264_v41 = vadd.f32 %v1651_v32, %v1184_v35  ;;  %v1847_v42 = vadd.f32 %v1846_v52, %v1845_v36  ;;  %v1848_v43 = vpop.f32.mrb[42].mxu1  ;;  %v1928_v46 = vpop.f32.mrb[41].mxu0  ;;  %v1281_v51 = vmax.f32 %v1263_v34, 0.0  ;;  %v998_v34 = vadd.f32 %v2376_v4, %v2383_v12 }
 0x14d   : > { %v1849_v57 = vpop.f32.mrb[43].mxu1  ;;  %v1199_v29 = vpop.f32.mrb[42].mxu0  ;;  %v1662_v36 = vunpack.c.l.bf16 %v1719_v25 }
 0x14e   : > { %v1282_v53 = vmax.f32 %v1264_v41, 0.0  ;;  %v1850_v54 = vadd.f32 %v1849_v57, %v1848_v43  ;;  %v1084_v49 = vadd.f32 %v1847_v42, %v979_v39  ;;  %v1929_v33 = vpop.f32.mrb[43].mxu0 }
 0x150   : > { %v1691_v55 = vpack.c.bf16 %v1282_v53, %v1281_v51  ;;  %v1189_v58 = vadd.f32 %v1188_v5, %v1084_v49  ;;  %v1087_v38 = vadd.f32 %v1850_v54, %v982_v47  ;;  %v1663_v47 = vunpack.c.h.bf16 %v1719_v25  ;;  %v1720_v51 = vld [vmem:[%s2397_s23 + $0x40] sm:$0xff]  }
 0x151   : > { %v1666_v33 = vunpack.c.l.bf16 %v1720_v51  ;;  %v1667_v1 = vunpack.c.h.bf16 %v1720_v51 }
 0x152   : > { %1724 = vst [vmem:[%s2412_s26 + $0x20] sm:$0xff] %v1691_v55   ;;  %v1265_v60 = vadd.f32 %v1654_v48, %v1189_v58  ;;  %v1192_v61 = vadd.f32 %v1191_v21, %v1087_v38  ;;  %v1851_v63 = vpop.f32.mrb[44].mxu1 }
 0x153   : > { %v1852_v2 = vpop.f32.mrb[45].mxu1  ;;  %v1204_v44 = vpop.f32.mrb[44].mxu0 }
 0x154   : > { %v1266_v0 = vadd.f32 %v1655_v59, %v1192_v61  ;;  %v1853_v6 = vadd.f32 %v1852_v2, %v1851_v63  ;;  %v1854_v40 = vpop.f32.mrb[46].mxu1  ;;  %v1932_v7 = vpop.f32.mrb[45].mxu0  ;;  %v1283_v10 = vmax.f32 %v1265_v60, 0.0 }
 0x155   : > { %v1855_v45 = vpop.f32.mrb[47].mxu1  ;;  %v1207_v5 = vpop.f32.mrb[46].mxu0 }
 0x156   : > { %v1284_v11 = vmax.f32 %v1266_v0, 0.0  ;;  %v1856_v13 = vadd.f32 %v1855_v45, %v1854_v40  ;;  %v1092_v14 = vadd.f32 %v1853_v6, %v987_v3  ;;  %v1933_v17 = vpop.f32.mrb[47].mxu0 }
 0x158   : > { %v1696_v16 = vpack.c.bf16 %v1284_v11, %v1283_v10  ;;  %v1197_v19 = vadd.f32 %v1196_v24, %v1092_v14  ;;  %v1095_v50 = vadd.f32 %v1856_v13, %v990_v8 }
 0x15a   : > { %1725 = vst [vmem:[%s2412_s26 + $0x28] sm:$0xff] %v1696_v16   ;;  %v1267_v21 = vadd.f32 %v1658_v9, %v1197_v19  ;;  %v1200_v23 = vadd.f32 %v1199_v29, %v1095_v50  ;;  %v1857_v22 = vpop.f32.mrb[48].mxu1 }
 0x15b   : > { %v1858_v26 = vpop.f32.mrb[49].mxu1  ;;  %v1212_v56 = vpop.f32.mrb[48].mxu0 }
 0x15c   : > { %v1268_v30 = vadd.f32 %v1659_v20, %v1200_v23  ;;  %v1859_v31 = vadd.f32 %v1858_v26, %v1857_v22  ;;  %v1860_v27 = vpop.f32.mrb[50].mxu1  ;;  %v1936_v32 = vpop.f32.mrb[49].mxu0  ;;  %v1285_v52 = vmax.f32 %v1267_v21, 0.0 }
 0x15d   : > { %v1861_v35 = vpop.f32.mrb[51].mxu1  ;;  %v1215_v37 = vpop.f32.mrb[50].mxu0 }
 0x15e   : > { %v1286_v24 = vmax.f32 %v1268_v30, 0.0  ;;  %v1862_v39 = vadd.f32 %v1861_v35, %v1860_v27  ;;  %v1100_v41 = vadd.f32 %v1859_v31, %v995_v28  ;;  %v1937_v42 = vpop.f32.mrb[51].mxu0 }
 0x160   : > { %v1701_v43 = vpack.c.bf16 %v1286_v24, %v1285_v52  ;;  %v1205_v46 = vadd.f32 %v1204_v44, %v1100_v41  ;;  %v1103_v62 = vadd.f32 %v1862_v39, %v998_v34 }
 0x162   : > { %1726 = vst [vmem:[%s2412_s26 + $0x30] sm:$0xff] %v1701_v43   ;;  %v1269_v57 = vadd.f32 %v1662_v36, %v1205_v46  ;;  %v1208_v48 = vadd.f32 %v1207_v5, %v1103_v62  ;;  %v1863_v29 = vpop.f32.mrb[52].mxu1 }
 0x163   : > { %v1864_v4 = vpop.f32.mrb[53].mxu1 }
 0x164   : > { %v1270_v12 = vadd.f32 %v1663_v47, %v1208_v48  ;;  %v1865_v53 = vadd.f32 %v1864_v4, %v1863_v29  ;;  %v1866_v54 = vpop.f32.mrb[54].mxu1  ;;  %v1287_v55 = vmax.f32 %v1269_v57, 0.0 }
 0x165   : > { %v1867_v49 = vpop.f32.mrb[55].mxu1 }
 0x166   : > { %v1288_v58 = vmax.f32 %v1270_v12, 0.0  ;;  %v1868_v38 = vadd.f32 %v1867_v49, %v1866_v54  ;;  %v1108_v59 = vadd.f32 %v1865_v53, %v2387_v15 }
 0x168   : > { %v1706_v60 = vpack.c.bf16 %v1288_v58, %v1287_v55  ;;  %v1213_v61 = vadd.f32 %v1212_v56, %v1108_v59  ;;  %v1111_v63 = vadd.f32 %v1868_v38, %v2390_v18 }
 0x16a   : > { %1727 = vst [vmem:[%s2412_s26 + $0x38] sm:$0xff] %v1706_v60   ;;  %v1271_v2 = vadd.f32 %v1666_v33, %v1213_v61  ;;  %v1216_v44 = vadd.f32 %v1215_v37, %v1111_v63 }
 0x16c   : > { %v1272_v3 = vadd.f32 %v1667_v1, %v1216_v44  ;;  %v1289_v0 = vmax.f32 %v1271_v2, 0.0 }
 0x16e   : > { %v1290_v6 = vmax.f32 %v1272_v3, 0.0 }
 0x170   : > { %v1711_v40 = vpack.c.bf16 %v1290_v6, %v1289_v0 }
 0x172   : > { %1728 = vst [vmem:[%s2412_s26 + $0x40] sm:$0xff] %v1711_v40  }
 0x173 PF: > { %s14_s17 = sadd.s32 1, %s2106_s17   ;;  %s2470_s15 = smov %s2102_s16 }
 0x174   : > { %p11_p5 = scmp.ge.s32.totalorder %s14_s17, 4   ;;  %s2471_s16 = smov %s2473_s18 }
 0x176   :  { %13 = sbr.rel (!%p11_p5) target bundleno = 2 (0x2), region = 75 }

// kernel: pspnet_forward.32
= control target key start
LH: loop header
LB: loop body
LE: loop exit
PB: predicated region body
PF: predicated region fallthrough
CT: control target
= control target key end

     0   :  { %v1134_v34 = vmov 0.0   ;;  %vm1135_vm0 = vmmov 0   ;;  %s1420_s1 = inlined_call_operand.vmem [shape: bf16[640,128], index: 1, kind: input, shape index: {}]   ;;  %s1421_s0 = inlined_call_operand.vmem [shape: bf16[80,640], index: 0, kind: input, shape index: {}]   ;;  %s1422_s2 = inlined_call_operand.vmem [shape: f32[1,128], index: 2, kind: input, shape index: {}]   ;;  %s1423_s3 = inlined_call_operand.vmem [shape: bf16[80,128], index: 3, kind: output, shape index: {}]  }
   0x1   :  { %v1059_v0 = vld [vmem:[%s1420_s1 + $0x40] sm:$0xff]   ;;  %v1063_v4 = vld [vmem:[%s1420_s1 + $0x48] sm:$0xff]   ;;  %v1067_v8 = vld [vmem:[%s1420_s1 + $0x50] sm:$0xff]  }
   0x2   :  { %v1060_v1 = vld [vmem:[%s1420_s1 + $0xc0] sm:$0xff]   ;;  %900 = vmatprep.subr.bf16.mxu0 %v1059_v0  ;;  %v1064_v5 = vld [vmem:[%s1420_s1 + $0xc8] sm:$0xff]   ;;  %v1068_v9 = vld [vmem:[%s1420_s1 + $0xd0] sm:$0xff]  }
   0x3   :  { %v1061_v2 = vld [vmem:[%s1420_s1] sm:$0xff]   ;;  %946 = vmatprep.subr.bf16.mxu1 %v1060_v1  ;;  %v1065_v6 = vld [vmem:[%s1420_s1 + $0x8] sm:$0xff]   ;;  %v1069_v10 = vld [vmem:[%s1420_s1 + $0x10] sm:$0xff]  }
   0x4   :  { %v1062_v3 = vld [vmem:[%s1420_s1 + $0x80] sm:$0xff]   ;;  %901 = vmatpush3.bf16.msra.mxu0 %v1061_v2  ;;  %v1066_v7 = vld [vmem:[%s1420_s1 + $0x88] sm:$0xff]   ;;  %v1070_v11 = vld [vmem:[%s1420_s1 + $0x90] sm:$0xff]  }
   0x5   :  { %947 = vmatpush3.bf16.msra.mxu1 %v1062_v3  ;;  %902 = vmatprep.subr.bf16.mxu0 %v1063_v4  ;;  %v1071_v12 = vld [vmem:[%s1420_s1 + $0x58] sm:$0xff]   ;;  %v1075_v16 = vld [vmem:[%s1420_s1 + $0x60] sm:$0xff]   ;;  %v1079_v20 = vld [vmem:[%s1420_s1 + $0x68] sm:$0xff]  }
   0x6   :  { %948 = vmatprep.subr.bf16.mxu1 %v1064_v5  ;;  %v1072_v13 = vld [vmem:[%s1420_s1 + $0xd8] sm:$0xff]   ;;  %v1076_v17 = vld [vmem:[%s1420_s1 + $0xe0] sm:$0xff]   ;;  %v1080_v21 = vld [vmem:[%s1420_s1 + $0xe8] sm:$0xff]  }
   0x7   :  { %v1073_v14 = vld [vmem:[%s1420_s1 + $0x18] sm:$0xff]   ;;  %v1077_v18 = vld [vmem:[%s1420_s1 + $0x20] sm:$0xff]   ;;  %v1081_v22 = vld [vmem:[%s1420_s1 + $0x28] sm:$0xff]  }
   0x8   :  { %903 = vmatpush3.bf16.msra.mxu0 %v1065_v6  ;;  %v1074_v15 = vld [vmem:[%s1420_s1 + $0x98] sm:$0xff]   ;;  %v1078_v19 = vld [vmem:[%s1420_s1 + $0xa0] sm:$0xff]   ;;  %v1082_v23 = vld [vmem:[%s1420_s1 + $0xa8] sm:$0xff]  }
   0x9   :  { %949 = vmatpush3.bf16.msra.mxu1 %v1066_v7  ;;  %904 = vmatprep.subr.bf16.mxu0 %v1067_v8  ;;  %v1083_v24 = vld [vmem:[%s1420_s1 + $0x70] sm:$0xff]   ;;  %v1087_v28 = vld [vmem:[%s1420_s1 + $0x78] sm:$0xff]   ;;  %v1096_v36 = vld [vmem:[%s1421_s0 + $0xc] ss:$20 sps:$4 sm:$0xff]  }
   0xa   :  { %950 = vmatprep.subr.bf16.mxu1 %v1068_v9  ;;  %v1084_v25 = vld [vmem:[%s1420_s1 + $0xf0] sm:$0xff]   ;;  %v1088_v29 = vld [vmem:[%s1420_s1 + $0xf8] sm:$0xff]   ;;  %v1097_v37 = vld [vmem:[%s1420_s1 + $0x100] sm:$0xff]   ;;  %607 = vmatprep.mubr.bf16.mxu1 %v1096_v36 }
   0xb   :  { %v1085_v26 = vld [vmem:[%s1420_s1 + $0x30] sm:$0xff]   ;;  %v1089_v30 = vld [vmem:[%s1420_s1 + $0x38] sm:$0xff]   ;;  %v1098_v38 = vld [vmem:[%s1420_s1 + $0x108] sm:$0xff]  }
   0xc   :  { %905 = vmatpush3.bf16.msra.mxu0 %v1069_v10  ;;  %v1086_v27 = vld [vmem:[%s1420_s1 + $0xb0] sm:$0xff]   ;;  %v1090_v31 = vld [vmem:[%s1420_s1 + $0xb8] sm:$0xff]   ;;  %v1099_v39 = vld [vmem:[%s1421_s0 + $0x2c] ss:$20 sps:$4 sm:$0xff]  }
   0xd   :  { %951 = vmatpush3.bf16.msra.mxu1 %v1070_v11  ;;  %906 = vmatprep.subr.bf16.mxu0 %v1071_v12  ;;  %v1091_v32 = vld [vmem:[%s1421_s0] ss:$20 sps:$4 sm:$0xff]   ;;  %v1093_v33 = vld [vmem:[%s1421_s0 + $0x4] ss:$20 sps:$4 sm:$0xff]   ;;  %v1094_v35 = vld [vmem:[%s1421_s0 + $0x8] ss:$20 sps:$4 sm:$0xff]  }
   0xe   :  { %952 = vmatprep.subr.bf16.mxu1 %v1072_v13  ;;  %534 = vmatprep.mubr.bf16.mxu0 %v1093_v33  ;;  %v1101_v40 = vld [vmem:[%s1421_s0 + $0x34] ss:$20 sps:$4 sm:$0xff]   ;;  %v1104_v42 = vld [vmem:[%s1421_s0 + $0x30] ss:$20 sps:$4 sm:$0xff]   ;;  %v1112_v46 = vld [vmem:[%s1420_s1 + $0x118] sm:$0xff]  }
   0xf   :  { %v1103_v41 = vld [vmem:[%s1421_s0 + $0x28] ss:$20 sps:$4 sm:$0xff]   ;;  %v1105_v43 = vld [vmem:[%s1420_s1 + $0x110] sm:$0xff]   ;;  %v1111_v48 = vld [vmem:[%s1421_s0 + $0x58] ss:$20 sps:$4 sm:$0xff]  }
  0x10   :  { %907 = vmatpush3.bf16.msra.mxu0 %v1073_v14  ;;  %v1106_v44 = vld [vmem:[%s1421_s0 + $0x54] ss:$20 sps:$4 sm:$0xff]   ;;  %v1108_v45 = vld [vmem:[%s1421_s0 + $0x5c] ss:$20 sps:$4 sm:$0xff]   ;;  %v1113_v49 = vld [vmem:[%s1420_s1 + $0x120] sm:$0xff]  }
  0x11   :  { %953 = vmatpush3.bf16.msra.mxu1 %v1074_v15  ;;  %908 = vmatprep.subr.bf16.mxu0 %v1075_v16  ;;  %v1110_v47 = vld [vmem:[%s1421_s0 + $0x50] ss:$20 sps:$4 sm:$0xff]   ;;  %v1120_v52 = vld [vmem:[%s1420_s1 + $0x128] sm:$0xff]   ;;  %v1119_v54 = vld [vmem:[%s1421_s0 + $0x80] ss:$20 sps:$4 sm:$0xff]  }
  0x12   :  { %954 = vmatprep.subr.bf16.mxu1 %v1076_v17  ;;  %v1114_v50 = vld [vmem:[%s1421_s0 + $0x7c] ss:$20 sps:$4 sm:$0xff]   ;;  %v1116_v51 = vld [vmem:[%s1421_s0 + $0x84] ss:$20 sps:$4 sm:$0xff]   ;;  %v1123_v56 = vld [vmem:[%s1421_s0 + $0xac] ss:$20 sps:$4 sm:$0xff]  }
  0x13   :  { %v1118_v53 = vld [vmem:[%s1421_s0 + $0x78] ss:$20 sps:$4 sm:$0xff]   ;;  %v1125_v57 = vld [vmem:[%s1420_s1 + $0x130] sm:$0xff]   ;;  %v1127_v60 = vld [vmem:[%s1421_s0 + $0xa8] ss:$20 sps:$4 sm:$0xff]  }
  0x14   :  { %909 = vmatpush3.bf16.msra.mxu0 %v1077_v18  ;;  %v1121_v55 = vld [vmem:[%s1421_s0 + $0xa4] ss:$20 sps:$4 sm:$0xff]   ;;  %v1126_v59 = vld [vmem:[%s1421_s0 + $0xa0] ss:$20 sps:$4 sm:$0xff]   ;;  %v1130_v62 = vld [vmem:[%s1421_s0 + $0x88] ss:$20 sps:$4 sm:$0xff]  }
  0x15   :  { %955 = vmatpush3.bf16.msra.mxu1 %v1078_v19  ;;  %910 = vmatprep.subr.bf16.mxu0 %v1079_v20  ;;  %v1128_v58 = vld [vmem:[%s1420_s1 + $0x138] sm:$0xff]   ;;  %v1129_v61 = vld [vmem:[%s1421_s0 + $0x10] ss:$20 sps:$4 sm:$0xff]   ;;  %v1133_v1 = vld [vmem:[%s1421_s0 + $0x60] ss:$20 sps:$4 sm:$0xff]  }
  0x16   :  { %956 = vmatprep.subr.bf16.mxu1 %v1080_v21  ;;  %v1131_v63 = vld [vmem:[%s1421_s0 + $0x38] ss:$20 sps:$4 sm:$0xff]   ;;  %v1132_v0 = vld [vmem:[%s1421_s0 + $0xb0] ss:$20 sps:$4 sm:$0xff]   ;;  %v1375_v3 = vld [vmem:[%s1422_s2] ss:$0 sm:$0xff] }
  0x18   :  { %911 = vmatpush3.bf16.msra.mxu0 %v1081_v22 }
  0x19   :  { %957 = vmatpush3.bf16.msra.mxu1 %v1082_v23  ;;  %912 = vmatprep.subr.bf16.mxu0 %v1083_v24 }
  0x1a   :  { %958 = vmatprep.subr.bf16.mxu1 %v1084_v25 }
  0x1c   :  { %913 = vmatpush3.bf16.msra.mxu0 %v1085_v26 }
  0x1d   :  { %959 = vmatpush3.bf16.msra.mxu1 %v1086_v27  ;;  %914 = vmatprep.subr.bf16.mxu0 %v1087_v28 }
  0x1e   :  { %960 = vmatprep.subr.bf16.mxu1 %v1088_v29 }
  0x20   :  { %915 = vmatpush3.bf16.msra.mxu0 %v1089_v30 }
  0x21   :  { %961 = vmatpush3.bf16.msra.mxu1 %v1090_v31  ;;  %1005 = vmatprep.subr.bf16.mxu0 %v1134_v34 }
  0x22   :  { %1041 = vmatprep.subr.bf16.mxu1 %v1134_v34 }
  0x23   :  { %535 = vmatmul.mubr.bf16.vlgmr.msra.gmra.mrb[0].mxu0 %v1091_v32 }
  0x24   :  { %608 = vmatmul.mubr.bf16.vlgmr.msra.gmra.mrb[0].mxu1 %v1094_v35  ;;  %1006 = vmatpush3.bf16.msra.mxu0 %v1097_v37 }
  0x25   :  { %1007 = vmatprep.subr.bf16.mxu0 %v1134_v34  ;;  %1049 = vmatpush3.bf16.msra.mxu1 %v1097_v37 }
  0x26   :  { %542 = vmatprep.mubr.bf16.mxu0 %v1099_v39  ;;  %1042 = vmatprep.subr.bf16.mxu1 %v1134_v34 }
  0x27   :  { %615 = vmatprep.mubr.bf16.mxu1 %v1101_v40 }
  0x28   :  { %1008 = vmatpush3.bf16.msra.mxu0 %v1098_v38 }
  0x29   :  { %1009 = vmatprep.subr.bf16.mxu0 %v1134_v34  ;;  %1050 = vmatpush3.bf16.msra.mxu1 %v1098_v38 }
  0x2a   :  { %1043 = vmatprep.subr.bf16.mxu1 %v1134_v34 }
  0x2b   :  { %543 = vmatmul.mubr.bf16.gmra.mrb[4].mxu0 %v1103_v41 }
  0x2c   :  { %616 = vmatmul.mubr.bf16.gmra.mrb[4].mxu1 %v1104_v42  ;;  %1010 = vmatpush3.bf16.msra.mxu0 %v1105_v43 }
  0x2d   :  { %550 = vmatprep.mubr.bf16.mxu0 %v1106_v44  ;;  %623 = vmatprep.mubr.bf16.mxu1 %v1108_v45 }
  0x2e   :  { %1011 = vmatprep.subr.bf16.mxu0 %v1134_v34  ;;  %1051 = vmatpush3.bf16.msra.mxu1 %v1105_v43 }
  0x2f   :  { %1044 = vmatprep.subr.bf16.mxu1 %v1134_v34 }
  0x30   :  { %1012 = vmatpush3.bf16.msra.mxu0 %v1112_v46 }
  0x31   :  { %1013 = vmatprep.subr.bf16.mxu0 %v1134_v34 }
  0x32   :  { %1052 = vmatpush3.bf16.msra.mxu1 %v1112_v46 }
  0x33   :  { %551 = vmatmul.mubr.bf16.gmra.mrb[8].mxu0 %v1110_v47  ;;  %1045 = vmatprep.subr.bf16.mxu1 %v1134_v34 }
  0x34   :  { %624 = vmatmul.mubr.bf16.gmra.mrb[8].mxu1 %v1111_v48  ;;  %1014 = vmatpush3.bf16.msra.mxu0 %v1113_v49 }
  0x35   :  { %558 = vmatprep.mubr.bf16.mxu0 %v1114_v50  ;;  %631 = vmatprep.mubr.bf16.mxu1 %v1116_v51 }
  0x36   :  { %1053 = vmatpush3.bf16.msra.mxu1 %v1113_v49  ;;  %1015 = vmatprep.subr.bf16.mxu0 %v1134_v34 }
  0x37   :  { %1046 = vmatprep.subr.bf16.mxu1 %v1134_v34 }
  0x38   :  { %1016 = vmatpush3.bf16.msra.mxu0 %v1120_v52 }
  0x39   :  { %1017 = vmatprep.subr.bf16.mxu0 %v1134_v34 }
  0x3a   :  { %1054 = vmatpush3.bf16.msra.mxu1 %v1120_v52 }
  0x3b   :  { %559 = vmatmul.mubr.bf16.gmra.mrb[12].mxu0 %v1118_v53  ;;  %1047 = vmatprep.subr.bf16.mxu1 %v1134_v34 }
  0x3c   :  { %632 = vmatmul.mubr.bf16.gmra.mrb[12].mxu1 %v1119_v54  ;;  %566 = vmatprep.mubr.bf16.mxu0 %v1121_v55 }
  0x3d   :  { %639 = vmatprep.mubr.bf16.mxu1 %v1123_v56  ;;  %1018 = vmatpush3.bf16.msra.mxu0 %v1125_v57 }
  0x3e   :  { %1055 = vmatpush3.bf16.msra.mxu1 %v1125_v57  ;;  %1019 = vmatprep.subr.bf16.mxu0 %v1134_v34 }
  0x3f   :  { %1048 = vmatprep.subr.bf16.mxu1 %v1134_v34 }
  0x41   :  { %1020 = vmatpush3.bf16.msra.mxu0 %v1128_v58 }
  0x42   :  { %1056 = vmatpush3.bf16.msra.mxu1 %v1128_v58 }
  0x43   :  { %567 = vmatmul.mubr.bf16.gmra.mrb[16].mxu0 %v1126_v59 }
  0x44   :  { %640 = vmatmul.mubr.bf16.gmra.mrb[16].mxu1 %v1127_v60  ;;  %1021 = vmatprep.mubr.msk.bf16.mxu0 %vm1135_vm0, %v1134_v34 }
  0x45   :  { %1033 = vmatprep.mubr.msk.bf16.mxu1 %vm1135_vm0, %v1134_v34 }
  0x4b   :  { %1022 = vmatmul.mubr.bf16.vlgmr.msra.gmra.mrb[20].mxu0 %v1129_v61 }
  0x4c   :  { %1034 = vmatmul.mubr.bf16.vlgmr.msra.gmra.mrb[20].mxu1 %v1130_v62  ;;  %1025 = vmatprep.mubr.msk.bf16.mxu0 %vm1135_vm0, %v1134_v34 }
  0x4d   :  { %1037 = vmatprep.mubr.msk.bf16.mxu1 %vm1135_vm0, %v1134_v34 }
  0x53   :  { %1026 = vmatmul.mubr.bf16.gmra.mrb[24].mxu0 %v1131_v63 }
  0x54   :  { %1038 = vmatmul.mubr.bf16.gmra.mrb[24].mxu1 %v1132_v0  ;;  %1029 = vmatprep.mubr.msk.bf16.mxu0 %vm1135_vm0, %v1134_v34 }
  0x5b   :  { %1030 = vmatmul.mubr.bf16.gmra.mrb[28].mxu0 %v1133_v1 }
  0xf6   :  { %v916_v2 = vpop.f32.mrb[0].mxu0 }
  0xf7   :  { %v917_v4 = vpop.f32.mrb[1].mxu0  ;;  %v962_v5 = vpop.f32.mrb[0].mxu1 }
  0xf8   :  { %v918_v6 = vadd.f32 %v917_v4, %v916_v2  ;;  %v919_v7 = vpop.f32.mrb[2].mxu0  ;;  %v963_v8 = vpop.f32.mrb[1].mxu1 }
  0xf9   :  { %v920_v9 = vpop.f32.mrb[3].mxu0  ;;  %v964_v10 = vadd.f32 %v963_v8, %v962_v5  ;;  %v965_v11 = vpop.f32.mrb[2].mxu1 }
  0xfa   :  { %v537_v12 = vadd.f32 %v918_v6, %v1375_v3  ;;  %v921_v13 = vadd.f32 %v920_v9, %v919_v7  ;;  %v966_v14 = vpop.f32.mrb[3].mxu1 }
  0xfb   :  { %v967_v15 = vadd.f32 %v966_v14, %v965_v11 }
  0xfc   :  { %v540_v16 = vadd.f32 %v921_v13, %v1375_v3  ;;  %v1379_v17 = vadd.f32 %v964_v10, %v537_v12 }
  0xfe   :  { %v922_v18 = vpop.f32.mrb[4].mxu0  ;;  %v1381_v19 = vadd.f32 %v967_v15, %v540_v16 }
  0xff   :  { %v923_v20 = vpop.f32.mrb[5].mxu0  ;;  %v968_v21 = vpop.f32.mrb[4].mxu1 }
 0x100   :  { %v924_v22 = vadd.f32 %v923_v20, %v922_v18  ;;  %v925_v23 = vpop.f32.mrb[6].mxu0  ;;  %v969_v24 = vpop.f32.mrb[5].mxu1 }
 0x101   :  { %v926_v25 = vpop.f32.mrb[7].mxu0  ;;  %v970_v26 = vadd.f32 %v969_v24, %v968_v21  ;;  %v971_v27 = vpop.f32.mrb[6].mxu1 }
 0x102   :  { %v545_v28 = vadd.f32 %v924_v22, %v1375_v3  ;;  %v927_v29 = vadd.f32 %v926_v25, %v925_v23  ;;  %v972_v30 = vpop.f32.mrb[7].mxu1 }
 0x103   :  { %v973_v31 = vadd.f32 %v972_v30, %v971_v27 }
 0x104   :  { %v548_v32 = vadd.f32 %v927_v29, %v1375_v3  ;;  %v1385_v33 = vadd.f32 %v970_v26, %v545_v28 }
 0x106   :  { %v928_v34 = vpop.f32.mrb[8].mxu0  ;;  %v1387_v35 = vadd.f32 %v973_v31, %v548_v32 }
 0x107   :  { %v929_v36 = vpop.f32.mrb[9].mxu0  ;;  %v974_v37 = vpop.f32.mrb[8].mxu1 }
 0x108   :  { %v930_v38 = vadd.f32 %v929_v36, %v928_v34  ;;  %v931_v39 = vpop.f32.mrb[10].mxu0  ;;  %v975_v40 = vpop.f32.mrb[9].mxu1 }
 0x109   :  { %v932_v41 = vpop.f32.mrb[11].mxu0  ;;  %v976_v42 = vadd.f32 %v975_v40, %v974_v37  ;;  %v977_v43 = vpop.f32.mrb[10].mxu1 }
 0x10a   :  { %v553_v44 = vadd.f32 %v930_v38, %v1375_v3  ;;  %v933_v45 = vadd.f32 %v932_v41, %v931_v39  ;;  %v978_v46 = vpop.f32.mrb[11].mxu1 }
 0x10b   :  { %v979_v47 = vadd.f32 %v978_v46, %v977_v43 }
 0x10c   :  { %v556_v48 = vadd.f32 %v933_v45, %v1375_v3  ;;  %v1391_v49 = vadd.f32 %v976_v42, %v553_v44 }
 0x10e   :  { %v934_v50 = vpop.f32.mrb[12].mxu0  ;;  %v1393_v51 = vadd.f32 %v979_v47, %v556_v48 }
 0x10f   :  { %v935_v52 = vpop.f32.mrb[13].mxu0  ;;  %v980_v53 = vpop.f32.mrb[12].mxu1 }
 0x110   :  { %v936_v54 = vadd.f32 %v935_v52, %v934_v50  ;;  %v937_v55 = vpop.f32.mrb[14].mxu0  ;;  %v981_v56 = vpop.f32.mrb[13].mxu1 }
 0x111   :  { %v938_v57 = vpop.f32.mrb[15].mxu0  ;;  %v982_v58 = vadd.f32 %v981_v56, %v980_v53  ;;  %v983_v59 = vpop.f32.mrb[14].mxu1 }
 0x112   :  { %v561_v60 = vadd.f32 %v936_v54, %v1375_v3  ;;  %v939_v61 = vadd.f32 %v938_v57, %v937_v55  ;;  %v984_v62 = vpop.f32.mrb[15].mxu1 }
 0x113   :  { %v985_v63 = vadd.f32 %v984_v62, %v983_v59 }
 0x114   :  { %v564_v0 = vadd.f32 %v939_v61, %v1375_v3  ;;  %v634_v1 = vadd.f32 %v982_v58, %v561_v60 }
 0x116   :  { %v940_v2 = vpop.f32.mrb[16].mxu0  ;;  %v637_v4 = vadd.f32 %v985_v63, %v564_v0 }
 0x117   :  { %v941_v5 = vpop.f32.mrb[17].mxu0  ;;  %v986_v6 = vpop.f32.mrb[16].mxu1 }
 0x118   :  { %v942_v7 = vadd.f32 %v941_v5, %v940_v2  ;;  %v943_v8 = vpop.f32.mrb[18].mxu0  ;;  %v987_v9 = vpop.f32.mrb[17].mxu1 }
 0x119   :  { %v944_v10 = vpop.f32.mrb[19].mxu0  ;;  %v988_v11 = vadd.f32 %v987_v9, %v986_v6  ;;  %v989_v12 = vpop.f32.mrb[18].mxu1 }
 0x11a   :  { %v569_v13 = vadd.f32 %v942_v7, %v1375_v3  ;;  %v945_v14 = vadd.f32 %v944_v10, %v943_v8  ;;  %v990_v15 = vpop.f32.mrb[19].mxu1 }
 0x11b   :  { %v991_v16 = vadd.f32 %v990_v15, %v989_v12 }
 0x11c   :  { %v572_v18 = vadd.f32 %v945_v14, %v1375_v3  ;;  %v642_v20 = vadd.f32 %v988_v11, %v569_v13 }
 0x11e   :  { %v682_v21 = vpop.f32.mrb[20].mxu0  ;;  %v645_v22 = vadd.f32 %v991_v16, %v572_v18 }
 0x11f   :  { %v683_v23 = vadd.f32 %v682_v21, %v1379_v17  ;;  %v706_v24 = vpop.f32.mrb[20].mxu1  ;;  %v1023_v25 = vpop.f32.mrb[21].mxu0 }
 0x120   :  { %v707_v26 = vadd.f32 %v706_v24, %v634_v1  ;;  %v1035_v27 = vpop.f32.mrb[21].mxu1  ;;  %v685_v28 = vpop.f32.mrb[22].mxu0 }
 0x121   :  { %v686_v29 = vadd.f32 %v685_v28, %v1381_v19  ;;  %v709_v30 = vpop.f32.mrb[22].mxu1  ;;  %v1024_v31 = vpop.f32.mrb[23].mxu0  ;;  %v721_v36 = vmax.f32 %v683_v23, 0.0 }
 0x122   :  { %v710_v32 = vadd.f32 %v709_v30, %v637_v4  ;;  %v1036_v34 = vpop.f32.mrb[23].mxu1  ;;  %v727_v38 = vmax.f32 %v707_v26, 0.0 }
 0x123   :  { %v722_v37 = vmax.f32 %v686_v29, 0.0 }
 0x124   :  { %v728_v3 = vmax.f32 %v710_v32, 0.0 }
 0x125   :  { %v874_v39 = vpack.c.bf16 %v722_v37, %v721_v36 }
 0x126   :  { %v889_v40 = vpack.c.bf16 %v728_v3, %v727_v38  ;;  %v690_v41 = vpop.f32.mrb[24].mxu0 }
 0x127   :  { %875 = vst [vmem:[%s1423_s3] sm:$0xff] %v874_v39   ;;  %v691_v17 = vadd.f32 %v690_v41, %v1385_v33  ;;  %v714_v42 = vpop.f32.mrb[24].mxu1  ;;  %v1027_v43 = vpop.f32.mrb[25].mxu0 }
 0x128   :  { %898 = vst [vmem:[%s1423_s3 + $0x18] sm:$0xff] %v889_v40   ;;  %v715_v19 = vadd.f32 %v714_v42, %v642_v20  ;;  %v1039_v44 = vpop.f32.mrb[25].mxu1  ;;  %v693_v45 = vpop.f32.mrb[26].mxu0 }
 0x129   :  { %v694_v46 = vadd.f32 %v693_v45, %v1387_v35  ;;  %v717_v47 = vpop.f32.mrb[26].mxu1  ;;  %v1028_v48 = vpop.f32.mrb[27].mxu0  ;;  %v723_v53 = vmax.f32 %v691_v17, 0.0 }
 0x12a   :  { %v718_v50 = vadd.f32 %v717_v47, %v645_v22  ;;  %v1040_v52 = vpop.f32.mrb[27].mxu1  ;;  %v729_v55 = vmax.f32 %v715_v19, 0.0 }
 0x12b   :  { %v724_v54 = vmax.f32 %v694_v46, 0.0 }
 0x12c   :  { %v730_v56 = vmax.f32 %v718_v50, 0.0 }
 0x12d   :  { %v879_v33 = vpack.c.bf16 %v724_v54, %v723_v53 }
 0x12e   :  { %v894_v57 = vpack.c.bf16 %v730_v56, %v729_v55  ;;  %v698_v58 = vpop.f32.mrb[28].mxu0 }
 0x12f   :  { %896 = vst [vmem:[%s1423_s3 + $0x8] sm:$0xff] %v879_v33   ;;  %v699_v59 = vadd.f32 %v698_v58, %v1391_v49  ;;  %v1031_v60 = vpop.f32.mrb[29].mxu0 }
 0x130   :  { %899 = vst [vmem:[%s1423_s3 + $0x20] sm:$0xff] %v894_v57   ;;  %v701_v35 = vpop.f32.mrb[30].mxu0 }
 0x131   :  { %v702_v61 = vadd.f32 %v701_v35, %v1393_v51  ;;  %v1032_v62 = vpop.f32.mrb[31].mxu0  ;;  %v725_v63 = vmax.f32 %v699_v59, 0.0 }
 0x133   :  { %v726_v0 = vmax.f32 %v702_v61, 0.0 }
 0x135   :  { %v884_v1 = vpack.c.bf16 %v726_v0, %v725_v63 }
 0x137   :  { %897 = vst [vmem:[%s1423_s3 + $0x10] sm:$0xff] %v884_v1  }

// kernel: pspnet_forward.33
= control target key start
LH: loop header
LB: loop body
LE: loop exit
PB: predicated region body
PF: predicated region fallthrough
CT: control target
= control target key end

     0   :  { %v396_v0 = vmov 0.0   ;;  %vm397_vm0 = vmmov 0   ;;  %s480_s1 = inlined_call_operand.vmem [shape: bf16[128,128], index: 1, kind: input, shape index: {}]   ;;  %s481_s0 = inlined_call_operand.vmem [shape: bf16[80,128], index: 0, kind: input, shape index: {}]   ;;  %s482_s2 = inlined_call_operand.vmem [shape: f32[1,128], index: 2, kind: input, shape index: {}]   ;;  %s483_s3 = inlined_call_operand.vmem [shape: bf16[80,128], index: 3, kind: output, shape index: {}]  }
   0x1   :  { %329 = vmatprep.subr.bf16.mxu0 %v396_v0  ;;  %v383_v1 = vld [vmem:[%s480_s1] sm:$0xff]   ;;  %365 = vmatprep.subr.bf16.mxu1 %v396_v0  ;;  %v384_v2 = vld [vmem:[%s480_s1 + $0x8] sm:$0xff]   ;;  %v385_v3 = vld [vmem:[%s480_s1 + $0x10] sm:$0xff]  }
   0x2   :  { %345 = vmatprep.mubr.msk.bf16.mxu0 %vm397_vm0, %v396_v0  ;;  %357 = vmatprep.mubr.msk.bf16.mxu1 %vm397_vm0, %v396_v0  ;;  %v386_v4 = vld [vmem:[%s480_s1 + $0x18] sm:$0xff]   ;;  %v387_v5 = vld [vmem:[%s480_s1 + $0x20] sm:$0xff]   ;;  %v388_v6 = vld [vmem:[%s480_s1 + $0x28] sm:$0xff]  }
   0x3   :  { %330 = vmatpush3.bf16.msra.mxu0 %v383_v1  ;;  %373 = vmatpush3.bf16.msra.mxu1 %v383_v1  ;;  %v389_v7 = vld [vmem:[%s480_s1 + $0x30] sm:$0xff]   ;;  %v390_v8 = vld [vmem:[%s480_s1 + $0x38] sm:$0xff]   ;;  %v391_v9 = vld [vmem:[%s481_s0] sm:$0xff]  }
   0x4   :  { %331 = vmatprep.subr.bf16.mxu0 %v396_v0  ;;  %366 = vmatprep.subr.bf16.mxu1 %v396_v0  ;;  %v392_v10 = vld [vmem:[%s481_s0 + $0x18] sm:$0xff]   ;;  %v393_v11 = vld [vmem:[%s481_s0 + $0x8] sm:$0xff]   ;;  %v394_v12 = vld [vmem:[%s481_s0 + $0x20] sm:$0xff]  }
   0x5   :  { %v395_v13 = vld [vmem:[%s481_s0 + $0x10] sm:$0xff]   ;;  %v253_v14 = vld [vmem:[%s482_s2] ss:$0 sm:$0xff] }
   0x7   :  { %332 = vmatpush3.bf16.msra.mxu0 %v384_v2  ;;  %374 = vmatpush3.bf16.msra.mxu1 %v384_v2 }
   0x8   :  { %333 = vmatprep.subr.bf16.mxu0 %v396_v0  ;;  %367 = vmatprep.subr.bf16.mxu1 %v396_v0 }
   0xb   :  { %334 = vmatpush3.bf16.msra.mxu0 %v385_v3  ;;  %375 = vmatpush3.bf16.msra.mxu1 %v385_v3 }
   0xc   :  { %335 = vmatprep.subr.bf16.mxu0 %v396_v0  ;;  %368 = vmatprep.subr.bf16.mxu1 %v396_v0 }
   0xf   :  { %336 = vmatpush3.bf16.msra.mxu0 %v386_v4  ;;  %376 = vmatpush3.bf16.msra.mxu1 %v386_v4 }
  0x10   :  { %337 = vmatprep.subr.bf16.mxu0 %v396_v0  ;;  %369 = vmatprep.subr.bf16.mxu1 %v396_v0 }
  0x13   :  { %338 = vmatpush3.bf16.msra.mxu0 %v387_v5  ;;  %377 = vmatpush3.bf16.msra.mxu1 %v387_v5 }
  0x14   :  { %339 = vmatprep.subr.bf16.mxu0 %v396_v0  ;;  %370 = vmatprep.subr.bf16.mxu1 %v396_v0 }
  0x17   :  { %340 = vmatpush3.bf16.msra.mxu0 %v388_v6  ;;  %378 = vmatpush3.bf16.msra.mxu1 %v388_v6 }
  0x18   :  { %341 = vmatprep.subr.bf16.mxu0 %v396_v0  ;;  %371 = vmatprep.subr.bf16.mxu1 %v396_v0 }
  0x1b   :  { %342 = vmatpush3.bf16.msra.mxu0 %v389_v7  ;;  %379 = vmatpush3.bf16.msra.mxu1 %v389_v7 }
  0x1c   :  { %343 = vmatprep.subr.bf16.mxu0 %v396_v0  ;;  %372 = vmatprep.subr.bf16.mxu1 %v396_v0 }
  0x1f   :  { %344 = vmatpush3.bf16.msra.mxu0 %v390_v8  ;;  %380 = vmatpush3.bf16.msra.mxu1 %v390_v8 }
  0x22   :  { %346 = vmatmul.mubr.bf16.vlgmr.msra.gmra.mrb[0].mxu0 %v391_v9  ;;  %358 = vmatmul.mubr.bf16.vlgmr.msra.gmra.mrb[0].mxu1 %v392_v10 }
  0x23   :  { %349 = vmatprep.mubr.msk.bf16.mxu0 %vm397_vm0, %v396_v0  ;;  %361 = vmatprep.mubr.msk.bf16.mxu1 %vm397_vm0, %v396_v0 }
  0x2a   :  { %350 = vmatmul.mubr.bf16.gmra.mrb[4].mxu0 %v393_v11  ;;  %362 = vmatmul.mubr.bf16.gmra.mrb[4].mxu1 %v394_v12 }
  0x2b   :  { %353 = vmatprep.mubr.msk.bf16.mxu0 %vm397_vm0, %v396_v0 }
  0x32   :  { %354 = vmatmul.mubr.bf16.gmra.mrb[8].mxu0 %v395_v13 }
  0xf5   :  { %v160_v15 = vpop.f32.mrb[0].mxu0  ;;  %v184_v16 = vpop.f32.mrb[0].mxu1 }
  0xf6   :  { %v347_v17 = vpop.f32.mrb[1].mxu0  ;;  %v185_v18 = vadd.f32 %v253_v14, %v184_v16  ;;  %v359_v19 = vpop.f32.mrb[1].mxu1  ;;  %v161_v22 = vadd.f32 %v253_v14, %v160_v15 }
  0xf7   :  { %v163_v20 = vpop.f32.mrb[2].mxu0  ;;  %v187_v21 = vpop.f32.mrb[2].mxu1 }
  0xf8   :  { %v164_v23 = vadd.f32 %v253_v14, %v163_v20  ;;  %v348_v24 = vpop.f32.mrb[3].mxu0  ;;  %v188_v25 = vadd.f32 %v253_v14, %v187_v21  ;;  %v360_v26 = vpop.f32.mrb[3].mxu1 }
  0xfa   :  { %v290_v27 = vpack.c.bf16 %v164_v23, %v161_v22  ;;  %v305_v28 = vpack.c.bf16 %v188_v25, %v185_v18 }
  0xfc   :  { %291 = vst [vmem:[%s483_s3] sm:$0xff] %v290_v27   ;;  %314 = vst [vmem:[%s483_s3 + $0x18] sm:$0xff] %v305_v28  }
  0xfd   :  { %v168_v29 = vpop.f32.mrb[4].mxu0  ;;  %v192_v30 = vpop.f32.mrb[4].mxu1 }
  0xfe   :  { %v351_v31 = vpop.f32.mrb[5].mxu0  ;;  %v193_v32 = vadd.f32 %v253_v14, %v192_v30  ;;  %v363_v33 = vpop.f32.mrb[5].mxu1  ;;  %v169_v36 = vadd.f32 %v253_v14, %v168_v29 }
  0xff   :  { %v171_v34 = vpop.f32.mrb[6].mxu0  ;;  %v195_v35 = vpop.f32.mrb[6].mxu1 }
 0x100   :  { %v172_v37 = vadd.f32 %v253_v14, %v171_v34  ;;  %v352_v38 = vpop.f32.mrb[7].mxu0  ;;  %v196_v39 = vadd.f32 %v253_v14, %v195_v35  ;;  %v364_v40 = vpop.f32.mrb[7].mxu1 }
 0x102   :  { %v295_v41 = vpack.c.bf16 %v172_v37, %v169_v36  ;;  %v310_v42 = vpack.c.bf16 %v196_v39, %v193_v32 }
 0x104   :  { %312 = vst [vmem:[%s483_s3 + $0x8] sm:$0xff] %v295_v41   ;;  %315 = vst [vmem:[%s483_s3 + $0x20] sm:$0xff] %v310_v42  }
 0x105   :  { %v176_v43 = vpop.f32.mrb[8].mxu0 }
 0x106   :  { %v355_v44 = vpop.f32.mrb[9].mxu0  ;;  %v177_v46 = vadd.f32 %v253_v14, %v176_v43 }
 0x107   :  { %v179_v45 = vpop.f32.mrb[10].mxu0 }
 0x108   :  { %v180_v47 = vadd.f32 %v253_v14, %v179_v45  ;;  %v356_v48 = vpop.f32.mrb[11].mxu0 }
 0x10a   :  { %v300_v49 = vpack.c.bf16 %v180_v47, %v177_v46 }
 0x10c   :  { %313 = vst [vmem:[%s483_s3 + $0x10] sm:$0xff] %v300_v49  }

// kernel: pspnet_forward.35
= control target key start
LH: loop header
LB: loop body
LE: loop exit
PB: predicated region body
PF: predicated region fallthrough
CT: control target
= control target key end

     0   :  { %s1779_s12 = smov 0   ;;  %s1781_s13 = smov 0   ;;  %s2033_s0 = inlined_call_operand.vmem [shape: bf16[80,1280], index: 0, kind: input, shape index: {}]   ;;  %s2034_s1 = inlined_call_operand.vmem [shape: bf16[1280,128], index: 1, kind: input, shape index: {}]   ;;  %s2035_s2 = inlined_call_operand.vmem [shape: f32[1,128], index: 2, kind: input, shape index: {}]   ;;  %s2036_s3 = inlined_call_operand.vmem [shape: bf16[80,128], index: 3, kind: output, shape index: {}]  }
   0x1   :  { %s1783_s14 = smov 0   ;;  %s1785_s15 = smov 0  }
   0x2   :  { %s1787_s16 = smov 0  }
   0x3 LB: > { %s25_s17 = sadd.s32 1, %s1750_s15  ;;  %p48_p1 = scmp.ne.s32.totalorder %s1742_s13, %s1738_s12  ;;  %s1754_s16 = sphi %s1787_s16, %s13_s16   ;;  %s1750_s15 = sphi %s1785_s15, %s2040_s15   ;;  %s1746_s14 = sphi %s1783_s14, %s2039_s14   ;;  %s1742_s13 = sphi %s1781_s13, %s2038_s13   ;;  %s1738_s12 = sphi %s1779_s12, %s2037_s12  }
   0x4   : > { %p26_p0 = scmp.ge.s32.totalorder %s25_s17, 2  ;;  %p49_p2 = scmp.eq.s32.totalorder %s1754_s16, 0 }
   0x5   : > { %s41_s19 = sadd.s32 1, %s1742_s13  ;;  %p1293_p5 = scmp.ge.s32.totalorder %s1754_s16, 2 }
   0x6   : > { %s2042_s17 = smov (%p26_p0, %s25_s17), 0  ;;  %p50_p3 = por %p49_p2, %p48_p1 }
   0x7   : > { %s37_s18 = ssub.s32 %s1750_s15, %s2042_s17  ;;  %162 = sbr.rel (%p1293_p5) target bundleno = 35 (0x23), region = 20 }
   0x8   : > { %p39_p4 = scmp.eq.s32.totalorder %s37_s18, 0 }
   0xa   : > { %s1814_s20 = scalar_select %p39_p4, %s1742_s13, %s41_s19  }
   0xe   : > { %165 = sbr.rel (!%p50_p3) target bundleno = 35 (0x23), region = 24  ;;  %s167_s21 = sand.u32 (%p50_p3), 1, %s1742_s13  }
   0xf   : > { %s1399_s22 = smul.u32 (%p50_p3), 20, %s1750_s15 }
  0x10   : > { %s1596_s23 = smul.u32 (%p50_p3), 200, %s167_s21 }
  0x11   : > { %s1822_s26 = scalar_lea.vmem (%p50_p3), %s2033_s0, %s1399_s22 }
  0x12   : > { %v190_v0 = vld [vmem:[%s1822_s26] sm:$0xff] (%p50_p3)  ;;  %v192_v1 = vld [vmem:[%s1822_s26 + $0x8] sm:$0xff] (%p50_p3)  ;;  %s1827_s27 = scalar_lea.vmem (%p50_p3), [#allocation3], %s1596_s23  ;;  %v196_v3 = vld [vmem:[%s1822_s26 + $0x30] sm:$0xff] (%p50_p3) }
  0x13   : > { %v194_v2 = vld [vmem:[%s1822_s26 + $0x28] sm:$0xff] (%p50_p3)  ;;  %191 = vst [vmem:[%s1827_s27] sm:$0xff] (%p50_p3), %v190_v0  ;;  %193 = vst [vmem:[%s1827_s27 + $0x8] sm:$0xff] (%p50_p3), %v192_v1  ;;  %v198_v4 = vld [vmem:[%s1822_s26 + $0x50] sm:$0xff] (%p50_p3) }
  0x14   : > { %195 = vst [vmem:[%s1827_s27 + $0x14] sm:$0xff] (%p50_p3), %v194_v2  ;;  %v200_v5 = vld [vmem:[%s1822_s26 + $0x58] sm:$0xff] (%p50_p3)  ;;  %197 = vst [vmem:[%s1827_s27 + $0x1c] sm:$0xff] (%p50_p3), %v196_v3  ;;  %v204_v7 = vld [vmem:[%s1822_s26 + $0x80] sm:$0xff] (%p50_p3) }
  0x15   : > { %199 = vst [vmem:[%s1827_s27 + $0x28] sm:$0xff] %v198_v4  ;;  %201 = vst [vmem:[%s1827_s27 + $0x30] sm:$0xff] %v200_v5  ;;  %v202_v6 = vld [vmem:[%s1822_s26 + $0x78] sm:$0xff]  ;;  %v206_v8 = vld [vmem:[%s1822_s26 + $0xa0] sm:$0xff] }
  0x16   : > { %203 = vst [vmem:[%s1827_s27 + $0x3c] sm:$0xff] %v202_v6  ;;  %205 = vst [vmem:[%s1827_s27 + $0x44] sm:$0xff] %v204_v7  ;;  %v208_v9 = vld [vmem:[%s1822_s26 + $0xa8] sm:$0xff]  ;;  %v212_v11 = vld [vmem:[%s1822_s26 + $0xd0] sm:$0xff] }
  0x17   : > { %207 = vst [vmem:[%s1827_s27 + $0x50] sm:$0xff] %v206_v8  ;;  %v210_v10 = vld [vmem:[%s1822_s26 + $0xc8] sm:$0xff]  ;;  %209 = vst [vmem:[%s1827_s27 + $0x58] sm:$0xff] %v208_v9  ;;  %v214_v12 = vld [vmem:[%s1822_s26 + $0xf0] sm:$0xff] }
  0x18   : > { %211 = vst [vmem:[%s1827_s27 + $0x64] sm:$0xff] %v210_v10  ;;  %213 = vst [vmem:[%s1827_s27 + $0x6c] sm:$0xff] %v212_v11  ;;  %v216_v13 = vld [vmem:[%s1822_s26 + $0xf8] sm:$0xff]  ;;  %v220_v15 = vld [vmem:[%s1822_s26 + $0x120] sm:$0xff] }
  0x19   : > { %v218_v14 = vld [vmem:[%s1822_s26 + $0x118] sm:$0xff]  ;;  %215 = vst [vmem:[%s1827_s27 + $0x78] sm:$0xff] %v214_v12  ;;  %217 = vst [vmem:[%s1827_s27 + $0x80] sm:$0xff] %v216_v13  ;;  %v222_v16 = vld [vmem:[%s1822_s26 + $0x140] sm:$0xff] }
  0x1a   : > { %219 = vst [vmem:[%s1827_s27 + $0x8c] sm:$0xff] %v218_v14  ;;  %v224_v17 = vld [vmem:[%s1822_s26 + $0x148] sm:$0xff]  ;;  %221 = vst [vmem:[%s1827_s27 + $0x94] sm:$0xff] %v220_v15  ;;  %v228_v19 = vld [vmem:[%s1822_s26 + $0x170] sm:$0xff] }
  0x1b   : > { %223 = vst [vmem:[%s1827_s27 + $0xa0] sm:$0xff] %v222_v16  ;;  %225 = vst [vmem:[%s1827_s27 + $0xa8] sm:$0xff] %v224_v17  ;;  %v226_v18 = vld [vmem:[%s1822_s26 + $0x168] sm:$0xff]  ;;  %v1295_v20 = vld [vmem:[%s1822_s26 + $0x10] sm:$0xf] }
  0x1c   : > { %227 = vst [vmem:[%s1827_s27 + $0xb4] sm:$0xff] %v226_v18  ;;  %229 = vst [vmem:[%s1827_s27 + $0xbc] sm:$0xff] %v228_v19  ;;  %v1297_v21 = vld [vmem:[%s1822_s26 + $0x38] sm:$0xf]  ;;  %v1299_v22 = vld [vmem:[%s1822_s26 + $0x60] sm:$0xf] }
  0x1d   : > { %1296 = vst [vmem:[%s1827_s27 + $0x10] sm:$0xf] %v1295_v20  ;;  %v1301_v23 = vld [vmem:[%s1822_s26 + $0x88] sm:$0xf]  ;;  %1298 = vst [vmem:[%s1827_s27 + $0x24] sm:$0xf] %v1297_v21 }
  0x1e   : > { %1300 = vst [vmem:[%s1827_s27 + $0x38] sm:$0xf] %v1299_v22  ;;  %1302 = vst [vmem:[%s1827_s27 + $0x4c] sm:$0xf] %v1301_v23  ;;  %v1303_v24 = vld [vmem:[%s1822_s26 + $0xb0] sm:$0xf] }
  0x1f   : > { %v1305_v25 = vld [vmem:[%s1822_s26 + $0xd8] sm:$0xf]  ;;  %v1307_v26 = vld [vmem:[%s1822_s26 + $0x100] sm:$0xf]  ;;  %1304 = vst [vmem:[%s1827_s27 + $0x60] sm:$0xf] %v1303_v24 }
  0x20   : > { %1306 = vst [vmem:[%s1827_s27 + $0x74] sm:$0xf] %v1305_v25  ;;  %1308 = vst [vmem:[%s1827_s27 + $0x88] sm:$0xf] %v1307_v26  ;;  %v1309_v27 = vld [vmem:[%s1822_s26 + $0x128] sm:$0xf] }
  0x21   : > { %v1311_v28 = vld [vmem:[%s1822_s26 + $0x150] sm:$0xf]  ;;  %v1313_v29 = vld [vmem:[%s1822_s26 + $0x178] sm:$0xf]  ;;  %1310 = vst [vmem:[%s1827_s27 + $0x9c] sm:$0xf] %v1309_v27 }
  0x22   : > { %1312 = vst [vmem:[%s1827_s27 + $0xb0] sm:$0xf] %v1311_v28  ;;  %1314 = vst [vmem:[%s1827_s27 + $0xc4] sm:$0xf] %v1313_v29 }
  0x23 PF: > { %p1315_p6 = scmp.ge.s32.totalorder %s1754_s16, 1  ;;  %p273_p7 = scmp.lt.s32.totalorder %s1754_s16, 3 }
  0x25   : > { %p274_p8 = pnand %p1315_p6, %p273_p7 }
  0x26   : > { %s280_s28 = sand.u32 (!%p274_p8), 1, %s1738_s12   ;;  %s319_s29 = smul.u32 (!%p274_p8), 80, %s1746_s14 }
  0x27   : > { %277 = sbr.rel (%p274_p8) target bundleno = 376 (0x178), region = 54  ;;  %p1317_p10 = scmp.ne.s32.totalorder (!%p274_p8), %s1746_s14, 0 }
  0x28   : > { %s1597_s30 = smul.u32 (!%p274_p8), 200, %s280_s28  ;;  %p320_p9 = scmp.lt.s32.totalorder (!%p274_p8), %s319_s29, 159 }
  0x2a   : > { %s1895_s8 = scalar_lea.vmem (!%p274_p8), [#allocation3], %s1597_s30 }
  0x2e   : > { %s2044_s29 = smov (!%p320_p9, %s319_s29), 159  ;;  %344 = sbr.rel (%p1317_p10) target bundleno = 53 (0x35), region = 62 }
  0x2f   : > { %s1316_s4 = sshll.u32 %s2044_s29, 2  ;;  %v1756_v30 = vmov (!%p1317_p10), 0.0  }
  0x30   : > { %s1893_s7 = scalar_lea.vmem %s2034_s1, %s1316_s4  ;;  %345 = vst [vmem:[#allocation2] sm:$0xff] (!%p1317_p10), %v1756_v30  ;;  %346 = vst [vmem:[#allocation2 + $0x8] sm:$0xff] (!%p1317_p10), %v1756_v30 }
  0x31   : > { %347 = vst [vmem:[#allocation2 + $0x10] sm:$0xff] (!%p1317_p10), %v1756_v30  ;;  %348 = vst [vmem:[#allocation2 + $0x18] sm:$0xff] (!%p1317_p10), %v1756_v30 }
  0x32   : > { %349 = vst [vmem:[#allocation2 + $0x20] sm:$0xff] (!%p1317_p10), %v1756_v30  ;;  %350 = vst [vmem:[#allocation2 + $0x28] sm:$0xff] (!%p1317_p10), %v1756_v30 }
  0x33   : > { %351 = vst [vmem:[#allocation2 + $0x30] sm:$0xff] (!%p1317_p10), %v1756_v30  ;;  %352 = vst [vmem:[#allocation2 + $0x38] sm:$0xff] (!%p1317_p10), %v1756_v30 }
  0x34   : > { %353 = vst [vmem:[#allocation2 + $0x40] sm:$0xff] (!%p1317_p10), %v1756_v30  ;;  %354 = vst [vmem:[#allocation2 + $0x48] sm:$0xff] (!%p1317_p10), %v1756_v30 }
  0x35 PF: > { %v1641_v31 = vld [vmem:[%s1893_s7 + $0x40] sm:$0xff]   ;;  %v1645_v35 = vld [vmem:[%s1893_s7 + $0x48] sm:$0xff]   ;;  %v1649_v39 = vld [vmem:[%s1893_s7 + $0x50] sm:$0xff]   ;;  %v1757_v1 = vmov 0.0   ;;  %vm1758_vm0 = vmmov 0   ;;  %p1383_p11 = scmp.ne.s32.totalorder %s1746_s14, 1 }
  0x36   : > { %v1642_v32 = vld [vmem:[%s1893_s7 + $0xc0] sm:$0xff]   ;;  %1439 = vmatprep.subr.bf16.mxu0 %v1641_v31  ;;  %v1646_v36 = vld [vmem:[%s1893_s7 + $0xc8] sm:$0xff]   ;;  %v1650_v40 = vld [vmem:[%s1893_s7 + $0xd0] sm:$0xff]  }
  0x37   : > { %v1643_v33 = vld [vmem:[%s1893_s7] sm:$0xff]   ;;  %1485 = vmatprep.subr.bf16.mxu1 %v1642_v32  ;;  %v1647_v37 = vld [vmem:[%s1893_s7 + $0x8] sm:$0xff]   ;;  %v1651_v41 = vld [vmem:[%s1893_s7 + $0x10] sm:$0xff]  }
  0x38   : > { %v1644_v34 = vld [vmem:[%s1893_s7 + $0x80] sm:$0xff]   ;;  %1440 = vmatpush3.bf16.msra.mxu0 %v1643_v33  ;;  %v1648_v38 = vld [vmem:[%s1893_s7 + $0x88] sm:$0xff]   ;;  %v1652_v42 = vld [vmem:[%s1893_s7 + $0x90] sm:$0xff]  }
  0x39   : > { %1486 = vmatpush3.bf16.msra.mxu1 %v1644_v34  ;;  %1441 = vmatprep.subr.bf16.mxu0 %v1645_v35  ;;  %v1653_v43 = vld [vmem:[%s1893_s7 + $0x58] sm:$0xff]   ;;  %v1657_v47 = vld [vmem:[%s1893_s7 + $0x60] sm:$0xff]   ;;  %v1661_v51 = vld [vmem:[%s1893_s7 + $0x68] sm:$0xff]  }
  0x3a   : > { %1487 = vmatprep.subr.bf16.mxu1 %v1646_v36  ;;  %v1654_v44 = vld [vmem:[%s1893_s7 + $0xd8] sm:$0xff]   ;;  %v1658_v48 = vld [vmem:[%s1893_s7 + $0xe0] sm:$0xff]   ;;  %v1662_v52 = vld [vmem:[%s1893_s7 + $0xe8] sm:$0xff]  }
  0x3b   : > { %v1655_v45 = vld [vmem:[%s1893_s7 + $0x18] sm:$0xff]   ;;  %v1659_v49 = vld [vmem:[%s1893_s7 + $0x20] sm:$0xff]   ;;  %v1663_v53 = vld [vmem:[%s1893_s7 + $0x28] sm:$0xff]  }
  0x3c   : > { %1442 = vmatpush3.bf16.msra.mxu0 %v1647_v37  ;;  %v1656_v46 = vld [vmem:[%s1893_s7 + $0x98] sm:$0xff]   ;;  %v1660_v50 = vld [vmem:[%s1893_s7 + $0xa0] sm:$0xff]   ;;  %v1664_v54 = vld [vmem:[%s1893_s7 + $0xa8] sm:$0xff]  }
  0x3d   : > { %1488 = vmatpush3.bf16.msra.mxu1 %v1648_v38  ;;  %1443 = vmatprep.subr.bf16.mxu0 %v1649_v39  ;;  %v1665_v55 = vld [vmem:[%s1893_s7 + $0x70] sm:$0xff]   ;;  %v1669_v59 = vld [vmem:[%s1893_s7 + $0x78] sm:$0xff]   ;;  %v1679_v4 = vld [vmem:[%s1893_s7 + $0x100] sm:$0xff]  }
  0x3e   : > { %1489 = vmatprep.subr.bf16.mxu1 %v1650_v40  ;;  %v1666_v56 = vld [vmem:[%s1893_s7 + $0xf0] sm:$0xff]   ;;  %v1670_v60 = vld [vmem:[%s1893_s7 + $0xf8] sm:$0xff]   ;;  %v1680_v5 = vld [vmem:[%s1893_s7 + $0x108] sm:$0xff]  }
  0x3f   : > { %v1667_v57 = vld [vmem:[%s1893_s7 + $0x30] sm:$0xff]   ;;  %v1671_v61 = vld [vmem:[%s1893_s7 + $0x38] sm:$0xff]   ;;  %v1695_v16 = vld [vmem:[%s1893_s7 + $0x120] sm:$0xff]  }
  0x40   : > { %1444 = vmatpush3.bf16.msra.mxu0 %v1651_v41  ;;  %v1668_v58 = vld [vmem:[%s1893_s7 + $0xb0] sm:$0xff]   ;;  %v1672_v62 = vld [vmem:[%s1893_s7 + $0xb8] sm:$0xff]   ;;  %v1702_v19 = vld [vmem:[%s1893_s7 + $0x128] sm:$0xff]  }
  0x41   : > { %1490 = vmatpush3.bf16.msra.mxu1 %v1652_v42  ;;  %1445 = vmatprep.subr.bf16.mxu0 %v1653_v43  ;;  %v1673_v63 = vld [vmem:[%s1895_s8] ss:$20 sps:$4 sm:$0xff]   ;;  %v1675_v0 = vld [vmem:[%s1895_s8 + $0x4] ss:$20 sps:$4 sm:$0xff]   ;;  %v1676_v2 = vld [vmem:[%s1895_s8 + $0x8] ss:$20 sps:$4 sm:$0xff]  }
  0x42   : > { %1491 = vmatprep.subr.bf16.mxu1 %v1654_v44  ;;  %v1678_v3 = vld [vmem:[%s1895_s8 + $0xc] ss:$20 sps:$4 sm:$0xff]   ;;  %877 = vmatprep.mubr.bf16.mxu0 %v1675_v0  ;;  %v1683_v7 = vld [vmem:[%s1895_s8 + $0x34] ss:$20 sps:$4 sm:$0xff]   ;;  %v1686_v9 = vld [vmem:[%s1895_s8 + $0x30] ss:$20 sps:$4 sm:$0xff]  }
  0x43   : > { %950 = vmatprep.mubr.bf16.mxu1 %v1678_v3  ;;  %v1681_v6 = vld [vmem:[%s1895_s8 + $0x2c] ss:$20 sps:$4 sm:$0xff]   ;;  %v1685_v8 = vld [vmem:[%s1895_s8 + $0x28] ss:$20 sps:$4 sm:$0xff]   ;;  %v1692_v14 = vld [vmem:[%s1895_s8 + $0x50] ss:$20 sps:$4 sm:$0xff]  }
  0x44   : > { %1446 = vmatpush3.bf16.msra.mxu0 %v1655_v45  ;;  %v1687_v10 = vld [vmem:[%s1893_s7 + $0x110] sm:$0xff]   ;;  %v1688_v11 = vld [vmem:[%s1895_s8 + $0x54] ss:$20 sps:$4 sm:$0xff]  }
  0x45   : > { %1492 = vmatpush3.bf16.msra.mxu1 %v1656_v46  ;;  %1447 = vmatprep.subr.bf16.mxu0 %v1657_v47  ;;  %v1690_v12 = vld [vmem:[%s1895_s8 + $0x5c] ss:$20 sps:$4 sm:$0xff]   ;;  %v1694_v13 = vld [vmem:[%s1893_s7 + $0x118] sm:$0xff]  }
  0x46   : > { %1493 = vmatprep.subr.bf16.mxu1 %v1658_v48  ;;  %v1693_v15 = vld [vmem:[%s1895_s8 + $0x58] ss:$20 sps:$4 sm:$0xff]   ;;  %v1696_v17 = vld [vmem:[%s1895_s8 + $0x7c] ss:$20 sps:$4 sm:$0xff]   ;;  %v1701_v21 = vld [vmem:[%s1895_s8 + $0x80] ss:$20 sps:$4 sm:$0xff]  }
  0x47   : > { %v1698_v18 = vld [vmem:[%s1895_s8 + $0x84] ss:$20 sps:$4 sm:$0xff]   ;;  %v1705_v23 = vld [vmem:[%s1895_s8 + $0xac] ss:$20 sps:$4 sm:$0xff]   ;;  %v1709_v27 = vld [vmem:[%s1895_s8 + $0xa8] ss:$20 sps:$4 sm:$0xff]  }
  0x48   : > { %1448 = vmatpush3.bf16.msra.mxu0 %v1659_v49  ;;  %v1700_v20 = vld [vmem:[%s1895_s8 + $0x78] ss:$20 sps:$4 sm:$0xff]   ;;  %v1708_v26 = vld [vmem:[%s1895_s8 + $0xa0] ss:$20 sps:$4 sm:$0xff]   ;;  %v1711_v28 = vld [vmem:[%s1895_s8 + $0x10] ss:$20 sps:$4 sm:$0xff]  }
  0x49   : > { %1494 = vmatpush3.bf16.msra.mxu1 %v1660_v50  ;;  %1449 = vmatprep.subr.bf16.mxu0 %v1661_v51  ;;  %v1703_v22 = vld [vmem:[%s1895_s8 + $0xa4] ss:$20 sps:$4 sm:$0xff]   ;;  %v1712_v29 = vld [vmem:[%s1895_s8 + $0x88] ss:$20 sps:$4 sm:$0xff]   ;;  %v1715_v32 = vld [vmem:[%s1895_s8 + $0x60] ss:$20 sps:$4 sm:$0xff]  }
  0x4a   : > { %1495 = vmatprep.subr.bf16.mxu1 %v1662_v52  ;;  %v1707_v24 = vld [vmem:[%s1893_s7 + $0x130] sm:$0xff]   ;;  %v1710_v25 = vld [vmem:[%s1893_s7 + $0x138] sm:$0xff]  }
  0x4b   : > { %v1713_v30 = vld [vmem:[%s1895_s8 + $0x38] ss:$20 sps:$4 sm:$0xff]   ;;  %v1714_v31 = vld [vmem:[%s1895_s8 + $0xb0] ss:$20 sps:$4 sm:$0xff]  }
  0x4c   : > { %1450 = vmatpush3.bf16.msra.mxu0 %v1663_v53 }
  0x4d   : > { %1496 = vmatpush3.bf16.msra.mxu1 %v1664_v54  ;;  %1451 = vmatprep.subr.bf16.mxu0 %v1665_v55 }
  0x4e   : > { %1497 = vmatprep.subr.bf16.mxu1 %v1666_v56 }
  0x50   : > { %1452 = vmatpush3.bf16.msra.mxu0 %v1667_v57 }
  0x51   : > { %1498 = vmatpush3.bf16.msra.mxu1 %v1668_v58  ;;  %1453 = vmatprep.subr.bf16.mxu0 %v1669_v59 }
  0x52   : > { %1499 = vmatprep.subr.bf16.mxu1 %v1670_v60 }
  0x54   : > { %1454 = vmatpush3.bf16.msra.mxu0 %v1671_v61 }
  0x55   : > { %1500 = vmatpush3.bf16.msra.mxu1 %v1672_v62  ;;  %1544 = vmatprep.subr.bf16.mxu0 %v1757_v1 }
  0x56   : > { %1580 = vmatprep.subr.bf16.mxu1 %v1757_v1 }
  0x57   : > { %878 = vmatmul.mubr.bf16.vlgmr.msra.gmra.mrb[0].mxu0 %v1673_v63 }
  0x58   : > { %951 = vmatmul.mubr.bf16.vlgmr.msra.gmra.mrb[0].mxu1 %v1676_v2  ;;  %1545 = vmatpush3.bf16.msra.mxu0 %v1679_v4 }
  0x59   : > { %1546 = vmatprep.subr.bf16.mxu0 %v1757_v1  ;;  %1588 = vmatpush3.bf16.msra.mxu1 %v1679_v4 }
  0x5a   : > { %885 = vmatprep.mubr.bf16.mxu0 %v1681_v6  ;;  %1581 = vmatprep.subr.bf16.mxu1 %v1757_v1 }
  0x5b   : > { %958 = vmatprep.mubr.bf16.mxu1 %v1683_v7 }
  0x5c   : > { %1547 = vmatpush3.bf16.msra.mxu0 %v1680_v5 }
  0x5d   : > { %1548 = vmatprep.subr.bf16.mxu0 %v1757_v1  ;;  %1589 = vmatpush3.bf16.msra.mxu1 %v1680_v5 }
  0x5e   : > { %1582 = vmatprep.subr.bf16.mxu1 %v1757_v1 }
  0x5f   : > { %886 = vmatmul.mubr.bf16.gmra.mrb[4].mxu0 %v1685_v8 }
  0x60   : > { %959 = vmatmul.mubr.bf16.gmra.mrb[4].mxu1 %v1686_v9  ;;  %1549 = vmatpush3.bf16.msra.mxu0 %v1687_v10 }
  0x61   : > { %893 = vmatprep.mubr.bf16.mxu0 %v1688_v11  ;;  %966 = vmatprep.mubr.bf16.mxu1 %v1690_v12 }
  0x62   : > { %1550 = vmatprep.subr.bf16.mxu0 %v1757_v1  ;;  %1590 = vmatpush3.bf16.msra.mxu1 %v1687_v10 }
  0x63   : > { %1583 = vmatprep.subr.bf16.mxu1 %v1757_v1 }
  0x64   : > { %1551 = vmatpush3.bf16.msra.mxu0 %v1694_v13 }
  0x65   : > { %1552 = vmatprep.subr.bf16.mxu0 %v1757_v1 }
  0x66   : > { %1591 = vmatpush3.bf16.msra.mxu1 %v1694_v13 }
  0x67   : > { %894 = vmatmul.mubr.bf16.gmra.mrb[8].mxu0 %v1692_v14  ;;  %1584 = vmatprep.subr.bf16.mxu1 %v1757_v1 }
  0x68   : > { %967 = vmatmul.mubr.bf16.gmra.mrb[8].mxu1 %v1693_v15  ;;  %1553 = vmatpush3.bf16.msra.mxu0 %v1695_v16 }
  0x69   : > { %901 = vmatprep.mubr.bf16.mxu0 %v1696_v17  ;;  %974 = vmatprep.mubr.bf16.mxu1 %v1698_v18 }
  0x6a   : > { %1592 = vmatpush3.bf16.msra.mxu1 %v1695_v16  ;;  %1554 = vmatprep.subr.bf16.mxu0 %v1757_v1 }
  0x6b   : > { %1585 = vmatprep.subr.bf16.mxu1 %v1757_v1 }
  0x6c   : > { %1555 = vmatpush3.bf16.msra.mxu0 %v1702_v19 }
  0x6d   : > { %1556 = vmatprep.subr.bf16.mxu0 %v1757_v1 }
  0x6e   : > { %1593 = vmatpush3.bf16.msra.mxu1 %v1702_v19 }
  0x6f   : > { %902 = vmatmul.mubr.bf16.gmra.mrb[12].mxu0 %v1700_v20  ;;  %1586 = vmatprep.subr.bf16.mxu1 %v1757_v1 }
  0x70   : > { %975 = vmatmul.mubr.bf16.gmra.mrb[12].mxu1 %v1701_v21  ;;  %909 = vmatprep.mubr.bf16.mxu0 %v1703_v22 }
  0x71   : > { %982 = vmatprep.mubr.bf16.mxu1 %v1705_v23  ;;  %1557 = vmatpush3.bf16.msra.mxu0 %v1707_v24 }
  0x72   : > { %1594 = vmatpush3.bf16.msra.mxu1 %v1707_v24  ;;  %1558 = vmatprep.subr.bf16.mxu0 %v1757_v1 }
  0x73   : > { %1587 = vmatprep.subr.bf16.mxu1 %v1757_v1 }
  0x75   : > { %1559 = vmatpush3.bf16.msra.mxu0 %v1710_v25 }
  0x76   : > { %1595 = vmatpush3.bf16.msra.mxu1 %v1710_v25 }
  0x77   : > { %910 = vmatmul.mubr.bf16.gmra.mrb[16].mxu0 %v1708_v26 }
  0x78   : > { %983 = vmatmul.mubr.bf16.gmra.mrb[16].mxu1 %v1709_v27  ;;  %1560 = vmatprep.mubr.msk.bf16.mxu0 %vm1758_vm0, %v1757_v1 }
  0x79   : > { %1572 = vmatprep.mubr.msk.bf16.mxu1 %vm1758_vm0, %v1757_v1 }
  0x7f   : > { %1561 = vmatmul.mubr.bf16.vlgmr.msra.gmra.mrb[20].mxu0 %v1711_v28 }
  0x80   : > { %1573 = vmatmul.mubr.bf16.vlgmr.msra.gmra.mrb[20].mxu1 %v1712_v29  ;;  %1564 = vmatprep.mubr.msk.bf16.mxu0 %vm1758_vm0, %v1757_v1 }
  0x81   : > { %1576 = vmatprep.mubr.msk.bf16.mxu1 %vm1758_vm0, %v1757_v1 }
  0x87   : > { %1565 = vmatmul.mubr.bf16.gmra.mrb[24].mxu0 %v1713_v30 }
  0x88   : > { %1577 = vmatmul.mubr.bf16.gmra.mrb[24].mxu1 %v1714_v31  ;;  %1568 = vmatprep.mubr.msk.bf16.mxu0 %vm1758_vm0, %v1757_v1 }
  0x8f   : > { %1569 = vmatmul.mubr.bf16.gmra.mrb[28].mxu0 %v1715_v32 }
 0x12a   : > { %v1455_v33 = vpop.f32.mrb[0].mxu0 }
 0x12b   : > { %v1501_v34 = vpop.f32.mrb[0].mxu1  ;;  %v1456_v35 = vpop.f32.mrb[1].mxu0 }
 0x12c   : > { %v1457_v36 = vadd.f32 %v1456_v35, %v1455_v33  ;;  %v1502_v37 = vpop.f32.mrb[1].mxu1  ;;  %v1458_v38 = vpop.f32.mrb[2].mxu0 }
 0x12d   : > { %v1503_v39 = vadd.f32 %v1502_v37, %v1501_v34  ;;  %v1504_v40 = vpop.f32.mrb[2].mxu1  ;;  %v1459_v41 = vpop.f32.mrb[3].mxu0 }
 0x12e   : > { %v1460_v42 = vadd.f32 %v1459_v41, %v1458_v38  ;;  %v1505_v43 = vpop.f32.mrb[3].mxu1 }
 0x12f   : > { %v1506_v44 = vadd.f32 %v1505_v43, %v1504_v40  ;;  %v953_v45 = vadd.f32 %v1503_v39, %v1457_v36  ;;  %v355_v39 = vld [vmem:[#allocation2] sm:$0xff] }
 0x131   : > { %v1984_v46 = vadd.f32 %v1506_v44, %v1460_v42  ;;  %v361_v42 = vld [vmem:[#allocation2 + $0x30] sm:$0xff] }
 0x132   : > { %v1461_v47 = vpop.f32.mrb[4].mxu0 }
 0x133   : > { %v1507_v48 = vpop.f32.mrb[4].mxu1  ;;  %v1462_v49 = vpop.f32.mrb[5].mxu0 }
 0x134   : > { %v1463_v50 = vadd.f32 %v1462_v49, %v1461_v47  ;;  %v1508_v51 = vpop.f32.mrb[5].mxu1  ;;  %v1464_v52 = vpop.f32.mrb[6].mxu0  ;;  %v356_v49 = vld [vmem:[#allocation2 + $0x8] sm:$0xff] }
 0x135   : > { %v1509_v53 = vadd.f32 %v1508_v51, %v1507_v48  ;;  %v1510_v54 = vpop.f32.mrb[6].mxu1  ;;  %v1465_v55 = vpop.f32.mrb[7].mxu0 }
 0x136   : > { %v1466_v56 = vadd.f32 %v1465_v55, %v1464_v52  ;;  %v1511_v57 = vpop.f32.mrb[7].mxu1 }
 0x137   : > { %v1512_v58 = vadd.f32 %v1511_v57, %v1510_v54  ;;  %v1986_v59 = vadd.f32 %v1509_v53, %v1463_v50  ;;  %v362_v53 = vld [vmem:[#allocation2 + $0x38] sm:$0xff] }
 0x139   : > { %v1988_v60 = vadd.f32 %v1512_v58, %v1466_v56 }
 0x13a   : > { %v1467_v61 = vpop.f32.mrb[8].mxu0 }
 0x13b   : > { %v1513_v62 = vpop.f32.mrb[8].mxu1  ;;  %v1468_v63 = vpop.f32.mrb[9].mxu0 }
 0x13c   : > { %v1469_v0 = vadd.f32 %v1468_v63, %v1467_v61  ;;  %v1514_v1 = vpop.f32.mrb[9].mxu1  ;;  %v1470_v2 = vpop.f32.mrb[10].mxu0 }
 0x13d   : > { %v1515_v3 = vadd.f32 %v1514_v1, %v1513_v62  ;;  %v1516_v4 = vpop.f32.mrb[10].mxu1  ;;  %v1471_v5 = vpop.f32.mrb[11].mxu0  ;;  %v357_v62 = vld [vmem:[#allocation2 + $0x10] sm:$0xff]  ;;  %v363_v1 = vld [vmem:[#allocation2 + $0x40] sm:$0xff] }
 0x13e   : > { %v1472_v6 = vadd.f32 %v1471_v5, %v1470_v2  ;;  %v1517_v7 = vpop.f32.mrb[11].mxu1  ;;  %v358_v5 = vld [vmem:[#allocation2 + $0x18] sm:$0xff] }
 0x13f   : > { %v1518_v8 = vadd.f32 %v1517_v7, %v1516_v4  ;;  %v1990_v9 = vadd.f32 %v1515_v3, %v1469_v0 }
 0x141   : > { %v1992_v10 = vadd.f32 %v1518_v8, %v1472_v6 }
 0x142   : > { %v1473_v11 = vpop.f32.mrb[12].mxu0 }
 0x143   : > { %v1519_v12 = vpop.f32.mrb[12].mxu1  ;;  %v1474_v13 = vpop.f32.mrb[13].mxu0 }
 0x144   : > { %v1475_v14 = vadd.f32 %v1474_v13, %v1473_v11  ;;  %v1520_v15 = vpop.f32.mrb[13].mxu1  ;;  %v1476_v16 = vpop.f32.mrb[14].mxu0  ;;  %v364_v11 = vld [vmem:[#allocation2 + $0x48] sm:$0xff] }
 0x145   : > { %v1521_v17 = vadd.f32 %v1520_v15, %v1519_v12  ;;  %v1522_v18 = vpop.f32.mrb[14].mxu1  ;;  %v1477_v19 = vpop.f32.mrb[15].mxu0 }
 0x146   : > { %v1478_v20 = vadd.f32 %v1477_v19, %v1476_v16  ;;  %v1523_v21 = vpop.f32.mrb[15].mxu1 }
 0x147   : > { %v1524_v22 = vadd.f32 %v1523_v21, %v1522_v18  ;;  %v977_v23 = vadd.f32 %v1521_v17, %v1475_v14  ;;  %v359_v18 = vld [vmem:[#allocation2 + $0x20] sm:$0xff] }
 0x149   : > { %v980_v24 = vadd.f32 %v1524_v22, %v1478_v20  ;;  %v360_v22 = vld [vmem:[#allocation2 + $0x28] sm:$0xff] }
 0x14a   : > { %v1479_v25 = vpop.f32.mrb[16].mxu0 }
 0x14b   : > { %v1525_v26 = vpop.f32.mrb[16].mxu1  ;;  %v1480_v27 = vpop.f32.mrb[17].mxu0 }
 0x14c   : > { %v1481_v28 = vadd.f32 %v1480_v27, %v1479_v25  ;;  %v1526_v29 = vpop.f32.mrb[17].mxu1  ;;  %v1482_v30 = vpop.f32.mrb[18].mxu0 }
 0x14d   : > { %v1527_v31 = vadd.f32 %v1526_v29, %v1525_v26  ;;  %v1528_v32 = vpop.f32.mrb[18].mxu1  ;;  %v1483_v33 = vpop.f32.mrb[19].mxu0  ;;  %v1384_v29 = vld [vmem:[%s2035_s2] ss:$0 sm:$0xff] (!%p1383_p11) }
 0x14e   : > { %v1484_v34 = vadd.f32 %v1483_v33, %v1482_v30  ;;  %v1529_v35 = vpop.f32.mrb[19].mxu1 }
 0x14f   : > { %v1530_v36 = vadd.f32 %v1529_v35, %v1528_v32  ;;  %v985_v37 = vadd.f32 %v1527_v31, %v1481_v28 }
 0x151   : > { %v988_v38 = vadd.f32 %v1530_v36, %v1484_v34 }
 0x152   : > { %v1025_v40 = vpop.f32.mrb[20].mxu0 }
 0x153   : > { %v1026_v41 = vadd.f32 %v1025_v40, %v953_v45  ;;  %v1049_v43 = vpop.f32.mrb[20].mxu1  ;;  %v1562_v44 = vpop.f32.mrb[21].mxu0 }
 0x154   : > { %v1050_v47 = vadd.f32 %v1049_v43, %v977_v23  ;;  %v1574_v48 = vpop.f32.mrb[21].mxu1  ;;  %v1028_v50 = vpop.f32.mrb[22].mxu0 }
 0x155   : > { %v1064_v51 = vadd.f32 %v1026_v41, %v355_v39  ;;  %v1029_v52 = vadd.f32 %v1028_v50, %v1984_v46  ;;  %v1052_v54 = vpop.f32.mrb[22].mxu1  ;;  %v1563_v55 = vpop.f32.mrb[23].mxu0 }
 0x156   : > { %v1070_v56 = vadd.f32 %v1050_v47, %v361_v42  ;;  %v1053_v57 = vadd.f32 %v1052_v54, %v980_v24  ;;  %v1575_v58 = vpop.f32.mrb[23].mxu1 }
 0x157   : > { %1074 = vst [vmem:[#allocation2] sm:$0xff] %v1064_v51  ;;  %v1065_v61 = vadd.f32 %v1029_v52, %v356_v49 }
 0x158   : > { %1080 = vst [vmem:[#allocation2 + $0x30] sm:$0xff] %v1070_v56  ;;  %v1071_v45 = vadd.f32 %v1053_v57, %v362_v53 }
 0x159   : > { %1075 = vst [vmem:[#allocation2 + $0x8] sm:$0xff] %v1065_v61 }
 0x15a   : > { %1081 = vst [vmem:[#allocation2 + $0x38] sm:$0xff] %v1071_v45  ;;  %v1033_v63 = vpop.f32.mrb[24].mxu0 }
 0x15b   : > { %v1034_v0 = vadd.f32 %v1033_v63, %v1986_v59  ;;  %v1057_v2 = vpop.f32.mrb[24].mxu1  ;;  %v1566_v3 = vpop.f32.mrb[25].mxu0 }
 0x15c   : > { %v1058_v46 = vadd.f32 %v1057_v2, %v985_v37  ;;  %v1578_v4 = vpop.f32.mrb[25].mxu1  ;;  %v1036_v6 = vpop.f32.mrb[26].mxu0 }
 0x15d   : > { %v1066_v7 = vadd.f32 %v1034_v0, %v357_v62  ;;  %v1037_v8 = vadd.f32 %v1036_v6, %v1988_v60  ;;  %v1060_v12 = vpop.f32.mrb[26].mxu1  ;;  %v1567_v13 = vpop.f32.mrb[27].mxu0 }
 0x15e   : > { %v1072_v14 = vadd.f32 %v1058_v46, %v363_v1  ;;  %v1061_v15 = vadd.f32 %v1060_v12, %v988_v38  ;;  %v1579_v16 = vpop.f32.mrb[27].mxu1  ;;  %v1088_v27 = vld [vmem:[#allocation2] sm:$0xff] (!%p1383_p11) }
 0x15f   : > { %1076 = vst [vmem:[#allocation2 + $0x10] sm:$0xff] %v1066_v7  ;;  %v1067_v17 = vadd.f32 %v1037_v8, %v358_v5  ;;  %v1094_v37 = vld [vmem:[#allocation2 + $0x30] sm:$0xff] (!%p1383_p11) }
 0x160   : > { %1082 = vst [vmem:[#allocation2 + $0x40] sm:$0xff] %v1072_v14  ;;  %v1073_v59 = vadd.f32 %v1061_v15, %v364_v11  ;;  %v1089_v28 = vld [vmem:[#allocation2 + $0x8] sm:$0xff] (!%p1383_p11)  ;;  %v1111_v42 = vadd.f32 (!%p1383_p11), %v1384_v29, %v1094_v37 }
 0x161   : > { %1077 = vst [vmem:[#allocation2 + $0x18] sm:$0xff] %v1067_v17  ;;  %v1106_v30 = vadd.f32 (!%p1383_p11), %v1384_v29, %v1089_v28  ;;  %v1095_v38 = vld [vmem:[#allocation2 + $0x38] sm:$0xff] (!%p1383_p11) }
 0x162   : > { %1083 = vst [vmem:[#allocation2 + $0x48] sm:$0xff] %v1073_v59  ;;  %v1041_v19 = vpop.f32.mrb[28].mxu0  ;;  %v1112_v50 = vadd.f32 (!%p1383_p11), %v1384_v29, %v1095_v38  ;;  %v1121_v53 = vmax.f32 (!%p1383_p11), %v1111_v42, 0.0 }
 0x163   : > { %v1042_v20 = vadd.f32 %v1041_v19, %v1990_v9  ;;  %v1570_v21 = vpop.f32.mrb[29].mxu0  ;;  %1087 = sbr.rel (%p1383_p11) target bundleno = 376 (0x178), region = 66  ;;  %v1105_v9 = vadd.f32 (!%p1383_p11), %v1384_v29, %v1088_v27  ;;  %v1116_v40 = vmax.f32 (!%p1383_p11), %v1106_v30, 0.0 }
 0x164   : > { %v1044_v23 = vpop.f32.mrb[30].mxu0  ;;  %v1122_v56 = vmax.f32 (!%p1383_p11), %v1112_v50, 0.0 }
 0x165   : > { %v1068_v60 = vadd.f32 %v1042_v20, %v359_v18  ;;  %v1045_v24 = vadd.f32 %v1044_v23, %v1992_v10  ;;  %v1571_v25 = vpop.f32.mrb[31].mxu0  ;;  %v1115_v39 = vmax.f32 (!%p1383_p11), %v1105_v9, 0.0 }
 0x166   : > { %v1090_v31 = vld [vmem:[#allocation2 + $0x10] sm:$0xff] (!%p1383_p11)  ;;  %v1428_v45 = vpack.c.bf16 (!%p1383_p11), %v1122_v56, %v1121_v53 }
 0x167   : > { %1078 = vst [vmem:[#allocation2 + $0x20] sm:$0xff] %v1068_v60  ;;  %v1069_v26 = vadd.f32 %v1045_v24, %v360_v22  ;;  %v1107_v34 = vadd.f32 (!%p1383_p11), %v1384_v29, %v1090_v31  ;;  %v1096_v43 = vld [vmem:[#allocation2 + $0x40] sm:$0xff] (!%p1383_p11)  ;;  %v1413_v51 = vpack.c.bf16 (!%p1383_p11), %v1116_v40, %v1115_v39 }
 0x168   : > { %v1091_v32 = vld [vmem:[#allocation2 + $0x18] sm:$0xff] (!%p1383_p11)  ;;  %v1113_v54 = vadd.f32 (!%p1383_p11), %v1384_v29, %v1096_v43  ;;  %1437 = vst [vmem:[%s2036_s3 + $0x18] sm:$0xff] (!%p1383_p11), %v1428_v45  }
 0x169   : > { %1079 = vst [vmem:[#allocation2 + $0x28] sm:$0xff] %v1069_v26  ;;  %v1108_v10 = vadd.f32 (!%p1383_p11), %v1384_v29, %v1091_v32  ;;  %v1097_v44 = vld [vmem:[#allocation2 + $0x48] sm:$0xff] (!%p1383_p11)  ;;  %v1117_v47 = vmax.f32 (!%p1383_p11), %v1107_v34, 0.0  ;;  %1414 = vst [vmem:[%s2036_s3] sm:$0xff] (!%p1383_p11), %v1413_v51  }
 0x16a   : > { %v1114_v57 = vadd.f32 %v1384_v29, %v1097_v44  ;;  %v1123_v61 = vmax.f32 %v1113_v54, 0.0 }
 0x16b   : > { %v1118_v48 = vmax.f32 %v1108_v10, 0.0 }
 0x16c   : > { %v1124_v62 = vmax.f32 %v1114_v57, 0.0 }
 0x16d   : > { %v1418_v55 = vpack.c.bf16 %v1118_v48, %v1117_v47 }
 0x16e   : > { %v1092_v33 = vld [vmem:[#allocation2 + $0x20] sm:$0xff]  ;;  %v1433_v63 = vpack.c.bf16 %v1124_v62, %v1123_v61 }
 0x16f   : > { %v1109_v36 = vadd.f32 %v1384_v29, %v1092_v33  ;;  %1435 = vst [vmem:[%s2036_s3 + $0x8] sm:$0xff] %v1418_v55  }
 0x170   : > { %v1093_v35 = vld [vmem:[#allocation2 + $0x28] sm:$0xff]  ;;  %1438 = vst [vmem:[%s2036_s3 + $0x20] sm:$0xff] %v1433_v63  }
 0x171   : > { %v1110_v41 = vadd.f32 %v1384_v29, %v1093_v35  ;;  %v1119_v49 = vmax.f32 %v1109_v36, 0.0 }
 0x173   : > { %v1120_v52 = vmax.f32 %v1110_v41, 0.0 }
 0x175   : > { %v1423_v58 = vpack.c.bf16 %v1120_v52, %v1119_v49 }
 0x177   : > { %1436 = vst [vmem:[%s2036_s3 + $0x10] sm:$0xff] %v1423_v58  }
 0x178 PF: > { %s13_s16 = sadd.s32 1, %s1754_s16   ;;  %s2037_s12 = smov %s1742_s13 }
 0x179   : > { %p10_p12 = scmp.ge.s32.totalorder %s13_s16, 4   ;;  %s2038_s13 = smov %s1814_s20 }
 0x17a   : > { %s2039_s14 = smov %s1750_s15  ;;  %s2040_s15 = smov %s2042_s17 }
 0x17b   :  { %12 = sbr.rel (!%p10_p12) target bundleno = 3 (0x3), region = 113 }

// kernel: pspnet_forward.34
= control target key start
LH: loop header
LB: loop body
LE: loop exit
PB: predicated region body
PF: predicated region fallthrough
CT: control target
= control target key end

     0   :  { %s1917_s15 = smov 0   ;;  %s1919_s16 = smov 0   ;;  %s2186_s0 = inlined_call_operand.vmem [shape: bf16[80,1280], index: 0, kind: input, shape index: {}]   ;;  %s2187_s1 = inlined_call_operand.vmem [shape: bf16[1280,128], index: 1, kind: input, shape index: {}]   ;;  %s2188_s2 = inlined_call_operand.vmem [shape: f32[1,128], index: 2, kind: input, shape index: {}]   ;;  %s2189_s3 = inlined_call_operand.vmem [shape: bf16[80,128], index: 3, kind: input, shape index: {}]   ;;  %s2190_s4 = inlined_call_operand.vmem [shape: bf16[80,128], index: 4, kind: output, shape index: {}]  }
   0x1   :  { %s1921_s17 = smov 0   ;;  %s1923_s18 = smov 0  }
   0x2   :  { %s1925_s19 = smov 0  }
   0x3 LB: > { %s26_s20 = sadd.s32 1, %s1883_s18  ;;  %p49_p1 = scmp.ne.s32.totalorder %s1875_s16, %s1871_s15  ;;  %s1887_s19 = sphi %s1925_s19, %s14_s19   ;;  %s1883_s18 = sphi %s1923_s18, %s2194_s18   ;;  %s1879_s17 = sphi %s1921_s17, %s2193_s17   ;;  %s1875_s16 = sphi %s1919_s16, %s2192_s16   ;;  %s1871_s15 = sphi %s1917_s15, %s2191_s15  }
   0x4   : > { %p27_p0 = scmp.ge.s32.totalorder %s26_s20, 2  ;;  %p50_p2 = scmp.eq.s32.totalorder %s1887_s19, 0 }
   0x5   : > { %s42_s22 = sadd.s32 1, %s1875_s16  ;;  %p1402_p5 = scmp.ge.s32.totalorder %s1887_s19, 2 }
   0x6   : > { %s2196_s20 = smov (%p27_p0, %s26_s20), 0  ;;  %p51_p3 = por %p50_p2, %p49_p1 }
   0x7   : > { %s38_s21 = ssub.s32 %s1883_s18, %s2196_s20  ;;  %203 = sbr.rel (%p1402_p5) target bundleno = 35 (0x23), region = 24 }
   0x8   : > { %p40_p4 = scmp.eq.s32.totalorder %s38_s21, 0 }
   0xa   : > { %s1952_s23 = scalar_select %p40_p4, %s1875_s16, %s42_s22  }
   0xe   : > { %206 = sbr.rel (!%p51_p3) target bundleno = 35 (0x23), region = 28  ;;  %s208_s24 = sand.u32 (%p51_p3), 1, %s1875_s16  }
   0xf   : > { %s1508_s25 = smul.u32 (%p51_p3), 20, %s1883_s18 }
  0x10   : > { %s1729_s26 = smul.u32 (%p51_p3), 200, %s208_s24 }
  0x11   : > { %s1960_s29 = scalar_lea.vmem (%p51_p3), %s2186_s0, %s1508_s25 }
  0x12   : > { %v231_v0 = vld [vmem:[%s1960_s29] sm:$0xff] (%p51_p3)  ;;  %v233_v1 = vld [vmem:[%s1960_s29 + $0x8] sm:$0xff] (%p51_p3)  ;;  %s1965_s30 = scalar_lea.vmem (%p51_p3), [#allocation3], %s1729_s26  ;;  %v237_v3 = vld [vmem:[%s1960_s29 + $0x30] sm:$0xff] (%p51_p3) }
  0x13   : > { %v235_v2 = vld [vmem:[%s1960_s29 + $0x28] sm:$0xff] (%p51_p3)  ;;  %232 = vst [vmem:[%s1965_s30] sm:$0xff] (%p51_p3), %v231_v0  ;;  %234 = vst [vmem:[%s1965_s30 + $0x8] sm:$0xff] (%p51_p3), %v233_v1  ;;  %v239_v4 = vld [vmem:[%s1960_s29 + $0x50] sm:$0xff] (%p51_p3) }
  0x14   : > { %236 = vst [vmem:[%s1965_s30 + $0x14] sm:$0xff] (%p51_p3), %v235_v2  ;;  %v241_v5 = vld [vmem:[%s1960_s29 + $0x58] sm:$0xff] (%p51_p3)  ;;  %238 = vst [vmem:[%s1965_s30 + $0x1c] sm:$0xff] (%p51_p3), %v237_v3  ;;  %v245_v7 = vld [vmem:[%s1960_s29 + $0x80] sm:$0xff] (%p51_p3) }
  0x15   : > { %240 = vst [vmem:[%s1965_s30 + $0x28] sm:$0xff] %v239_v4  ;;  %242 = vst [vmem:[%s1965_s30 + $0x30] sm:$0xff] %v241_v5  ;;  %v243_v6 = vld [vmem:[%s1960_s29 + $0x78] sm:$0xff]  ;;  %v247_v8 = vld [vmem:[%s1960_s29 + $0xa0] sm:$0xff] }
  0x16   : > { %244 = vst [vmem:[%s1965_s30 + $0x3c] sm:$0xff] %v243_v6  ;;  %246 = vst [vmem:[%s1965_s30 + $0x44] sm:$0xff] %v245_v7  ;;  %v249_v9 = vld [vmem:[%s1960_s29 + $0xa8] sm:$0xff]  ;;  %v253_v11 = vld [vmem:[%s1960_s29 + $0xd0] sm:$0xff] }
  0x17   : > { %248 = vst [vmem:[%s1965_s30 + $0x50] sm:$0xff] %v247_v8  ;;  %v251_v10 = vld [vmem:[%s1960_s29 + $0xc8] sm:$0xff]  ;;  %250 = vst [vmem:[%s1965_s30 + $0x58] sm:$0xff] %v249_v9  ;;  %v255_v12 = vld [vmem:[%s1960_s29 + $0xf0] sm:$0xff] }
  0x18   : > { %252 = vst [vmem:[%s1965_s30 + $0x64] sm:$0xff] %v251_v10  ;;  %254 = vst [vmem:[%s1965_s30 + $0x6c] sm:$0xff] %v253_v11  ;;  %v257_v13 = vld [vmem:[%s1960_s29 + $0xf8] sm:$0xff]  ;;  %v261_v15 = vld [vmem:[%s1960_s29 + $0x120] sm:$0xff] }
  0x19   : > { %v259_v14 = vld [vmem:[%s1960_s29 + $0x118] sm:$0xff]  ;;  %256 = vst [vmem:[%s1965_s30 + $0x78] sm:$0xff] %v255_v12  ;;  %258 = vst [vmem:[%s1965_s30 + $0x80] sm:$0xff] %v257_v13  ;;  %v263_v16 = vld [vmem:[%s1960_s29 + $0x140] sm:$0xff] }
  0x1a   : > { %260 = vst [vmem:[%s1965_s30 + $0x8c] sm:$0xff] %v259_v14  ;;  %v265_v17 = vld [vmem:[%s1960_s29 + $0x148] sm:$0xff]  ;;  %262 = vst [vmem:[%s1965_s30 + $0x94] sm:$0xff] %v261_v15  ;;  %v269_v19 = vld [vmem:[%s1960_s29 + $0x170] sm:$0xff] }
  0x1b   : > { %264 = vst [vmem:[%s1965_s30 + $0xa0] sm:$0xff] %v263_v16  ;;  %266 = vst [vmem:[%s1965_s30 + $0xa8] sm:$0xff] %v265_v17  ;;  %v267_v18 = vld [vmem:[%s1960_s29 + $0x168] sm:$0xff]  ;;  %v1404_v20 = vld [vmem:[%s1960_s29 + $0x10] sm:$0xf] }
  0x1c   : > { %268 = vst [vmem:[%s1965_s30 + $0xb4] sm:$0xff] %v267_v18  ;;  %270 = vst [vmem:[%s1965_s30 + $0xbc] sm:$0xff] %v269_v19  ;;  %v1406_v21 = vld [vmem:[%s1960_s29 + $0x38] sm:$0xf]  ;;  %v1408_v22 = vld [vmem:[%s1960_s29 + $0x60] sm:$0xf] }
  0x1d   : > { %1405 = vst [vmem:[%s1965_s30 + $0x10] sm:$0xf] %v1404_v20  ;;  %v1410_v23 = vld [vmem:[%s1960_s29 + $0x88] sm:$0xf]  ;;  %1407 = vst [vmem:[%s1965_s30 + $0x24] sm:$0xf] %v1406_v21 }
  0x1e   : > { %1409 = vst [vmem:[%s1965_s30 + $0x38] sm:$0xf] %v1408_v22  ;;  %1411 = vst [vmem:[%s1965_s30 + $0x4c] sm:$0xf] %v1410_v23  ;;  %v1412_v24 = vld [vmem:[%s1960_s29 + $0xb0] sm:$0xf] }
  0x1f   : > { %v1414_v25 = vld [vmem:[%s1960_s29 + $0xd8] sm:$0xf]  ;;  %v1416_v26 = vld [vmem:[%s1960_s29 + $0x100] sm:$0xf]  ;;  %1413 = vst [vmem:[%s1965_s30 + $0x60] sm:$0xf] %v1412_v24 }
  0x20   : > { %1415 = vst [vmem:[%s1965_s30 + $0x74] sm:$0xf] %v1414_v25  ;;  %1417 = vst [vmem:[%s1965_s30 + $0x88] sm:$0xf] %v1416_v26  ;;  %v1418_v27 = vld [vmem:[%s1960_s29 + $0x128] sm:$0xf] }
  0x21   : > { %v1420_v28 = vld [vmem:[%s1960_s29 + $0x150] sm:$0xf]  ;;  %v1422_v29 = vld [vmem:[%s1960_s29 + $0x178] sm:$0xf]  ;;  %1419 = vst [vmem:[%s1965_s30 + $0x9c] sm:$0xf] %v1418_v27 }
  0x22   : > { %1421 = vst [vmem:[%s1965_s30 + $0xb0] sm:$0xf] %v1420_v28  ;;  %1423 = vst [vmem:[%s1965_s30 + $0xc4] sm:$0xf] %v1422_v29 }
  0x23 PF: > { %p1424_p6 = scmp.ge.s32.totalorder %s1887_s19, 1  ;;  %p314_p7 = scmp.lt.s32.totalorder %s1887_s19, 3 }
  0x25   : > { %p315_p8 = pnand %p1424_p6, %p314_p7 }
  0x26   : > { %s321_s5 = sand.u32 (!%p315_p8), 1, %s1871_s15   ;;  %s370_s6 = smul.u32 (!%p315_p8), 80, %s1879_s17 }
  0x27   : > { %318 = sbr.rel (%p315_p8) target bundleno = 378 (0x17a), region = 58  ;;  %p1426_p10 = scmp.ne.s32.totalorder (!%p315_p8), %s1879_s17, 0 }
  0x28   : > { %s1730_s7 = smul.u32 (!%p315_p8), 200, %s321_s5  ;;  %p371_p9 = scmp.lt.s32.totalorder (!%p315_p8), %s370_s6, 159 }
  0x2a   : > { %s2033_s12 = scalar_lea.vmem (!%p315_p8), [#allocation3], %s1730_s7 }
  0x2e   : > { %s2198_s6 = smov (!%p371_p9, %s370_s6), 159  ;;  %404 = sbr.rel (%p1426_p10) target bundleno = 53 (0x35), region = 66 }
  0x2f   : > { %s1425_s8 = sshll.u32 %s2198_s6, 2  ;;  %v1889_v30 = vmov (!%p1426_p10), 0.0  }
  0x30   : > { %s2031_s11 = scalar_lea.vmem %s2187_s1, %s1425_s8  ;;  %405 = vst [vmem:[#allocation2] sm:$0xff] (!%p1426_p10), %v1889_v30  ;;  %406 = vst [vmem:[#allocation2 + $0x8] sm:$0xff] (!%p1426_p10), %v1889_v30 }
  0x31   : > { %407 = vst [vmem:[#allocation2 + $0x10] sm:$0xff] (!%p1426_p10), %v1889_v30  ;;  %408 = vst [vmem:[#allocation2 + $0x18] sm:$0xff] (!%p1426_p10), %v1889_v30 }
  0x32   : > { %409 = vst [vmem:[#allocation2 + $0x20] sm:$0xff] (!%p1426_p10), %v1889_v30  ;;  %410 = vst [vmem:[#allocation2 + $0x28] sm:$0xff] (!%p1426_p10), %v1889_v30 }
  0x33   : > { %411 = vst [vmem:[#allocation2 + $0x30] sm:$0xff] (!%p1426_p10), %v1889_v30  ;;  %412 = vst [vmem:[#allocation2 + $0x38] sm:$0xff] (!%p1426_p10), %v1889_v30 }
  0x34   : > { %413 = vst [vmem:[#allocation2 + $0x40] sm:$0xff] (!%p1426_p10), %v1889_v30  ;;  %414 = vst [vmem:[#allocation2 + $0x48] sm:$0xff] (!%p1426_p10), %v1889_v30 }
  0x35 PF: > { %v1774_v31 = vld [vmem:[%s2031_s11 + $0x40] sm:$0xff]   ;;  %v1778_v35 = vld [vmem:[%s2031_s11 + $0x48] sm:$0xff]   ;;  %v1782_v39 = vld [vmem:[%s2031_s11 + $0x50] sm:$0xff]   ;;  %v1890_v1 = vmov 0.0   ;;  %vm1891_vm0 = vmmov 0   ;;  %p1492_p11 = scmp.ne.s32.totalorder %s1879_s17, 1 }
  0x36   : > { %v1775_v32 = vld [vmem:[%s2031_s11 + $0xc0] sm:$0xff]   ;;  %1572 = vmatprep.subr.bf16.mxu0 %v1774_v31  ;;  %v1779_v36 = vld [vmem:[%s2031_s11 + $0xc8] sm:$0xff]   ;;  %v1783_v40 = vld [vmem:[%s2031_s11 + $0xd0] sm:$0xff]  }
  0x37   : > { %v1776_v33 = vld [vmem:[%s2031_s11] sm:$0xff]   ;;  %1618 = vmatprep.subr.bf16.mxu1 %v1775_v32  ;;  %v1780_v37 = vld [vmem:[%s2031_s11 + $0x8] sm:$0xff]   ;;  %v1784_v41 = vld [vmem:[%s2031_s11 + $0x10] sm:$0xff]  }
  0x38   : > { %v1777_v34 = vld [vmem:[%s2031_s11 + $0x80] sm:$0xff]   ;;  %1573 = vmatpush3.bf16.msra.mxu0 %v1776_v33  ;;  %v1781_v38 = vld [vmem:[%s2031_s11 + $0x88] sm:$0xff]   ;;  %v1785_v42 = vld [vmem:[%s2031_s11 + $0x90] sm:$0xff]  }
  0x39   : > { %1619 = vmatpush3.bf16.msra.mxu1 %v1777_v34  ;;  %1574 = vmatprep.subr.bf16.mxu0 %v1778_v35  ;;  %v1786_v43 = vld [vmem:[%s2031_s11 + $0x58] sm:$0xff]   ;;  %v1790_v47 = vld [vmem:[%s2031_s11 + $0x60] sm:$0xff]   ;;  %v1794_v51 = vld [vmem:[%s2031_s11 + $0x68] sm:$0xff]  }
  0x3a   : > { %1620 = vmatprep.subr.bf16.mxu1 %v1779_v36  ;;  %v1787_v44 = vld [vmem:[%s2031_s11 + $0xd8] sm:$0xff]   ;;  %v1791_v48 = vld [vmem:[%s2031_s11 + $0xe0] sm:$0xff]   ;;  %v1795_v52 = vld [vmem:[%s2031_s11 + $0xe8] sm:$0xff]  }
  0x3b   : > { %v1788_v45 = vld [vmem:[%s2031_s11 + $0x18] sm:$0xff]   ;;  %v1792_v49 = vld [vmem:[%s2031_s11 + $0x20] sm:$0xff]   ;;  %v1796_v53 = vld [vmem:[%s2031_s11 + $0x28] sm:$0xff]  }
  0x3c   : > { %1575 = vmatpush3.bf16.msra.mxu0 %v1780_v37  ;;  %v1789_v46 = vld [vmem:[%s2031_s11 + $0x98] sm:$0xff]   ;;  %v1793_v50 = vld [vmem:[%s2031_s11 + $0xa0] sm:$0xff]   ;;  %v1797_v54 = vld [vmem:[%s2031_s11 + $0xa8] sm:$0xff]  }
  0x3d   : > { %1621 = vmatpush3.bf16.msra.mxu1 %v1781_v38  ;;  %1576 = vmatprep.subr.bf16.mxu0 %v1782_v39  ;;  %v1798_v55 = vld [vmem:[%s2031_s11 + $0x70] sm:$0xff]   ;;  %v1802_v59 = vld [vmem:[%s2031_s11 + $0x78] sm:$0xff]   ;;  %v1812_v4 = vld [vmem:[%s2031_s11 + $0x100] sm:$0xff]  }
  0x3e   : > { %1622 = vmatprep.subr.bf16.mxu1 %v1783_v40  ;;  %v1799_v56 = vld [vmem:[%s2031_s11 + $0xf0] sm:$0xff]   ;;  %v1803_v60 = vld [vmem:[%s2031_s11 + $0xf8] sm:$0xff]   ;;  %v1813_v5 = vld [vmem:[%s2031_s11 + $0x108] sm:$0xff]  }
  0x3f   : > { %v1800_v57 = vld [vmem:[%s2031_s11 + $0x30] sm:$0xff]   ;;  %v1804_v61 = vld [vmem:[%s2031_s11 + $0x38] sm:$0xff]   ;;  %v1828_v16 = vld [vmem:[%s2031_s11 + $0x120] sm:$0xff]  }
  0x40   : > { %1577 = vmatpush3.bf16.msra.mxu0 %v1784_v41  ;;  %v1801_v58 = vld [vmem:[%s2031_s11 + $0xb0] sm:$0xff]   ;;  %v1805_v62 = vld [vmem:[%s2031_s11 + $0xb8] sm:$0xff]   ;;  %v1835_v19 = vld [vmem:[%s2031_s11 + $0x128] sm:$0xff]  }
  0x41   : > { %1623 = vmatpush3.bf16.msra.mxu1 %v1785_v42  ;;  %1578 = vmatprep.subr.bf16.mxu0 %v1786_v43  ;;  %v1806_v63 = vld [vmem:[%s2033_s12] ss:$20 sps:$4 sm:$0xff]   ;;  %v1808_v0 = vld [vmem:[%s2033_s12 + $0x4] ss:$20 sps:$4 sm:$0xff]   ;;  %v1809_v2 = vld [vmem:[%s2033_s12 + $0x8] ss:$20 sps:$4 sm:$0xff]  }
  0x42   : > { %1624 = vmatprep.subr.bf16.mxu1 %v1787_v44  ;;  %v1811_v3 = vld [vmem:[%s2033_s12 + $0xc] ss:$20 sps:$4 sm:$0xff]   ;;  %937 = vmatprep.mubr.bf16.mxu0 %v1808_v0  ;;  %v1816_v7 = vld [vmem:[%s2033_s12 + $0x34] ss:$20 sps:$4 sm:$0xff]   ;;  %v1819_v9 = vld [vmem:[%s2033_s12 + $0x30] ss:$20 sps:$4 sm:$0xff]  }
  0x43   : > { %1010 = vmatprep.mubr.bf16.mxu1 %v1811_v3  ;;  %v1814_v6 = vld [vmem:[%s2033_s12 + $0x2c] ss:$20 sps:$4 sm:$0xff]   ;;  %v1818_v8 = vld [vmem:[%s2033_s12 + $0x28] ss:$20 sps:$4 sm:$0xff]   ;;  %v1825_v14 = vld [vmem:[%s2033_s12 + $0x50] ss:$20 sps:$4 sm:$0xff]  }
  0x44   : > { %1579 = vmatpush3.bf16.msra.mxu0 %v1788_v45  ;;  %v1820_v10 = vld [vmem:[%s2031_s11 + $0x110] sm:$0xff]   ;;  %v1821_v11 = vld [vmem:[%s2033_s12 + $0x54] ss:$20 sps:$4 sm:$0xff]  }
  0x45   : > { %1625 = vmatpush3.bf16.msra.mxu1 %v1789_v46  ;;  %1580 = vmatprep.subr.bf16.mxu0 %v1790_v47  ;;  %v1823_v12 = vld [vmem:[%s2033_s12 + $0x5c] ss:$20 sps:$4 sm:$0xff]   ;;  %v1827_v13 = vld [vmem:[%s2031_s11 + $0x118] sm:$0xff]  }
  0x46   : > { %1626 = vmatprep.subr.bf16.mxu1 %v1791_v48  ;;  %v1826_v15 = vld [vmem:[%s2033_s12 + $0x58] ss:$20 sps:$4 sm:$0xff]   ;;  %v1829_v17 = vld [vmem:[%s2033_s12 + $0x7c] ss:$20 sps:$4 sm:$0xff]   ;;  %v1834_v21 = vld [vmem:[%s2033_s12 + $0x80] ss:$20 sps:$4 sm:$0xff]  }
  0x47   : > { %v1831_v18 = vld [vmem:[%s2033_s12 + $0x84] ss:$20 sps:$4 sm:$0xff]   ;;  %v1838_v23 = vld [vmem:[%s2033_s12 + $0xac] ss:$20 sps:$4 sm:$0xff]   ;;  %v1842_v27 = vld [vmem:[%s2033_s12 + $0xa8] ss:$20 sps:$4 sm:$0xff]  }
  0x48   : > { %1581 = vmatpush3.bf16.msra.mxu0 %v1792_v49  ;;  %v1833_v20 = vld [vmem:[%s2033_s12 + $0x78] ss:$20 sps:$4 sm:$0xff]   ;;  %v1841_v26 = vld [vmem:[%s2033_s12 + $0xa0] ss:$20 sps:$4 sm:$0xff]   ;;  %v1844_v28 = vld [vmem:[%s2033_s12 + $0x10] ss:$20 sps:$4 sm:$0xff]  }
  0x49   : > { %1627 = vmatpush3.bf16.msra.mxu1 %v1793_v50  ;;  %1582 = vmatprep.subr.bf16.mxu0 %v1794_v51  ;;  %v1836_v22 = vld [vmem:[%s2033_s12 + $0xa4] ss:$20 sps:$4 sm:$0xff]   ;;  %v1845_v29 = vld [vmem:[%s2033_s12 + $0x88] ss:$20 sps:$4 sm:$0xff]   ;;  %v1848_v32 = vld [vmem:[%s2033_s12 + $0x60] ss:$20 sps:$4 sm:$0xff]  }
  0x4a   : > { %1628 = vmatprep.subr.bf16.mxu1 %v1795_v52  ;;  %v1840_v24 = vld [vmem:[%s2031_s11 + $0x130] sm:$0xff]   ;;  %v1843_v25 = vld [vmem:[%s2031_s11 + $0x138] sm:$0xff]  }
  0x4b   : > { %v1846_v30 = vld [vmem:[%s2033_s12 + $0x38] ss:$20 sps:$4 sm:$0xff]   ;;  %v1847_v31 = vld [vmem:[%s2033_s12 + $0xb0] ss:$20 sps:$4 sm:$0xff]  }
  0x4c   : > { %1583 = vmatpush3.bf16.msra.mxu0 %v1796_v53 }
  0x4d   : > { %1629 = vmatpush3.bf16.msra.mxu1 %v1797_v54  ;;  %1584 = vmatprep.subr.bf16.mxu0 %v1798_v55 }
  0x4e   : > { %1630 = vmatprep.subr.bf16.mxu1 %v1799_v56 }
  0x50   : > { %1585 = vmatpush3.bf16.msra.mxu0 %v1800_v57 }
  0x51   : > { %1631 = vmatpush3.bf16.msra.mxu1 %v1801_v58  ;;  %1586 = vmatprep.subr.bf16.mxu0 %v1802_v59 }
  0x52   : > { %1632 = vmatprep.subr.bf16.mxu1 %v1803_v60 }
  0x54   : > { %1587 = vmatpush3.bf16.msra.mxu0 %v1804_v61 }
  0x55   : > { %1633 = vmatpush3.bf16.msra.mxu1 %v1805_v62  ;;  %1677 = vmatprep.subr.bf16.mxu0 %v1890_v1 }
  0x56   : > { %1713 = vmatprep.subr.bf16.mxu1 %v1890_v1 }
  0x57   : > { %938 = vmatmul.mubr.bf16.vlgmr.msra.gmra.mrb[0].mxu0 %v1806_v63 }
  0x58   : > { %1011 = vmatmul.mubr.bf16.vlgmr.msra.gmra.mrb[0].mxu1 %v1809_v2  ;;  %1678 = vmatpush3.bf16.msra.mxu0 %v1812_v4 }
  0x59   : > { %1679 = vmatprep.subr.bf16.mxu0 %v1890_v1  ;;  %1721 = vmatpush3.bf16.msra.mxu1 %v1812_v4 }
  0x5a   : > { %945 = vmatprep.mubr.bf16.mxu0 %v1814_v6  ;;  %1714 = vmatprep.subr.bf16.mxu1 %v1890_v1 }
  0x5b   : > { %1018 = vmatprep.mubr.bf16.mxu1 %v1816_v7 }
  0x5c   : > { %1680 = vmatpush3.bf16.msra.mxu0 %v1813_v5 }
  0x5d   : > { %1681 = vmatprep.subr.bf16.mxu0 %v1890_v1  ;;  %1722 = vmatpush3.bf16.msra.mxu1 %v1813_v5 }
  0x5e   : > { %1715 = vmatprep.subr.bf16.mxu1 %v1890_v1 }
  0x5f   : > { %946 = vmatmul.mubr.bf16.gmra.mrb[4].mxu0 %v1818_v8 }
  0x60   : > { %1019 = vmatmul.mubr.bf16.gmra.mrb[4].mxu1 %v1819_v9  ;;  %1682 = vmatpush3.bf16.msra.mxu0 %v1820_v10 }
  0x61   : > { %953 = vmatprep.mubr.bf16.mxu0 %v1821_v11  ;;  %1026 = vmatprep.mubr.bf16.mxu1 %v1823_v12 }
  0x62   : > { %1683 = vmatprep.subr.bf16.mxu0 %v1890_v1  ;;  %1723 = vmatpush3.bf16.msra.mxu1 %v1820_v10 }
  0x63   : > { %1716 = vmatprep.subr.bf16.mxu1 %v1890_v1 }
  0x64   : > { %1684 = vmatpush3.bf16.msra.mxu0 %v1827_v13 }
  0x65   : > { %1685 = vmatprep.subr.bf16.mxu0 %v1890_v1 }
  0x66   : > { %1724 = vmatpush3.bf16.msra.mxu1 %v1827_v13 }
  0x67   : > { %954 = vmatmul.mubr.bf16.gmra.mrb[8].mxu0 %v1825_v14  ;;  %1717 = vmatprep.subr.bf16.mxu1 %v1890_v1 }
  0x68   : > { %1027 = vmatmul.mubr.bf16.gmra.mrb[8].mxu1 %v1826_v15  ;;  %1686 = vmatpush3.bf16.msra.mxu0 %v1828_v16 }
  0x69   : > { %961 = vmatprep.mubr.bf16.mxu0 %v1829_v17  ;;  %1034 = vmatprep.mubr.bf16.mxu1 %v1831_v18 }
  0x6a   : > { %1725 = vmatpush3.bf16.msra.mxu1 %v1828_v16  ;;  %1687 = vmatprep.subr.bf16.mxu0 %v1890_v1 }
  0x6b   : > { %1718 = vmatprep.subr.bf16.mxu1 %v1890_v1 }
  0x6c   : > { %1688 = vmatpush3.bf16.msra.mxu0 %v1835_v19 }
  0x6d   : > { %1689 = vmatprep.subr.bf16.mxu0 %v1890_v1 }
  0x6e   : > { %1726 = vmatpush3.bf16.msra.mxu1 %v1835_v19 }
  0x6f   : > { %962 = vmatmul.mubr.bf16.gmra.mrb[12].mxu0 %v1833_v20  ;;  %1719 = vmatprep.subr.bf16.mxu1 %v1890_v1 }
  0x70   : > { %1035 = vmatmul.mubr.bf16.gmra.mrb[12].mxu1 %v1834_v21  ;;  %969 = vmatprep.mubr.bf16.mxu0 %v1836_v22 }
  0x71   : > { %1042 = vmatprep.mubr.bf16.mxu1 %v1838_v23  ;;  %1690 = vmatpush3.bf16.msra.mxu0 %v1840_v24 }
  0x72   : > { %1727 = vmatpush3.bf16.msra.mxu1 %v1840_v24  ;;  %1691 = vmatprep.subr.bf16.mxu0 %v1890_v1 }
  0x73   : > { %1720 = vmatprep.subr.bf16.mxu1 %v1890_v1 }
  0x75   : > { %1692 = vmatpush3.bf16.msra.mxu0 %v1843_v25 }
  0x76   : > { %1728 = vmatpush3.bf16.msra.mxu1 %v1843_v25 }
  0x77   : > { %970 = vmatmul.mubr.bf16.gmra.mrb[16].mxu0 %v1841_v26 }
  0x78   : > { %1043 = vmatmul.mubr.bf16.gmra.mrb[16].mxu1 %v1842_v27  ;;  %1693 = vmatprep.mubr.msk.bf16.mxu0 %vm1891_vm0, %v1890_v1 }
  0x79   : > { %1705 = vmatprep.mubr.msk.bf16.mxu1 %vm1891_vm0, %v1890_v1 }
  0x7f   : > { %1694 = vmatmul.mubr.bf16.vlgmr.msra.gmra.mrb[20].mxu0 %v1844_v28 }
  0x80   : > { %1706 = vmatmul.mubr.bf16.vlgmr.msra.gmra.mrb[20].mxu1 %v1845_v29  ;;  %1697 = vmatprep.mubr.msk.bf16.mxu0 %vm1891_vm0, %v1890_v1 }
  0x81   : > { %1709 = vmatprep.mubr.msk.bf16.mxu1 %vm1891_vm0, %v1890_v1 }
  0x87   : > { %1698 = vmatmul.mubr.bf16.gmra.mrb[24].mxu0 %v1846_v30 }
  0x88   : > { %1710 = vmatmul.mubr.bf16.gmra.mrb[24].mxu1 %v1847_v31  ;;  %1701 = vmatprep.mubr.msk.bf16.mxu0 %vm1891_vm0, %v1890_v1 }
  0x8f   : > { %1702 = vmatmul.mubr.bf16.gmra.mrb[28].mxu0 %v1848_v32 }
 0x12a   : > { %v1588_v33 = vpop.f32.mrb[0].mxu0 }
 0x12b   : > { %v1634_v34 = vpop.f32.mrb[0].mxu1  ;;  %v1589_v35 = vpop.f32.mrb[1].mxu0 }
 0x12c   : > { %v1590_v36 = vadd.f32 %v1589_v35, %v1588_v33  ;;  %v1635_v37 = vpop.f32.mrb[1].mxu1  ;;  %v1591_v38 = vpop.f32.mrb[2].mxu0 }
 0x12d   : > { %v1636_v39 = vadd.f32 %v1635_v37, %v1634_v34  ;;  %v1637_v40 = vpop.f32.mrb[2].mxu1  ;;  %v1592_v41 = vpop.f32.mrb[3].mxu0 }
 0x12e   : > { %v1593_v42 = vadd.f32 %v1592_v41, %v1591_v38  ;;  %v1638_v43 = vpop.f32.mrb[3].mxu1 }
 0x12f   : > { %v1639_v44 = vadd.f32 %v1638_v43, %v1637_v40  ;;  %v1013_v45 = vadd.f32 %v1636_v39, %v1590_v36  ;;  %v415_v39 = vld [vmem:[#allocation2] sm:$0xff] }
 0x131   : > { %v2122_v46 = vadd.f32 %v1639_v44, %v1593_v42  ;;  %v421_v42 = vld [vmem:[#allocation2 + $0x30] sm:$0xff] }
 0x132   : > { %v1594_v47 = vpop.f32.mrb[4].mxu0 }
 0x133   : > { %v1640_v48 = vpop.f32.mrb[4].mxu1  ;;  %v1595_v49 = vpop.f32.mrb[5].mxu0 }
 0x134   : > { %v1596_v50 = vadd.f32 %v1595_v49, %v1594_v47  ;;  %v1641_v51 = vpop.f32.mrb[5].mxu1  ;;  %v1597_v52 = vpop.f32.mrb[6].mxu0  ;;  %v416_v49 = vld [vmem:[#allocation2 + $0x8] sm:$0xff] }
 0x135   : > { %v1642_v53 = vadd.f32 %v1641_v51, %v1640_v48  ;;  %v1643_v54 = vpop.f32.mrb[6].mxu1  ;;  %v1598_v55 = vpop.f32.mrb[7].mxu0 }
 0x136   : > { %v1599_v56 = vadd.f32 %v1598_v55, %v1597_v52  ;;  %v1644_v57 = vpop.f32.mrb[7].mxu1 }
 0x137   : > { %v1645_v58 = vadd.f32 %v1644_v57, %v1643_v54  ;;  %v2124_v59 = vadd.f32 %v1642_v53, %v1596_v50  ;;  %v422_v53 = vld [vmem:[#allocation2 + $0x38] sm:$0xff] }
 0x139   : > { %v2126_v60 = vadd.f32 %v1645_v58, %v1599_v56 }
 0x13a   : > { %v1600_v61 = vpop.f32.mrb[8].mxu0 }
 0x13b   : > { %v1646_v62 = vpop.f32.mrb[8].mxu1  ;;  %v1601_v63 = vpop.f32.mrb[9].mxu0 }
 0x13c   : > { %v1602_v0 = vadd.f32 %v1601_v63, %v1600_v61  ;;  %v1647_v1 = vpop.f32.mrb[9].mxu1  ;;  %v1603_v2 = vpop.f32.mrb[10].mxu0 }
 0x13d   : > { %v1648_v3 = vadd.f32 %v1647_v1, %v1646_v62  ;;  %v1649_v4 = vpop.f32.mrb[10].mxu1  ;;  %v1604_v5 = vpop.f32.mrb[11].mxu0  ;;  %v417_v62 = vld [vmem:[#allocation2 + $0x10] sm:$0xff]  ;;  %v423_v1 = vld [vmem:[#allocation2 + $0x40] sm:$0xff] }
 0x13e   : > { %v1605_v6 = vadd.f32 %v1604_v5, %v1603_v2  ;;  %v1650_v7 = vpop.f32.mrb[11].mxu1  ;;  %v418_v5 = vld [vmem:[#allocation2 + $0x18] sm:$0xff] }
 0x13f   : > { %v1651_v8 = vadd.f32 %v1650_v7, %v1649_v4  ;;  %v2128_v9 = vadd.f32 %v1648_v3, %v1602_v0 }
 0x141   : > { %v2130_v10 = vadd.f32 %v1651_v8, %v1605_v6 }
 0x142   : > { %v1606_v11 = vpop.f32.mrb[12].mxu0 }
 0x143   : > { %v1652_v12 = vpop.f32.mrb[12].mxu1  ;;  %v1607_v13 = vpop.f32.mrb[13].mxu0 }
 0x144   : > { %v1608_v14 = vadd.f32 %v1607_v13, %v1606_v11  ;;  %v1653_v15 = vpop.f32.mrb[13].mxu1  ;;  %v1609_v16 = vpop.f32.mrb[14].mxu0  ;;  %v424_v11 = vld [vmem:[#allocation2 + $0x48] sm:$0xff] }
 0x145   : > { %v1654_v17 = vadd.f32 %v1653_v15, %v1652_v12  ;;  %v1655_v18 = vpop.f32.mrb[14].mxu1  ;;  %v1610_v19 = vpop.f32.mrb[15].mxu0 }
 0x146   : > { %v1611_v20 = vadd.f32 %v1610_v19, %v1609_v16  ;;  %v1656_v21 = vpop.f32.mrb[15].mxu1 }
 0x147   : > { %v1657_v22 = vadd.f32 %v1656_v21, %v1655_v18  ;;  %v1037_v23 = vadd.f32 %v1654_v17, %v1608_v14  ;;  %v419_v18 = vld [vmem:[#allocation2 + $0x20] sm:$0xff] }
 0x149   : > { %v1040_v24 = vadd.f32 %v1657_v22, %v1611_v20  ;;  %v420_v22 = vld [vmem:[#allocation2 + $0x28] sm:$0xff] }
 0x14a   : > { %v1612_v25 = vpop.f32.mrb[16].mxu0 }
 0x14b   : > { %v1658_v26 = vpop.f32.mrb[16].mxu1  ;;  %v1613_v27 = vpop.f32.mrb[17].mxu0 }
 0x14c   : > { %v1614_v28 = vadd.f32 %v1613_v27, %v1612_v25  ;;  %v1659_v29 = vpop.f32.mrb[17].mxu1  ;;  %v1615_v30 = vpop.f32.mrb[18].mxu0 }
 0x14d   : > { %v1660_v31 = vadd.f32 %v1659_v29, %v1658_v26  ;;  %v1661_v32 = vpop.f32.mrb[18].mxu1  ;;  %v1616_v33 = vpop.f32.mrb[19].mxu0  ;;  %v1493_v29 = vld [vmem:[%s2188_s2] ss:$0 sm:$0xff] (!%p1492_p11) }
 0x14e   : > { %v1617_v34 = vadd.f32 %v1616_v33, %v1615_v30  ;;  %v1662_v35 = vpop.f32.mrb[19].mxu1 }
 0x14f   : > { %v1663_v36 = vadd.f32 %v1662_v35, %v1661_v32  ;;  %v1045_v37 = vadd.f32 %v1660_v31, %v1614_v28  ;;  %v1520_v31 = vld [vmem:[%s2189_s3] sm:$0xff] (!%p1492_p11)  }
 0x150   : > { %v1521_v33 = vunpack.c.l.bf16 (!%p1492_p11), %v1520_v31 }
 0x151   : > { %v1048_v38 = vadd.f32 %v1663_v36, %v1617_v34  ;;  %v1522_v34 = vunpack.c.h.bf16 (!%p1492_p11), %v1520_v31 }
 0x152   : > { %v1085_v40 = vpop.f32.mrb[20].mxu0 }
 0x153   : > { %v1086_v41 = vadd.f32 %v1085_v40, %v1013_v45  ;;  %v1109_v43 = vpop.f32.mrb[20].mxu1  ;;  %v1695_v44 = vpop.f32.mrb[21].mxu0 }
 0x154   : > { %v1110_v47 = vadd.f32 %v1109_v43, %v1037_v23  ;;  %v1707_v48 = vpop.f32.mrb[21].mxu1  ;;  %v1088_v50 = vpop.f32.mrb[22].mxu0  ;;  %v1565_v44 = vld [vmem:[%s2189_s3 + $0x10] sm:$0xff] (!%p1492_p11)  }
 0x155   : > { %v1124_v51 = vadd.f32 %v1086_v41, %v415_v39  ;;  %v1089_v52 = vadd.f32 %v1088_v50, %v2122_v46  ;;  %v1112_v54 = vpop.f32.mrb[22].mxu1  ;;  %v1696_v55 = vpop.f32.mrb[23].mxu0 }
 0x156   : > { %v1130_v56 = vadd.f32 %v1110_v47, %v421_v42  ;;  %v1113_v57 = vadd.f32 %v1112_v54, %v1040_v24  ;;  %v1708_v58 = vpop.f32.mrb[23].mxu1 }
 0x157   : > { %1134 = vst [vmem:[#allocation2] sm:$0xff] %v1124_v51  ;;  %v1125_v61 = vadd.f32 %v1089_v52, %v416_v49  ;;  %v1529_v51 = vunpack.c.l.bf16 (!%p1492_p11), %v1565_v44  ;;  %v1530_v52 = vunpack.c.h.bf16 (!%p1492_p11), %v1565_v44 }
 0x158   : > { %1140 = vst [vmem:[#allocation2 + $0x30] sm:$0xff] %v1130_v56  ;;  %v1131_v45 = vadd.f32 %v1113_v57, %v422_v53  ;;  %v1566_v53 = vld [vmem:[%s2189_s3 + $0x18] sm:$0xff] (!%p1492_p11)  }
 0x159   : > { %1135 = vst [vmem:[#allocation2 + $0x8] sm:$0xff] %v1125_v61 }
 0x15a   : > { %1141 = vst [vmem:[#allocation2 + $0x38] sm:$0xff] %v1131_v45  ;;  %v1093_v63 = vpop.f32.mrb[24].mxu0 }
 0x15b   : > { %v1094_v0 = vadd.f32 %v1093_v63, %v2124_v59  ;;  %v1117_v2 = vpop.f32.mrb[24].mxu1  ;;  %v1699_v3 = vpop.f32.mrb[25].mxu0 }
 0x15c   : > { %v1118_v46 = vadd.f32 %v1117_v2, %v1045_v37  ;;  %v1711_v4 = vpop.f32.mrb[25].mxu1  ;;  %v1096_v6 = vpop.f32.mrb[26].mxu0  ;;  %v1564_v37 = vld [vmem:[%s2189_s3 + $0x8] sm:$0xff] (!%p1492_p11)   ;;  %v1533_v3 = vunpack.c.l.bf16 (!%p1492_p11), %v1566_v53 }
 0x15d   : > { %v1126_v7 = vadd.f32 %v1094_v0, %v417_v62  ;;  %v1097_v8 = vadd.f32 %v1096_v6, %v2126_v60  ;;  %v1120_v12 = vpop.f32.mrb[26].mxu1  ;;  %v1700_v13 = vpop.f32.mrb[27].mxu0  ;;  %v1525_v40 = vunpack.c.l.bf16 (!%p1492_p11), %v1564_v37  ;;  %v1526_v41 = vunpack.c.h.bf16 (!%p1492_p11), %v1564_v37  ;;  %v1567_v4 = vld [vmem:[%s2189_s3 + $0x20] sm:$0xff] (!%p1492_p11)  }
 0x15e   : > { %v1132_v14 = vadd.f32 %v1118_v46, %v423_v1  ;;  %v1121_v15 = vadd.f32 %v1120_v12, %v1048_v38  ;;  %v1712_v16 = vpop.f32.mrb[27].mxu1  ;;  %v1148_v27 = vld [vmem:[#allocation2] sm:$0xff] (!%p1492_p11)  ;;  %v1534_v46 = vunpack.c.h.bf16 (!%p1492_p11), %v1566_v53 }
 0x15f   : > { %1136 = vst [vmem:[#allocation2 + $0x10] sm:$0xff] %v1126_v7  ;;  %v1127_v17 = vadd.f32 %v1097_v8, %v418_v5  ;;  %v1154_v47 = vld [vmem:[#allocation2 + $0x30] sm:$0xff] (!%p1492_p11)  ;;  %v1537_v16 = vunpack.c.l.bf16 (!%p1492_p11), %v1567_v4 }
 0x160   : > { %1142 = vst [vmem:[#allocation2 + $0x40] sm:$0xff] %v1132_v14  ;;  %v1133_v59 = vadd.f32 %v1121_v15, %v424_v11  ;;  %v1149_v28 = vld [vmem:[#allocation2 + $0x8] sm:$0xff] (!%p1492_p11)  ;;  %v1171_v56 = vadd.f32 (!%p1492_p11), %v1493_v29, %v1154_v47 }
 0x161   : > { %1137 = vst [vmem:[#allocation2 + $0x18] sm:$0xff] %v1127_v17  ;;  %v1166_v30 = vadd.f32 (!%p1492_p11), %v1493_v29, %v1149_v28  ;;  %v1155_v48 = vld [vmem:[#allocation2 + $0x38] sm:$0xff] (!%p1492_p11)  ;;  %v1538_v17 = vunpack.c.h.bf16 (!%p1492_p11), %v1567_v4 }
 0x162   : > { %1143 = vst [vmem:[#allocation2 + $0x48] sm:$0xff] %v1133_v59  ;;  %v1101_v19 = vpop.f32.mrb[28].mxu0  ;;  %v1172_v57 = vadd.f32 (!%p1492_p11), %v1493_v29, %v1155_v48  ;;  %v1201_v12 = vadd.f32 (!%p1492_p11), %v1533_v3, %v1171_v56 }
 0x163   : > { %v1102_v20 = vadd.f32 %v1101_v19, %v2128_v9  ;;  %v1703_v21 = vpop.f32.mrb[29].mxu0  ;;  %1147 = sbr.rel (%p1492_p11) target bundleno = 378 (0x17a), region = 70  ;;  %v1165_v9 = vadd.f32 (!%p1492_p11), %v1493_v29, %v1148_v27  ;;  %v1196_v50 = vadd.f32 (!%p1492_p11), %v1522_v34, %v1166_v30 }
 0x164   : > { %v1104_v23 = vpop.f32.mrb[30].mxu0  ;;  %v1202_v13 = vadd.f32 (!%p1492_p11), %v1534_v46, %v1172_v57  ;;  %v1211_v59 = vmax.f32 (!%p1492_p11), %v1201_v12, 0.0 }
 0x165   : > { %v1128_v60 = vadd.f32 %v1102_v20, %v419_v18  ;;  %v1105_v24 = vadd.f32 %v1104_v23, %v2130_v10  ;;  %v1704_v25 = vpop.f32.mrb[31].mxu0  ;;  %v1195_v49 = vadd.f32 (!%p1492_p11), %v1521_v33, %v1165_v9  ;;  %v1206_v45 = vmax.f32 (!%p1492_p11), %v1196_v50, 0.0 }
 0x166   : > { %v1150_v10 = vld [vmem:[#allocation2 + $0x10] sm:$0xff] (!%p1492_p11)  ;;  %v1212_v18 = vmax.f32 (!%p1492_p11), %v1202_v13, 0.0 }
 0x167   : > { %1138 = vst [vmem:[#allocation2 + $0x20] sm:$0xff] %v1128_v60  ;;  %v1129_v26 = vadd.f32 %v1105_v24, %v420_v22  ;;  %v1167_v35 = vadd.f32 (!%p1492_p11), %v1493_v29, %v1150_v10  ;;  %v1156_v58 = vld [vmem:[#allocation2 + $0x40] sm:$0xff] (!%p1492_p11)  ;;  %v1205_v61 = vmax.f32 (!%p1492_p11), %v1195_v49, 0.0 }
 0x168   : > { %v1151_v32 = vld [vmem:[#allocation2 + $0x18] sm:$0xff] (!%p1492_p11)  ;;  %v1173_v8 = vadd.f32 (!%p1492_p11), %v1493_v29, %v1156_v58  ;;  %v1557_v21 = vpack.c.bf16 (!%p1492_p11), %v1212_v18, %v1211_v59 }
 0x169   : > { %1139 = vst [vmem:[#allocation2 + $0x28] sm:$0xff] %v1129_v26  ;;  %v1168_v36 = vadd.f32 (!%p1492_p11), %v1493_v29, %v1151_v32  ;;  %v1197_v54 = vadd.f32 (!%p1492_p11), %v1525_v40, %v1167_v35  ;;  %v1157_v0 = vld [vmem:[#allocation2 + $0x48] sm:$0xff] (!%p1492_p11)  ;;  %v1542_v5 = vpack.c.bf16 (!%p1492_p11), %v1206_v45, %v1205_v61 }
 0x16a   : > { %v1174_v14 = vadd.f32 %v1493_v29, %v1157_v0  ;;  %v1203_v19 = vadd.f32 %v1537_v16, %v1173_v8  ;;  %1570 = vst [vmem:[%s2190_s4 + $0x18] sm:$0xff] %v1557_v21  }
 0x16b   : > { %v1198_v55 = vadd.f32 %v1526_v41, %v1168_v36  ;;  %v1207_v1 = vmax.f32 %v1197_v54, 0.0  ;;  %1543 = vst [vmem:[%s2190_s4] sm:$0xff] %v1542_v5  }
 0x16c   : > { %v1204_v20 = vadd.f32 %v1538_v17, %v1174_v14  ;;  %v1213_v22 = vmax.f32 %v1203_v19, 0.0 }
 0x16d   : > { %v1208_v2 = vmax.f32 %v1198_v55, 0.0 }
 0x16e   : > { %v1152_v38 = vld [vmem:[#allocation2 + $0x20] sm:$0xff]  ;;  %v1214_v23 = vmax.f32 %v1204_v20, 0.0 }
 0x16f   : > { %v1169_v42 = vadd.f32 %v1493_v29, %v1152_v38  ;;  %v1547_v11 = vpack.c.bf16 %v1208_v2, %v1207_v1 }
 0x170   : > { %v1153_v39 = vld [vmem:[#allocation2 + $0x28] sm:$0xff]  ;;  %v1562_v60 = vpack.c.bf16 %v1214_v23, %v1213_v22 }
 0x171   : > { %v1170_v43 = vadd.f32 %v1493_v29, %v1153_v39  ;;  %v1199_v62 = vadd.f32 %v1529_v51, %v1169_v42  ;;  %1568 = vst [vmem:[%s2190_s4 + $0x8] sm:$0xff] %v1547_v11  }
 0x172   : > { %1571 = vst [vmem:[%s2190_s4 + $0x20] sm:$0xff] %v1562_v60  }
 0x173   : > { %v1200_v63 = vadd.f32 %v1530_v52, %v1170_v43  ;;  %v1209_v6 = vmax.f32 %v1199_v62, 0.0 }
 0x175   : > { %v1210_v7 = vmax.f32 %v1200_v63, 0.0 }
 0x177   : > { %v1552_v15 = vpack.c.bf16 %v1210_v7, %v1209_v6 }
 0x179   : > { %1569 = vst [vmem:[%s2190_s4 + $0x10] sm:$0xff] %v1552_v15  }
 0x17a PF: > { %s14_s19 = sadd.s32 1, %s1887_s19   ;;  %s2191_s15 = smov %s1875_s16 }
 0x17b   : > { %p11_p12 = scmp.ge.s32.totalorder %s14_s19, 4   ;;  %s2192_s16 = smov %s1952_s23 }
 0x17c   : > { %s2193_s17 = smov %s1883_s18  ;;  %s2194_s18 = smov %s2196_s20 }
 0x17d   :  { %13 = sbr.rel (!%p11_p12) target bundleno = 3 (0x3), region = 120 }

// kernel: pspnet_forward.41
= control target key start
LH: loop header
LB: loop body
LE: loop exit
PB: predicated region body
PF: predicated region fallthrough
CT: control target
= control target key end

     0   :  { %v369_v1 = vmov 0   ;;  %v41_v21 = vlaneseq  ;;  %s477_s1 = inlined_call_operand.vmem [shape: bf16[128,256], index: 1, kind: input, shape index: {}]   ;;  %s478_s0 = inlined_call_operand.vmem [shape: bf16[64,128], index: 0, kind: input, shape index: {}]   ;;  %s479_s2 = inlined_call_operand.vmem [shape: f32[1,256], index: 2, kind: input, shape index: {}]   ;;  %s480_s3 = inlined_call_operand.vmem [shape: bf16[64,256], index: 3, kind: output, shape index: {}]  }
   0x1   :  { %v341_v0 = vld [vmem:[%s477_s1 + $0x4] ss:$8 sps:$4 sm:$0xff]   ;;  %187 = vmatprep.mubr.bf16.mxu0 %v369_v1  ;;  %207 = vmatprep.mubr.bf16.mxu1 %v369_v1  ;;  %v343_v2 = vld [vmem:[%s477_s1] ss:$8 sps:$4 sm:$0xff]   ;;  %v344_v3 = vld [vmem:[%s477_s1 + $0x14] ss:$8 sps:$4 sm:$0xff]  }
   0x2   :  { %155 = vmatprep.subr.bf16.mxu0 %v341_v0  ;;  %324 = vmatprep.subr.bf16.mxu1 %v341_v0  ;;  %v346_v4 = vld [vmem:[%s477_s1 + $0x10] ss:$8 sps:$4 sm:$0xff]   ;;  %v347_v5 = vld [vmem:[%s477_s1 + $0x24] ss:$8 sps:$4 sm:$0xff]   ;;  %v349_v6 = vld [vmem:[%s477_s1 + $0x20] ss:$8 sps:$4 sm:$0xff]  }
   0x3   :  { %156 = vmatpush1.bf16.msra.mxu0 %v343_v2  ;;  %332 = vmatpush1.bf16.msra.mxu1 %v343_v2  ;;  %v350_v7 = vld [vmem:[%s477_s1 + $0x34] ss:$8 sps:$4 sm:$0xff]   ;;  %v352_v8 = vld [vmem:[%s477_s1 + $0x30] ss:$8 sps:$4 sm:$0xff]   ;;  %v353_v9 = vld [vmem:[%s477_s1 + $0x44] ss:$8 sps:$4 sm:$0xff]  }
   0x4   :  { %157 = vmatprep.subr.bf16.mxu0 %v344_v3  ;;  %325 = vmatprep.subr.bf16.mxu1 %v344_v3  ;;  %v355_v10 = vld [vmem:[%s477_s1 + $0x40] ss:$8 sps:$4 sm:$0xff]   ;;  %v356_v11 = vld [vmem:[%s477_s1 + $0x54] ss:$8 sps:$4 sm:$0xff]   ;;  %v358_v12 = vld [vmem:[%s477_s1 + $0x50] ss:$8 sps:$4 sm:$0xff]  }
   0x5   :  { %v359_v13 = vld [vmem:[%s477_s1 + $0x64] ss:$8 sps:$4 sm:$0xff]   ;;  %v361_v14 = vld [vmem:[%s477_s1 + $0x60] ss:$8 sps:$4 sm:$0xff]   ;;  %v362_v15 = vld [vmem:[%s477_s1 + $0x74] ss:$8 sps:$4 sm:$0xff]  }
   0x6   :  { %v364_v16 = vld [vmem:[%s477_s1 + $0x70] ss:$8 sps:$4 sm:$0xff]   ;;  %v365_v17 = vld [vmem:[%s478_s0] sm:$0xff]   ;;  %v367_v19 = vld [vmem:[%s478_s0 + $0x8] sm:$0xff]   ;;  %v42_v22 = vshrl.u32 %v41_v21, 7 }
   0x7   :  { %158 = vmatpush1.bf16.msra.mxu0 %v346_v4  ;;  %333 = vmatpush1.bf16.msra.mxu1 %v346_v4  ;;  %v366_v18 = vld [vmem:[%s478_s0 + $0x10] sm:$0xff]   ;;  %v368_v20 = vld [vmem:[%s478_s0 + $0x18] sm:$0xff]   ;;  %v39_v24 = vld [vmem:[%s479_s2] sm:$0x3] }
   0x8   :  { %159 = vmatprep.subr.bf16.mxu0 %v347_v5  ;;  %326 = vmatprep.subr.bf16.mxu1 %v347_v5  ;;  %v43_v23 = vsub.s32 0, %v42_v22  ;;  %v47_v25 = vsub.s32 1, %v42_v22 }
   0xa   :  { %v44_v26 = vrot.slane %v39_v24, %v43_v23  ;;  %v48_v27 = vrot.slane %v39_v24, %v47_v25 }
   0xb   :  { %160 = vmatpush1.bf16.msra.mxu0 %v349_v6  ;;  %334 = vmatpush1.bf16.msra.mxu1 %v349_v6 }
   0xc   :  { %161 = vmatprep.subr.bf16.mxu0 %v350_v7  ;;  %327 = vmatprep.subr.bf16.mxu1 %v350_v7 }
   0xf   :  { %162 = vmatpush1.bf16.msra.mxu0 %v352_v8  ;;  %335 = vmatpush1.bf16.msra.mxu1 %v352_v8 }
  0x10   :  { %163 = vmatprep.subr.bf16.mxu0 %v353_v9  ;;  %328 = vmatprep.subr.bf16.mxu1 %v353_v9 }
  0x13   :  { %164 = vmatpush1.bf16.msra.mxu0 %v355_v10  ;;  %336 = vmatpush1.bf16.msra.mxu1 %v355_v10 }
  0x14   :  { %165 = vmatprep.subr.bf16.mxu0 %v356_v11  ;;  %329 = vmatprep.subr.bf16.mxu1 %v356_v11 }
  0x17   :  { %166 = vmatpush1.bf16.msra.mxu0 %v358_v12  ;;  %337 = vmatpush1.bf16.msra.mxu1 %v358_v12 }
  0x18   :  { %167 = vmatprep.subr.bf16.mxu0 %v359_v13  ;;  %330 = vmatprep.subr.bf16.mxu1 %v359_v13 }
  0x1b   :  { %168 = vmatpush1.bf16.msra.mxu0 %v361_v14  ;;  %338 = vmatpush1.bf16.msra.mxu1 %v361_v14 }
  0x1c   :  { %169 = vmatprep.subr.bf16.mxu0 %v362_v15  ;;  %331 = vmatprep.subr.bf16.mxu1 %v362_v15 }
  0x1f   :  { %170 = vmatpush1.bf16.msra.mxu0 %v364_v16  ;;  %339 = vmatpush1.bf16.msra.mxu1 %v364_v16 }
  0x22   :  { %188 = vmatmul.mubr.bf16.vlgmr.msra.gmra.mrb[0].mxu0 %v365_v17  ;;  %208 = vmatmul.mubr.bf16.vlgmr.msra.gmra.mrb[0].mxu1 %v366_v18 }
  0x23   :  { %197 = vmatprep.mubr.bf16.mxu0 %v369_v1  ;;  %217 = vmatprep.mubr.bf16.mxu1 %v369_v1 }
  0x2a   :  { %198 = vmatmul.mubr.bf16.gmra.mrb[4].mxu0 %v367_v19  ;;  %218 = vmatmul.mubr.bf16.gmra.mrb[4].mxu1 %v368_v20 }
  0xf5   :  { %v189_v28 = vpop.f32.mrb[0].mxu0  ;;  %v209_v29 = vpop.f32.mrb[0].mxu1 }
  0xf6   :  { %v190_v30 = vadd.f32 %v189_v28, %v44_v26  ;;  %v210_v31 = vadd.f32 %v209_v29, %v44_v26  ;;  %v191_v32 = vpop.f32.mrb[1].mxu0  ;;  %v211_v33 = vpop.f32.mrb[1].mxu1 }
  0xf7   :  { %v192_v34 = vadd.f32 %v191_v32, %v48_v27  ;;  %v212_v35 = vadd.f32 %v211_v33, %v48_v27  ;;  %v193_v36 = vpop.f32.mrb[2].mxu0  ;;  %v213_v37 = vpop.f32.mrb[2].mxu1 }
  0xf8   :  { %v194_v38 = vadd.f32 %v193_v36, %v44_v26  ;;  %v214_v39 = vadd.f32 %v213_v37, %v44_v26  ;;  %v195_v40 = vpop.f32.mrb[3].mxu0  ;;  %v215_v41 = vpop.f32.mrb[3].mxu1 }
  0xf9   :  { %v316_v42 = vpack.c.bf16 %v192_v34, %v190_v30  ;;  %v320_v43 = vpack.c.bf16 %v212_v35, %v210_v31  ;;  %v196_v44 = vadd.f32 %v195_v40, %v48_v27  ;;  %v216_v45 = vadd.f32 %v215_v41, %v48_v27 }
  0xfb   :  { %276 = vst [vmem:[%s480_s3] sm:$0xff] %v316_v42  ;;  %280 = vst [vmem:[%s480_s3 + $0x20] sm:$0xff] %v320_v43  ;;  %v317_v46 = vpack.c.bf16 %v196_v44, %v194_v38  ;;  %v321_v47 = vpack.c.bf16 %v216_v45, %v214_v39 }
  0xfd   :  { %277 = vst [vmem:[%s480_s3 + $0x8] sm:$0xff] %v317_v46  ;;  %281 = vst [vmem:[%s480_s3 + $0x28] sm:$0xff] %v321_v47  ;;  %v199_v48 = vpop.f32.mrb[4].mxu0  ;;  %v219_v49 = vpop.f32.mrb[4].mxu1 }
  0xfe   :  { %v200_v50 = vadd.f32 %v199_v48, %v44_v26  ;;  %v220_v51 = vadd.f32 %v219_v49, %v44_v26  ;;  %v201_v52 = vpop.f32.mrb[5].mxu0  ;;  %v221_v53 = vpop.f32.mrb[5].mxu1 }
  0xff   :  { %v202_v54 = vadd.f32 %v201_v52, %v48_v27  ;;  %v222_v55 = vadd.f32 %v221_v53, %v48_v27  ;;  %v203_v56 = vpop.f32.mrb[6].mxu0  ;;  %v223_v57 = vpop.f32.mrb[6].mxu1 }
 0x100   :  { %v204_v58 = vadd.f32 %v203_v56, %v44_v26  ;;  %v224_v59 = vadd.f32 %v223_v57, %v44_v26  ;;  %v205_v60 = vpop.f32.mrb[7].mxu0  ;;  %v225_v61 = vpop.f32.mrb[7].mxu1 }
 0x101   :  { %v318_v62 = vpack.c.bf16 %v202_v54, %v200_v50  ;;  %v322_v63 = vpack.c.bf16 %v222_v55, %v220_v51  ;;  %v206_v0 = vadd.f32 %v205_v60, %v48_v27  ;;  %v226_v1 = vadd.f32 %v225_v61, %v48_v27 }
 0x103   :  { %278 = vst [vmem:[%s480_s3 + $0x10] sm:$0xff] %v318_v62  ;;  %282 = vst [vmem:[%s480_s3 + $0x30] sm:$0xff] %v322_v63  ;;  %v319_v2 = vpack.c.bf16 %v206_v0, %v204_v58  ;;  %v323_v3 = vpack.c.bf16 %v226_v1, %v224_v59 }
 0x105   :  { %279 = vst [vmem:[%s480_s3 + $0x18] sm:$0xff] %v319_v2  ;;  %283 = vst [vmem:[%s480_s3 + $0x38] sm:$0xff] %v323_v3 }

// kernel: pspnet_forward.42
= control target key start
LH: loop header
LB: loop body
LE: loop exit
PB: predicated region body
PF: predicated region fallthrough
CT: control target
= control target key end

     0   :  { %v496_v0 = vmov 0.0   ;;  %vm497_vm0 = vmmov 0   ;;  %s610_s1 = inlined_call_operand.vmem [shape: bf16[128,128], index: 1, kind: input, shape index: {}]   ;;  %s611_s0 = inlined_call_operand.vmem [shape: bf16[112,128], index: 0, kind: input, shape index: {}]   ;;  %s612_s2 = inlined_call_operand.vmem [shape: f32[1,128], index: 2, kind: input, shape index: {}]   ;;  %s613_s3 = inlined_call_operand.vmem [shape: bf16[112,128], index: 3, kind: output, shape index: {}]  }
   0x1   :  { %419 = vmatprep.subr.bf16.mxu0 %v496_v0  ;;  %v481_v1 = vld [vmem:[%s610_s1] sm:$0xff]   ;;  %463 = vmatprep.subr.bf16.mxu1 %v496_v0  ;;  %v482_v2 = vld [vmem:[%s610_s1 + $0x8] sm:$0xff]   ;;  %v483_v3 = vld [vmem:[%s610_s1 + $0x10] sm:$0xff]  }
   0x2   :  { %435 = vmatprep.mubr.msk.bf16.mxu0 %vm497_vm0, %v496_v0  ;;  %451 = vmatprep.mubr.msk.bf16.mxu1 %vm497_vm0, %v496_v0  ;;  %v484_v4 = vld [vmem:[%s610_s1 + $0x18] sm:$0xff]   ;;  %v485_v5 = vld [vmem:[%s610_s1 + $0x20] sm:$0xff]   ;;  %v486_v6 = vld [vmem:[%s610_s1 + $0x28] sm:$0xff]  }
   0x3   :  { %420 = vmatpush3.bf16.msra.mxu0 %v481_v1  ;;  %471 = vmatpush3.bf16.msra.mxu1 %v481_v1  ;;  %v487_v7 = vld [vmem:[%s610_s1 + $0x30] sm:$0xff]   ;;  %v488_v8 = vld [vmem:[%s610_s1 + $0x38] sm:$0xff]   ;;  %v489_v9 = vld [vmem:[%s611_s0] sm:$0xff]  }
   0x4   :  { %421 = vmatprep.subr.bf16.mxu0 %v496_v0  ;;  %464 = vmatprep.subr.bf16.mxu1 %v496_v0  ;;  %v490_v10 = vld [vmem:[%s611_s0 + $0x20] sm:$0xff]   ;;  %v491_v11 = vld [vmem:[%s611_s0 + $0x8] sm:$0xff]   ;;  %v493_v13 = vld [vmem:[%s611_s0 + $0x10] sm:$0xff]  }
   0x5   :  { %v492_v12 = vld [vmem:[%s611_s0 + $0x28] sm:$0xff]   ;;  %v494_v14 = vld [vmem:[%s611_s0 + $0x30] sm:$0xff]   ;;  %v495_v15 = vld [vmem:[%s611_s0 + $0x18] sm:$0xff]  }
   0x6   :  { %v573_v16 = vld [vmem:[%s612_s2] ss:$0 sm:$0xff] }
   0x7   :  { %422 = vmatpush3.bf16.msra.mxu0 %v482_v2  ;;  %472 = vmatpush3.bf16.msra.mxu1 %v482_v2 }
   0x8   :  { %423 = vmatprep.subr.bf16.mxu0 %v496_v0  ;;  %465 = vmatprep.subr.bf16.mxu1 %v496_v0 }
   0xb   :  { %424 = vmatpush3.bf16.msra.mxu0 %v483_v3  ;;  %473 = vmatpush3.bf16.msra.mxu1 %v483_v3 }
   0xc   :  { %425 = vmatprep.subr.bf16.mxu0 %v496_v0  ;;  %466 = vmatprep.subr.bf16.mxu1 %v496_v0 }
   0xf   :  { %426 = vmatpush3.bf16.msra.mxu0 %v484_v4  ;;  %474 = vmatpush3.bf16.msra.mxu1 %v484_v4 }
  0x10   :  { %427 = vmatprep.subr.bf16.mxu0 %v496_v0  ;;  %467 = vmatprep.subr.bf16.mxu1 %v496_v0 }
  0x13   :  { %428 = vmatpush3.bf16.msra.mxu0 %v485_v5  ;;  %475 = vmatpush3.bf16.msra.mxu1 %v485_v5 }
  0x14   :  { %429 = vmatprep.subr.bf16.mxu0 %v496_v0  ;;  %468 = vmatprep.subr.bf16.mxu1 %v496_v0 }
  0x17   :  { %430 = vmatpush3.bf16.msra.mxu0 %v486_v6  ;;  %476 = vmatpush3.bf16.msra.mxu1 %v486_v6 }
  0x18   :  { %431 = vmatprep.subr.bf16.mxu0 %v496_v0  ;;  %469 = vmatprep.subr.bf16.mxu1 %v496_v0 }
  0x1b   :  { %432 = vmatpush3.bf16.msra.mxu0 %v487_v7  ;;  %477 = vmatpush3.bf16.msra.mxu1 %v487_v7 }
  0x1c   :  { %433 = vmatprep.subr.bf16.mxu0 %v496_v0  ;;  %470 = vmatprep.subr.bf16.mxu1 %v496_v0 }
  0x1f   :  { %434 = vmatpush3.bf16.msra.mxu0 %v488_v8  ;;  %478 = vmatpush3.bf16.msra.mxu1 %v488_v8 }
  0x22   :  { %436 = vmatmul.mubr.bf16.vlgmr.msra.gmra.mrb[0].mxu0 %v489_v9  ;;  %452 = vmatmul.mubr.bf16.vlgmr.msra.gmra.mrb[0].mxu1 %v490_v10 }
  0x23   :  { %439 = vmatprep.mubr.msk.bf16.mxu0 %vm497_vm0, %v496_v0  ;;  %455 = vmatprep.mubr.msk.bf16.mxu1 %vm497_vm0, %v496_v0 }
  0x2a   :  { %440 = vmatmul.mubr.bf16.gmra.mrb[4].mxu0 %v491_v11  ;;  %456 = vmatmul.mubr.bf16.gmra.mrb[4].mxu1 %v492_v12 }
  0x2b   :  { %443 = vmatprep.mubr.msk.bf16.mxu0 %vm497_vm0, %v496_v0  ;;  %459 = vmatprep.mubr.msk.bf16.mxu1 %vm497_vm0, %v496_v0 }
  0x32   :  { %444 = vmatmul.mubr.bf16.gmra.mrb[8].mxu0 %v493_v13  ;;  %460 = vmatmul.mubr.bf16.gmra.mrb[8].mxu1 %v494_v14 }
  0x33   :  { %447 = vmatprep.mubr.msk.bf16.mxu0 %vm497_vm0, %v496_v0 }
  0x3a   :  { %448 = vmatmul.mubr.bf16.gmra.mrb[12].mxu0 %v495_v15 }
  0xf5   :  { %v176_v17 = vpop.f32.mrb[0].mxu0  ;;  %v208_v18 = vpop.f32.mrb[0].mxu1 }
  0xf6   :  { %v177_v19 = vadd.f32 %v573_v16, %v176_v17  ;;  %v437_v20 = vpop.f32.mrb[1].mxu0  ;;  %v209_v21 = vadd.f32 %v573_v16, %v208_v18  ;;  %v453_v22 = vpop.f32.mrb[1].mxu1 }
  0xf7   :  { %v179_v23 = vpop.f32.mrb[2].mxu0  ;;  %v211_v24 = vpop.f32.mrb[2].mxu1 }
  0xf8   :  { %v180_v25 = vadd.f32 %v573_v16, %v179_v23  ;;  %v438_v26 = vpop.f32.mrb[3].mxu0  ;;  %v239_v27 = vmax.f32 %v209_v21, 0.0  ;;  %v212_v28 = vadd.f32 %v573_v16, %v211_v24  ;;  %v454_v29 = vpop.f32.mrb[3].mxu1  ;;  %v231_v30 = vmax.f32 %v177_v19, 0.0 }
  0xfa   :  { %v232_v31 = vmax.f32 %v180_v25, 0.0  ;;  %v240_v32 = vmax.f32 %v212_v28, 0.0 }
  0xfc   :  { %v366_v33 = vpack.c.bf16 %v232_v31, %v231_v30  ;;  %v386_v34 = vpack.c.bf16 %v240_v32, %v239_v27 }
  0xfd   :  { %v184_v35 = vpop.f32.mrb[4].mxu0  ;;  %v216_v36 = vpop.f32.mrb[4].mxu1 }
  0xfe   :  { %367 = vst [vmem:[%s613_s3] sm:$0xff] %v366_v33   ;;  %401 = vst [vmem:[%s613_s3 + $0x20] sm:$0xff] %v386_v34   ;;  %v185_v37 = vadd.f32 %v573_v16, %v184_v35  ;;  %v441_v38 = vpop.f32.mrb[5].mxu0  ;;  %v217_v39 = vadd.f32 %v573_v16, %v216_v36  ;;  %v457_v40 = vpop.f32.mrb[5].mxu1 }
  0xff   :  { %v187_v41 = vpop.f32.mrb[6].mxu0  ;;  %v219_v42 = vpop.f32.mrb[6].mxu1 }
 0x100   :  { %v188_v43 = vadd.f32 %v573_v16, %v187_v41  ;;  %v442_v44 = vpop.f32.mrb[7].mxu0  ;;  %v241_v45 = vmax.f32 %v217_v39, 0.0  ;;  %v220_v46 = vadd.f32 %v573_v16, %v219_v42  ;;  %v458_v47 = vpop.f32.mrb[7].mxu1  ;;  %v233_v48 = vmax.f32 %v185_v37, 0.0 }
 0x102   :  { %v234_v49 = vmax.f32 %v188_v43, 0.0  ;;  %v242_v50 = vmax.f32 %v220_v46, 0.0 }
 0x104   :  { %v371_v51 = vpack.c.bf16 %v234_v49, %v233_v48  ;;  %v391_v52 = vpack.c.bf16 %v242_v50, %v241_v45 }
 0x105   :  { %v192_v53 = vpop.f32.mrb[8].mxu0  ;;  %v224_v54 = vpop.f32.mrb[8].mxu1 }
 0x106   :  { %398 = vst [vmem:[%s613_s3 + $0x8] sm:$0xff] %v371_v51   ;;  %402 = vst [vmem:[%s613_s3 + $0x28] sm:$0xff] %v391_v52   ;;  %v193_v55 = vadd.f32 %v573_v16, %v192_v53  ;;  %v445_v56 = vpop.f32.mrb[9].mxu0  ;;  %v225_v57 = vadd.f32 %v573_v16, %v224_v54  ;;  %v461_v58 = vpop.f32.mrb[9].mxu1 }
 0x107   :  { %v195_v59 = vpop.f32.mrb[10].mxu0  ;;  %v227_v60 = vpop.f32.mrb[10].mxu1 }
 0x108   :  { %v196_v61 = vadd.f32 %v573_v16, %v195_v59  ;;  %v446_v62 = vpop.f32.mrb[11].mxu0  ;;  %v243_v63 = vmax.f32 %v225_v57, 0.0  ;;  %v228_v0 = vadd.f32 %v573_v16, %v227_v60  ;;  %v462_v1 = vpop.f32.mrb[11].mxu1  ;;  %v235_v2 = vmax.f32 %v193_v55, 0.0 }
 0x10a   :  { %v236_v3 = vmax.f32 %v196_v61, 0.0  ;;  %v244_v4 = vmax.f32 %v228_v0, 0.0 }
 0x10c   :  { %v376_v5 = vpack.c.bf16 %v236_v3, %v235_v2  ;;  %v396_v6 = vpack.c.bf16 %v244_v4, %v243_v63 }
 0x10d   :  { %v200_v7 = vpop.f32.mrb[12].mxu0 }
 0x10e   :  { %399 = vst [vmem:[%s613_s3 + $0x10] sm:$0xff] %v376_v5   ;;  %403 = vst [vmem:[%s613_s3 + $0x30] sm:$0xff] %v396_v6   ;;  %v201_v8 = vadd.f32 %v573_v16, %v200_v7  ;;  %v449_v9 = vpop.f32.mrb[13].mxu0 }
 0x10f   :  { %v203_v10 = vpop.f32.mrb[14].mxu0 }
 0x110   :  { %v204_v11 = vadd.f32 %v573_v16, %v203_v10  ;;  %v450_v12 = vpop.f32.mrb[15].mxu0  ;;  %v237_v13 = vmax.f32 %v201_v8, 0.0 }
 0x112   :  { %v238_v14 = vmax.f32 %v204_v11, 0.0 }
 0x114   :  { %v381_v15 = vpack.c.bf16 %v238_v14, %v237_v13 }
 0x116   :  { %400 = vst [vmem:[%s613_s3 + $0x18] sm:$0xff] %v381_v15  }

// kernel: pspnet_forward.43
= control target key start
LH: loop header
LB: loop body
LE: loop exit
PB: predicated region body
PF: predicated region fallthrough
CT: control target
= control target key end

     0   :  { %v331_v1 = vmov 0   ;;  %v39_v20 = vlaneseq  ;;  %s430_s1 = inlined_call_operand.vmem [shape: bf16[128,256], index: 1, kind: input, shape index: {}]   ;;  %s431_s0 = inlined_call_operand.vmem [shape: bf16[48,128], index: 0, kind: input, shape index: {}]   ;;  %s432_s2 = inlined_call_operand.vmem [shape: f32[1,256], index: 2, kind: input, shape index: {}]   ;;  %s433_s3 = inlined_call_operand.vmem [shape: bf16[48,256], index: 3, kind: output, shape index: {}]  }
   0x1   :  { %v304_v0 = vld [vmem:[%s430_s1 + $0x4] ss:$8 sps:$4 sm:$0xff]   ;;  %189 = vmatprep.mubr.bf16.mxu1 %v331_v1  ;;  %179 = vmatprep.mubr.bf16.mxu0 %v331_v1  ;;  %v306_v2 = vld [vmem:[%s430_s1] ss:$8 sps:$4 sm:$0xff]   ;;  %v307_v3 = vld [vmem:[%s430_s1 + $0x14] ss:$8 sps:$4 sm:$0xff]  }
   0x2   :  { %287 = vmatprep.subr.bf16.mxu1 %v304_v0  ;;  %147 = vmatprep.subr.bf16.mxu0 %v304_v0  ;;  %v309_v4 = vld [vmem:[%s430_s1 + $0x10] ss:$8 sps:$4 sm:$0xff]   ;;  %v310_v5 = vld [vmem:[%s430_s1 + $0x24] ss:$8 sps:$4 sm:$0xff]   ;;  %v312_v6 = vld [vmem:[%s430_s1 + $0x20] ss:$8 sps:$4 sm:$0xff]  }
   0x3   :  { %295 = vmatpush1.bf16.msra.mxu1 %v306_v2  ;;  %148 = vmatpush1.bf16.msra.mxu0 %v306_v2  ;;  %v313_v7 = vld [vmem:[%s430_s1 + $0x34] ss:$8 sps:$4 sm:$0xff]   ;;  %v315_v8 = vld [vmem:[%s430_s1 + $0x30] ss:$8 sps:$4 sm:$0xff]   ;;  %v316_v9 = vld [vmem:[%s430_s1 + $0x44] ss:$8 sps:$4 sm:$0xff]  }
   0x4   :  { %288 = vmatprep.subr.bf16.mxu1 %v307_v3  ;;  %149 = vmatprep.subr.bf16.mxu0 %v307_v3  ;;  %v318_v10 = vld [vmem:[%s430_s1 + $0x40] ss:$8 sps:$4 sm:$0xff]   ;;  %v319_v11 = vld [vmem:[%s430_s1 + $0x54] ss:$8 sps:$4 sm:$0xff]   ;;  %v321_v12 = vld [vmem:[%s430_s1 + $0x50] ss:$8 sps:$4 sm:$0xff]  }
   0x5   :  { %v322_v13 = vld [vmem:[%s430_s1 + $0x64] ss:$8 sps:$4 sm:$0xff]   ;;  %v324_v14 = vld [vmem:[%s430_s1 + $0x60] ss:$8 sps:$4 sm:$0xff]   ;;  %v325_v15 = vld [vmem:[%s430_s1 + $0x74] ss:$8 sps:$4 sm:$0xff]  }
   0x6   :  { %v327_v16 = vld [vmem:[%s430_s1 + $0x70] ss:$8 sps:$4 sm:$0xff]   ;;  %v328_v17 = vld [vmem:[%s431_s0 + $0x8] sm:$0xff]   ;;  %v329_v18 = vld [vmem:[%s431_s0] sm:$0xff]   ;;  %v40_v21 = vshrl.u32 %v39_v20, 7 }
   0x7   :  { %296 = vmatpush1.bf16.msra.mxu1 %v309_v4  ;;  %150 = vmatpush1.bf16.msra.mxu0 %v309_v4  ;;  %v330_v19 = vld [vmem:[%s431_s0 + $0x10] sm:$0xff]   ;;  %v37_v23 = vld [vmem:[%s432_s2] sm:$0x3] }
   0x8   :  { %289 = vmatprep.subr.bf16.mxu1 %v310_v5  ;;  %151 = vmatprep.subr.bf16.mxu0 %v310_v5  ;;  %v41_v22 = vsub.s32 0, %v40_v21  ;;  %v45_v24 = vsub.s32 1, %v40_v21 }
   0xa   :  { %v42_v25 = vrot.slane %v37_v23, %v41_v22  ;;  %v46_v26 = vrot.slane %v37_v23, %v45_v24 }
   0xb   :  { %297 = vmatpush1.bf16.msra.mxu1 %v312_v6  ;;  %152 = vmatpush1.bf16.msra.mxu0 %v312_v6 }
   0xc   :  { %290 = vmatprep.subr.bf16.mxu1 %v313_v7  ;;  %153 = vmatprep.subr.bf16.mxu0 %v313_v7 }
   0xf   :  { %298 = vmatpush1.bf16.msra.mxu1 %v315_v8  ;;  %154 = vmatpush1.bf16.msra.mxu0 %v315_v8 }
  0x10   :  { %291 = vmatprep.subr.bf16.mxu1 %v316_v9  ;;  %155 = vmatprep.subr.bf16.mxu0 %v316_v9 }
  0x13   :  { %299 = vmatpush1.bf16.msra.mxu1 %v318_v10  ;;  %156 = vmatpush1.bf16.msra.mxu0 %v318_v10 }
  0x14   :  { %292 = vmatprep.subr.bf16.mxu1 %v319_v11  ;;  %157 = vmatprep.subr.bf16.mxu0 %v319_v11 }
  0x17   :  { %300 = vmatpush1.bf16.msra.mxu1 %v321_v12  ;;  %158 = vmatpush1.bf16.msra.mxu0 %v321_v12 }
  0x18   :  { %293 = vmatprep.subr.bf16.mxu1 %v322_v13  ;;  %159 = vmatprep.subr.bf16.mxu0 %v322_v13 }
  0x1b   :  { %301 = vmatpush1.bf16.msra.mxu1 %v324_v14  ;;  %160 = vmatpush1.bf16.msra.mxu0 %v324_v14 }
  0x1c   :  { %294 = vmatprep.subr.bf16.mxu1 %v325_v15  ;;  %161 = vmatprep.subr.bf16.mxu0 %v325_v15 }
  0x1f   :  { %302 = vmatpush1.bf16.msra.mxu1 %v327_v16  ;;  %162 = vmatpush1.bf16.msra.mxu0 %v327_v16 }
  0x22   :  { %190 = vmatmul.mubr.bf16.vlgmr.msra.gmra.mrb[0].mxu1 %v328_v17  ;;  %180 = vmatmul.mubr.bf16.vlgmr.msra.gmra.mrb[0].mxu0 %v329_v18 }
  0x23   :  { %199 = vmatprep.mubr.bf16.mxu1 %v331_v1 }
  0x2a   :  { %200 = vmatmul.mubr.bf16.gmra.mrb[4].mxu1 %v330_v19 }
  0xf5   :  { %v191_v27 = vpop.f32.mrb[0].mxu1  ;;  %v181_v28 = vpop.f32.mrb[0].mxu0 }
  0xf6   :  { %v192_v29 = vadd.f32 %v191_v27, %v42_v25  ;;  %v193_v30 = vpop.f32.mrb[1].mxu1  ;;  %v182_v31 = vadd.f32 %v181_v28, %v42_v25  ;;  %v183_v32 = vpop.f32.mrb[1].mxu0 }
  0xf7   :  { %v194_v33 = vadd.f32 %v193_v30, %v46_v26  ;;  %v195_v34 = vpop.f32.mrb[2].mxu1  ;;  %v184_v35 = vadd.f32 %v183_v32, %v46_v26  ;;  %v185_v36 = vpop.f32.mrb[2].mxu0 }
  0xf8   :  { %v196_v37 = vadd.f32 %v195_v34, %v42_v25  ;;  %v197_v38 = vpop.f32.mrb[3].mxu1  ;;  %v186_v39 = vadd.f32 %v185_v36, %v42_v25  ;;  %v187_v40 = vpop.f32.mrb[3].mxu0 }
  0xf9   :  { %v283_v41 = vpack.c.bf16 %v194_v33, %v192_v29  ;;  %v198_v42 = vadd.f32 %v197_v38, %v46_v26  ;;  %v281_v43 = vpack.c.bf16 %v184_v35, %v182_v31  ;;  %v188_v44 = vadd.f32 %v187_v40, %v46_v26 }
  0xfb   :  { %248 = vst [vmem:[%s433_s3 + $0x10] sm:$0xff] %v283_v41  ;;  %v284_v45 = vpack.c.bf16 %v198_v42, %v196_v37  ;;  %246 = vst [vmem:[%s433_s3] sm:$0xff] %v281_v43  ;;  %v282_v46 = vpack.c.bf16 %v188_v44, %v186_v39 }
  0xfd   :  { %249 = vst [vmem:[%s433_s3 + $0x18] sm:$0xff] %v284_v45  ;;  %247 = vst [vmem:[%s433_s3 + $0x8] sm:$0xff] %v282_v46  ;;  %v201_v47 = vpop.f32.mrb[4].mxu1 }
  0xfe   :  { %v202_v48 = vadd.f32 %v201_v47, %v42_v25  ;;  %v203_v49 = vpop.f32.mrb[5].mxu1 }
  0xff   :  { %v204_v50 = vadd.f32 %v203_v49, %v46_v26  ;;  %v205_v51 = vpop.f32.mrb[6].mxu1 }
 0x100   :  { %v206_v52 = vadd.f32 %v205_v51, %v42_v25  ;;  %v207_v53 = vpop.f32.mrb[7].mxu1 }
 0x101   :  { %v285_v54 = vpack.c.bf16 %v204_v50, %v202_v48  ;;  %v208_v55 = vadd.f32 %v207_v53, %v46_v26 }
 0x103   :  { %250 = vst [vmem:[%s433_s3 + $0x20] sm:$0xff] %v285_v54  ;;  %v286_v56 = vpack.c.bf16 %v208_v55, %v206_v52 }
 0x105   :  { %251 = vst [vmem:[%s433_s3 + $0x28] sm:$0xff] %v286_v56 }

// kernel: pspnet_forward.44
= control target key start
LH: loop header
LB: loop body
LE: loop exit
PB: predicated region body
PF: predicated region fallthrough
CT: control target
= control target key end

     0   :  { %s1270_s12 = smov 0   ;;  %s1272_s13 = smov 0   ;;  %s1528_s0 = inlined_call_operand.vmem [shape: bf16[80,256], index: 0, kind: input, shape index: {}]   ;;  %s1529_s1 = inlined_call_operand.vmem [shape: bf16[256,512], index: 1, kind: input, shape index: {}]   ;;  %s1530_s2 = inlined_call_operand.vmem [shape: f32[1,512], index: 2, kind: input, shape index: {}]   ;;  %s1531_s3 = inlined_call_operand.vmem [shape: bf16[80,512], index: 3, kind: output, shape index: {}]  }
   0x1   :  { %s1274_s14 = smov 0   ;;  %s1276_s15 = smov 0  }
   0x2   :  { %s1278_s16 = smov 0  }
   0x3 LB: > { %s22_s17 = sadd.s32 1, %s1244_s15  ;;  %s995_s18 = sadd.s32 4294967295, %s1248_s16   ;;  %s1248_s16 = sphi %s1278_s16, %s13_s16   ;;  %s1244_s15 = sphi %s1276_s15, %s1536_s15   ;;  %s1240_s14 = sphi %s1274_s14, %s1535_s14   ;;  %s1236_s13 = sphi %s1272_s13, %s1534_s13   ;;  %s1232_s12 = sphi %s1270_s12, %s1533_s12  }
   0x4   : > { %p23_p0 = scmp.ge.s32.totalorder %s22_s17, 2  ;;  %p65_p1 = scmp.ne.s32.totalorder %s1236_s13, %s1232_s12 }
   0x5   : > { %p66_p2 = scmp.eq.s32.totalorder %s1248_s16, 0  ;;  %p123_p4 = scmp.eq.s32.totalorder %s995_s18, 1 }
   0x6   : > { %s1538_s17 = smov (%p23_p0, %s22_s17), 0  ;;  %s58_s20 = sadd.s32 1, %s1236_s13 }
   0x7   : > { %p67_p3 = por %p66_p2, %p65_p1  ;;  %s55_s19 = ssub.s32 %s1244_s15, %s1538_s17 }
   0x8   : > { %p56_p5 = scmp.eq.s32.totalorder %s55_s19, 0  ;;  %p1305_p6 = por %p123_p4, %p65_p1 }
   0x9   : > { %p999_p7 = scmp.ge.s32.totalorder %s1248_s16, 2 }
   0xa   : > { %s1310_s22 = scalar_select %p56_p5, %s1236_s13, %s58_s20  }
   0xb   : > { %155 = sbr.rel (%p999_p7) target bundleno = 38 (0x26), region = 20 }
  0x12   : > { %158 = sbr.rel (!%p67_p3) target bundleno = 38 (0x26), region = 24  ;;  %s160_s23 = sand.u32 (%p67_p3), 1, %s1236_s13  }
  0x13   : > { %s1062_s24 = sshll.u32 (%p67_p3), %s1244_s15, 3  ;;  %s1000_s25 = sshll.u32 (%p67_p3), %s160_s23, 8 }
  0x14   : > { %s1318_s28 = scalar_lea.vmem (%p67_p3), %s1529_s1, %s1062_s24  ;;  %s1323_s29 = scalar_lea.vmem (%p67_p3), [#allocation2], %s1000_s25 }
  0x15   : > { %v255_v0 = vld [vmem:[%s1318_s28] sm:$0xff] (%p67_p3)  ;;  %v257_v1 = vld [vmem:[%s1318_s28 + $0x10] sm:$0xff] (%p67_p3) }
  0x16   : > { %v259_v2 = vld [vmem:[%s1318_s28 + $0x20] sm:$0xff] (%p67_p3)  ;;  %256 = vst [vmem:[%s1323_s29] sm:$0xff] (%p67_p3), %v255_v0  ;;  %258 = vst [vmem:[%s1323_s29 + $0x8] sm:$0xff] (%p67_p3), %v257_v1  ;;  %v261_v3 = vld [vmem:[%s1318_s28 + $0x30] sm:$0xff] (%p67_p3) }
  0x17   : > { %260 = vst [vmem:[%s1323_s29 + $0x10] sm:$0xff] (%p67_p3), %v259_v2  ;;  %v263_v4 = vld [vmem:[%s1318_s28 + $0x40] sm:$0xff] (%p67_p3)  ;;  %v265_v5 = vld [vmem:[%s1318_s28 + $0x50] sm:$0xff] (%p67_p3)  ;;  %262 = vst [vmem:[%s1323_s29 + $0x18] sm:$0xff] (%p67_p3), %v261_v3 }
  0x18   : > { %264 = vst [vmem:[%s1323_s29 + $0x20] sm:$0xff] (%p67_p3), %v263_v4  ;;  %266 = vst [vmem:[%s1323_s29 + $0x28] sm:$0xff] (%p67_p3), %v265_v5  ;;  %v267_v6 = vld [vmem:[%s1318_s28 + $0x60] sm:$0xff] (%p67_p3)  ;;  %v269_v7 = vld [vmem:[%s1318_s28 + $0x70] sm:$0xff] (%p67_p3) }
  0x19   : > { %v271_v8 = vld [vmem:[%s1318_s28 + $0x80] sm:$0xff]  ;;  %268 = vst [vmem:[%s1323_s29 + $0x30] sm:$0xff] %v267_v6  ;;  %270 = vst [vmem:[%s1323_s29 + $0x38] sm:$0xff] %v269_v7  ;;  %v273_v9 = vld [vmem:[%s1318_s28 + $0x90] sm:$0xff] }
  0x1a   : > { %272 = vst [vmem:[%s1323_s29 + $0x40] sm:$0xff] %v271_v8  ;;  %v275_v10 = vld [vmem:[%s1318_s28 + $0xa0] sm:$0xff]  ;;  %v277_v11 = vld [vmem:[%s1318_s28 + $0xb0] sm:$0xff]  ;;  %274 = vst [vmem:[%s1323_s29 + $0x48] sm:$0xff] %v273_v9 }
  0x1b   : > { %276 = vst [vmem:[%s1323_s29 + $0x50] sm:$0xff] %v275_v10  ;;  %278 = vst [vmem:[%s1323_s29 + $0x58] sm:$0xff] %v277_v11  ;;  %v279_v12 = vld [vmem:[%s1318_s28 + $0xc0] sm:$0xff]  ;;  %v281_v13 = vld [vmem:[%s1318_s28 + $0xd0] sm:$0xff] }
  0x1c   : > { %v283_v14 = vld [vmem:[%s1318_s28 + $0xe0] sm:$0xff]  ;;  %280 = vst [vmem:[%s1323_s29 + $0x60] sm:$0xff] %v279_v12  ;;  %282 = vst [vmem:[%s1323_s29 + $0x68] sm:$0xff] %v281_v13  ;;  %v285_v15 = vld [vmem:[%s1318_s28 + $0xf0] sm:$0xff] }
  0x1d   : > { %284 = vst [vmem:[%s1323_s29 + $0x70] sm:$0xff] %v283_v14  ;;  %v287_v16 = vld [vmem:[%s1318_s28 + $0x100] sm:$0xff]  ;;  %v289_v17 = vld [vmem:[%s1318_s28 + $0x110] sm:$0xff]  ;;  %286 = vst [vmem:[%s1323_s29 + $0x78] sm:$0xff] %v285_v15 }
  0x1e   : > { %288 = vst [vmem:[%s1323_s29 + $0x80] sm:$0xff] %v287_v16  ;;  %290 = vst [vmem:[%s1323_s29 + $0x88] sm:$0xff] %v289_v17  ;;  %v291_v18 = vld [vmem:[%s1318_s28 + $0x120] sm:$0xff]  ;;  %v293_v19 = vld [vmem:[%s1318_s28 + $0x130] sm:$0xff] }
  0x1f   : > { %v295_v20 = vld [vmem:[%s1318_s28 + $0x140] sm:$0xff]  ;;  %292 = vst [vmem:[%s1323_s29 + $0x90] sm:$0xff] %v291_v18  ;;  %294 = vst [vmem:[%s1323_s29 + $0x98] sm:$0xff] %v293_v19  ;;  %v297_v21 = vld [vmem:[%s1318_s28 + $0x150] sm:$0xff] }
  0x20   : > { %296 = vst [vmem:[%s1323_s29 + $0xa0] sm:$0xff] %v295_v20  ;;  %v299_v22 = vld [vmem:[%s1318_s28 + $0x160] sm:$0xff]  ;;  %v301_v23 = vld [vmem:[%s1318_s28 + $0x170] sm:$0xff]  ;;  %298 = vst [vmem:[%s1323_s29 + $0xa8] sm:$0xff] %v297_v21 }
  0x21   : > { %300 = vst [vmem:[%s1323_s29 + $0xb0] sm:$0xff] %v299_v22  ;;  %302 = vst [vmem:[%s1323_s29 + $0xb8] sm:$0xff] %v301_v23  ;;  %v303_v24 = vld [vmem:[%s1318_s28 + $0x180] sm:$0xff]  ;;  %v305_v25 = vld [vmem:[%s1318_s28 + $0x190] sm:$0xff] }
  0x22   : > { %v307_v26 = vld [vmem:[%s1318_s28 + $0x1a0] sm:$0xff]  ;;  %304 = vst [vmem:[%s1323_s29 + $0xc0] sm:$0xff] %v303_v24  ;;  %306 = vst [vmem:[%s1323_s29 + $0xc8] sm:$0xff] %v305_v25  ;;  %v309_v27 = vld [vmem:[%s1318_s28 + $0x1b0] sm:$0xff] }
  0x23   : > { %308 = vst [vmem:[%s1323_s29 + $0xd0] sm:$0xff] %v307_v26  ;;  %v311_v28 = vld [vmem:[%s1318_s28 + $0x1c0] sm:$0xff]  ;;  %v313_v29 = vld [vmem:[%s1318_s28 + $0x1d0] sm:$0xff]  ;;  %310 = vst [vmem:[%s1323_s29 + $0xd8] sm:$0xff] %v309_v27 }
  0x24   : > { %312 = vst [vmem:[%s1323_s29 + $0xe0] sm:$0xff] %v311_v28  ;;  %314 = vst [vmem:[%s1323_s29 + $0xe8] sm:$0xff] %v313_v29  ;;  %v315_v30 = vld [vmem:[%s1318_s28 + $0x1e0] sm:$0xff]  ;;  %v317_v31 = vld [vmem:[%s1318_s28 + $0x1f0] sm:$0xff] }
  0x25   : > { %316 = vst [vmem:[%s1323_s29 + $0xf0] sm:$0xff] %v315_v30  ;;  %318 = vst [vmem:[%s1323_s29 + $0xf8] sm:$0xff] %v317_v31 }
  0x26 PF: > { %p1003_p8 = scmp.ge.s32.totalorder %s1248_s16, 1  ;;  %p331_p9 = scmp.lt.s32.totalorder %s1248_s16, 3 }
  0x28   : > { %p332_p10 = pnand %p1003_p8, %p331_p9 }
  0x29   : > { %s338_s30 = sand.u32 (!%p332_p10), 1, %s1232_s12   ;;  %v1197_v32 = vld [vmem:[%s1528_s0 + $0x4] ss:$8 sps:$4 sm:$0xff] (!%p332_p10)   ;;  %v1200_v33 = vld [vmem:[%s1528_s0 + $0x34] ss:$8 sps:$4 sm:$0xff] (!%p332_p10)   ;;  %s1005_s8 = sshll.u32 (!%p332_p10), %s1240_s14, 1  ;;  %v429_v10 = vlaneseq (!%p332_p10) }
  0x2a   : > { %335 = sbr.rel (%p332_p10) target bundleno = 355 (0x163), region = 66  ;;  %s1004_s4 = sshll.u32 (!%p332_p10), %s338_s30, 8  ;;  %681 = vmatprep.mubr.bf16.mxu0 (!%p332_p10), %v1197_v32  ;;  %711 = vmatprep.mubr.bf16.mxu1 (!%p332_p10), %v1200_v33  ;;  %v1195_v2 = vld [vmem:[%s1528_s0] ss:$8 sps:$4 sm:$0xff] (!%p332_p10)   ;;  %v1198_v3 = vld [vmem:[%s1528_s0 + $0x30] ss:$8 sps:$4 sm:$0xff] (!%p332_p10)  }
  0x2b   : > { %s1397_s9 = scalar_lea.vmem (!%p332_p10), [#allocation2], %s1004_s4  ;;  %v1201_v4 = vld [vmem:[%s1528_s0 + $0x14] ss:$8 sps:$4 sm:$0xff] (!%p332_p10)   ;;  %v1204_v5 = vld [vmem:[%s1528_s0 + $0x44] ss:$8 sps:$4 sm:$0xff] (!%p332_p10)   ;;  %p379_p11 = scmp.lt.s32.totalorder (!%p332_p10), %s1005_s8, 3 }
  0x2c   : > { %v1147_v34 = vld [vmem:[%s1397_s9 + $0x4] ss:$8 sps:$4 sm:$0xff] (!%p332_p10)   ;;  %v1149_v35 = vld [vmem:[%s1397_s9] ss:$8 sps:$4 sm:$0xff] (!%p332_p10)   ;;  %v1150_v36 = vld [vmem:[%s1397_s9 + $0x14] ss:$8 sps:$4 sm:$0xff] (!%p332_p10)  }
  0x2d   : > { %649 = vmatprep.subr.bf16.mxu0 (!%p332_p10), %v1147_v34  ;;  %1074 = vmatprep.subr.bf16.mxu1 (!%p332_p10), %v1147_v34  ;;  %v1152_v37 = vld [vmem:[%s1397_s9 + $0x10] ss:$8 sps:$4 sm:$0xff] (!%p332_p10)   ;;  %v1153_v38 = vld [vmem:[%s1397_s9 + $0x24] ss:$8 sps:$4 sm:$0xff] (!%p332_p10)   ;;  %v1155_v39 = vld [vmem:[%s1397_s9 + $0x20] ss:$8 sps:$4 sm:$0xff] (!%p332_p10)  }
  0x2e   : > { %650 = vmatpush1.bf16.msra.mxu0 (!%p332_p10), %v1149_v35  ;;  %1090 = vmatpush1.bf16.msra.mxu1 (!%p332_p10), %v1149_v35  ;;  %v1156_v40 = vld [vmem:[%s1397_s9 + $0x34] ss:$8 sps:$4 sm:$0xff] (!%p332_p10)   ;;  %v1158_v41 = vld [vmem:[%s1397_s9 + $0x30] ss:$8 sps:$4 sm:$0xff] (!%p332_p10)   ;;  %v1159_v42 = vld [vmem:[%s1397_s9 + $0x44] ss:$8 sps:$4 sm:$0xff] (!%p332_p10)  }
  0x2f   : > { %651 = vmatprep.subr.bf16.mxu0 (!%p332_p10), %v1150_v36  ;;  %1075 = vmatprep.subr.bf16.mxu1 (!%p332_p10), %v1150_v36  ;;  %v1161_v43 = vld [vmem:[%s1397_s9 + $0x40] ss:$8 sps:$4 sm:$0xff] (!%p332_p10)   ;;  %v1162_v44 = vld [vmem:[%s1397_s9 + $0x54] ss:$8 sps:$4 sm:$0xff] (!%p332_p10)   ;;  %v1164_v45 = vld [vmem:[%s1397_s9 + $0x50] ss:$8 sps:$4 sm:$0xff] (!%p332_p10)  }
  0x30   : > { %v1165_v46 = vld [vmem:[%s1397_s9 + $0x64] ss:$8 sps:$4 sm:$0xff] (!%p332_p10)   ;;  %v1167_v47 = vld [vmem:[%s1397_s9 + $0x60] ss:$8 sps:$4 sm:$0xff] (!%p332_p10)   ;;  %v1168_v48 = vld [vmem:[%s1397_s9 + $0x74] ss:$8 sps:$4 sm:$0xff] (!%p332_p10)  }
  0x31   : > { %v1170_v49 = vld [vmem:[%s1397_s9 + $0x70] ss:$8 sps:$4 sm:$0xff]   ;;  %v1171_v50 = vld [vmem:[%s1397_s9 + $0x84] ss:$8 sps:$4 sm:$0xff]   ;;  %v1173_v51 = vld [vmem:[%s1397_s9 + $0x80] ss:$8 sps:$4 sm:$0xff]  }
  0x32   : > { %652 = vmatpush1.bf16.msra.mxu0 %v1152_v37  ;;  %1091 = vmatpush1.bf16.msra.mxu1 %v1152_v37  ;;  %v1174_v52 = vld [vmem:[%s1397_s9 + $0x94] ss:$8 sps:$4 sm:$0xff]   ;;  %v1176_v53 = vld [vmem:[%s1397_s9 + $0x90] ss:$8 sps:$4 sm:$0xff]   ;;  %v1177_v54 = vld [vmem:[%s1397_s9 + $0xa4] ss:$8 sps:$4 sm:$0xff]  }
  0x33   : > { %653 = vmatprep.subr.bf16.mxu0 %v1153_v38  ;;  %1076 = vmatprep.subr.bf16.mxu1 %v1153_v38  ;;  %v1179_v55 = vld [vmem:[%s1397_s9 + $0xa0] ss:$8 sps:$4 sm:$0xff]   ;;  %v1180_v56 = vld [vmem:[%s1397_s9 + $0xb4] ss:$8 sps:$4 sm:$0xff]   ;;  %v1182_v57 = vld [vmem:[%s1397_s9 + $0xb0] ss:$8 sps:$4 sm:$0xff]  }
  0x34   : > { %v1183_v58 = vld [vmem:[%s1397_s9 + $0xc4] ss:$8 sps:$4 sm:$0xff]   ;;  %v1185_v59 = vld [vmem:[%s1397_s9 + $0xc0] ss:$8 sps:$4 sm:$0xff]   ;;  %v1186_v60 = vld [vmem:[%s1397_s9 + $0xd4] ss:$8 sps:$4 sm:$0xff]  }
  0x35   : > { %v1188_v61 = vld [vmem:[%s1397_s9 + $0xd0] ss:$8 sps:$4 sm:$0xff]   ;;  %v1189_v62 = vld [vmem:[%s1397_s9 + $0xe4] ss:$8 sps:$4 sm:$0xff]   ;;  %v1191_v63 = vld [vmem:[%s1397_s9 + $0xe0] ss:$8 sps:$4 sm:$0xff]  }
  0x36   : > { %654 = vmatpush1.bf16.msra.mxu0 %v1155_v39  ;;  %1092 = vmatpush1.bf16.msra.mxu1 %v1155_v39  ;;  %v1192_v0 = vld [vmem:[%s1397_s9 + $0xf4] ss:$8 sps:$4 sm:$0xff]   ;;  %v1194_v1 = vld [vmem:[%s1397_s9 + $0xf0] ss:$8 sps:$4 sm:$0xff]   ;;  %v1206_v7 = vld [vmem:[%s1528_s0 + $0x40] ss:$8 sps:$4 sm:$0xff]  }
  0x37   : > { %655 = vmatprep.subr.bf16.mxu0 %v1156_v40  ;;  %1077 = vmatprep.subr.bf16.mxu1 %v1156_v40  ;;  %v1203_v6 = vld [vmem:[%s1528_s0 + $0x10] ss:$8 sps:$4 sm:$0xff]   ;;  %v1207_v8 = vld [vmem:[%s1528_s0 + $0x24] ss:$8 sps:$4 sm:$0xff]   ;;  %v1209_v9 = vld [vmem:[%s1528_s0 + $0x20] ss:$8 sps:$4 sm:$0xff]  }
  0x38   : > { %s1540_s8 = smov (!%p379_p11, %s1005_s8), 3  ;;  %v430_v11 = vshrl.u32 %v429_v10, 7  ;;  %s1106_s18 = smul.u32 80, %s338_s30 }
  0x39   : > { %s381_s11 = scalar_lea.vmem %s1530_s2, %s1540_s8  ;;  %s1073_s30 = sshll.u32 (%p1305_p6), %s1240_s14, 3 }
  0x3a   : > { %656 = vmatpush1.bf16.msra.mxu0 %v1158_v41  ;;  %1093 = vmatpush1.bf16.msra.mxu1 %v1158_v41  ;;  %v431_v12 = vsub.s32 0, %v430_v11  ;;  %v427_v13 = vld [vmem:[%s381_s11] sm:$0x3]  ;;  %v435_v14 = vsub.s32 1, %v430_v11  ;;  %s1473_s12 = scalar_lea.vmem [#allocation3], %s1106_s18  ;;  %s834_s23 = scalar_lea.vmem (%p1305_p6), %s1531_s3, %s1073_s30 }
  0x3b   : > { %657 = vmatprep.subr.bf16.mxu0 %v1159_v42  ;;  %1078 = vmatprep.subr.bf16.mxu1 %v1159_v42 }
  0x3c   : > { %v1459_v15 = vrot.slane %v427_v13, %v431_v12  ;;  %v1461_v16 = vrot.slane %v427_v13, %v435_v14 }
  0x3e   : > { %658 = vmatpush1.bf16.msra.mxu0 %v1161_v43  ;;  %1094 = vmatpush1.bf16.msra.mxu1 %v1161_v43 }
  0x3f   : > { %659 = vmatprep.subr.bf16.mxu0 %v1162_v44  ;;  %1079 = vmatprep.subr.bf16.mxu1 %v1162_v44 }
  0x42   : > { %660 = vmatpush1.bf16.msra.mxu0 %v1164_v45  ;;  %1095 = vmatpush1.bf16.msra.mxu1 %v1164_v45 }
  0x43   : > { %661 = vmatprep.subr.bf16.mxu0 %v1165_v46  ;;  %1080 = vmatprep.subr.bf16.mxu1 %v1165_v46 }
  0x46   : > { %662 = vmatpush1.bf16.msra.mxu0 %v1167_v47  ;;  %1096 = vmatpush1.bf16.msra.mxu1 %v1167_v47 }
  0x47   : > { %663 = vmatprep.subr.bf16.mxu0 %v1168_v48  ;;  %1081 = vmatprep.subr.bf16.mxu1 %v1168_v48 }
  0x4a   : > { %664 = vmatpush1.bf16.msra.mxu0 %v1170_v49  ;;  %1097 = vmatpush1.bf16.msra.mxu1 %v1170_v49 }
  0x4b   : > { %665 = vmatprep.subr.bf16.mxu0 %v1171_v50  ;;  %1082 = vmatprep.subr.bf16.mxu1 %v1171_v50 }
  0x4e   : > { %666 = vmatpush1.bf16.msra.mxu0 %v1173_v51  ;;  %1098 = vmatpush1.bf16.msra.mxu1 %v1173_v51 }
  0x4f   : > { %667 = vmatprep.subr.bf16.mxu0 %v1174_v52  ;;  %1083 = vmatprep.subr.bf16.mxu1 %v1174_v52 }
  0x52   : > { %668 = vmatpush1.bf16.msra.mxu0 %v1176_v53  ;;  %1099 = vmatpush1.bf16.msra.mxu1 %v1176_v53 }
  0x53   : > { %669 = vmatprep.subr.bf16.mxu0 %v1177_v54  ;;  %1084 = vmatprep.subr.bf16.mxu1 %v1177_v54 }
  0x56   : > { %670 = vmatpush1.bf16.msra.mxu0 %v1179_v55  ;;  %1100 = vmatpush1.bf16.msra.mxu1 %v1179_v55 }
  0x57   : > { %671 = vmatprep.subr.bf16.mxu0 %v1180_v56  ;;  %1085 = vmatprep.subr.bf16.mxu1 %v1180_v56 }
  0x5a   : > { %672 = vmatpush1.bf16.msra.mxu0 %v1182_v57  ;;  %1101 = vmatpush1.bf16.msra.mxu1 %v1182_v57 }
  0x5b   : > { %673 = vmatprep.subr.bf16.mxu0 %v1183_v58  ;;  %1086 = vmatprep.subr.bf16.mxu1 %v1183_v58 }
  0x5e   : > { %674 = vmatpush1.bf16.msra.mxu0 %v1185_v59  ;;  %1102 = vmatpush1.bf16.msra.mxu1 %v1185_v59 }
  0x5f   : > { %675 = vmatprep.subr.bf16.mxu0 %v1186_v60  ;;  %1087 = vmatprep.subr.bf16.mxu1 %v1186_v60 }
  0x62   : > { %676 = vmatpush1.bf16.msra.mxu0 %v1188_v61  ;;  %1103 = vmatpush1.bf16.msra.mxu1 %v1188_v61 }
  0x63   : > { %677 = vmatprep.subr.bf16.mxu0 %v1189_v62  ;;  %1088 = vmatprep.subr.bf16.mxu1 %v1189_v62 }
  0x66   : > { %678 = vmatpush1.bf16.msra.mxu0 %v1191_v63  ;;  %1104 = vmatpush1.bf16.msra.mxu1 %v1191_v63 }
  0x67   : > { %679 = vmatprep.subr.bf16.mxu0 %v1192_v0  ;;  %1089 = vmatprep.subr.bf16.mxu1 %v1192_v0 }
  0x6a   : > { %680 = vmatpush1.bf16.msra.mxu0 %v1194_v1  ;;  %1105 = vmatpush1.bf16.msra.mxu1 %v1194_v1 }
  0x6d   : > { %682 = vmatmul.mubr.bf16.vlgmr.msra.gmra.mrb[0].mxu0 %v1195_v2  ;;  %712 = vmatmul.mubr.bf16.vlgmr.msra.gmra.mrb[0].mxu1 %v1198_v3 }
  0x6e   : > { %691 = vmatprep.mubr.bf16.mxu0 %v1201_v4  ;;  %721 = vmatprep.mubr.bf16.mxu1 %v1204_v5 }
  0x75   : > { %692 = vmatmul.mubr.bf16.gmra.mrb[4].mxu0 %v1203_v6  ;;  %722 = vmatmul.mubr.bf16.gmra.mrb[4].mxu1 %v1206_v7 }
  0x76   : > { %701 = vmatprep.mubr.bf16.mxu0 %v1207_v8 }
  0x7d   : > { %702 = vmatmul.mubr.bf16.gmra.mrb[8].mxu0 %v1209_v9 }
 0x140   : > { %v683_v17 = vpop.f32.mrb[0].mxu0  ;;  %v713_v18 = vpop.f32.mrb[0].mxu1 }
 0x141   : > { %v684_v19 = vadd.f32 %v683_v17, %v1459_v15  ;;  %v685_v20 = vpop.f32.mrb[1].mxu0  ;;  %v714_v21 = vadd.f32 %v713_v18, %v1459_v15  ;;  %v715_v22 = vpop.f32.mrb[1].mxu1 }
 0x142   : > { %v686_v23 = vadd.f32 %v685_v20, %v1461_v16  ;;  %v687_v24 = vpop.f32.mrb[2].mxu0  ;;  %v716_v25 = vadd.f32 %v715_v22, %v1461_v16  ;;  %v717_v26 = vpop.f32.mrb[2].mxu1 }
 0x143   : > { %v732_v27 = vmax.f32 %v684_v19, 0.0  ;;  %v688_v28 = vadd.f32 %v687_v24, %v1459_v15  ;;  %v689_v29 = vpop.f32.mrb[3].mxu0  ;;  %v744_v30 = vmax.f32 %v714_v21, 0.0  ;;  %v718_v31 = vadd.f32 %v717_v26, %v1459_v15  ;;  %v719_v32 = vpop.f32.mrb[3].mxu1 }
 0x144   : > { %v733_v33 = vmax.f32 %v686_v23, 0.0  ;;  %v690_v34 = vadd.f32 %v689_v29, %v1461_v16  ;;  %v745_v35 = vmax.f32 %v716_v25, 0.0  ;;  %v720_v36 = vadd.f32 %v719_v32, %v1461_v16 }
 0x145   : > { %v734_v37 = vmax.f32 %v688_v28, 0.0  ;;  %v746_v38 = vmax.f32 %v718_v31, 0.0 }
 0x146   : > { %v1063_v39 = vpack.c.bf16 %v733_v33, %v732_v27  ;;  %v735_v40 = vmax.f32 %v690_v34, 0.0  ;;  %v1069_v41 = vpack.c.bf16 %v745_v35, %v744_v30  ;;  %v747_v42 = vmax.f32 %v720_v36, 0.0 }
 0x148   : > { %812 = vst [vmem:[%s1473_s12] sm:$0xff] %v1063_v39  ;;  %v1064_v43 = vpack.c.bf16 %v735_v40, %v734_v37  ;;  %818 = vst [vmem:[%s1473_s12 + $0x30] sm:$0xff] %v1069_v41  ;;  %v693_v44 = vpop.f32.mrb[4].mxu0  ;;  %v1070_v45 = vpack.c.bf16 %v747_v42, %v746_v38  ;;  %v723_v46 = vpop.f32.mrb[4].mxu1 }
 0x149   : > { %v694_v47 = vadd.f32 %v693_v44, %v1459_v15  ;;  %v695_v48 = vpop.f32.mrb[5].mxu0  ;;  %v724_v49 = vadd.f32 %v723_v46, %v1459_v15  ;;  %v725_v50 = vpop.f32.mrb[5].mxu1 }
 0x14a   : > { %813 = vst [vmem:[%s1473_s12 + $0x8] sm:$0xff] %v1064_v43  ;;  %819 = vst [vmem:[%s1473_s12 + $0x38] sm:$0xff] %v1070_v45  ;;  %v696_v51 = vadd.f32 %v695_v48, %v1461_v16  ;;  %v697_v52 = vpop.f32.mrb[6].mxu0  ;;  %v726_v53 = vadd.f32 %v725_v50, %v1461_v16  ;;  %v727_v54 = vpop.f32.mrb[6].mxu1 }
 0x14b   : > { %v736_v55 = vmax.f32 %v694_v47, 0.0  ;;  %v698_v56 = vadd.f32 %v697_v52, %v1459_v15  ;;  %v699_v57 = vpop.f32.mrb[7].mxu0  ;;  %v748_v58 = vmax.f32 %v724_v49, 0.0  ;;  %v728_v59 = vadd.f32 %v727_v54, %v1459_v15  ;;  %v729_v60 = vpop.f32.mrb[7].mxu1 }
 0x14c   : > { %v737_v61 = vmax.f32 %v696_v51, 0.0  ;;  %v700_v62 = vadd.f32 %v699_v57, %v1461_v16  ;;  %v749_v63 = vmax.f32 %v726_v53, 0.0  ;;  %v730_v0 = vadd.f32 %v729_v60, %v1461_v16 }
 0x14d   : > { %v738_v1 = vmax.f32 %v698_v56, 0.0  ;;  %v750_v2 = vmax.f32 %v728_v59, 0.0 }
 0x14e   : > { %v1065_v3 = vpack.c.bf16 %v737_v61, %v736_v55  ;;  %v739_v4 = vmax.f32 %v700_v62, 0.0  ;;  %v1071_v5 = vpack.c.bf16 %v749_v63, %v748_v58  ;;  %v751_v6 = vmax.f32 %v730_v0, 0.0 }
 0x14f   : > { %v892_v29 = vld [vmem:[%s1473_s12 + $0x30] sm:$0xff] (%p1305_p6) }
 0x150   : > { %814 = vst [vmem:[%s1473_s12 + $0x10] sm:$0xff] %v1065_v3  ;;  %v1066_v7 = vpack.c.bf16 %v739_v4, %v738_v1  ;;  %820 = vst [vmem:[%s1473_s12 + $0x40] sm:$0xff] %v1071_v5  ;;  %v703_v8 = vpop.f32.mrb[8].mxu0  ;;  %v1072_v9 = vpack.c.bf16 %v751_v6, %v750_v2 }
 0x151   : > { %v704_v10 = vadd.f32 %v703_v8, %v1459_v15  ;;  %v705_v11 = vpop.f32.mrb[9].mxu0  ;;  %v894_v30 = vld [vmem:[%s1473_s12 + $0x38] sm:$0xff] (%p1305_p6)  ;;  %893 = vst [vmem:[%s834_s23 + $0x60] sm:$0xff] (%p1305_p6), %v892_v29 }
 0x152   : > { %815 = vst [vmem:[%s1473_s12 + $0x18] sm:$0xff] %v1066_v7  ;;  %821 = vst [vmem:[%s1473_s12 + $0x48] sm:$0xff] %v1072_v9  ;;  %v706_v12 = vadd.f32 %v705_v11, %v1461_v16  ;;  %v707_v13 = vpop.f32.mrb[10].mxu0 }
 0x153   : > { %v740_v14 = vmax.f32 %v704_v10, 0.0  ;;  %v708_v17 = vadd.f32 %v707_v13, %v1459_v15  ;;  %v709_v18 = vpop.f32.mrb[11].mxu0  ;;  %v880_v15 = vld [vmem:[%s1473_s12] sm:$0xff] (%p1305_p6)  ;;  %895 = vst [vmem:[%s834_s23 + $0x70] sm:$0xff] (%p1305_p6), %v894_v30 }
 0x154   : > { %v741_v19 = vmax.f32 %v706_v12, 0.0  ;;  %v710_v20 = vadd.f32 %v709_v18, %v1461_v16  ;;  %828 = sbr.rel (!%p1305_p6) target bundleno = 355 (0x163), region = 74  ;;  %v882_v16 = vld [vmem:[%s1473_s12 + $0x8] sm:$0xff] (%p1305_p6)  ;;  %881 = vst [vmem:[%s834_s23] sm:$0xff] (%p1305_p6), %v880_v15 }
 0x155   : > { %v742_v21 = vmax.f32 %v708_v17, 0.0  ;;  %883 = vst [vmem:[%s834_s23 + $0x10] sm:$0xff] (%p1305_p6), %v882_v16 }
 0x156   : > { %v1067_v22 = vpack.c.bf16 %v741_v19, %v740_v14  ;;  %v743_v23 = vmax.f32 %v710_v20, 0.0 }
 0x157   : > { %v884_v25 = vld [vmem:[%s1473_s12 + $0x10] sm:$0xff] (%p1305_p6)  ;;  %v896_v31 = vld [vmem:[%s1473_s12 + $0x40] sm:$0xff] (%p1305_p6) }
 0x158   : > { %816 = vst [vmem:[%s1473_s12 + $0x20] sm:$0xff] %v1067_v22  ;;  %v1068_v24 = vpack.c.bf16 %v743_v23, %v742_v21  ;;  %885 = vst [vmem:[%s834_s23 + $0x20] sm:$0xff] (%p1305_p6), %v884_v25 }
 0x159   : > { %v886_v26 = vld [vmem:[%s1473_s12 + $0x18] sm:$0xff] (%p1305_p6)  ;;  %897 = vst [vmem:[%s834_s23 + $0x80] sm:$0xff] (%p1305_p6), %v896_v31  ;;  %v898_v32 = vld [vmem:[%s1473_s12 + $0x48] sm:$0xff] (%p1305_p6) }
 0x15a   : > { %817 = vst [vmem:[%s1473_s12 + $0x28] sm:$0xff] %v1068_v24  ;;  %887 = vst [vmem:[%s834_s23 + $0x30] sm:$0xff] (%p1305_p6), %v886_v26 }
 0x15b   : > { %899 = vst [vmem:[%s834_s23 + $0x90] sm:$0xff] %v898_v32 }
 0x15f   : > { %v888_v27 = vld [vmem:[%s1473_s12 + $0x20] sm:$0xff] }
 0x160   : > { %889 = vst [vmem:[%s834_s23 + $0x40] sm:$0xff] %v888_v27 }
 0x161   : > { %v890_v28 = vld [vmem:[%s1473_s12 + $0x28] sm:$0xff] }
 0x162   : > { %891 = vst [vmem:[%s834_s23 + $0x50] sm:$0xff] %v890_v28 }
 0x163 PF: > { %s13_s16 = sadd.s32 1, %s1248_s16   ;;  %s1533_s12 = smov %s1236_s13 }
 0x164   : > { %p10_p12 = scmp.ge.s32.totalorder %s13_s16, 4   ;;  %s1534_s13 = smov %s1310_s22 }
 0x165   : > { %s1535_s14 = smov %s1244_s15  ;;  %s1536_s15 = smov %s1538_s17 }
 0x166   :  { %12 = sbr.rel (!%p10_p12) target bundleno = 3 (0x3), region = 149 }

// kernel: pspnet_forward.45
= control target key start
LH: loop header
LB: loop body
LE: loop exit
PB: predicated region body
PF: predicated region fallthrough
CT: control target
= control target key end

     0   :  { %s2154_s12 = smov 0   ;;  %s2156_s13 = smov 0   ;;  %s2461_s0 = inlined_call_operand.vmem [shape: bf16[80,5120], index: 0, kind: input, shape index: {}]   ;;  %s2462_s1 = inlined_call_operand.vmem [shape: bf16[5120,128], index: 1, kind: input, shape index: {}]   ;;  %s2463_s2 = inlined_call_operand.vmem [shape: f32[1,128], index: 2, kind: input, shape index: {}]   ;;  %s2464_s3 = inlined_call_operand.vmem [shape: bf16[80,128], index: 3, kind: output, shape index: {}]  }
   0x1   :  { %s2158_s14 = smov 0   ;;  %s2160_s15 = smov 0  }
   0x2   :  { %s2162_s16 = smov 0  }
   0x3 LB: > { %s25_s17 = sadd.s32 1, %s2127_s15  ;;  %p48_p1 = scmp.ne.s32.totalorder %s2119_s13, %s2115_s12  ;;  %s2131_s16 = sphi %s2162_s16, %s13_s16   ;;  %s2127_s15 = sphi %s2160_s15, %s2468_s15   ;;  %s2123_s14 = sphi %s2158_s14, %s2467_s14   ;;  %s2119_s13 = sphi %s2156_s13, %s2466_s13   ;;  %s2115_s12 = sphi %s2154_s12, %s2465_s12  }
   0x4   : > { %p26_p0 = scmp.ge.s32.totalorder %s25_s17, 5  ;;  %p49_p2 = scmp.eq.s32.totalorder %s2131_s16, 0 }
   0x5   : > { %s41_s19 = sadd.s32 1, %s2119_s13  ;;  %p1635_p5 = scmp.ge.s32.totalorder %s2131_s16, 5 }
   0x6   : > { %s2470_s17 = smov (%p26_p0, %s25_s17), 0  ;;  %p50_p3 = por %p49_p2, %p48_p1 }
   0x7   : > { %s37_s18 = ssub.s32 %s2127_s15, %s2470_s17  ;;  %162 = sbr.rel (%p1635_p5) target bundleno = 39 (0x27), region = 20 }
   0x8   : > { %p39_p4 = scmp.eq.s32.totalorder %s37_s18, 0 }
   0xa   : > { %s2189_s20 = scalar_select %p39_p4, %s2119_s13, %s41_s19  }
   0xe   : > { %165 = sbr.rel (!%p50_p3) target bundleno = 39 (0x27), region = 24  ;;  %s167_s21 = sand.u32 (%p50_p3), 1, %s2119_s13  }
   0xf   : > { %s1762_s22 = sshll.u32 (%p50_p3), %s2127_s15, 5  ;;  %s1986_s23 = smul.u32 (%p50_p3), 320, %s167_s21 }
  0x10   : > { %s2197_s26 = scalar_lea.vmem (%p50_p3), %s2461_s0, %s1762_s22 }
  0x11   : > { %v188_v0 = vld [vmem:[%s2197_s26] sm:$0xff] (%p50_p3)  ;;  %v190_v1 = vld [vmem:[%s2197_s26 + $0x8] sm:$0xff] (%p50_p3)  ;;  %v192_v2 = vld [vmem:[%s2197_s26 + $0x10] sm:$0xff] (%p50_p3)  ;;  %s2205_s27 = scalar_lea.vmem (%p50_p3), [#allocation3], %s1986_s23 }
  0x12   : > { %v194_v3 = vld [vmem:[%s2197_s26 + $0x18] sm:$0xff] (%p50_p3)  ;;  %v196_v4 = vld [vmem:[%s2197_s26 + $0xa0] sm:$0xff] (%p50_p3)  ;;  %v198_v5 = vld [vmem:[%s2197_s26 + $0xa8] sm:$0xff] (%p50_p3)  ;;  %189 = vst [vmem:[%s2205_s27] sm:$0xff] (%p50_p3), %v188_v0 }
  0x13   : > { %191 = vst [vmem:[%s2205_s27 + $0x8] sm:$0xff] (%p50_p3), %v190_v1  ;;  %193 = vst [vmem:[%s2205_s27 + $0x10] sm:$0xff] (%p50_p3), %v192_v2  ;;  %v200_v6 = vld [vmem:[%s2197_s26 + $0xb0] sm:$0xff] (%p50_p3)  ;;  %v202_v7 = vld [vmem:[%s2197_s26 + $0xb8] sm:$0xff] (%p50_p3) }
  0x14   : > { %195 = vst [vmem:[%s2205_s27 + $0x18] sm:$0xff] (%p50_p3), %v194_v3  ;;  %197 = vst [vmem:[%s2205_s27 + $0x20] sm:$0xff] (%p50_p3), %v196_v4  ;;  %v204_v8 = vld [vmem:[%s2197_s26 + $0x140] sm:$0xff] (%p50_p3)  ;;  %v206_v9 = vld [vmem:[%s2197_s26 + $0x148] sm:$0xff] (%p50_p3) }
  0x15   : > { %199 = vst [vmem:[%s2205_s27 + $0x28] sm:$0xff] %v198_v5  ;;  %201 = vst [vmem:[%s2205_s27 + $0x30] sm:$0xff] %v200_v6  ;;  %v208_v10 = vld [vmem:[%s2197_s26 + $0x150] sm:$0xff]  ;;  %v210_v11 = vld [vmem:[%s2197_s26 + $0x158] sm:$0xff] }
  0x16   : > { %203 = vst [vmem:[%s2205_s27 + $0x38] sm:$0xff] %v202_v7  ;;  %205 = vst [vmem:[%s2205_s27 + $0x40] sm:$0xff] %v204_v8  ;;  %v212_v12 = vld [vmem:[%s2197_s26 + $0x1e0] sm:$0xff]  ;;  %v214_v13 = vld [vmem:[%s2197_s26 + $0x1e8] sm:$0xff] }
  0x17   : > { %207 = vst [vmem:[%s2205_s27 + $0x48] sm:$0xff] %v206_v9  ;;  %209 = vst [vmem:[%s2205_s27 + $0x50] sm:$0xff] %v208_v10  ;;  %v216_v14 = vld [vmem:[%s2197_s26 + $0x1f0] sm:$0xff]  ;;  %v218_v15 = vld [vmem:[%s2197_s26 + $0x1f8] sm:$0xff] }
  0x18   : > { %211 = vst [vmem:[%s2205_s27 + $0x58] sm:$0xff] %v210_v11  ;;  %213 = vst [vmem:[%s2205_s27 + $0x60] sm:$0xff] %v212_v12  ;;  %v220_v16 = vld [vmem:[%s2197_s26 + $0x280] sm:$0xff]  ;;  %v222_v17 = vld [vmem:[%s2197_s26 + $0x288] sm:$0xff] }
  0x19   : > { %215 = vst [vmem:[%s2205_s27 + $0x68] sm:$0xff] %v214_v13  ;;  %217 = vst [vmem:[%s2205_s27 + $0x70] sm:$0xff] %v216_v14  ;;  %v224_v18 = vld [vmem:[%s2197_s26 + $0x290] sm:$0xff]  ;;  %v226_v19 = vld [vmem:[%s2197_s26 + $0x298] sm:$0xff] }
  0x1a   : > { %219 = vst [vmem:[%s2205_s27 + $0x78] sm:$0xff] %v218_v15  ;;  %221 = vst [vmem:[%s2205_s27 + $0x80] sm:$0xff] %v220_v16  ;;  %v228_v20 = vld [vmem:[%s2197_s26 + $0x320] sm:$0xff]  ;;  %v230_v21 = vld [vmem:[%s2197_s26 + $0x328] sm:$0xff] }
  0x1b   : > { %223 = vst [vmem:[%s2205_s27 + $0x88] sm:$0xff] %v222_v17  ;;  %225 = vst [vmem:[%s2205_s27 + $0x90] sm:$0xff] %v224_v18  ;;  %v232_v22 = vld [vmem:[%s2197_s26 + $0x330] sm:$0xff]  ;;  %v234_v23 = vld [vmem:[%s2197_s26 + $0x338] sm:$0xff] }
  0x1c   : > { %227 = vst [vmem:[%s2205_s27 + $0x98] sm:$0xff] %v226_v19  ;;  %229 = vst [vmem:[%s2205_s27 + $0xa0] sm:$0xff] %v228_v20  ;;  %v236_v24 = vld [vmem:[%s2197_s26 + $0x3c0] sm:$0xff]  ;;  %v238_v25 = vld [vmem:[%s2197_s26 + $0x3c8] sm:$0xff] }
  0x1d   : > { %231 = vst [vmem:[%s2205_s27 + $0xa8] sm:$0xff] %v230_v21  ;;  %233 = vst [vmem:[%s2205_s27 + $0xb0] sm:$0xff] %v232_v22  ;;  %v240_v26 = vld [vmem:[%s2197_s26 + $0x3d0] sm:$0xff]  ;;  %v242_v27 = vld [vmem:[%s2197_s26 + $0x3d8] sm:$0xff] }
  0x1e   : > { %235 = vst [vmem:[%s2205_s27 + $0xb8] sm:$0xff] %v234_v23  ;;  %237 = vst [vmem:[%s2205_s27 + $0xc0] sm:$0xff] %v236_v24  ;;  %v244_v28 = vld [vmem:[%s2197_s26 + $0x460] sm:$0xff]  ;;  %v246_v29 = vld [vmem:[%s2197_s26 + $0x468] sm:$0xff] }
  0x1f   : > { %239 = vst [vmem:[%s2205_s27 + $0xc8] sm:$0xff] %v238_v25  ;;  %241 = vst [vmem:[%s2205_s27 + $0xd0] sm:$0xff] %v240_v26  ;;  %v248_v30 = vld [vmem:[%s2197_s26 + $0x470] sm:$0xff]  ;;  %v250_v31 = vld [vmem:[%s2197_s26 + $0x478] sm:$0xff] }
  0x20   : > { %243 = vst [vmem:[%s2205_s27 + $0xd8] sm:$0xff] %v242_v27  ;;  %245 = vst [vmem:[%s2205_s27 + $0xe0] sm:$0xff] %v244_v28  ;;  %v252_v32 = vld [vmem:[%s2197_s26 + $0x500] sm:$0xff]  ;;  %v254_v33 = vld [vmem:[%s2197_s26 + $0x508] sm:$0xff] }
  0x21   : > { %247 = vst [vmem:[%s2205_s27 + $0xe8] sm:$0xff] %v246_v29  ;;  %249 = vst [vmem:[%s2205_s27 + $0xf0] sm:$0xff] %v248_v30  ;;  %v256_v34 = vld [vmem:[%s2197_s26 + $0x510] sm:$0xff]  ;;  %v258_v35 = vld [vmem:[%s2197_s26 + $0x518] sm:$0xff] }
  0x22   : > { %251 = vst [vmem:[%s2205_s27 + $0xf8] sm:$0xff] %v250_v31  ;;  %253 = vst [vmem:[%s2205_s27 + $0x100] sm:$0xff] %v252_v32  ;;  %v260_v36 = vld [vmem:[%s2197_s26 + $0x5a0] sm:$0xff]  ;;  %v262_v37 = vld [vmem:[%s2197_s26 + $0x5a8] sm:$0xff] }
  0x23   : > { %255 = vst [vmem:[%s2205_s27 + $0x108] sm:$0xff] %v254_v33  ;;  %257 = vst [vmem:[%s2205_s27 + $0x110] sm:$0xff] %v256_v34  ;;  %v264_v38 = vld [vmem:[%s2197_s26 + $0x5b0] sm:$0xff]  ;;  %v266_v39 = vld [vmem:[%s2197_s26 + $0x5b8] sm:$0xff] }
  0x24   : > { %259 = vst [vmem:[%s2205_s27 + $0x118] sm:$0xff] %v258_v35  ;;  %261 = vst [vmem:[%s2205_s27 + $0x120] sm:$0xff] %v260_v36 }
  0x25   : > { %263 = vst [vmem:[%s2205_s27 + $0x128] sm:$0xff] %v262_v37  ;;  %265 = vst [vmem:[%s2205_s27 + $0x130] sm:$0xff] %v264_v38 }
  0x26   : > { %267 = vst [vmem:[%s2205_s27 + $0x138] sm:$0xff] %v266_v39 }
  0x27 PF: > { %p1638_p6 = scmp.ge.s32.totalorder %s2131_s16, 1  ;;  %p284_p7 = scmp.lt.s32.totalorder %s2131_s16, 6 }
  0x29   : > { %p285_p8 = pnand %p1638_p6, %p284_p7 }
  0x2a   : > { %s291_s28 = sand.u32 (!%p285_p8), 1, %s2115_s12   ;;  %s1639_s29 = sshll.u32 (!%p285_p8), %s2123_s14, 7 }
  0x2b   : > { %288 = sbr.rel (%p285_p8) target bundleno = 399 (0x18f), region = 51  ;;  %p331_p9 = scmp.lt.s32.totalorder (!%p285_p8), %s1639_s29, 639 }
  0x2c   : > { %s1987_s30 = smul.u32 (!%p285_p8), 320, %s291_s28  ;;  %p1641_p10 = scmp.ne.s32.totalorder (!%p285_p8), %s2123_s14, 0 }
  0x2e   : > { %s2290_s8 = scalar_lea.vmem (!%p285_p8), [#allocation3], %s1987_s30 }
  0x32   : > { %s2472_s29 = smov (!%p331_p9, %s1639_s29), 639  ;;  %355 = sbr.rel (%p1641_p10) target bundleno = 57 (0x39), region = 59 }
  0x33   : > { %s1640_s4 = sshll.u32 %s2472_s29, 2  ;;  %v2133_v40 = vmov (!%p1641_p10), 0.0  }
  0x34   : > { %s2288_s7 = scalar_lea.vmem %s2462_s1, %s1640_s4  ;;  %356 = vst [vmem:[#allocation2] sm:$0xff] (!%p1641_p10), %v2133_v40  ;;  %357 = vst [vmem:[#allocation2 + $0x8] sm:$0xff] (!%p1641_p10), %v2133_v40 }
  0x35   : > { %358 = vst [vmem:[#allocation2 + $0x10] sm:$0xff] (!%p1641_p10), %v2133_v40  ;;  %359 = vst [vmem:[#allocation2 + $0x18] sm:$0xff] (!%p1641_p10), %v2133_v40 }
  0x36   : > { %360 = vst [vmem:[#allocation2 + $0x20] sm:$0xff] (!%p1641_p10), %v2133_v40  ;;  %361 = vst [vmem:[#allocation2 + $0x28] sm:$0xff] (!%p1641_p10), %v2133_v40 }
  0x37   : > { %362 = vst [vmem:[#allocation2 + $0x30] sm:$0xff] (!%p1641_p10), %v2133_v40  ;;  %363 = vst [vmem:[#allocation2 + $0x38] sm:$0xff] (!%p1641_p10), %v2133_v40 }
  0x38   : > { %364 = vst [vmem:[#allocation2 + $0x40] sm:$0xff] (!%p1641_p10), %v2133_v40  ;;  %365 = vst [vmem:[#allocation2 + $0x48] sm:$0xff] (!%p1641_p10), %v2133_v40 }
  0x39 PF: > { %v2029_v41 = vld [vmem:[%s2288_s7 + $0x40] sm:$0xff]   ;;  %v2033_v45 = vld [vmem:[%s2288_s7 + $0x48] sm:$0xff]   ;;  %v2037_v49 = vld [vmem:[%s2288_s7 + $0x50] sm:$0xff]   ;;  %p1746_p11 = scmp.ne.s32.totalorder %s2123_s14, 4 }
  0x3a   : > { %v2030_v42 = vld [vmem:[%s2288_s7 + $0xc0] sm:$0xff]   ;;  %1802 = vmatprep.subr.bf16.mxu0 %v2029_v41  ;;  %v2034_v46 = vld [vmem:[%s2288_s7 + $0xc8] sm:$0xff]   ;;  %v2038_v50 = vld [vmem:[%s2288_s7 + $0xd0] sm:$0xff]  }
  0x3b   : > { %v2031_v43 = vld [vmem:[%s2288_s7] sm:$0xff]   ;;  %1848 = vmatprep.subr.bf16.mxu1 %v2030_v42  ;;  %v2035_v47 = vld [vmem:[%s2288_s7 + $0x8] sm:$0xff]   ;;  %v2039_v51 = vld [vmem:[%s2288_s7 + $0x10] sm:$0xff]  }
  0x3c   : > { %v2032_v44 = vld [vmem:[%s2288_s7 + $0x80] sm:$0xff]   ;;  %1803 = vmatpush3.bf16.msra.mxu0 %v2031_v43  ;;  %v2036_v48 = vld [vmem:[%s2288_s7 + $0x88] sm:$0xff]   ;;  %v2040_v52 = vld [vmem:[%s2288_s7 + $0x90] sm:$0xff]  }
  0x3d   : > { %1849 = vmatpush3.bf16.msra.mxu1 %v2032_v44  ;;  %1804 = vmatprep.subr.bf16.mxu0 %v2033_v45  ;;  %v2041_v53 = vld [vmem:[%s2288_s7 + $0x58] sm:$0xff]   ;;  %v2045_v57 = vld [vmem:[%s2288_s7 + $0x60] sm:$0xff]   ;;  %v2049_v61 = vld [vmem:[%s2288_s7 + $0x68] sm:$0xff]  }
  0x3e   : > { %1850 = vmatprep.subr.bf16.mxu1 %v2034_v46  ;;  %v2042_v54 = vld [vmem:[%s2288_s7 + $0xd8] sm:$0xff]   ;;  %v2046_v58 = vld [vmem:[%s2288_s7 + $0xe0] sm:$0xff]   ;;  %v2050_v62 = vld [vmem:[%s2288_s7 + $0xe8] sm:$0xff]  }
  0x3f   : > { %v2043_v55 = vld [vmem:[%s2288_s7 + $0x18] sm:$0xff]   ;;  %v2047_v59 = vld [vmem:[%s2288_s7 + $0x20] sm:$0xff]   ;;  %v2051_v63 = vld [vmem:[%s2288_s7 + $0x28] sm:$0xff]  }
  0x40   : > { %1805 = vmatpush3.bf16.msra.mxu0 %v2035_v47  ;;  %v2044_v56 = vld [vmem:[%s2288_s7 + $0x98] sm:$0xff]   ;;  %v2048_v60 = vld [vmem:[%s2288_s7 + $0xa0] sm:$0xff]   ;;  %v2052_v0 = vld [vmem:[%s2288_s7 + $0xa8] sm:$0xff]  }
  0x41   : > { %1851 = vmatpush3.bf16.msra.mxu1 %v2036_v48  ;;  %1806 = vmatprep.subr.bf16.mxu0 %v2037_v49  ;;  %v2053_v1 = vld [vmem:[%s2288_s7 + $0x70] sm:$0xff]   ;;  %v2057_v5 = vld [vmem:[%s2288_s7 + $0x78] sm:$0xff]   ;;  %v2061_v17 = vld [vmem:[%s2288_s7 + $0x140] sm:$0xff]  }
  0x42   : > { %1852 = vmatprep.subr.bf16.mxu1 %v2038_v50  ;;  %v2054_v2 = vld [vmem:[%s2288_s7 + $0xf0] sm:$0xff]   ;;  %v2058_v6 = vld [vmem:[%s2288_s7 + $0xf8] sm:$0xff]   ;;  %v2062_v18 = vld [vmem:[%s2288_s7 + $0x100] sm:$0xff]  }
  0x43   : > { %v2055_v3 = vld [vmem:[%s2288_s7 + $0x30] sm:$0xff]   ;;  %v2059_v7 = vld [vmem:[%s2288_s7 + $0x38] sm:$0xff]   ;;  %v2063_v19 = vld [vmem:[%s2288_s7 + $0x1c0] sm:$0xff]  }
  0x44   : > { %1807 = vmatpush3.bf16.msra.mxu0 %v2039_v51  ;;  %v2056_v4 = vld [vmem:[%s2288_s7 + $0xb0] sm:$0xff]   ;;  %v2060_v8 = vld [vmem:[%s2288_s7 + $0xb8] sm:$0xff]   ;;  %v2064_v20 = vld [vmem:[%s2288_s7 + $0x180] sm:$0xff]  }
  0x45   : > { %1853 = vmatpush3.bf16.msra.mxu1 %v2040_v52  ;;  %1808 = vmatprep.subr.bf16.mxu0 %v2041_v53  ;;  %v376_v9 = vld [vmem:[%s2290_s8] sm:$0xff]  ;;  %v377_v11 = vld [vmem:[%s2290_s8 + $0x8] sm:$0xff]  ;;  %v2065_v21 = vld [vmem:[%s2288_s7 + $0x148] sm:$0xff]  }
  0x46   : > { %1854 = vmatprep.subr.bf16.mxu1 %v2042_v54  ;;  %v380_v10 = vld [vmem:[%s2290_s8 + $0x20] sm:$0xff]  ;;  %v381_v14 = vld [vmem:[%s2290_s8 + $0x28] sm:$0xff]  ;;  %v2066_v22 = vld [vmem:[%s2288_s7 + $0x108] sm:$0xff]  }
  0x47   : > { %v1642_v12 = vcombine.low %v376_v9, %v380_v10  ;;  %v1643_v13 = vcombine.high %v376_v9, %v380_v10  ;;  %v1644_v15 = vcombine.low %v377_v11, %v381_v14  ;;  %v1645_v16 = vcombine.high %v377_v11, %v381_v14  ;;  %v384_v23 = vld [vmem:[%s2290_s8 + $0x40] sm:$0xff]  ;;  %v385_v26 = vld [vmem:[%s2290_s8 + $0x48] sm:$0xff]  ;;  %v2067_v30 = vld [vmem:[%s2288_s7 + $0x1c8] sm:$0xff]  }
  0x48   : > { %1809 = vmatpush3.bf16.msra.mxu0 %v2043_v55  ;;  %v388_v24 = vld [vmem:[%s2290_s8 + $0x60] sm:$0xff]  ;;  %v389_v27 = vld [vmem:[%s2290_s8 + $0x68] sm:$0xff]  ;;  %v2068_v32 = vld [vmem:[%s2288_s7 + $0x188] sm:$0xff]  }
  0x49   : > { %1855 = vmatpush3.bf16.msra.mxu1 %v2044_v56  ;;  %1810 = vmatprep.subr.bf16.mxu0 %v2045_v57  ;;  %v1651_v25 = vcombine.high %v384_v23, %v388_v24  ;;  %v1650_v28 = vcombine.low %v384_v23, %v388_v24  ;;  %v1653_v29 = vcombine.high %v385_v26, %v389_v27  ;;  %v2069_v33 = vld [vmem:[%s2288_s7 + $0x150] sm:$0xff]   ;;  %v393_v39 = vld [vmem:[%s2290_s8 + $0x88] sm:$0xff]  ;;  %v2077_v49 = vld [vmem:[%s2288_s7 + $0x160] sm:$0xff]  }
  0x4a   : > { %1856 = vmatprep.subr.bf16.mxu1 %v2046_v58  ;;  %1160 = vmatprep.mubr.bf16.mxu0 %v1643_v13  ;;  %v1652_v31 = vcombine.low %v385_v26, %v389_v27  ;;  %v2070_v34 = vld [vmem:[%s2288_s7 + $0x110] sm:$0xff]   ;;  %v397_v40 = vld [vmem:[%s2290_s8 + $0xa8] sm:$0xff]  ;;  %v2078_v50 = vld [vmem:[%s2288_s7 + $0x120] sm:$0xff]  }
  0x4b   : > { %1233 = vmatprep.mubr.bf16.mxu1 %v1645_v16  ;;  %v2071_v35 = vld [vmem:[%s2288_s7 + $0x1d0] sm:$0xff]   ;;  %v1661_v42 = vcombine.high %v393_v39, %v397_v40  ;;  %v2073_v43 = vld [vmem:[%s2288_s7 + $0x158] sm:$0xff]   ;;  %v1660_v45 = vcombine.low %v393_v39, %v397_v40  ;;  %v2079_v51 = vld [vmem:[%s2288_s7 + $0x1e0] sm:$0xff]  }
  0x4c   : > { %1811 = vmatpush3.bf16.msra.mxu0 %v2047_v59  ;;  %v2072_v36 = vld [vmem:[%s2288_s7 + $0x190] sm:$0xff]   ;;  %v2074_v46 = vld [vmem:[%s2288_s7 + $0x118] sm:$0xff]   ;;  %v2080_v59 = vld [vmem:[%s2288_s7 + $0x1a0] sm:$0xff]  }
  0x4d   : > { %1857 = vmatpush3.bf16.msra.mxu1 %v2048_v60  ;;  %1812 = vmatprep.subr.bf16.mxu0 %v2049_v61  ;;  %v392_v37 = vld [vmem:[%s2290_s8 + $0x80] sm:$0xff]  ;;  %v2075_v47 = vld [vmem:[%s2288_s7 + $0x1d8] sm:$0xff]   ;;  %v2081_v61 = vld [vmem:[%s2288_s7 + $0x168] sm:$0xff]  }
  0x4e   : > { %1858 = vmatprep.subr.bf16.mxu1 %v2050_v62  ;;  %v396_v38 = vld [vmem:[%s2290_s8 + $0xa0] sm:$0xff]  ;;  %v2076_v48 = vld [vmem:[%s2288_s7 + $0x198] sm:$0xff]   ;;  %v2082_v62 = vld [vmem:[%s2288_s7 + $0x128] sm:$0xff]  }
  0x4f   : > { %v1659_v41 = vcombine.high %v392_v37, %v396_v38  ;;  %v1658_v44 = vcombine.low %v392_v37, %v396_v38  ;;  %v400_v52 = vld [vmem:[%s2290_s8 + $0xc0] sm:$0xff]  ;;  %v401_v54 = vld [vmem:[%s2290_s8 + $0xc8] sm:$0xff]  ;;  %v386_v24 = vld [vmem:[%s2290_s8 + $0x50] sm:$0xff] }
  0x50   : > { %1813 = vmatpush3.bf16.msra.mxu0 %v2051_v63  ;;  %v404_v53 = vld [vmem:[%s2290_s8 + $0xe0] sm:$0xff]  ;;  %v405_v56 = vld [vmem:[%s2290_s8 + $0xe8] sm:$0xff]  ;;  %v2083_v63 = vld [vmem:[%s2288_s7 + $0x1e8] sm:$0xff]  }
  0x51   : > { %1859 = vmatpush3.bf16.msra.mxu1 %v2052_v0  ;;  %1814 = vmatprep.subr.bf16.mxu0 %v2053_v1  ;;  %v1667_v55 = vcombine.high %v400_v52, %v404_v53  ;;  %v1666_v57 = vcombine.low %v400_v52, %v404_v53  ;;  %v1669_v58 = vcombine.high %v401_v54, %v405_v56  ;;  %v2084_v0 = vld [vmem:[%s2288_s7 + $0x1a8] sm:$0xff]   ;;  %v2085_v1 = vld [vmem:[%s2288_s7 + $0x170] sm:$0xff]   ;;  %v2089_v13 = vld [vmem:[%s2288_s7 + $0x178] sm:$0xff]  }
  0x52   : > { %1860 = vmatprep.subr.bf16.mxu1 %v2054_v2  ;;  %v1668_v60 = vcombine.low %v401_v54, %v405_v56  ;;  %v408_v2 = vld [vmem:[%s2290_s8 + $0x100] sm:$0xff]  ;;  %v2090_v14 = vld [vmem:[%s2288_s7 + $0x138] sm:$0xff]   ;;  %v387_v26 = vld [vmem:[%s2290_s8 + $0x58] sm:$0xff] }
  0x53   : > { %v2087_v11 = vld [vmem:[%s2288_s7 + $0x1f0] sm:$0xff]   ;;  %v2092_v16 = vld [vmem:[%s2288_s7 + $0x1b8] sm:$0xff]   ;;  %v402_v39 = vld [vmem:[%s2290_s8 + $0xd0] sm:$0xff] }
  0x54   : > { %1815 = vmatpush3.bf16.msra.mxu0 %v2055_v3  ;;  %v412_v3 = vld [vmem:[%s2290_s8 + $0x120] sm:$0xff]  ;;  %v406_v40 = vld [vmem:[%s2290_s8 + $0xf0] sm:$0xff] }
  0x55   : > { %1861 = vmatpush3.bf16.msra.mxu1 %v2056_v4  ;;  %1816 = vmatprep.subr.bf16.mxu0 %v2057_v5  ;;  %v1675_v4 = vcombine.high %v408_v2, %v412_v3  ;;  %v409_v5 = vld [vmem:[%s2290_s8 + $0x108] sm:$0xff]  ;;  %v1674_v9 = vcombine.low %v408_v2, %v412_v3 }
  0x56   : > { %1862 = vmatprep.subr.bf16.mxu1 %v2058_v6  ;;  %v413_v6 = vld [vmem:[%s2290_s8 + $0x128] sm:$0xff] }
  0x57   : > { %v1676_v10 = vcombine.low %v409_v5, %v413_v6 }
  0x58   : > { %1817 = vmatpush3.bf16.msra.mxu0 %v2059_v7  ;;  %v1677_v7 = vcombine.high %v409_v5, %v413_v6 }
  0x59   : > { %1863 = vmatpush3.bf16.msra.mxu1 %v2060_v8  ;;  %1894 = vmatprep.subr.bf16.mxu0 %v2061_v17  ;;  %v2086_v8 = vld [vmem:[%s2288_s7 + $0x130] sm:$0xff]   ;;  %v378_v17 = vld [vmem:[%s2290_s8 + $0x10] sm:$0xff] }
  0x5a   : > { %1940 = vmatprep.subr.bf16.mxu1 %v2063_v19  ;;  %v379_v19 = vld [vmem:[%s2290_s8 + $0x18] sm:$0xff] }
  0x5b   : > { %1161 = vmatmul.mubr.bf16.vlgmr.msra.gmra.mrb[0].mxu0 %v1642_v12  ;;  %v2088_v12 = vld [vmem:[%s2288_s7 + $0x1b0] sm:$0xff]  }
  0x5c   : > { %1234 = vmatmul.mubr.bf16.vlgmr.msra.gmra.mrb[0].mxu1 %v1644_v15  ;;  %1895 = vmatpush3.bf16.msra.mxu0 %v2062_v18  ;;  %v2091_v15 = vld [vmem:[%s2288_s7 + $0x1f8] sm:$0xff]   ;;  %v382_v18 = vld [vmem:[%s2290_s8 + $0x30] sm:$0xff] }
  0x5d   : > { %1941 = vmatpush3.bf16.msra.mxu1 %v2064_v20  ;;  %1896 = vmatprep.subr.bf16.mxu0 %v2065_v21  ;;  %v383_v20 = vld [vmem:[%s2290_s8 + $0x38] sm:$0xff]  ;;  %v1646_v21 = vcombine.low %v378_v17, %v382_v18 }
  0x5e   : > { %1168 = vmatprep.mubr.bf16.mxu0 %v1651_v25  ;;  %1241 = vmatprep.mubr.bf16.mxu1 %v1653_v29  ;;  %v1649_v23 = vcombine.high %v379_v19, %v383_v20  ;;  %v390_v25 = vld [vmem:[%s2290_s8 + $0x70] sm:$0xff]  ;;  %v1648_v27 = vcombine.low %v379_v19, %v383_v20  ;;  %v391_v29 = vld [vmem:[%s2290_s8 + $0x78] sm:$0xff] }
  0x5f   : > { %1942 = vmatprep.subr.bf16.mxu1 %v2067_v30  ;;  %v1657_v30 = vcombine.high %v387_v26, %v391_v29 }
  0x60   : > { %1897 = vmatpush3.bf16.msra.mxu0 %v2066_v22  ;;  %v1647_v22 = vcombine.high %v378_v17, %v382_v18 }
  0x61   : > { %1943 = vmatpush3.bf16.msra.mxu1 %v2068_v32  ;;  %1898 = vmatprep.subr.bf16.mxu0 %v2069_v33  ;;  %v398_v32 = vld [vmem:[%s2290_s8 + $0xb0] sm:$0xff]  ;;  %v395_v33 = vld [vmem:[%s2290_s8 + $0x98] sm:$0xff] }
  0x62   : > { %1944 = vmatprep.subr.bf16.mxu1 %v2071_v35  ;;  %v1654_v35 = vcombine.low %v386_v24, %v390_v25 }
  0x63   : > { %1169 = vmatmul.mubr.bf16.gmra.mrb[4].mxu0 %v1650_v28  ;;  %v1655_v28 = vcombine.high %v386_v24, %v390_v25 }
  0x64   : > { %1242 = vmatmul.mubr.bf16.gmra.mrb[4].mxu1 %v1652_v31  ;;  %1899 = vmatpush3.bf16.msra.mxu0 %v2070_v34  ;;  %v394_v31 = vld [vmem:[%s2290_s8 + $0x90] sm:$0xff]  ;;  %v399_v34 = vld [vmem:[%s2290_s8 + $0xb8] sm:$0xff] }
  0x65   : > { %1945 = vmatpush3.bf16.msra.mxu1 %v2072_v36  ;;  %1176 = vmatprep.mubr.bf16.mxu0 %v1659_v41  ;;  %v1656_v36 = vcombine.low %v387_v26, %v391_v29  ;;  %v1663_v37 = vcombine.high %v394_v31, %v398_v32  ;;  %v1665_v38 = vcombine.high %v395_v33, %v399_v34  ;;  %v403_v41 = vld [vmem:[%s2290_s8 + $0xd8] sm:$0xff] }
  0x66   : > { %1249 = vmatprep.mubr.bf16.mxu1 %v1661_v42  ;;  %1900 = vmatprep.subr.bf16.mxu0 %v2073_v43  ;;  %v407_v42 = vld [vmem:[%s2290_s8 + $0xf8] sm:$0xff]  ;;  %v1662_v43 = vcombine.low %v394_v31, %v398_v32 }
  0x67   : > { %1946 = vmatprep.subr.bf16.mxu1 %v2075_v47  ;;  %v410_v47 = vld [vmem:[%s2290_s8 + $0x110] sm:$0xff]  ;;  %v1672_v52 = vcombine.low %v403_v41, %v407_v42 }
  0x68   : > { %1901 = vmatpush3.bf16.msra.mxu0 %v2074_v46  ;;  %v1673_v46 = vcombine.high %v403_v41, %v407_v42 }
  0x69   : > { %1947 = vmatpush3.bf16.msra.mxu1 %v2076_v48  ;;  %1902 = vmatprep.subr.bf16.mxu0 %v2077_v49  ;;  %v414_v48 = vld [vmem:[%s2290_s8 + $0x130] sm:$0xff]  ;;  %v411_v49 = vld [vmem:[%s2290_s8 + $0x118] sm:$0xff] }
  0x6a   : > { %1948 = vmatprep.subr.bf16.mxu1 %v2079_v51  ;;  %v1670_v51 = vcombine.low %v402_v39, %v406_v40  ;;  %v1679_v53 = vcombine.high %v410_v47, %v414_v48 }
  0x6b   : > { %1177 = vmatmul.mubr.bf16.gmra.mrb[8].mxu0 %v1658_v44  ;;  %v1664_v44 = vcombine.low %v395_v33, %v399_v34 }
  0x6c   : > { %1250 = vmatmul.mubr.bf16.gmra.mrb[8].mxu1 %v1660_v45  ;;  %1903 = vmatpush3.bf16.msra.mxu0 %v2078_v50  ;;  %v1671_v45 = vcombine.high %v402_v39, %v406_v40  ;;  %v415_v50 = vld [vmem:[%s2290_s8 + $0x138] sm:$0xff] }
  0x6d   : > { %1184 = vmatprep.mubr.bf16.mxu0 %v1667_v55  ;;  %1257 = vmatprep.mubr.bf16.mxu1 %v1669_v58  ;;  %v1681_v54 = vcombine.high %v411_v49, %v415_v50  ;;  %v1678_v55 = vcombine.low %v410_v47, %v414_v48  ;;  %v1680_v56 = vcombine.low %v411_v49, %v415_v50 }
  0x6e   : > { %1949 = vmatpush3.bf16.msra.mxu1 %v2080_v59  ;;  %1904 = vmatprep.subr.bf16.mxu0 %v2081_v61 }
  0x6f   : > { %1950 = vmatprep.subr.bf16.mxu1 %v2083_v63 }
  0x70   : > { %1905 = vmatpush3.bf16.msra.mxu0 %v2082_v62 }
  0x71   : > { %1906 = vmatprep.subr.bf16.mxu0 %v2085_v1 }
  0x72   : > { %1951 = vmatpush3.bf16.msra.mxu1 %v2084_v0 }
  0x73   : > { %1185 = vmatmul.mubr.bf16.gmra.mrb[12].mxu0 %v1666_v57  ;;  %1952 = vmatprep.subr.bf16.mxu1 %v2087_v11 }
  0x74   : > { %1258 = vmatmul.mubr.bf16.gmra.mrb[12].mxu1 %v1668_v60  ;;  %1192 = vmatprep.mubr.bf16.mxu0 %v1675_v4 }
  0x75   : > { %1265 = vmatprep.mubr.bf16.mxu1 %v1677_v7  ;;  %1907 = vmatpush3.bf16.msra.mxu0 %v2086_v8 }
  0x76   : > { %1953 = vmatpush3.bf16.msra.mxu1 %v2088_v12  ;;  %1908 = vmatprep.subr.bf16.mxu0 %v2089_v13 }
  0x77   : > { %1954 = vmatprep.subr.bf16.mxu1 %v2091_v15 }
  0x79   : > { %1909 = vmatpush3.bf16.msra.mxu0 %v2090_v14 }
  0x7a   : > { %1955 = vmatpush3.bf16.msra.mxu1 %v2092_v16 }
  0x7b   : > { %1193 = vmatmul.mubr.bf16.gmra.mrb[16].mxu0 %v1674_v9 }
  0x7c   : > { %1266 = vmatmul.mubr.bf16.gmra.mrb[16].mxu1 %v1676_v10  ;;  %1306 = vmatprep.mubr.bf16.mxu0 %v1647_v22 }
  0x7d   : > { %1379 = vmatprep.mubr.bf16.mxu1 %v1649_v23 }
  0x83   : > { %1307 = vmatmul.mubr.bf16.vlgmr.msra.gmra.mrb[20].mxu0 %v1646_v21 }
  0x84   : > { %1380 = vmatmul.mubr.bf16.vlgmr.msra.gmra.mrb[20].mxu1 %v1648_v27  ;;  %1314 = vmatprep.mubr.bf16.mxu0 %v1655_v28 }
  0x85   : > { %1387 = vmatprep.mubr.bf16.mxu1 %v1657_v30 }
  0x8b   : > { %1315 = vmatmul.mubr.bf16.gmra.mrb[24].mxu0 %v1654_v35 }
  0x8c   : > { %1388 = vmatmul.mubr.bf16.gmra.mrb[24].mxu1 %v1656_v36  ;;  %1322 = vmatprep.mubr.bf16.mxu0 %v1663_v37 }
  0x8d   : > { %1395 = vmatprep.mubr.bf16.mxu1 %v1665_v38 }
  0x93   : > { %1323 = vmatmul.mubr.bf16.gmra.mrb[28].mxu0 %v1662_v43 }
  0x94   : > { %1396 = vmatmul.mubr.bf16.gmra.mrb[28].mxu1 %v1664_v44  ;;  %1330 = vmatprep.mubr.bf16.mxu0 %v1671_v45 }
  0x95   : > { %1403 = vmatprep.mubr.bf16.mxu1 %v1673_v46 }
  0x9b   : > { %1331 = vmatmul.mubr.bf16.gmra.mrb[32].mxu0 %v1670_v51 }
  0x9c   : > { %1404 = vmatmul.mubr.bf16.gmra.mrb[32].mxu1 %v1672_v52  ;;  %1338 = vmatprep.mubr.bf16.mxu0 %v1679_v53 }
  0x9d   : > { %1411 = vmatprep.mubr.bf16.mxu1 %v1681_v54 }
  0xa3   : > { %1339 = vmatmul.mubr.bf16.gmra.mrb[36].mxu0 %v1678_v55 }
  0xa4   : > { %1412 = vmatmul.mubr.bf16.gmra.mrb[36].mxu1 %v1680_v56 }
 0x12e   : > { %v1818_v57 = vpop.f32.mrb[0].mxu0 }
 0x12f   : > { %v1864_v58 = vpop.f32.mrb[0].mxu1  ;;  %v1819_v59 = vpop.f32.mrb[1].mxu0 }
 0x130   : > { %v1820_v60 = vadd.f32 %v1819_v59, %v1818_v57  ;;  %v1865_v61 = vpop.f32.mrb[1].mxu1  ;;  %v1821_v62 = vpop.f32.mrb[2].mxu0 }
 0x131   : > { %v1866_v63 = vadd.f32 %v1865_v61, %v1864_v58  ;;  %v1867_v0 = vpop.f32.mrb[2].mxu1  ;;  %v1822_v1 = vpop.f32.mrb[3].mxu0 }
 0x132   : > { %v1823_v2 = vadd.f32 %v1822_v1, %v1821_v62  ;;  %v1868_v3 = vpop.f32.mrb[3].mxu1 }
 0x133   : > { %v2397_v4 = vadd.f32 %v1866_v63, %v1820_v60  ;;  %v1869_v5 = vadd.f32 %v1868_v3, %v1867_v0 }
 0x135   : > { %v2399_v6 = vadd.f32 %v1869_v5, %v1823_v2 }
 0x136   : > { %v1824_v7 = vpop.f32.mrb[4].mxu0 }
 0x137   : > { %v1870_v8 = vpop.f32.mrb[4].mxu1  ;;  %v1825_v9 = vpop.f32.mrb[5].mxu0 }
 0x138   : > { %v1826_v10 = vadd.f32 %v1825_v9, %v1824_v7  ;;  %v1871_v11 = vpop.f32.mrb[5].mxu1  ;;  %v1827_v12 = vpop.f32.mrb[6].mxu0 }
 0x139   : > { %v1872_v13 = vadd.f32 %v1871_v11, %v1870_v8  ;;  %v1873_v14 = vpop.f32.mrb[6].mxu1  ;;  %v1828_v15 = vpop.f32.mrb[7].mxu0 }
 0x13a   : > { %v1829_v16 = vadd.f32 %v1828_v15, %v1827_v12  ;;  %v1874_v17 = vpop.f32.mrb[7].mxu1 }
 0x13b   : > { %v2401_v18 = vadd.f32 %v1872_v13, %v1826_v10  ;;  %v1875_v19 = vadd.f32 %v1874_v17, %v1873_v14  ;;  %v366_v13 = vld [vmem:[#allocation2] sm:$0xff]  ;;  %v367_v17 = vld [vmem:[#allocation2 + $0x8] sm:$0xff] }
 0x13d   : > { %v2403_v20 = vadd.f32 %v1875_v19, %v1829_v16 }
 0x13e   : > { %v1830_v21 = vpop.f32.mrb[8].mxu0 }
 0x13f   : > { %v1876_v22 = vpop.f32.mrb[8].mxu1  ;;  %v1831_v23 = vpop.f32.mrb[9].mxu0 }
 0x140   : > { %v1832_v24 = vadd.f32 %v1831_v23, %v1830_v21  ;;  %v1877_v25 = vpop.f32.mrb[9].mxu1  ;;  %v1833_v26 = vpop.f32.mrb[10].mxu0 }
 0x141   : > { %v1878_v27 = vadd.f32 %v1877_v25, %v1876_v22  ;;  %v1879_v28 = vpop.f32.mrb[10].mxu1  ;;  %v1834_v29 = vpop.f32.mrb[11].mxu0 }
 0x142   : > { %v1835_v30 = vadd.f32 %v1834_v29, %v1833_v26  ;;  %v1880_v31 = vpop.f32.mrb[11].mxu1 }
 0x143   : > { %v2405_v32 = vadd.f32 %v1878_v27, %v1832_v24  ;;  %v1881_v33 = vadd.f32 %v1880_v31, %v1879_v28 }
 0x145   : > { %v2407_v34 = vadd.f32 %v1881_v33, %v1835_v30 }
 0x146   : > { %v1836_v35 = vpop.f32.mrb[12].mxu0 }
 0x147   : > { %v1882_v36 = vpop.f32.mrb[12].mxu1  ;;  %v1837_v37 = vpop.f32.mrb[13].mxu0 }
 0x148   : > { %v1838_v38 = vadd.f32 %v1837_v37, %v1836_v35  ;;  %v1883_v39 = vpop.f32.mrb[13].mxu1  ;;  %v1839_v40 = vpop.f32.mrb[14].mxu0 }
 0x149   : > { %v1884_v41 = vadd.f32 %v1883_v39, %v1882_v36  ;;  %v1885_v42 = vpop.f32.mrb[14].mxu1  ;;  %v1840_v43 = vpop.f32.mrb[15].mxu0  ;;  %v369_v39 = vld [vmem:[#allocation2 + $0x18] sm:$0xff] }
 0x14a   : > { %v1841_v44 = vadd.f32 %v1840_v43, %v1839_v40  ;;  %v1886_v45 = vpop.f32.mrb[15].mxu1 }
 0x14b   : > { %v2409_v46 = vadd.f32 %v1884_v41, %v1838_v38  ;;  %v1887_v47 = vadd.f32 %v1886_v45, %v1885_v42 }
 0x14d   : > { %v2411_v48 = vadd.f32 %v1887_v47, %v1841_v44 }
 0x14e   : > { %v1842_v49 = vpop.f32.mrb[16].mxu0 }
 0x14f   : > { %v1888_v50 = vpop.f32.mrb[16].mxu1  ;;  %v1843_v51 = vpop.f32.mrb[17].mxu0 }
 0x150   : > { %v1844_v52 = vadd.f32 %v1843_v51, %v1842_v49  ;;  %v1889_v53 = vpop.f32.mrb[17].mxu1  ;;  %v1845_v54 = vpop.f32.mrb[18].mxu0 }
 0x151   : > { %v1890_v55 = vadd.f32 %v1889_v53, %v1888_v50  ;;  %v1891_v56 = vpop.f32.mrb[18].mxu1  ;;  %v1846_v57 = vpop.f32.mrb[19].mxu0 }
 0x152   : > { %v1847_v58 = vadd.f32 %v1846_v57, %v1845_v54  ;;  %v1892_v59 = vpop.f32.mrb[19].mxu1 }
 0x153   : > { %v2413_v60 = vadd.f32 %v1890_v55, %v1844_v52  ;;  %v1893_v61 = vadd.f32 %v1892_v59, %v1891_v56  ;;  %v371_v59 = vld [vmem:[#allocation2 + $0x28] sm:$0xff] }
 0x155   : > { %v2415_v62 = vadd.f32 %v1893_v61, %v1847_v58 }
 0x156   : > { %v1910_v63 = vpop.f32.mrb[20].mxu0 }
 0x157   : > { %v1956_v0 = vpop.f32.mrb[20].mxu1  ;;  %v1911_v1 = vpop.f32.mrb[21].mxu0 }
 0x158   : > { %v1912_v2 = vadd.f32 %v1911_v1, %v1910_v63  ;;  %v1957_v3 = vpop.f32.mrb[21].mxu1  ;;  %v1913_v5 = vpop.f32.mrb[22].mxu0 }
 0x159   : > { %v1958_v7 = vadd.f32 %v1957_v3, %v1956_v0  ;;  %v1959_v8 = vpop.f32.mrb[22].mxu1  ;;  %v1914_v9 = vpop.f32.mrb[23].mxu0 }
 0x15a   : > { %v1309_v10 = vadd.f32 %v1912_v2, %v2397_v4  ;;  %v1915_v11 = vadd.f32 %v1914_v9, %v1913_v5  ;;  %v1960_v12 = vpop.f32.mrb[23].mxu1 }
 0x15b   : > { %v1961_v14 = vadd.f32 %v1960_v12, %v1959_v8 }
 0x15c   : > { %v1382_v15 = vadd.f32 %v1958_v7, %v1309_v10  ;;  %v1312_v16 = vadd.f32 %v1915_v11, %v2399_v6  ;;  %v368_v6 = vld [vmem:[#allocation2 + $0x10] sm:$0xff] }
 0x15e   : > { %v1420_v19 = vadd.f32 %v1382_v15, %v366_v13  ;;  %v1385_v21 = vadd.f32 %v1961_v14, %v1312_v16  ;;  %v1916_v22 = vpop.f32.mrb[24].mxu0 }
 0x15f   : > { %v1962_v23 = vpop.f32.mrb[24].mxu1  ;;  %v1917_v24 = vpop.f32.mrb[25].mxu0 }
 0x160   : > { %1430 = vst [vmem:[#allocation2] sm:$0xff] %v1420_v19  ;;  %v1421_v25 = vadd.f32 %v1385_v21, %v367_v17  ;;  %v1918_v26 = vadd.f32 %v1917_v24, %v1916_v22  ;;  %v1963_v27 = vpop.f32.mrb[25].mxu1  ;;  %v1919_v28 = vpop.f32.mrb[26].mxu0  ;;  %v373_v17 = vld [vmem:[#allocation2 + $0x38] sm:$0xff] }
 0x161   : > { %v1964_v29 = vadd.f32 %v1963_v27, %v1962_v23  ;;  %v1965_v4 = vpop.f32.mrb[26].mxu1  ;;  %v1920_v30 = vpop.f32.mrb[27].mxu0 }
 0x162   : > { %1431 = vst [vmem:[#allocation2 + $0x8] sm:$0xff] %v1421_v25  ;;  %v1317_v31 = vadd.f32 %v1918_v26, %v2401_v18  ;;  %v1921_v33 = vadd.f32 %v1920_v30, %v1919_v28  ;;  %v1966_v35 = vpop.f32.mrb[27].mxu1 }
 0x163   : > { %v1967_v36 = vadd.f32 %v1966_v35, %v1965_v4 }
 0x164   : > { %v1390_v37 = vadd.f32 %v1964_v29, %v1317_v31  ;;  %v1320_v38 = vadd.f32 %v1921_v33, %v2403_v20  ;;  %v370_v20 = vld [vmem:[#allocation2 + $0x20] sm:$0xff] }
 0x166   : > { %v1422_v40 = vadd.f32 %v1390_v37, %v368_v6  ;;  %v1393_v41 = vadd.f32 %v1967_v36, %v1320_v38  ;;  %v1922_v42 = vpop.f32.mrb[28].mxu0  ;;  %v375_v37 = vld [vmem:[#allocation2 + $0x48] sm:$0xff] }
 0x167   : > { %v1968_v43 = vpop.f32.mrb[28].mxu1  ;;  %v1923_v44 = vpop.f32.mrb[29].mxu0 }
 0x168   : > { %1432 = vst [vmem:[#allocation2 + $0x10] sm:$0xff] %v1422_v40  ;;  %v1423_v45 = vadd.f32 %v1393_v41, %v369_v39  ;;  %v1924_v47 = vadd.f32 %v1923_v44, %v1922_v42  ;;  %v1969_v49 = vpop.f32.mrb[29].mxu1  ;;  %v1925_v50 = vpop.f32.mrb[30].mxu0  ;;  %v1444_v41 = vld [vmem:[#allocation2] sm:$0xff] (!%p1746_p11) }
 0x169   : > { %v1970_v51 = vadd.f32 %v1969_v49, %v1968_v43  ;;  %v1971_v18 = vpop.f32.mrb[30].mxu1  ;;  %v1926_v52 = vpop.f32.mrb[31].mxu0  ;;  %v1445_v42 = vld [vmem:[#allocation2 + $0x8] sm:$0xff] (!%p1746_p11) }
 0x16a   : > { %1433 = vst [vmem:[#allocation2 + $0x18] sm:$0xff] %v1423_v45  ;;  %v1325_v53 = vadd.f32 %v1924_v47, %v2405_v32  ;;  %v1927_v54 = vadd.f32 %v1926_v52, %v1925_v50  ;;  %v1972_v55 = vpop.f32.mrb[31].mxu1 }
 0x16b   : > { %v1973_v56 = vadd.f32 %v1972_v55, %v1971_v18 }
 0x16c   : > { %v1398_v57 = vadd.f32 %v1970_v51, %v1325_v53  ;;  %v1328_v58 = vadd.f32 %v1927_v54, %v2407_v34  ;;  %v372_v34 = vld [vmem:[#allocation2 + $0x30] sm:$0xff] }
 0x16e   : > { %v1424_v61 = vadd.f32 %v1398_v57, %v370_v20  ;;  %v1401_v63 = vadd.f32 %v1973_v56, %v1328_v58  ;;  %v1928_v0 = vpop.f32.mrb[32].mxu0 }
 0x16f   : > { %v1974_v1 = vpop.f32.mrb[32].mxu1  ;;  %v1929_v2 = vpop.f32.mrb[33].mxu0  ;;  %v1446_v45 = vld [vmem:[#allocation2 + $0x10] sm:$0xff] (!%p1746_p11) }
 0x170   : > { %1434 = vst [vmem:[#allocation2 + $0x20] sm:$0xff] %v1424_v61  ;;  %v1425_v3 = vadd.f32 %v1401_v63, %v371_v59  ;;  %v1930_v5 = vadd.f32 %v1929_v2, %v1928_v0  ;;  %v1975_v7 = vpop.f32.mrb[33].mxu1  ;;  %v1931_v8 = vpop.f32.mrb[34].mxu0 }
 0x171   : > { %v1976_v9 = vadd.f32 %v1975_v7, %v1974_v1  ;;  %v1977_v32 = vpop.f32.mrb[34].mxu1  ;;  %v1932_v10 = vpop.f32.mrb[35].mxu0  ;;  %v1447_v47 = vld [vmem:[#allocation2 + $0x18] sm:$0xff] (!%p1746_p11) }
 0x172   : > { %1435 = vst [vmem:[#allocation2 + $0x28] sm:$0xff] %v1425_v3  ;;  %v1333_v11 = vadd.f32 %v1930_v5, %v2409_v46  ;;  %v1933_v12 = vadd.f32 %v1932_v10, %v1931_v8  ;;  %v1978_v13 = vpop.f32.mrb[35].mxu1 }
 0x173   : > { %v1979_v14 = vadd.f32 %v1978_v13, %v1977_v32 }
 0x174   : > { %v1406_v15 = vadd.f32 %v1976_v9, %v1333_v11  ;;  %v1336_v16 = vadd.f32 %v1933_v12, %v2411_v48  ;;  %v374_v48 = vld [vmem:[#allocation2 + $0x40] sm:$0xff] }
 0x176   : > { %v1426_v19 = vadd.f32 %v1406_v15, %v372_v34  ;;  %v1409_v21 = vadd.f32 %v1979_v14, %v1336_v16  ;;  %v1934_v22 = vpop.f32.mrb[36].mxu0 }
 0x177   : > { %v1980_v23 = vpop.f32.mrb[36].mxu1  ;;  %v1935_v24 = vpop.f32.mrb[37].mxu0 }
 0x178   : > { %1436 = vst [vmem:[#allocation2 + $0x30] sm:$0xff] %v1426_v19  ;;  %v1427_v25 = vadd.f32 %v1409_v21, %v373_v17  ;;  %v1936_v26 = vadd.f32 %v1935_v24, %v1934_v22  ;;  %v1981_v27 = vpop.f32.mrb[37].mxu1  ;;  %v1937_v28 = vpop.f32.mrb[38].mxu0 }
 0x179   : > { %v1982_v29 = vadd.f32 %v1981_v27, %v1980_v23  ;;  %v1983_v46 = vpop.f32.mrb[38].mxu1  ;;  %v1938_v4 = vpop.f32.mrb[39].mxu0  ;;  %v1449_v51 = vld [vmem:[#allocation2 + $0x28] sm:$0xff] (!%p1746_p11) }
 0x17a   : > { %1437 = vst [vmem:[#allocation2 + $0x38] sm:$0xff] %v1427_v25  ;;  %v1341_v30 = vadd.f32 %v1936_v26, %v2413_v60  ;;  %v1939_v31 = vadd.f32 %v1938_v4, %v1937_v28  ;;  %v1984_v33 = vpop.f32.mrb[39].mxu1  ;;  %v1747_v60 = vld [vmem:[%s2463_s2] ss:$0 sm:$0xff] (!%p1746_p11) }
 0x17b   : > { %v1985_v35 = vadd.f32 %v1984_v33, %v1983_v46  ;;  %v1461_v43 = vadd.f32 (!%p1746_p11), %v1747_v60, %v1444_v41  ;;  %v1462_v44 = vadd.f32 (!%p1746_p11), %v1747_v60, %v1445_v42  ;;  %v1463_v49 = vadd.f32 (!%p1746_p11), %v1747_v60, %v1446_v45 }
 0x17c   : > { %v1414_v6 = vadd.f32 %v1982_v29, %v1341_v30  ;;  %v1344_v36 = vadd.f32 %v1939_v31, %v2415_v62  ;;  %1443 = sbr.rel (%p1746_p11) target bundleno = 399 (0x18f), region = 63  ;;  %v1448_v62 = vld [vmem:[#allocation2 + $0x20] sm:$0xff] (!%p1746_p11)  ;;  %v1464_v50 = vadd.f32 (!%p1746_p11), %v1747_v60, %v1447_v47  ;;  %v1466_v55 = vadd.f32 (!%p1746_p11), %v1747_v60, %v1449_v51 }
 0x17d   : > { %v1465_v18 = vadd.f32 (!%p1746_p11), %v1747_v60, %v1448_v62  ;;  %v1776_v54 = vpack.c.bf16 (!%p1746_p11), %v1462_v44, %v1461_v43 }
 0x17e   : > { %v1428_v38 = vadd.f32 %v1414_v6, %v374_v48  ;;  %v1417_v39 = vadd.f32 %v1985_v35, %v1344_v36  ;;  %v1781_v59 = vpack.c.bf16 (!%p1746_p11), %v1464_v50, %v1463_v49 }
 0x17f   : > { %v1450_v52 = vld [vmem:[#allocation2 + $0x30] sm:$0xff] (!%p1746_p11)  ;;  %1777 = vst [vmem:[%s2464_s3] sm:$0xff] (!%p1746_p11), %v1776_v54   ;;  %v1786_v0 = vpack.c.bf16 (!%p1746_p11), %v1466_v55, %v1465_v18 }
 0x180   : > { %1438 = vst [vmem:[#allocation2 + $0x40] sm:$0xff] %v1428_v38  ;;  %v1429_v40 = vadd.f32 %v1417_v39, %v375_v37  ;;  %v1467_v20 = vadd.f32 (!%p1746_p11), %v1747_v60, %v1450_v52  ;;  %1798 = vst [vmem:[%s2464_s3 + $0x8] sm:$0xff] (!%p1746_p11), %v1781_v59  }
 0x181   : > { %v1451_v53 = vld [vmem:[#allocation2 + $0x38] sm:$0xff] (!%p1746_p11)  ;;  %1799 = vst [vmem:[%s2464_s3 + $0x10] sm:$0xff] (!%p1746_p11), %v1786_v0  }
 0x182   : > { %1439 = vst [vmem:[#allocation2 + $0x48] sm:$0xff] %v1429_v40  ;;  %v1468_v56 = vadd.f32 (!%p1746_p11), %v1747_v60, %v1451_v53 }
 0x184   : > { %v1791_v1 = vpack.c.bf16 %v1468_v56, %v1467_v20 }
 0x186   : > { %1800 = vst [vmem:[%s2464_s3 + $0x18] sm:$0xff] %v1791_v1  }
 0x187   : > { %v1452_v57 = vld [vmem:[#allocation2 + $0x40] sm:$0xff] }
 0x188   : > { %v1469_v61 = vadd.f32 %v1747_v60, %v1452_v57 }
 0x189   : > { %v1453_v58 = vld [vmem:[#allocation2 + $0x48] sm:$0xff] }
 0x18a   : > { %v1470_v63 = vadd.f32 %v1747_v60, %v1453_v58 }
 0x18c   : > { %v1796_v2 = vpack.c.bf16 %v1470_v63, %v1469_v61 }
 0x18e   : > { %1801 = vst [vmem:[%s2464_s3 + $0x20] sm:$0xff] %v1796_v2  }
 0x18f PF: > { %s13_s16 = sadd.s32 1, %s2131_s16   ;;  %s2465_s12 = smov %s2119_s13 }
 0x190   : > { %p10_p12 = scmp.ge.s32.totalorder %s13_s16, 7   ;;  %s2466_s13 = smov %s2189_s20 }
 0x191   : > { %s2467_s14 = smov %s2127_s15  ;;  %s2468_s15 = smov %s2470_s17 }
 0x192   :  { %12 = sbr.rel (!%p10_p12) target bundleno = 3 (0x3), region = 104 }

// kernel: pspnet_forward.46
= control target key start
LH: loop header
LB: loop body
LE: loop exit
PB: predicated region body
PF: predicated region fallthrough
CT: control target
= control target key end

     0   :  { %s907_s12 = smov 0   ;;  %s909_s13 = smov 0   ;;  %s1032_s0 = inlined_call_operand.vmem [shape: bf16[48,128], index: 0, kind: input, shape index: {}]   ;;  %s1033_s1 = inlined_call_operand.vmem [shape: bf16[128,1536], index: 1, kind: input, shape index: {}]   ;;  %s1034_s2 = inlined_call_operand.vmem [shape: f32[1,1536], index: 2, kind: input, shape index: {}]   ;;  %s1035_s3 = inlined_call_operand.vmem [shape: bf16[48,1536], index: 3, kind: output, shape index: {}]  }
   0x1   :  { %s911_s14 = smov 0   ;;  %s913_s15 = smov 0  }
   0x2   :  { %s915_s16 = smov 0  }
   0x3 LB: > { %s22_s17 = sadd.s32 1, %s880_s15  ;;  %s713_s18 = sadd.s32 4294967295, %s884_s16   ;;  %s884_s16 = sphi %s915_s16, %s13_s16   ;;  %s880_s15 = sphi %s913_s15, %s1040_s15   ;;  %s876_s14 = sphi %s911_s14, %s1039_s14   ;;  %s872_s13 = sphi %s909_s13, %s1038_s13   ;;  %s868_s12 = sphi %s907_s12, %s1037_s12  }
   0x4   : > { %p23_p0 = scmp.ge.s32.totalorder %s22_s17, 6  ;;  %p65_p1 = scmp.ne.s32.totalorder %s872_s13, %s868_s12 }
   0x5   : > { %p66_p2 = scmp.eq.s32.totalorder %s884_s16, 0  ;;  %p123_p4 = scmp.eq.s32.totalorder %s713_s18, 5 }
   0x6   : > { %s1042_s17 = smov (%p23_p0, %s22_s17), 0  ;;  %s58_s20 = sadd.s32 1, %s872_s13 }
   0x7   : > { %p67_p3 = por %p66_p2, %p65_p1  ;;  %s55_s19 = ssub.s32 %s880_s15, %s1042_s17 }
   0x8   : > { %p56_p5 = scmp.eq.s32.totalorder %s55_s19, 0  ;;  %p942_p6 = por %p123_p4, %p65_p1 }
   0x9   : > { %p717_p7 = scmp.ge.s32.totalorder %s884_s16, 6 }
   0xa   : > { %s947_s22 = scalar_select %p56_p5, %s872_s13, %s58_s20  }
   0xb   : > { %154 = sbr.rel (%p717_p7) target bundleno = 30 (0x1e), region = 20 }
  0x12   : > { %157 = sbr.rel (!%p67_p3) target bundleno = 30 (0x1e), region = 24  ;;  %s159_s23 = sand.u32 (%p67_p3), 1, %s872_s13  }
  0x13   : > { %s753_s24 = sshll.u32 (%p67_p3), %s880_s15, 3  ;;  %s718_s25 = sshll.u32 (%p67_p3), %s159_s23, 7 }
  0x14   : > { %s955_s28 = scalar_lea.vmem (%p67_p3), %s1033_s1, %s753_s24  ;;  %s161_s29 = scalar_lea.vmem (%p67_p3), [#allocation2], %s718_s25 }
  0x15   : > { %v222_v0 = vld [vmem:[%s955_s28] sm:$0xff] (%p67_p3)  ;;  %v224_v1 = vld [vmem:[%s955_s28 + $0x30] sm:$0xff] (%p67_p3) }
  0x16   : > { %v226_v2 = vld [vmem:[%s955_s28 + $0x60] sm:$0xff] (%p67_p3)  ;;  %223 = vst [vmem:[%s161_s29] sm:$0xff] (%p67_p3), %v222_v0  ;;  %225 = vst [vmem:[%s161_s29 + $0x8] sm:$0xff] (%p67_p3), %v224_v1  ;;  %v228_v3 = vld [vmem:[%s955_s28 + $0x90] sm:$0xff] (%p67_p3) }
  0x17   : > { %227 = vst [vmem:[%s161_s29 + $0x10] sm:$0xff] (%p67_p3), %v226_v2  ;;  %v230_v4 = vld [vmem:[%s955_s28 + $0xc0] sm:$0xff] (%p67_p3)  ;;  %v232_v5 = vld [vmem:[%s955_s28 + $0xf0] sm:$0xff] (%p67_p3)  ;;  %229 = vst [vmem:[%s161_s29 + $0x18] sm:$0xff] (%p67_p3), %v228_v3 }
  0x18   : > { %231 = vst [vmem:[%s161_s29 + $0x20] sm:$0xff] (%p67_p3), %v230_v4  ;;  %233 = vst [vmem:[%s161_s29 + $0x28] sm:$0xff] (%p67_p3), %v232_v5  ;;  %v234_v6 = vld [vmem:[%s955_s28 + $0x120] sm:$0xff] (%p67_p3)  ;;  %v236_v7 = vld [vmem:[%s955_s28 + $0x150] sm:$0xff] (%p67_p3) }
  0x19   : > { %v238_v8 = vld [vmem:[%s955_s28 + $0x180] sm:$0xff]  ;;  %235 = vst [vmem:[%s161_s29 + $0x30] sm:$0xff] %v234_v6  ;;  %237 = vst [vmem:[%s161_s29 + $0x38] sm:$0xff] %v236_v7  ;;  %v240_v9 = vld [vmem:[%s955_s28 + $0x1b0] sm:$0xff] }
  0x1a   : > { %239 = vst [vmem:[%s161_s29 + $0x40] sm:$0xff] %v238_v8  ;;  %v242_v10 = vld [vmem:[%s955_s28 + $0x1e0] sm:$0xff]  ;;  %v244_v11 = vld [vmem:[%s955_s28 + $0x210] sm:$0xff]  ;;  %241 = vst [vmem:[%s161_s29 + $0x48] sm:$0xff] %v240_v9 }
  0x1b   : > { %243 = vst [vmem:[%s161_s29 + $0x50] sm:$0xff] %v242_v10  ;;  %245 = vst [vmem:[%s161_s29 + $0x58] sm:$0xff] %v244_v11  ;;  %v246_v12 = vld [vmem:[%s955_s28 + $0x240] sm:$0xff]  ;;  %v248_v13 = vld [vmem:[%s955_s28 + $0x270] sm:$0xff] }
  0x1c   : > { %v250_v14 = vld [vmem:[%s955_s28 + $0x2a0] sm:$0xff]  ;;  %247 = vst [vmem:[%s161_s29 + $0x60] sm:$0xff] %v246_v12  ;;  %249 = vst [vmem:[%s161_s29 + $0x68] sm:$0xff] %v248_v13  ;;  %v252_v15 = vld [vmem:[%s955_s28 + $0x2d0] sm:$0xff] }
  0x1d   : > { %251 = vst [vmem:[%s161_s29 + $0x70] sm:$0xff] %v250_v14  ;;  %253 = vst [vmem:[%s161_s29 + $0x78] sm:$0xff] %v252_v15 }
  0x1e PF: > { %p721_p8 = scmp.ge.s32.totalorder %s884_s16, 1  ;;  %p266_p9 = scmp.lt.s32.totalorder %s884_s16, 7 }
  0x20   : > { %p267_p10 = pnand %p721_p8, %p266_p9 }
  0x21   : > { %s273_s30 = sand.u32 (!%p267_p10), 1, %s868_s12   ;;  %v886_v16 = vmov (!%p267_p10), 0   ;;  %v843_v33 = vld [vmem:[%s1032_s0 + $0x8] sm:$0xff] (!%p267_p10)   ;;  %v844_v34 = vld [vmem:[%s1032_s0] sm:$0xff] (!%p267_p10)   ;;  %v845_v35 = vld [vmem:[%s1032_s0 + $0x10] sm:$0xff] (!%p267_p10)   ;;  %s723_s18 = sshll.u32 (!%p267_p10), %s876_s14, 1  ;;  %v343_v36 = vlaneseq (!%p267_p10) }
  0x22   : > { %270 = sbr.rel (%p267_p10) target bundleno = 305 (0x131), region = 66  ;;  %s722_s4 = sshll.u32 (!%p267_p10), %s273_s30, 7  ;;  %493 = vmatprep.mubr.bf16.mxu1 (!%p267_p10), %v886_v16  ;;  %483 = vmatprep.mubr.bf16.mxu0 (!%p267_p10), %v886_v16 }
  0x23   : > { %s978_s5 = scalar_lea.vmem (!%p267_p10), [#allocation2], %s722_s4  ;;  %p312_p11 = scmp.lt.s32.totalorder (!%p267_p10), %s723_s18, 11  ;;  %v344_v37 = vshrl.u32 (!%p267_p10), %v343_v36, 7 }
  0x24   : > { %v819_v17 = vld [vmem:[%s978_s5 + $0x4] ss:$8 sps:$4 sm:$0xff] (!%p267_p10)   ;;  %v821_v18 = vld [vmem:[%s978_s5] ss:$8 sps:$4 sm:$0xff] (!%p267_p10)   ;;  %v822_v19 = vld [vmem:[%s978_s5 + $0x14] ss:$8 sps:$4 sm:$0xff] (!%p267_p10)  }
  0x25   : > { %761 = vmatprep.subr.bf16.mxu1 (!%p267_p10), %v819_v17  ;;  %451 = vmatprep.subr.bf16.mxu0 (!%p267_p10), %v819_v17  ;;  %v824_v20 = vld [vmem:[%s978_s5 + $0x10] ss:$8 sps:$4 sm:$0xff] (!%p267_p10)   ;;  %v825_v21 = vld [vmem:[%s978_s5 + $0x24] ss:$8 sps:$4 sm:$0xff] (!%p267_p10)   ;;  %v827_v22 = vld [vmem:[%s978_s5 + $0x20] ss:$8 sps:$4 sm:$0xff] (!%p267_p10)  }
  0x26   : > { %769 = vmatpush1.bf16.msra.mxu1 (!%p267_p10), %v821_v18  ;;  %452 = vmatpush1.bf16.msra.mxu0 (!%p267_p10), %v821_v18  ;;  %v828_v23 = vld [vmem:[%s978_s5 + $0x34] ss:$8 sps:$4 sm:$0xff] (!%p267_p10)   ;;  %v830_v24 = vld [vmem:[%s978_s5 + $0x30] ss:$8 sps:$4 sm:$0xff] (!%p267_p10)   ;;  %v831_v25 = vld [vmem:[%s978_s5 + $0x44] ss:$8 sps:$4 sm:$0xff] (!%p267_p10)  }
  0x27   : > { %762 = vmatprep.subr.bf16.mxu1 (!%p267_p10), %v822_v19  ;;  %453 = vmatprep.subr.bf16.mxu0 (!%p267_p10), %v822_v19  ;;  %v833_v26 = vld [vmem:[%s978_s5 + $0x40] ss:$8 sps:$4 sm:$0xff] (!%p267_p10)   ;;  %v834_v27 = vld [vmem:[%s978_s5 + $0x54] ss:$8 sps:$4 sm:$0xff] (!%p267_p10)   ;;  %v836_v28 = vld [vmem:[%s978_s5 + $0x50] ss:$8 sps:$4 sm:$0xff] (!%p267_p10)  }
  0x28   : > { %v837_v29 = vld [vmem:[%s978_s5 + $0x64] ss:$8 sps:$4 sm:$0xff] (!%p267_p10)   ;;  %v839_v30 = vld [vmem:[%s978_s5 + $0x60] ss:$8 sps:$4 sm:$0xff] (!%p267_p10)   ;;  %v840_v31 = vld [vmem:[%s978_s5 + $0x74] ss:$8 sps:$4 sm:$0xff] (!%p267_p10)  }
  0x29   : > { %v842_v32 = vld [vmem:[%s978_s5 + $0x70] ss:$8 sps:$4 sm:$0xff]   ;;  %s1044_s18 = smov (!%p312_p11, %s723_s18), 11  ;;  %v345_v38 = vsub.s32 0, %v344_v37  ;;  %v349_v40 = vsub.s32 1, %v344_v37  ;;  %s777_s24 = smul.u32 48, %s273_s30 }
  0x2a   : > { %770 = vmatpush1.bf16.msra.mxu1 %v824_v20  ;;  %454 = vmatpush1.bf16.msra.mxu0 %v824_v20  ;;  %s314_s23 = scalar_lea.vmem %s1034_s2, %s1044_s18  ;;  %s760_s25 = sshll.u32 (%p942_p6), %s876_s14, 3 }
  0x2b   : > { %763 = vmatprep.subr.bf16.mxu1 %v825_v21  ;;  %455 = vmatprep.subr.bf16.mxu0 %v825_v21  ;;  %v341_v39 = vld [vmem:[%s314_s23] sm:$0x3]  ;;  %s303_s12 = scalar_lea.vmem [#allocation3], %s777_s24  ;;  %s568_s28 = scalar_lea.vmem (%p942_p6), %s1035_s3, %s760_s25 }
  0x2c   : > { %v346_v41 = vrot.slane %v341_v39, %v345_v38  ;;  %v350_v42 = vrot.slane %v341_v39, %v349_v40 }
  0x2e   : > { %771 = vmatpush1.bf16.msra.mxu1 %v827_v22  ;;  %456 = vmatpush1.bf16.msra.mxu0 %v827_v22 }
  0x2f   : > { %764 = vmatprep.subr.bf16.mxu1 %v828_v23  ;;  %457 = vmatprep.subr.bf16.mxu0 %v828_v23 }
  0x32   : > { %772 = vmatpush1.bf16.msra.mxu1 %v830_v24  ;;  %458 = vmatpush1.bf16.msra.mxu0 %v830_v24 }
  0x33   : > { %765 = vmatprep.subr.bf16.mxu1 %v831_v25  ;;  %459 = vmatprep.subr.bf16.mxu0 %v831_v25 }
  0x36   : > { %773 = vmatpush1.bf16.msra.mxu1 %v833_v26  ;;  %460 = vmatpush1.bf16.msra.mxu0 %v833_v26 }
  0x37   : > { %766 = vmatprep.subr.bf16.mxu1 %v834_v27  ;;  %461 = vmatprep.subr.bf16.mxu0 %v834_v27 }
  0x3a   : > { %774 = vmatpush1.bf16.msra.mxu1 %v836_v28  ;;  %462 = vmatpush1.bf16.msra.mxu0 %v836_v28 }
  0x3b   : > { %767 = vmatprep.subr.bf16.mxu1 %v837_v29  ;;  %463 = vmatprep.subr.bf16.mxu0 %v837_v29 }
  0x3e   : > { %775 = vmatpush1.bf16.msra.mxu1 %v839_v30  ;;  %464 = vmatpush1.bf16.msra.mxu0 %v839_v30 }
  0x3f   : > { %768 = vmatprep.subr.bf16.mxu1 %v840_v31  ;;  %465 = vmatprep.subr.bf16.mxu0 %v840_v31 }
  0x42   : > { %776 = vmatpush1.bf16.msra.mxu1 %v842_v32  ;;  %466 = vmatpush1.bf16.msra.mxu0 %v842_v32 }
  0x45   : > { %494 = vmatmul.mubr.bf16.vlgmr.msra.gmra.mrb[0].mxu1 %v843_v33  ;;  %484 = vmatmul.mubr.bf16.vlgmr.msra.gmra.mrb[0].mxu0 %v844_v34 }
  0x46   : > { %503 = vmatprep.mubr.bf16.mxu1 %v886_v16 }
  0x4d   : > { %504 = vmatmul.mubr.bf16.gmra.mrb[4].mxu1 %v845_v35 }
 0x118   : > { %v495_v43 = vpop.f32.mrb[0].mxu1  ;;  %v485_v44 = vpop.f32.mrb[0].mxu0 }
 0x119   : > { %v496_v45 = vadd.f32 %v495_v43, %v346_v41  ;;  %v497_v46 = vpop.f32.mrb[1].mxu1  ;;  %v486_v47 = vadd.f32 %v485_v44, %v346_v41  ;;  %v487_v48 = vpop.f32.mrb[1].mxu0 }
 0x11a   : > { %v498_v49 = vadd.f32 %v497_v46, %v350_v42  ;;  %v499_v50 = vpop.f32.mrb[2].mxu1  ;;  %v488_v51 = vadd.f32 %v487_v48, %v350_v42  ;;  %v489_v52 = vpop.f32.mrb[2].mxu0 }
 0x11b   : > { %v500_v53 = vadd.f32 %v499_v50, %v346_v41  ;;  %v501_v54 = vpop.f32.mrb[3].mxu1  ;;  %v490_v55 = vadd.f32 %v489_v52, %v346_v41  ;;  %v491_v56 = vpop.f32.mrb[3].mxu0 }
 0x11c   : > { %v756_v57 = vpack.c.bf16 %v498_v49, %v496_v45  ;;  %v502_v58 = vadd.f32 %v501_v54, %v350_v42  ;;  %v754_v59 = vpack.c.bf16 %v488_v51, %v486_v47  ;;  %v492_v60 = vadd.f32 %v491_v56, %v350_v42 }
 0x11e   : > { %552 = vst [vmem:[%s303_s12 + $0x10] sm:$0xff] %v756_v57  ;;  %v757_v61 = vpack.c.bf16 %v502_v58, %v500_v53  ;;  %550 = vst [vmem:[%s303_s12] sm:$0xff] %v754_v59  ;;  %v755_v62 = vpack.c.bf16 %v492_v60, %v490_v55 }
 0x120   : > { %553 = vst [vmem:[%s303_s12 + $0x18] sm:$0xff] %v757_v61  ;;  %551 = vst [vmem:[%s303_s12 + $0x8] sm:$0xff] %v755_v62  ;;  %v505_v63 = vpop.f32.mrb[4].mxu1 }
 0x121   : > { %v506_v0 = vadd.f32 %v505_v63, %v346_v41  ;;  %v507_v1 = vpop.f32.mrb[5].mxu1 }
 0x122   : > { %v508_v2 = vadd.f32 %v507_v1, %v350_v42  ;;  %v509_v3 = vpop.f32.mrb[6].mxu1  ;;  %562 = sbr.rel (!%p942_p6) target bundleno = 305 (0x131), region = 74 }
 0x123   : > { %v510_v4 = vadd.f32 %v509_v3, %v346_v41  ;;  %v511_v5 = vpop.f32.mrb[7].mxu1 }
 0x124   : > { %v758_v6 = vpack.c.bf16 %v508_v2, %v506_v0  ;;  %v512_v7 = vadd.f32 %v511_v5, %v350_v42 }
 0x125   : > { %v606_v9 = vld [vmem:[%s303_s12] sm:$0xff] (%p942_p6)  ;;  %v610_v11 = vld [vmem:[%s303_s12 + $0x10] sm:$0xff] (%p942_p6) }
 0x126   : > { %554 = vst [vmem:[%s303_s12 + $0x20] sm:$0xff] %v758_v6  ;;  %v759_v8 = vpack.c.bf16 %v512_v7, %v510_v4  ;;  %607 = vst [vmem:[%s568_s28] sm:$0xff] (%p942_p6), %v606_v9 }
 0x127   : > { %v608_v10 = vld [vmem:[%s303_s12 + $0x8] sm:$0xff] (%p942_p6)  ;;  %v612_v12 = vld [vmem:[%s303_s12 + $0x18] sm:$0xff] (%p942_p6)  ;;  %611 = vst [vmem:[%s568_s28 + $0x60] sm:$0xff] (%p942_p6), %v610_v11 }
 0x128   : > { %555 = vst [vmem:[%s303_s12 + $0x28] sm:$0xff] %v759_v8  ;;  %609 = vst [vmem:[%s568_s28 + $0x30] sm:$0xff] (%p942_p6), %v608_v10 }
 0x129   : > { %613 = vst [vmem:[%s568_s28 + $0x90] sm:$0xff] %v612_v12 }
 0x12d   : > { %v614_v13 = vld [vmem:[%s303_s12 + $0x20] sm:$0xff] }
 0x12e   : > { %615 = vst [vmem:[%s568_s28 + $0xc0] sm:$0xff] %v614_v13 }
 0x12f   : > { %v616_v14 = vld [vmem:[%s303_s12 + $0x28] sm:$0xff] }
 0x130   : > { %617 = vst [vmem:[%s568_s28 + $0xf0] sm:$0xff] %v616_v14 }
 0x131 PF: > { %s13_s16 = sadd.s32 1, %s884_s16   ;;  %s1037_s12 = smov %s872_s13 }
 0x132   : > { %p10_p12 = scmp.ge.s32.totalorder %s13_s16, 8   ;;  %s1038_s13 = smov %s947_s22 }
 0x133   : > { %s1039_s14 = smov %s880_s15  ;;  %s1040_s15 = smov %s1042_s17 }
 0x134   :  { %12 = sbr.rel (!%p10_p12) target bundleno = 3 (0x3), region = 149 }

// kernel: pspnet_forward.47
= control target key start
LH: loop header
LB: loop body
LE: loop exit
PB: predicated region body
PF: predicated region fallthrough
CT: control target
= control target key end

     0   :  { %s852_s12 = smov 0   ;;  %s854_s13 = smov 0   ;;  %s1003_s0 = inlined_call_operand.vmem [shape: bf16[48,128], index: 0, kind: input, shape index: {}]   ;;  %s1004_s1 = inlined_call_operand.vmem [shape: bf16[128,12288], index: 1, kind: input, shape index: {}]   ;;  %s1005_s2 = inlined_call_operand.vmem [shape: f32[1,12288], index: 2, kind: input, shape index: {}]   ;;  %s1006_s3 = inlined_call_operand.vmem [shape: f32[48,12288], index: 3, kind: output, shape index: {}]  }
   0x1   :  { %s856_s14 = smov 0   ;;  %s858_s15 = smov 0  }
   0x2   :  { %s860_s16 = smov 0  }
   0x3 LB: > { %s22_s17 = sadd.s32 1, %s825_s15  ;;  %s670_s18 = sadd.s32 4294967295, %s829_s16   ;;  %s829_s16 = sphi %s860_s16, %s13_s16   ;;  %s825_s15 = sphi %s858_s15, %s1011_s15   ;;  %s821_s14 = sphi %s856_s14, %s1010_s14   ;;  %s817_s13 = sphi %s854_s13, %s1009_s13   ;;  %s813_s12 = sphi %s852_s12, %s1008_s12  }
   0x4   : > { %p23_p0 = scmp.ge.s32.totalorder %s22_s17, 48  ;;  %p65_p1 = scmp.ne.s32.totalorder %s817_s13, %s813_s12 }
   0x5   : > { %p66_p2 = scmp.eq.s32.totalorder %s829_s16, 0  ;;  %p123_p4 = scmp.eq.s32.totalorder %s670_s18, 47 }
   0x6   : > { %s1013_s17 = smov (%p23_p0, %s22_s17), 0  ;;  %s58_s20 = sadd.s32 1, %s817_s13 }
   0x7   : > { %p67_p3 = por %p66_p2, %p65_p1  ;;  %s55_s19 = ssub.s32 %s825_s15, %s1013_s17 }
   0x8   : > { %p56_p5 = scmp.eq.s32.totalorder %s55_s19, 0  ;;  %p887_p6 = por %p123_p4, %p65_p1 }
   0x9   : > { %p674_p7 = scmp.ge.s32.totalorder %s829_s16, 48 }
   0xa   : > { %s892_s22 = scalar_select %p56_p5, %s817_s13, %s58_s20  }
   0xb   : > { %154 = sbr.rel (%p674_p7) target bundleno = 38 (0x26), region = 20 }
  0x12   : > { %157 = sbr.rel (!%p67_p3) target bundleno = 38 (0x26), region = 24  ;;  %s159_s23 = sand.u32 (%p67_p3), 1, %s817_s13  }
  0x13   : > { %s704_s24 = sshll.u32 (%p67_p3), %s825_s15, 3  ;;  %s675_s25 = sshll.u32 (%p67_p3), %s159_s23, 7 }
  0x14   : > { %s900_s28 = scalar_lea.vmem (%p67_p3), %s1004_s1, %s704_s24  ;;  %s161_s29 = scalar_lea.vmem (%p67_p3), [#allocation2], %s675_s25 }
  0x15   : > { %v222_v0 = vld [vmem:[%s900_s28] sm:$0xff] (%p67_p3) }
  0x16   : > { %v224_v1 = vld [vmem:[%s900_s28 + $0x180] sm:$0xff] (%p67_p3)  ;;  %223 = vst [vmem:[%s161_s29] sm:$0xff] (%p67_p3), %v222_v0 }
  0x17   : > { %v226_v2 = vld [vmem:[%s900_s28 + $0x300] sm:$0xff] (%p67_p3)  ;;  %225 = vst [vmem:[%s161_s29 + $0x8] sm:$0xff] (%p67_p3), %v224_v1 }
  0x18   : > { %227 = vst [vmem:[%s161_s29 + $0x10] sm:$0xff] (%p67_p3), %v226_v2  ;;  %v228_v3 = vld [vmem:[%s900_s28 + $0x480] sm:$0xff] (%p67_p3) }
  0x19   : > { %v230_v4 = vld [vmem:[%s900_s28 + $0x600] sm:$0xff]  ;;  %229 = vst [vmem:[%s161_s29 + $0x18] sm:$0xff] %v228_v3 }
  0x1a   : > { %v232_v5 = vld [vmem:[%s900_s28 + $0x780] sm:$0xff]  ;;  %231 = vst [vmem:[%s161_s29 + $0x20] sm:$0xff] %v230_v4 }
  0x1b   : > { %233 = vst [vmem:[%s161_s29 + $0x28] sm:$0xff] %v232_v5  ;;  %v234_v6 = vld [vmem:[%s900_s28 + $0x900] sm:$0xff] }
  0x1c   : > { %v236_v7 = vld [vmem:[%s900_s28 + $0xa80] sm:$0xff]  ;;  %235 = vst [vmem:[%s161_s29 + $0x30] sm:$0xff] %v234_v6 }
  0x1d   : > { %v238_v8 = vld [vmem:[%s900_s28 + $0xc00] sm:$0xff]  ;;  %237 = vst [vmem:[%s161_s29 + $0x38] sm:$0xff] %v236_v7 }
  0x1e   : > { %239 = vst [vmem:[%s161_s29 + $0x40] sm:$0xff] %v238_v8  ;;  %v240_v9 = vld [vmem:[%s900_s28 + $0xd80] sm:$0xff] }
  0x1f   : > { %v242_v10 = vld [vmem:[%s900_s28 + $0xf00] sm:$0xff]  ;;  %241 = vst [vmem:[%s161_s29 + $0x48] sm:$0xff] %v240_v9 }
  0x20   : > { %v244_v11 = vld [vmem:[%s900_s28 + $0x1080] sm:$0xff]  ;;  %243 = vst [vmem:[%s161_s29 + $0x50] sm:$0xff] %v242_v10 }
  0x21   : > { %245 = vst [vmem:[%s161_s29 + $0x58] sm:$0xff] %v244_v11  ;;  %v246_v12 = vld [vmem:[%s900_s28 + $0x1200] sm:$0xff] }
  0x22   : > { %v248_v13 = vld [vmem:[%s900_s28 + $0x1380] sm:$0xff]  ;;  %247 = vst [vmem:[%s161_s29 + $0x60] sm:$0xff] %v246_v12 }
  0x23   : > { %v250_v14 = vld [vmem:[%s900_s28 + $0x1500] sm:$0xff]  ;;  %249 = vst [vmem:[%s161_s29 + $0x68] sm:$0xff] %v248_v13 }
  0x24   : > { %251 = vst [vmem:[%s161_s29 + $0x70] sm:$0xff] %v250_v14  ;;  %v252_v15 = vld [vmem:[%s900_s28 + $0x1680] sm:$0xff] }
  0x25   : > { %253 = vst [vmem:[%s161_s29 + $0x78] sm:$0xff] %v252_v15 }
  0x26 PF: > { %p678_p8 = scmp.ge.s32.totalorder %s829_s16, 1  ;;  %p266_p9 = scmp.lt.s32.totalorder %s829_s16, 49 }
  0x28   : > { %p267_p10 = pnand %p678_p8, %p266_p9 }
  0x29   : > { %s273_s30 = sand.u32 (!%p267_p10), 1, %s813_s12   ;;  %v831_v16 = vmov (!%p267_p10), 0   ;;  %v788_v33 = vld [vmem:[%s1003_s0 + $0x8] sm:$0xff] (!%p267_p10)   ;;  %v789_v34 = vld [vmem:[%s1003_s0] sm:$0xff] (!%p267_p10)   ;;  %v790_v35 = vld [vmem:[%s1003_s0 + $0x10] sm:$0xff] (!%p267_p10)   ;;  %s680_s18 = sshll.u32 (!%p267_p10), %s821_s14, 1  ;;  %v343_v36 = vlaneseq (!%p267_p10) }
  0x2a   : > { %270 = sbr.rel (%p267_p10) target bundleno = 311 (0x137), region = 66  ;;  %s679_s4 = sshll.u32 (!%p267_p10), %s273_s30, 7  ;;  %493 = vmatprep.mubr.bf16.mxu1 (!%p267_p10), %v831_v16  ;;  %483 = vmatprep.mubr.bf16.mxu0 (!%p267_p10), %v831_v16 }
  0x2b   : > { %s923_s5 = scalar_lea.vmem (!%p267_p10), [#allocation2], %s679_s4  ;;  %p312_p11 = scmp.lt.s32.totalorder (!%p267_p10), %s680_s18, 95  ;;  %v344_v37 = vshrl.u32 (!%p267_p10), %v343_v36, 7 }
  0x2c   : > { %v764_v17 = vld [vmem:[%s923_s5 + $0x4] ss:$8 sps:$4 sm:$0xff] (!%p267_p10)   ;;  %v766_v18 = vld [vmem:[%s923_s5] ss:$8 sps:$4 sm:$0xff] (!%p267_p10)   ;;  %v767_v19 = vld [vmem:[%s923_s5 + $0x14] ss:$8 sps:$4 sm:$0xff] (!%p267_p10)  }
  0x2d   : > { %706 = vmatprep.subr.bf16.mxu1 (!%p267_p10), %v764_v17  ;;  %451 = vmatprep.subr.bf16.mxu0 (!%p267_p10), %v764_v17  ;;  %v769_v20 = vld [vmem:[%s923_s5 + $0x10] ss:$8 sps:$4 sm:$0xff] (!%p267_p10)   ;;  %v770_v21 = vld [vmem:[%s923_s5 + $0x24] ss:$8 sps:$4 sm:$0xff] (!%p267_p10)   ;;  %v772_v22 = vld [vmem:[%s923_s5 + $0x20] ss:$8 sps:$4 sm:$0xff] (!%p267_p10)  }
  0x2e   : > { %714 = vmatpush1.bf16.msra.mxu1 (!%p267_p10), %v766_v18  ;;  %452 = vmatpush1.bf16.msra.mxu0 (!%p267_p10), %v766_v18  ;;  %v773_v23 = vld [vmem:[%s923_s5 + $0x34] ss:$8 sps:$4 sm:$0xff] (!%p267_p10)   ;;  %v775_v24 = vld [vmem:[%s923_s5 + $0x30] ss:$8 sps:$4 sm:$0xff] (!%p267_p10)   ;;  %v776_v25 = vld [vmem:[%s923_s5 + $0x44] ss:$8 sps:$4 sm:$0xff] (!%p267_p10)  }
  0x2f   : > { %707 = vmatprep.subr.bf16.mxu1 (!%p267_p10), %v767_v19  ;;  %453 = vmatprep.subr.bf16.mxu0 (!%p267_p10), %v767_v19  ;;  %v778_v26 = vld [vmem:[%s923_s5 + $0x40] ss:$8 sps:$4 sm:$0xff] (!%p267_p10)   ;;  %v779_v27 = vld [vmem:[%s923_s5 + $0x54] ss:$8 sps:$4 sm:$0xff] (!%p267_p10)   ;;  %v781_v28 = vld [vmem:[%s923_s5 + $0x50] ss:$8 sps:$4 sm:$0xff] (!%p267_p10)  }
  0x30   : > { %v782_v29 = vld [vmem:[%s923_s5 + $0x64] ss:$8 sps:$4 sm:$0xff] (!%p267_p10)   ;;  %v784_v30 = vld [vmem:[%s923_s5 + $0x60] ss:$8 sps:$4 sm:$0xff] (!%p267_p10)   ;;  %v785_v31 = vld [vmem:[%s923_s5 + $0x74] ss:$8 sps:$4 sm:$0xff] (!%p267_p10)  }
  0x31   : > { %v787_v32 = vld [vmem:[%s923_s5 + $0x70] ss:$8 sps:$4 sm:$0xff]   ;;  %s1015_s18 = smov (!%p312_p11, %s680_s18), 95  ;;  %v345_v38 = vsub.s32 0, %v344_v37  ;;  %v349_v40 = vsub.s32 1, %v344_v37  ;;  %s722_s24 = smul.u32 96, %s273_s30 }
  0x32   : > { %715 = vmatpush1.bf16.msra.mxu1 %v769_v20  ;;  %454 = vmatpush1.bf16.msra.mxu0 %v769_v20  ;;  %s314_s23 = scalar_lea.vmem %s1005_s2, %s1015_s18  ;;  %s705_s12 = sshll.u32 (%p887_p6), %s821_s14, 4 }
  0x33   : > { %708 = vmatprep.subr.bf16.mxu1 %v770_v21  ;;  %455 = vmatprep.subr.bf16.mxu0 %v770_v21  ;;  %v341_v39 = vld [vmem:[%s314_s23] sm:$0x3]  ;;  %s956_s25 = scalar_lea.vmem [#allocation3], %s722_s24  ;;  %s538_s28 = scalar_lea.vmem (%p887_p6), %s1006_s3, %s705_s12 }
  0x34   : > { %v346_v41 = vrot.slane %v341_v39, %v345_v38  ;;  %v350_v42 = vrot.slane %v341_v39, %v349_v40 }
  0x36   : > { %716 = vmatpush1.bf16.msra.mxu1 %v772_v22  ;;  %456 = vmatpush1.bf16.msra.mxu0 %v772_v22 }
  0x37   : > { %709 = vmatprep.subr.bf16.mxu1 %v773_v23  ;;  %457 = vmatprep.subr.bf16.mxu0 %v773_v23 }
  0x3a   : > { %717 = vmatpush1.bf16.msra.mxu1 %v775_v24  ;;  %458 = vmatpush1.bf16.msra.mxu0 %v775_v24 }
  0x3b   : > { %710 = vmatprep.subr.bf16.mxu1 %v776_v25  ;;  %459 = vmatprep.subr.bf16.mxu0 %v776_v25 }
  0x3e   : > { %718 = vmatpush1.bf16.msra.mxu1 %v778_v26  ;;  %460 = vmatpush1.bf16.msra.mxu0 %v778_v26 }
  0x3f   : > { %711 = vmatprep.subr.bf16.mxu1 %v779_v27  ;;  %461 = vmatprep.subr.bf16.mxu0 %v779_v27 }
  0x42   : > { %719 = vmatpush1.bf16.msra.mxu1 %v781_v28  ;;  %462 = vmatpush1.bf16.msra.mxu0 %v781_v28 }
  0x43   : > { %712 = vmatprep.subr.bf16.mxu1 %v782_v29  ;;  %463 = vmatprep.subr.bf16.mxu0 %v782_v29 }
  0x46   : > { %720 = vmatpush1.bf16.msra.mxu1 %v784_v30  ;;  %464 = vmatpush1.bf16.msra.mxu0 %v784_v30 }
  0x47   : > { %713 = vmatprep.subr.bf16.mxu1 %v785_v31  ;;  %465 = vmatprep.subr.bf16.mxu0 %v785_v31 }
  0x4a   : > { %721 = vmatpush1.bf16.msra.mxu1 %v787_v32  ;;  %466 = vmatpush1.bf16.msra.mxu0 %v787_v32 }
  0x4d   : > { %494 = vmatmul.mubr.bf16.vlgmr.msra.gmra.mrb[0].mxu1 %v788_v33  ;;  %484 = vmatmul.mubr.bf16.vlgmr.msra.gmra.mrb[0].mxu0 %v789_v34 }
  0x4e   : > { %503 = vmatprep.mubr.bf16.mxu1 %v831_v16 }
  0x55   : > { %504 = vmatmul.mubr.bf16.gmra.mrb[4].mxu1 %v790_v35 }
 0x120   : > { %v495_v43 = vpop.f32.mrb[0].mxu1  ;;  %v485_v44 = vpop.f32.mrb[0].mxu0 }
 0x121   : > { %v496_v45 = vadd.f32 %v495_v43, %v346_v41  ;;  %v497_v46 = vpop.f32.mrb[1].mxu1  ;;  %v486_v47 = vadd.f32 %v485_v44, %v346_v41  ;;  %v487_v48 = vpop.f32.mrb[1].mxu0 }
 0x122   : > { %v498_v49 = vadd.f32 %v497_v46, %v350_v42  ;;  %v499_v50 = vpop.f32.mrb[2].mxu1  ;;  %v488_v51 = vadd.f32 %v487_v48, %v350_v42  ;;  %v489_v52 = vpop.f32.mrb[2].mxu0 }
 0x123   : > { %518 = vst [vmem:[%s956_s25 + $0x20] sm:$0xff] %v496_v45  ;;  %v500_v53 = vadd.f32 %v499_v50, %v346_v41  ;;  %v501_v54 = vpop.f32.mrb[3].mxu1  ;;  %514 = vst [vmem:[%s956_s25] sm:$0xff] %v486_v47  ;;  %v490_v55 = vadd.f32 %v489_v52, %v346_v41  ;;  %v491_v56 = vpop.f32.mrb[3].mxu0 }
 0x124   : > { %519 = vst [vmem:[%s956_s25 + $0x28] sm:$0xff] %v498_v49  ;;  %v502_v57 = vadd.f32 %v501_v54, %v350_v42  ;;  %515 = vst [vmem:[%s956_s25 + $0x8] sm:$0xff] %v488_v51  ;;  %v492_v58 = vadd.f32 %v491_v56, %v350_v42 }
 0x125   : > { %520 = vst [vmem:[%s956_s25 + $0x30] sm:$0xff] %v500_v53  ;;  %516 = vst [vmem:[%s956_s25 + $0x10] sm:$0xff] %v490_v55 }
 0x126   : > { %521 = vst [vmem:[%s956_s25 + $0x38] sm:$0xff] %v502_v57  ;;  %517 = vst [vmem:[%s956_s25 + $0x18] sm:$0xff] %v492_v58 }
 0x128   : > { %v505_v59 = vpop.f32.mrb[4].mxu1  ;;  %532 = sbr.rel (!%p887_p6) target bundleno = 311 (0x137), region = 74 }
 0x129   : > { %v506_v60 = vadd.f32 %v505_v59, %v346_v41  ;;  %v507_v61 = vpop.f32.mrb[5].mxu1 }
 0x12a   : > { %v508_v62 = vadd.f32 %v507_v61, %v350_v42  ;;  %v509_v63 = vpop.f32.mrb[6].mxu1  ;;  %v551_v3 = vld [vmem:[%s956_s25] sm:$0xff] (%p887_p6) }
 0x12b   : > { %522 = vst [vmem:[%s956_s25 + $0x40] sm:$0xff] %v506_v60  ;;  %v510_v0 = vadd.f32 %v509_v63, %v346_v41  ;;  %v511_v1 = vpop.f32.mrb[7].mxu1  ;;  %v553_v4 = vld [vmem:[%s956_s25 + $0x8] sm:$0xff] (%p887_p6)  ;;  %v559_v7 = vld [vmem:[%s956_s25 + $0x20] sm:$0xff] (%p887_p6)  ;;  %552 = vst [vmem:[%s538_s28] sm:$0xff] (%p887_p6), %v551_v3 }
 0x12c   : > { %523 = vst [vmem:[%s956_s25 + $0x48] sm:$0xff] %v508_v62  ;;  %v512_v2 = vadd.f32 %v511_v1, %v350_v42  ;;  %v555_v5 = vld [vmem:[%s956_s25 + $0x10] sm:$0xff] (%p887_p6)  ;;  %v561_v8 = vld [vmem:[%s956_s25 + $0x28] sm:$0xff] (%p887_p6)  ;;  %554 = vst [vmem:[%s538_s28 + $0x8] sm:$0xff] (%p887_p6), %v553_v4 }
 0x12d   : > { %524 = vst [vmem:[%s956_s25 + $0x50] sm:$0xff] %v510_v0  ;;  %v557_v6 = vld [vmem:[%s956_s25 + $0x18] sm:$0xff] (%p887_p6)  ;;  %556 = vst [vmem:[%s538_s28 + $0x300] sm:$0xff] (%p887_p6), %v555_v5  ;;  %v563_v9 = vld [vmem:[%s956_s25 + $0x30] sm:$0xff] (%p887_p6) }
 0x12e   : > { %525 = vst [vmem:[%s956_s25 + $0x58] sm:$0xff] %v512_v2  ;;  %558 = vst [vmem:[%s538_s28 + $0x308] sm:$0xff] (%p887_p6), %v557_v6  ;;  %v565_v10 = vld [vmem:[%s956_s25 + $0x38] sm:$0xff] (%p887_p6) }
 0x12f   : > { %560 = vst [vmem:[%s538_s28 + $0x600] sm:$0xff] %v559_v7  ;;  %562 = vst [vmem:[%s538_s28 + $0x608] sm:$0xff] %v561_v8 }
 0x130   : > { %564 = vst [vmem:[%s538_s28 + $0x900] sm:$0xff] %v563_v9  ;;  %566 = vst [vmem:[%s538_s28 + $0x908] sm:$0xff] %v565_v10 }
 0x132   : > { %v567_v11 = vld [vmem:[%s956_s25 + $0x40] sm:$0xff] }
 0x133   : > { %568 = vst [vmem:[%s538_s28 + $0xc00] sm:$0xff] %v567_v11  ;;  %v569_v12 = vld [vmem:[%s956_s25 + $0x48] sm:$0xff] }
 0x134   : > { %v571_v13 = vld [vmem:[%s956_s25 + $0x50] sm:$0xff]  ;;  %570 = vst [vmem:[%s538_s28 + $0xc08] sm:$0xff] %v569_v12 }
 0x135   : > { %v573_v14 = vld [vmem:[%s956_s25 + $0x58] sm:$0xff]  ;;  %572 = vst [vmem:[%s538_s28 + $0xf00] sm:$0xff] %v571_v13 }
 0x136   : > { %574 = vst [vmem:[%s538_s28 + $0xf08] sm:$0xff] %v573_v14 }
 0x137 PF: > { %s13_s16 = sadd.s32 1, %s829_s16   ;;  %s1008_s12 = smov %s817_s13 }
 0x138   : > { %p10_p12 = scmp.ge.s32.totalorder %s13_s16, 50   ;;  %s1009_s13 = smov %s892_s22 }
 0x139   : > { %s1010_s14 = smov %s825_s15  ;;  %s1011_s15 = smov %s1013_s17 }
 0x13a   :  { %12 = sbr.rel (!%p10_p12) target bundleno = 3 (0x3), region = 134 }

</bundles_post_ra>
